<compile_context>
chip_gen: v6e
topology: v6e:2x2x1
jax: 0.10.0
libtpu: 0.0.40
codegen_flags: <defaults>
</compile_context>

<pallas_src>
import functools

import jax
import jax.numpy as jnp
from jax.experimental import pallas as pl
from jax.experimental.pallas import tpu as pltpu


_VMEM_LIMIT_BYTES = 48 * 1024 * 1024          # explicit scoped-VMEM limit
_TILE_BUDGET_BYTES = 24 * 1024 * 1024         # per-tile budget used by the chooser


def _cp(*sems):
    return pltpu.CompilerParams(dimension_semantics=sems,
                                vmem_limit_bytes=_VMEM_LIMIT_BYTES)


# ------------------------------ tiling helper ------------------------------ #

def _choose_row_tile(H, W, Cin, Cout, row_tile=None, max_rows=64,
                     vmem_budget_bytes=_TILE_BUDGET_BYTES, in_rows_per_row=1):
    """Largest divisor of H that is <= cap and keeps per-tile VMEM use (double-
    buffered blocks + live in-kernel intermediates, f32-equivalent) under budget."""
    cap = max_rows if row_tile is None else max(1, min(row_tile, H))
    best = 1
    for th in range(1, min(H, cap) + 1):
        if H % th != 0:
            continue
        in_rows = th * in_rows_per_row + 2
        blocks = 2 * (in_rows * W * Cin            # mid + halo rows (double-buffered)
                      + th * W * Cin               # shortcut input
                      + th * W * Cout)             # output block
        interm = (in_rows * W * Cin                # activated / decimated rows
                  + 5 * th * W * Cin               # kw-shifted slices + stacked patch
                  + 2 * th * W * Cout)             # f32 accumulator + store temp
        est = 4 * (blocks + interm)
        if est <= vmem_budget_bytes:
            best = th
    return best


# ------------------------------ kernel helpers ------------------------------ #

def _write_tile_stats(stats_ref, y):
    """Write per-row-tile partial channel stats (sum, sum-sq) of y ((rows, C) f32)."""
    s = jnp.sum(y, axis=0, keepdims=True)
    ss = jnp.sum(y * y, axis=0, keepdims=True)
    stats_ref[0, 0] = jnp.concatenate([s, ss], axis=0)          # (2, C)


def _activated_rows(scale_ref, shift_ref, top_ref, mid_ref, bot_ref, t, num_t):
    """(TH+2, W, C) rows of SiLU(x*scale+shift); halo rows zeroed at image boundary
    (zero padding is applied AFTER the activation, matching conv padding of the
    normalized/activated tensor)."""
    C = mid_ref.shape[3]
    scale = scale_ref[0].reshape(1, 1, C).astype(jnp.float32)
    shift = shift_ref[0].reshape(1, 1, C).astype(jnp.float32)

    def act(v):
        y = v.astype(jnp.float32) * scale + shift
        return y * jax.nn.sigmoid(y)                             # SiLU

    top = act(top_ref[0]) * (t > 0).astype(jnp.float32)          # row R0-1 (or 0)
    bot = act(bot_ref[0]) * (t < num_t - 1).astype(jnp.float32)  # row R0+TH (or 0)
    mid = act(mid_ref[0])
    return jnp.concatenate([top, mid, bot], axis=0)              # (TH+2, W, C)


def _conv3x3_kwstack(rows, w_ref, TH, W):
    """3x3 / stride-1 conv of the (TH+2, W, Cin) f32 row window as 3 MXU matmuls.
    Per kh the patch is [col-1 | col | col+1] stacked on the lane dim (K = 3*Cin);
    the weight ref is pre-reshaped to (3, 3*Cin, Cout) bf16.  f32 accumulation."""
    Cin = rows.shape[-1]
    Cout = w_ref.shape[-1]
    zc = jnp.zeros((TH, 1, Cin), jnp.float32)
    acc = jnp.zeros((TH * W, Cout), jnp.float32)
    for kh in range(3):
        r = rows[kh:kh + TH]                                     # (TH, W, Cin)
        left = jnp.concatenate([zc, r[:, :-1, :]], axis=1)       # input col c-1 (kw=0)
        right = jnp.concatenate([r[:, 1:, :], zc], axis=1)       # input col c+1 (kw=2)
        patch = jnp.concatenate([left, r, right], axis=-1)       # (TH, W, 3*Cin)
        acc = acc + jnp.dot(
            patch.reshape(TH * W, 3 * Cin).astype(jnp.bfloat16),
            w_ref[kh],
            preferred_element_type=jnp.float32)
    return acc


# --------------------------------- kernels ---------------------------------- #

def _stats_kernel(x_ref, stats_ref):
    """Per-sample, per-channel, per-row-tile partial sum / sum-sq (first GroupNorm)."""
    C = x_ref.shape[-1]
    xf = x_ref[0].astype(jnp.float32).reshape(-1, C)
    _write_tile_stats(stats_ref, xf)


def _gn_act_conv_kernel(scale_ref, shift_ref, top_ref, mid_ref, bot_ref,
                        w_ref, b_ref, o_ref, stats_ref):
    """y = conv3x3(SiLU(x*scale+shift)) + b; also emits partial channel stats of y."""
    t = pl.program_id(1)
    T = pl.num_programs(1)
    TH, W = mid_ref.shape[1], mid_ref.shape[2]
    Cout = o_ref.shape[3]
    rows = _activated_rows(scale_ref, shift_ref, top_ref, mid_ref, bot_ref, t, T)
    acc = _conv3x3_kwstack(rows, w_ref, TH, W) + b_ref[0].astype(jnp.float32)
    _write_tile_stats(stats_ref, acc)
    o_ref[0] = acc.reshape(TH, W, Cout).astype(o_ref.dtype)


def _gn_act_conv_add_kernel(scale_ref, shift_ref, top_ref, mid_ref, bot_ref,
                            w_ref, b_ref, xin_ref, o_ref, stats_ref):
    """Same as above + fused identity shortcut (out += xin)."""
    t = pl.program_id(1)
    T = pl.num_programs(1)
    TH, W = mid_ref.shape[1], mid_ref.shape[2]
    Cout = o_ref.shape[3]
    rows = _activated_rows(scale_ref, shift_ref, top_ref, mid_ref, bot_ref, t, T)
    acc = _conv3x3_kwstack(rows, w_ref, TH, W) + b_ref[0].astype(jnp.float32)
    acc = acc + xin_ref[0].reshape(TH * W, Cout).astype(jnp.float32)
    _write_tile_stats(stats_ref, acc)
    o_ref[0] = acc.reshape(TH, W, Cout).astype(o_ref.dtype)


def _gn_act_conv_proj_add_kernel(scale_ref, shift_ref, top_ref, mid_ref, bot_ref,
                                 w_ref, b_ref, xin_ref, ws_ref, bs_ref,
                                 o_ref, stats_ref):
    """Same as above + fused 1x1-projection shortcut (out += xin @ ws + bs)."""
    t = pl.program_id(1)
    T = pl.num_programs(1)
    TH, W = mid_ref.shape[1], mid_ref.shape[2]
    Cout = o_ref.shape[3]
    Cx = xin_ref.shape[3]
    rows = _activated_rows(scale_ref, shift_ref, top_ref, mid_ref, bot_ref, t, T)
    acc = _conv3x3_kwstack(rows, w_ref, TH, W) + b_ref[0].astype(jnp.float32)
    short = jnp.dot(xin_ref[0].reshape(TH * W, Cx).astype(jnp.bfloat16),
                    ws_ref[...],
                    preferred_element_type=jnp.float32)
    acc = acc + short + bs_ref[0].astype(jnp.float32)
    _write_tile_stats(stats_ref, acc)
    o_ref[0] = acc.reshape(TH, W, Cout).astype(o_ref.dtype)


def _downsample_conv_kernel(top_ref, mid_ref, w_ref, b_ref, o_ref):
    """3x3 / stride-2 / pad-1 conv.  The whole (2*TDo, W, C) input tile is loaded
    once; row/column decimation is done with reshapes + static slices (no strided
    ref indexing).  Per kh the taps are kw-stacked (K = 3*C) -> 3 bf16 MXU matmuls.
    The single top halo row comes via a clamped 1-row BlockSpec, zero-masked at the
    image boundary."""
    t = pl.program_id(1)
    TDo, Wo, Cout = o_ref.shape[1], o_ref.shape[2], o_ref.shape[3]
    C = mid_ref.shape[3]
    f32 = jnp.float32

    mid = mid_ref[0].astype(f32)                                 # (2*TDo, W, C)
    top = top_ref[0].astype(f32) * (t > 0).astype(f32)           # (1, W, C)

    mid4 = mid.reshape(TDo, 2, 2 * Wo, C)
    even_rows = mid4[:, 0]                                       # rows 2r     (kh=1)
    odd_rows = mid4[:, 1]                                        # rows 2r+1   (kh=2)
    prev_rows = jnp.concatenate([top, odd_rows[:-1]], axis=0)    # rows 2r-1   (kh=0)

    def kw_stack(rows):                                          # (TDo, W, C) -> (TDo*Wo, 3C)
        r4 = rows.reshape(TDo, Wo, 2, C)
        even_c = r4[:, :, 0, :]                                  # cols 2c     (kw=1)
        odd_c = r4[:, :, 1, :]                                   # cols 2c+1   (kw=2)
        prev_c = jnp.concatenate(
            [jnp.zeros((TDo, 1, C), f32), odd_c[:, :-1, :]], axis=1)  # cols 2c-1 (kw=0)
        return jnp.concatenate([prev_c, even_c, odd_c], axis=-1).reshape(TDo * Wo, 3 * C)

    acc = jnp.zeros((TDo * Wo, Cout), f32)
    for kh, rows in enumerate((prev_rows, even_rows, odd_rows)):
        acc = acc + jnp.dot(kw_stack(rows).astype(jnp.bfloat16), w_ref[kh],
                            preferred_element_type=f32)
    acc = acc + b_ref[0].astype(f32)
    o_ref[0] = acc.reshape(TDo, Wo, Cout).astype(o_ref.dtype)


# ------------------------------ JAX wrappers -------------------------------- #

def channel_stats(x, row_tile=None):
    """Per-sample per-channel per-row-tile partial (sum, sum-sq) -> (N, T, 2, C) f32."""
    N, H, W, C = x.shape
    TH = _choose_row_tile(H, W, C, C, row_tile)
    T = H // TH
    isz = x.dtype.itemsize
    return pl.pallas_call(
        _stats_kernel,
        out_shape=jax.ShapeDtypeStruct((N, T, 2, C), jnp.float32),
        grid=(N, T),
        in_specs=[pl.BlockSpec((1, TH, W, C), lambda n, t: (n, t, 0, 0))],
        out_specs=pl.BlockSpec((1, 1, 2, C), lambda n, t: (n, t, 0, 0)),
        compiler_params=_cp("parallel", "parallel"),
        cost_estimate=pl.CostEstimate(flops=3 * N * H * W * C, transcendentals=0,
                                      bytes_accessed=isz * N * H * W * C
                                      + 4 * N * T * 2 * C),
    )(x)


def _affine_from_stats(stats, gamma, beta, groups, eps, hw):
    """Tiny XLA op: reduce per-tile partial (sum, sumsq) and turn them into
    per-sample, per-channel GroupNorm scale/shift."""
    stats = stats.sum(axis=1)                                    # (N, 2, C)
    N, _, C = stats.shape
    assert C % groups == 0, "groupnorm_groups must divide the channel count"
    cg = C // groups
    s = stats[:, 0, :].reshape(N, groups, cg).sum(-1)            # (N, G)
    ss = stats[:, 1, :].reshape(N, groups, cg).sum(-1)
    cnt = float(hw * cg)
    mean = s / cnt
    var = ss / cnt - mean * mean                                 # biased var (PyTorch GN)
    inv = jax.lax.rsqrt(var + eps)
    mean_c = jnp.repeat(mean, cg, axis=1)                        # (N, C)
    inv_c = jnp.repeat(inv, cg, axis=1)
    scale = gamma[None, :] * inv_c
    shift = beta[None, :] - mean_c * scale
    return scale[:, None, :], shift[:, None, :]                  # (N, 1, C) each


def gn_silu_conv3x3(x, scale, shift, w, b, xin=None, ws=None, bs=None, row_tile=None):
    """Fused: y = conv3x3(SiLU(x*scale+shift)) [+ shortcut]; returns (y, partial stats)."""
    N, H, W, Cin = x.shape
    Cout = w.shape[-1]
    TH = _choose_row_tile(H, W, max(Cin, Cout), Cout, row_tile)
    T = H // TH
    isz = x.dtype.itemsize

    w_k = w.reshape(3, 3 * Cin, Cout).astype(jnp.bfloat16)       # kw-stacked bf16 weight

    def mid_map(n, t): return (n, t, 0, 0)
    def top_map(n, t): return (n, jnp.maximum(t * TH - 1, 0), 0, 0)
    def bot_map(n, t): return (n, jnp.minimum((t + 1) * TH, H - 1), 0, 0)
    def per_n(n, t): return (n, 0, 0)
    def full3(n, t): return (0, 0, 0)
    def full2(n, t): return (0, 0)

    in_specs = [
        pl.BlockSpec((1, 1, Cin), per_n),                        # scale
        pl.BlockSpec((1, 1, Cin), per_n),                        # shift
        pl.BlockSpec((1, 1, W, Cin), top_map),                   # top halo row (clamped)
        pl.BlockSpec((1, TH, W, Cin), mid_map),                  # main row tile
        pl.BlockSpec((1, 1, W, Cin), bot_map),                   # bottom halo row (clamped)
        pl.BlockSpec((3, 3 * Cin, Cout), full3),                 # kw-stacked conv weight
        pl.BlockSpec((1, Cout), full2),                          # conv bias
    ]
    args = [scale, shift, x, x, x, w_k, b.reshape(1, Cout)]
    flops = 2 * N * H * W * 9 * Cin * Cout
    bytes_acc = (isz * N * H * W * (Cin + Cout) + 2 * 9 * Cin * Cout
                 + 4 * N * T * 2 * Cout + 8 * N * Cin)

    if xin is None:
        kernel = _gn_act_conv_kernel
    else:
        Cx = xin.shape[-1]
        in_specs.append(pl.BlockSpec((1, TH, W, Cx), mid_map))
        args.append(xin)
        bytes_acc += xin.dtype.itemsize * N * H * W * Cx
        if ws is None:
            kernel = _gn_act_conv_add_kernel
        else:
            kernel = _gn_act_conv_proj_add_kernel
            in_specs += [pl.BlockSpec((Cx, Cout), full2),
                         pl.BlockSpec((1, Cout), full2)]
            args += [ws.astype(jnp.bfloat16), bs.reshape(1, Cout)]
            flops += 2 * N * H * W * Cx * Cout

    return pl.pallas_call(
        kernel,
        out_shape=(jax.ShapeDtypeStruct((N, H, W, Cout), x.dtype),
                   jax.ShapeDtypeStruct((N, T, 2, Cout), jnp.float32)),
        grid=(N, T),
        in_specs=in_specs,
        out_specs=(pl.BlockSpec((1, TH, W, Cout), mid_map),
                   pl.BlockSpec((1, 1, 2, Cout), mid_map)),
        compiler_params=_cp("parallel", "parallel"),             # per-tile stats -> both parallel
        cost_estimate=pl.CostEstimate(flops=flops,
                                      transcendentals=N * H * W * Cin,
                                      bytes_accessed=bytes_acc),
    )(*args)


def downsample_conv(x, w, b, stride=2, ksize=3, row_tile=None):
    """Strided conv (k=3, stride=2, pad=1); taps gathered in-kernel via reshapes."""
    if ksize != 3 or stride != 2:
        # TODO(synk): general downsample_factor / downsample_kernel_size not implemented.
        raise NotImplementedError("only downsample_factor=2, kernel_size=3 supported")
    N, H, W, C = x.shape
    assert H % 2 == 0 and W % 2 == 0
    Cout = w.shape[-1]
    Ho, Wo = H // 2, W // 2
    TD = _choose_row_tile(Ho, W, C, Cout, row_tile, in_rows_per_row=2)
    RT = TD * stride
    To = Ho // TD
    isz = x.dtype.itemsize

    w_k = w.reshape(3, 3 * C, Cout).astype(jnp.bfloat16)         # kw-stacked bf16 weight

    def mid_map(n, t): return (n, t, 0, 0)
    def top_map(n, t): return (n, jnp.maximum(t * RT - 1, 0), 0, 0)

    return pl.pallas_call(
        _downsample_conv_kernel,
        out_shape=jax.ShapeDtypeStruct((N, Ho, Wo, Cout), x.dtype),
        grid=(N, To),
        in_specs=[
            pl.BlockSpec((1, 1, W, C), top_map),                 # top halo row (clamped)
            pl.BlockSpec((1, RT, W, C), mid_map),                # 2*TD input rows
            pl.BlockSpec((3, 3 * C, Cout), lambda n, t: (0, 0, 0)),
            pl.BlockSpec((1, Cout), lambda n, t: (0, 0)),
        ],
        out_specs=pl.BlockSpec((1, TD, Wo, Cout), mid_map),
        compiler_params=_cp("parallel", "parallel"),
        cost_estimate=pl.CostEstimate(
            flops=2 * N * Ho * Wo * 9 * C * Cout, transcendentals=0,
            bytes_accessed=isz * (N * H * W * C + N * Ho * Wo * Cout) + 2 * 9 * C * Cout),
    )(x, x, w_k, b.reshape(1, Cout))


# --------------------------- Module forward pass ----------------------------- #

def residual_block_2d(x, stats_x, p, groups, eps, row_tile=None):
    """Returns (out, partial channel-stats(out)); stats feed the next block's GN1."""
    N, H, W, _ = x.shape
    hw = H * W
    sc1, sh1 = _affine_from_stats(stats_x, p["gn1_g"], p["gn1_b"], groups, eps, hw)
    h1, stats_h1 = gn_silu_conv3x3(x, sc1, sh1, p["w1"], p["b1"], row_tile=row_tile)
    sc2, sh2 = _affine_from_stats(stats_h1, p["gn2_g"], p["gn2_b"], groups, eps, hw)
    # TODO(synk): dropout_p > 0 not implemented (module default 0.0 -> identity at eval).
    if "ws" in p:   # projected shortcut (Cin != Cout), fused into the conv kernel
        out, stats_out = gn_silu_conv3x3(h1, sc2, sh2, p["w2"], p["b2"],
                                         xin=x, ws=p["ws"], bs=p["bs"],
                                         row_tile=row_tile)
    else:           # identity shortcut, fused
        out, stats_out = gn_silu_conv3x3(h1, sc2, sh2, p["w2"], p["b2"],
                                         xin=x, row_tile=row_tile)
    return out, stats_out


def encoder_block_2d(x_nchw, params, groups, eps=1e-6,
                     downsample_factor=2, downsample_kernel_size=3, row_tile=None):
    x = jnp.transpose(x_nchw, (0, 2, 3, 1))        # NCHW -> NHWC (channels -> lanes)
    stats = channel_stats(x, row_tile)             # partial stats for the first GroupNorm
    for p in params["blocks"]:
        x, stats = residual_block_2d(x, stats, p, groups, eps, row_tile)
    if "down" in params:
        d = params["down"]
        x = downsample_conv(x, d["w"], d["b"], downsample_factor,
                            downsample_kernel_size, row_tile)
    return jnp.transpose(x, (0, 3, 1, 2))          # NHWC -> NCHW


# ------------------------------ Param building ------------------------------- #

def init_params(key, in_channels, out_channels, num_residual_blocks=2,
                add_downsample=True, downsample_kernel_size=3):
    params = {"blocks": []}
    for i in range(num_residual_blocks):
        cin = in_channels if i == 0 else out_channels
        key, k1, k2, k3 = jax.random.split(key, 4)
        p = {
            "gn1_g": jnp.ones((cin,), jnp.float32),
            "gn1_b": jnp.zeros((cin,), jnp.float32),
            "w1": 0.1 * jax.random.normal(k1, (3, 3, cin, out_channels), jnp.float32),
            "b1": jnp.zeros((out_channels,), jnp.float32),
            "gn2_g": jnp.ones((out_channels,), jnp.float32),
            "gn2_b": jnp.zeros((out_channels,), jnp.float32),
            "w2": 0.1 * jax.random.normal(k2, (3, 3, out_channels, out_channels), jnp.float32),
            "b2": jnp.zeros((out_channels,), jnp.float32),
        }
        if cin != out_channels:
            p["ws"] = 0.1 * jax.random.normal(k3, (cin, out_channels), jnp.float32)
            p["bs"] = jnp.zeros((out_channels,), jnp.float32)
        params["blocks"].append(p)
    if add_downsample:
        key, kd = jax.random.split(key)
        k = downsample_kernel_size
        params["down"] = {
            "w": 0.1 * jax.random.normal(kd, (k, k, out_channels, out_channels), jnp.float32),
            "b": jnp.zeros((out_channels,), jnp.float32),
        }
    return params


# ---------------------------------- main ------------------------------------- #

if __name__ == "__main__":
    key = jax.random.PRNGKey(0)
    kx, kp = jax.random.split(key)

    N, Cin, Hs, Ws = 2, 8, 16, 16
    Cout, groups = 16, 4   # groups chosen so they divide both 8 and 16

    x = jax.random.normal(kx, (N, Cin, Hs, Ws), jnp.float32)   # NCHW, like PyTorch
    params = init_params(kp, Cin, Cout, num_residual_blocks=2, add_downsample=True)

    # row_tile=8 -> grid (N, 2): exercises the H-tiling / halo / pipelining path.
    fwd = jax.jit(functools.partial(encoder_block_2d, groups=groups, row_tile=8))
    out = fwd(x, params)
    jax.block_until_ready(out)

    assert out.shape == (N, Cout, Hs // 2, Ws // 2), out.shape
    assert bool(jnp.all(jnp.isfinite(out)))
    print("KERNEL_OK")
</pallas_src>

<mosaic_0001>
module attributes {stable_mosaic.version = 11 : i64} {
  func.func @_stats_kernel(%arg0: i32, %arg1: i32, %arg2: memref<1x8x16x8xf32, #tpu.memory_space<vmem>>, %arg3: memref<1x1x2x8xf32, #tpu.memory_space<vmem>>) attributes {dimension_semantics = [#tpu.dimension_semantics<parallel>, #tpu.dimension_semantics<parallel>], iteration_bounds = array<i64: 2, 2>, scalar_prefetch = 0 : i64, scratch_operands = 0 : i64, tpu.core_type = #tpu.core_type<tc>, window_params = [{transform_indices = @transform_0, window_bounds = array<i64: 1, 8, 16, 8>}, {transform_indices = @transform_1, window_bounds = array<i64: 1, 1, 2, 8>}]} {
    %c0 = arith.constant 0 : index
    %c0_0 = arith.constant 0 : index
    %c0_1 = arith.constant 0 : index
    %c0_2 = arith.constant 0 : index
    %0 = vector.load %arg2[%c0, %c0_0, %c0_1, %c0_2] : memref<1x8x16x8xf32, #tpu.memory_space<vmem>>, vector<1x8x16x8xf32>
    %1 = vector.shape_cast %0 : vector<1x8x16x8xf32> to vector<8x16x8xf32>
    %2 = vector.shape_cast %1 : vector<8x16x8xf32> to vector<128x8xf32>
    %cst = arith.constant dense<0.000000e+00> : vector<8xf32>
    %3 = vector.multi_reduction <add>, %2, %cst [0] : vector<128x8xf32> to vector<8xf32>
    %4 = vector.shape_cast %3 : vector<8xf32> to vector<1x8xf32>
    %5 = arith.mulf %2, %2 : vector<128x8xf32>
    %cst_3 = arith.constant dense<0.000000e+00> : vector<8xf32>
    %6 = vector.multi_reduction <add>, %5, %cst_3 [0] : vector<128x8xf32> to vector<8xf32>
    %7 = vector.shape_cast %6 : vector<8xf32> to vector<1x8xf32>
    %8 = tpu.concatenate %4, %7 in 0 : vector<1x8xf32>, vector<1x8xf32> -> vector<2x8xf32>
    %c0_4 = arith.constant 0 : index
    %c0_5 = arith.constant 0 : index
    %c0_6 = arith.constant 0 : index
    %c0_7 = arith.constant 0 : index
    %9 = vector.load %arg3[%c0_4, %c0_5, %c0_6, %c0_7] : memref<1x1x2x8xf32, #tpu.memory_space<vmem>>, vector<1x1x2x8xf32>
    %10 = vector.shape_cast %9 : vector<1x1x2x8xf32> to vector<2x8xf32>
    %11 = vector.shape_cast %8 : vector<2x8xf32> to vector<1x1x2x8xf32>
    tpu.vector_store %arg3[%c0_4, %c0_5, %c0_6, %c0_7], %11 {strides = array<i32>} : memref<1x1x2x8xf32, #tpu.memory_space<vmem>>, vector<1x1x2x8xf32>,
    return
  }
  func.func @transform_0(%arg0: i32, %arg1: i32) -> (i32, i32, i32, i32) {
    %c0_i32 = arith.constant 0 : i32
    %c0_i32_0 = arith.constant 0 : i32
    %c0_i32_1 = arith.constant 0 : i32
    return %arg0, %arg1, %c0_i32, %c0_i32_0 : i32, i32, i32, i32
  }
  func.func @transform_1(%arg0: i32, %arg1: i32) -> (i32, i32, i32, i32) {
    %c0_i32 = arith.constant 0 : i32
    %c0_i32_0 = arith.constant 0 : i32
    %c0_i32_1 = arith.constant 0 : i32
    return %arg0, %arg1, %c0_i32, %c0_i32_0 : i32, i32, i32, i32
  }
}

module attributes {stable_mosaic.version = 11 : i64} {
  func.func @_gn_act_conv_kernel(%arg0: i32, %arg1: i32, %arg2: memref<1x1x8xf32, #tpu.memory_space<vmem>>, %arg3: memref<1x1x8xf32, #tpu.memory_space<vmem>>, %arg4: memref<1x1x16x8xf32, #tpu.memory_space<vmem>>, %arg5: memref<1x8x16x8xf32, #tpu.memory_space<vmem>>, %arg6: memref<1x1x16x8xf32, #tpu.memory_space<vmem>>, %arg7: memref<3x24x16xbf16, #tpu.memory_space<vmem>>, %arg8: memref<1x16xf32, #tpu.memory_space<vmem>>, %arg9: memref<1x8x16x16xf32, #tpu.memory_space<vmem>>, %arg10: memref<1x1x2x16xf32, #tpu.memory_space<vmem>>) attributes {dimension_semantics = [#tpu.dimension_semantics<parallel>, #tpu.dimension_semantics<parallel>], iteration_bounds = array<i64: 2, 2>, scalar_prefetch = 0 : i64, scratch_operands = 0 : i64, tpu.core_type = #tpu.core_type<tc>, window_params = [{transform_indices = @transform_0, window_bounds = array<i64: 1, 1, 8>}, {transform_indices = @transform_1, window_bounds = array<i64: 1, 1, 8>}, {transform_indices = @transform_2, window_bounds = array<i64: 1, 1, 16, 8>}, {transform_indices = @transform_3, window_bounds = array<i64: 1, 8, 16, 8>}, {transform_indices = @transform_4, window_bounds = array<i64: 1, 1, 16, 8>}, {pipeline_mode = #tpu.pipeline_mode<synchronous>, transform_indices = @transform_5, window_bounds = array<i64: 3, 24, 16>}, {pipeline_mode = #tpu.pipeline_mode<synchronous>, transform_indices = @transform_6, window_bounds = array<i64: 1, 16>}, {transform_indices = @transform_7, window_bounds = array<i64: 1, 8, 16, 16>}, {transform_indices = @transform_8, window_bounds = array<i64: 1, 1, 2, 16>}]} {
    %c0 = arith.constant 0 : index
    %c0_0 = arith.constant 0 : index
    %c0_1 = arith.constant 0 : index
    %0 = vector.load %arg2[%c0, %c0_0, %c0_1] : memref<1x1x8xf32, #tpu.memory_space<vmem>>, vector<1x1x8xf32>
    %1 = vector.shape_cast %0 : vector<1x1x8xf32> to vector<1x8xf32>
    %2 = vector.shape_cast %1 : vector<1x8xf32> to vector<1x1x8xf32>
    %c0_2 = arith.constant 0 : index
    %c0_3 = arith.constant 0 : index
    %c0_4 = arith.constant 0 : index
    %3 = vector.load %arg3[%c0_2, %c0_3, %c0_4] : memref<1x1x8xf32, #tpu.memory_space<vmem>>, vector<1x1x8xf32>
    %4 = vector.shape_cast %3 : vector<1x1x8xf32> to vector<1x8xf32>
    %5 = vector.shape_cast %4 : vector<1x8xf32> to vector<1x1x8xf32>
    %c0_5 = arith.constant 0 : index
    %c0_6 = arith.constant 0 : index
    %c0_7 = arith.constant 0 : index
    %c0_8 = arith.constant 0 : index
    %6 = vector.load %arg4[%c0_5, %c0_6, %c0_7, %c0_8] : memref<1x1x16x8xf32, #tpu.memory_space<vmem>>, vector<1x1x16x8xf32>
    %7 = vector.shape_cast %6 : vector<1x1x16x8xf32> to vector<1x16x8xf32>
    %8 = vector.broadcast %2 : vector<1x1x8xf32> to vector<1x16x8xf32>
    %9 = arith.mulf %7, %8 : vector<1x16x8xf32>
    %10 = vector.broadcast %5 : vector<1x1x8xf32> to vector<1x16x8xf32>
    %11 = arith.addf %9, %10 : vector<1x16x8xf32>
    %12 = arith.negf %11 : vector<1x16x8xf32>
    %13 = math.exp %12 : vector<1x16x8xf32>
    %cst = arith.constant 1.000000e+00 : f32
    %14 = vector.broadcast %cst : f32 to vector<1x16x8xf32>
    %15 = arith.addf %14, %13 : vector<1x16x8xf32>
    %16 = arith.divf %14, %15 : vector<1x16x8xf32>
    %17 = arith.mulf %11, %16 : vector<1x16x8xf32>
    %c0_i32 = arith.constant 0 : i32
    %18 = arith.cmpi sgt, %arg1, %c0_i32 : i32
    %19 = arith.extui %18 : i1 to i32
    %20 = arith.sitofp %19 : i32 to f32
    %21 = vector.broadcast %20 : f32 to vector<1x16x8xf32>
    %22 = arith.mulf %17, %21 : vector<1x16x8xf32>
    %c0_9 = arith.constant 0 : index
    %c0_10 = arith.constant 0 : index
    %c0_11 = arith.constant 0 : index
    %c0_12 = arith.constant 0 : index
    %23 = vector.load %arg6[%c0_9, %c0_10, %c0_11, %c0_12] : memref<1x1x16x8xf32, #tpu.memory_space<vmem>>, vector<1x1x16x8xf32>
    %24 = vector.shape_cast %23 : vector<1x1x16x8xf32> to vector<1x16x8xf32>
    %25 = vector.broadcast %2 : vector<1x1x8xf32> to vector<1x16x8xf32>
    %26 = arith.mulf %24, %25 : vector<1x16x8xf32>
    %27 = vector.broadcast %5 : vector<1x1x8xf32> to vector<1x16x8xf32>
    %28 = arith.addf %26, %27 : vector<1x16x8xf32>
    %29 = arith.negf %28 : vector<1x16x8xf32>
    %30 = math.exp %29 : vector<1x16x8xf32>
    %cst_13 = arith.constant 1.000000e+00 : f32
    %31 = vector.broadcast %cst_13 : f32 to vector<1x16x8xf32>
    %32 = arith.addf %31, %30 : vector<1x16x8xf32>
    %33 = arith.divf %31, %32 : vector<1x16x8xf32>
    %34 = arith.mulf %28, %33 : vector<1x16x8xf32>
    %c1_i32 = arith.constant 1 : i32
    %35 = arith.cmpi slt, %arg1, %c1_i32 : i32
    %36 = arith.extui %35 : i1 to i32
    %37 = arith.sitofp %36 : i32 to f32
    %38 = vector.broadcast %37 : f32 to vector<1x16x8xf32>
    %39 = arith.mulf %34, %38 : vector<1x16x8xf32>
    %c0_14 = arith.constant 0 : index
    %c0_15 = arith.constant 0 : index
    %c0_16 = arith.constant 0 : index
    %c0_17 = arith.constant 0 : index
    %40 = vector.load %arg5[%c0_14, %c0_15, %c0_16, %c0_17] : memref<1x8x16x8xf32, #tpu.memory_space<vmem>>, vector<1x8x16x8xf32>
    %41 = vector.shape_cast %40 : vector<1x8x16x8xf32> to vector<8x16x8xf32>
    %42 = vector.broadcast %2 : vector<1x1x8xf32> to vector<8x16x8xf32>
    %43 = arith.mulf %41, %42 : vector<8x16x8xf32>
    %44 = vector.broadcast %5 : vector<1x1x8xf32> to vector<8x16x8xf32>
    %45 = arith.addf %43, %44 : vector<8x16x8xf32>
    %46 = arith.negf %45 : vector<8x16x8xf32>
    %47 = math.exp %46 : vector<8x16x8xf32>
    %cst_18 = arith.constant 1.000000e+00 : f32
    %48 = vector.broadcast %cst_18 : f32 to vector<8x16x8xf32>
    %49 = arith.addf %48, %47 : vector<8x16x8xf32>
    %50 = arith.divf %48, %49 : vector<8x16x8xf32>
    %51 = arith.mulf %45, %50 : vector<8x16x8xf32>
    %52 = tpu.concatenate %22, %51, %39 in 0 : vector<1x16x8xf32>, vector<8x16x8xf32>, vector<1x16x8xf32> -> vector<10x16x8xf32>
    %cst_19 = arith.constant 0.000000e+00 : f32
    %53 = vector.broadcast %cst_19 : f32 to vector<8x1x8xf32>
    %cst_20 = arith.constant 0.000000e+00 : f32
    %54 = vector.broadcast %cst_20 : f32 to vector<128x16xf32>
    %55 = vector.extract_strided_slice %52 {offsets = [0, 0, 0], sizes = [8, 16, 8], strides = [1, 1, 1]} : vector<10x16x8xf32> to vector<8x16x8xf32>
    %56 = vector.extract_strided_slice %55 {offsets = [0, 0, 0], sizes = [8, 15, 8], strides = [1, 1, 1]} : vector<8x16x8xf32> to vector<8x15x8xf32>
    %57 = tpu.concatenate %53, %56 in 1 : vector<8x1x8xf32>, vector<8x15x8xf32> -> vector<8x16x8xf32>
    %58 = vector.extract_strided_slice %55 {offsets = [0, 1, 0], sizes = [8, 15, 8], strides = [1, 1, 1]} : vector<8x16x8xf32> to vector<8x15x8xf32>
    %59 = tpu.concatenate %58, %53 in 1 : vector<8x15x8xf32>, vector<8x1x8xf32> -> vector<8x16x8xf32>
    %60 = tpu.concatenate %57, %55, %59 in 2 : vector<8x16x8xf32>, vector<8x16x8xf32>, vector<8x16x8xf32> -> vector<8x16x24xf32>
    %61 = vector.shape_cast %60 : vector<8x16x24xf32> to vector<128x24xf32>
    %62 = arith.truncf %61 : vector<128x24xf32> to vector<128x24xbf16>
    %c0_21 = arith.constant 0 : index
    %c0_22 = arith.constant 0 : index
    %c0_23 = arith.constant 0 : index
    %63 = vector.load %arg7[%c0_21, %c0_22, %c0_23] : memref<3x24x16xbf16, #tpu.memory_space<vmem>>, vector<1x24x16xbf16>
    %64 = vector.shape_cast %63 : vector<1x24x16xbf16> to vector<24x16xbf16>
    %cst_24 = arith.constant dense<0.000000e+00> : vector<128x16xf32>
    %65 = tpu.matmul %62, %64, %cst_24 {dimension_numbers = #tpu.dot_dimension_numbers<[1], [0], [0], [1], [0, 0, 1, 1], [], []>} : vector<128x24xbf16>, vector<24x16xbf16>, vector<128x16xf32> -> vector<128x16xf32>
    %66 = arith.addf %54, %65 : vector<128x16xf32>
    %67 = vector.extract_strided_slice %52 {offsets = [1, 0, 0], sizes = [8, 16, 8], strides = [1, 1, 1]} : vector<10x16x8xf32> to vector<8x16x8xf32>
    %68 = vector.extract_strided_slice %67 {offsets = [0, 0, 0], sizes = [8, 15, 8], strides = [1, 1, 1]} : vector<8x16x8xf32> to vector<8x15x8xf32>
    %69 = tpu.concatenate %53, %68 in 1 : vector<8x1x8xf32>, vector<8x15x8xf32> -> vector<8x16x8xf32>
    %70 = vector.extract_strided_slice %67 {offsets = [0, 1, 0], sizes = [8, 15, 8], strides = [1, 1, 1]} : vector<8x16x8xf32> to vector<8x15x8xf32>
    %71 = tpu.concatenate %70, %53 in 1 : vector<8x15x8xf32>, vector<8x1x8xf32> -> vector<8x16x8xf32>
    %72 = tpu.concatenate %69, %67, %71 in 2 : vector<8x16x8xf32>, vector<8x16x8xf32>, vector<8x16x8xf32> -> vector<8x16x24xf32>
    %73 = vector.shape_cast %72 : vector<8x16x24xf32> to vector<128x24xf32>
    %74 = arith.truncf %73 : vector<128x24xf32> to vector<128x24xbf16>
    %c1 = arith.constant 1 : index
    %c0_25 = arith.constant 0 : index
    %c0_26 = arith.constant 0 : index
    %75 = vector.load %arg7[%c1, %c0_25, %c0_26] : memref<3x24x16xbf16, #tpu.memory_space<vmem>>, vector<1x24x16xbf16>
    %76 = vector.shape_cast %75 : vector<1x24x16xbf16> to vector<24x16xbf16>
    %cst_27 = arith.constant dense<0.000000e+00> : vector<128x16xf32>
    %77 = tpu.matmul %74, %76, %cst_27 {dimension_numbers = #tpu.dot_dimension_numbers<[1], [0], [0], [1], [0, 0, 1, 1], [], []>} : vector<128x24xbf16>, vector<24x16xbf16>, vector<128x16xf32> -> vector<128x16xf32>
    %78 = arith.addf %66, %77 : vector<128x16xf32>
    %79 = vector.extract_strided_slice %52 {offsets = [2, 0, 0], sizes = [8, 16, 8], strides = [1, 1, 1]} : vector<10x16x8xf32> to vector<8x16x8xf32>
    %80 = vector.extract_strided_slice %79 {offsets = [0, 0, 0], sizes = [8, 15, 8], strides = [1, 1, 1]} : vector<8x16x8xf32> to vector<8x15x8xf32>
    %81 = tpu.concatenate %53, %80 in 1 : vector<8x1x8xf32>, vector<8x15x8xf32> -> vector<8x16x8xf32>
    %82 = vector.extract_strided_slice %79 {offsets = [0, 1, 0], sizes = [8, 15, 8], strides = [1, 1, 1]} : vector<8x16x8xf32> to vector<8x15x8xf32>
    %83 = tpu.concatenate %82, %53 in 1 : vector<8x15x8xf32>, vector<8x1x8xf32> -> vector<8x16x8xf32>
    %84 = tpu.concatenate %81, %79, %83 in 2 : vector<8x16x8xf32>, vector<8x16x8xf32>, vector<8x16x8xf32> -> vector<8x16x24xf32>
    %85 = vector.shape_cast %84 : vector<8x16x24xf32> to vector<128x24xf32>
    %86 = arith.truncf %85 : vector<128x24xf32> to vector<128x24xbf16>
    %c2 = arith.constant 2 : index
    %c0_28 = arith.constant 0 : index
    %c0_29 = arith.constant 0 : index
    %87 = vector.load %arg7[%c2, %c0_28, %c0_29] : memref<3x24x16xbf16, #tpu.memory_space<vmem>>, vector<1x24x16xbf16>
    %88 = vector.shape_cast %87 : vector<1x24x16xbf16> to vector<24x16xbf16>
    %cst_30 = arith.constant dense<0.000000e+00> : vector<128x16xf32>
    %89 = tpu.matmul %86, %88, %cst_30 {dimension_numbers = #tpu.dot_dimension_numbers<[1], [0], [0], [1], [0, 0, 1, 1], [], []>} : vector<128x24xbf16>, vector<24x16xbf16>, vector<128x16xf32> -> vector<128x16xf32>
    %90 = arith.addf %78, %89 : vector<128x16xf32>
    %c0_31 = arith.constant 0 : index
    %c0_32 = arith.constant 0 : index
    %91 = vector.load %arg8[%c0_31, %c0_32] : memref<1x16xf32, #tpu.memory_space<vmem>>, vector<1x16xf32>
    %92 = vector.shape_cast %91 : vector<1x16xf32> to vector<16xf32>
    %93 = vector.shape_cast %92 : vector<16xf32> to vector<1x16xf32>
    %94 = vector.broadcast %93 : vector<1x16xf32> to vector<128x16xf32>
    %95 = arith.addf %90, %94 : vector<128x16xf32>
    %cst_33 = arith.constant dense<0.000000e+00> : vector<16xf32>
    %96 = vector.multi_reduction <add>, %95, %cst_33 [0] : vector<128x16xf32> to vector<16xf32>
    %97 = vector.shape_cast %96 : vector<16xf32> to vector<1x16xf32>
    %98 = arith.mulf %95, %95 : vector<128x16xf32>
    %cst_34 = arith.constant dense<0.000000e+00> : vector<16xf32>
    %99 = vector.multi_reduction <add>, %98, %cst_34 [0] : vector<128x16xf32> to vector<16xf32>
    %100 = vector.shape_cast %99 : vector<16xf32> to vector<1x16xf32>
    %101 = tpu.concatenate %97, %100 in 0 : vector<1x16xf32>, vector<1x16xf32> -> vector<2x16xf32>
    %c0_35 = arith.constant 0 : index
    %c0_36 = arith.constant 0 : index
    %c0_37 = arith.constant 0 : index
    %c0_38 = arith.constant 0 : index
    %102 = vector.load %arg10[%c0_35, %c0_36, %c0_37, %c0_38] : memref<1x1x2x16xf32, #tpu.memory_space<vmem>>, vector<1x1x2x16xf32>
    %103 = vector.shape_cast %102 : vector<1x1x2x16xf32> to vector<2x16xf32>
    %104 = vector.shape_cast %101 : vector<2x16xf32> to vector<1x1x2x16xf32>
    tpu.vector_store %arg10[%c0_35, %c0_36, %c0_37, %c0_38], %104 {strides = array<i32>} : memref<1x1x2x16xf32, #tpu.memory_space<vmem>>, vector<1x1x2x16xf32>,
    %105 = vector.shape_cast %95 : vector<128x16xf32> to vector<8x16x16xf32>
    %c0_39 = arith.constant 0 : index
    %c0_40 = arith.constant 0 : index
    %c0_41 = arith.constant 0 : index
    %c0_42 = arith.constant 0 : index
    %106 = vector.load %arg9[%c0_39, %c0_40, %c0_41, %c0_42] : memref<1x8x16x16xf32, #tpu.memory_space<vmem>>, vector<1x8x16x16xf32>
    %107 = vector.shape_cast %106 : vector<1x8x16x16xf32> to vector<8x16x16xf32>
    %108 = vector.shape_cast %105 : vector<8x16x16xf32> to vector<1x8x16x16xf32>
    tpu.vector_store %arg9[%c0_39, %c0_40, %c0_41, %c0_42], %108 {strides = array<i32>} : memref<1x8x16x16xf32, #tpu.memory_space<vmem>>, vector<1x8x16x16xf32>,
    return
  }
  func.func @transform_0(%arg0: i32, %arg1: i32) -> (i32, i32, i32) {
    %c0_i32 = arith.constant 0 : i32
    %c0_i32_0 = arith.constant 0 : i32
    %c0_i32_1 = arith.constant 0 : i32
    return %arg0, %c0_i32, %c0_i32_0 : i32, i32, i32
  }
  func.func @transform_1(%arg0: i32, %arg1: i32) -> (i32, i32, i32) {
    %c0_i32 = arith.constant 0 : i32
    %c0_i32_0 = arith.constant 0 : i32
    %c0_i32_1 = arith.constant 0 : i32
    return %arg0, %c0_i32, %c0_i32_0 : i32, i32, i32
  }
  func.func @transform_2(%arg0: i32, %arg1: i32) -> (i32, i32, i32, i32) {
    %c8_i32 = arith.constant 8 : i32
    %0 = arith.muli %arg1, %c8_i32 : i32
    %c1_i32 = arith.constant 1 : i32
    %1 = arith.subi %0, %c1_i32 : i32
    %c0_i32 = arith.constant 0 : i32
    %2 = arith.maxsi %1, %c0_i32 : i32
    %c0_i32_0 = arith.constant 0 : i32
    %c0_i32_1 = arith.constant 0 : i32
    %c0_i32_2 = arith.constant 0 : i32
    return %arg0, %2, %c0_i32_0, %c0_i32_1 : i32, i32, i32, i32
  }
  func.func @transform_3(%arg0: i32, %arg1: i32) -> (i32, i32, i32, i32) {
    %c0_i32 = arith.constant 0 : i32
    %c0_i32_0 = arith.constant 0 : i32
    %c0_i32_1 = arith.constant 0 : i32
    return %arg0, %arg1, %c0_i32, %c0_i32_0 : i32, i32, i32, i32
  }
  func.func @transform_4(%arg0: i32, %arg1: i32) -> (i32, i32, i32, i32) {
    %c1_i32 = arith.constant 1 : i32
    %0 = arith.addi %arg1, %c1_i32 : i32
    %c8_i32 = arith.constant 8 : i32
    %1 = arith.muli %0, %c8_i32 : i32
    %c15_i32 = arith.constant 15 : i32
    %2 = arith.minsi %1, %c15_i32 : i32
    %c0_i32 = arith.constant 0 : i32
    %c0_i32_0 = arith.constant 0 : i32
    %c0_i32_1 = arith.constant 0 : i32
    return %arg0, %2, %c0_i32, %c0_i32_0 : i32, i32, i32, i32
  }
  func.func @transform_5(%arg0: i32, %arg1: i32) -> (i32, i32, i32) {
    %c0_i32 = arith.constant 0 : i32
    %c0_i32_0 = arith.constant 0 : i32
    %c0_i32_1 = arith.constant 0 : i32
    %c0_i32_2 = arith.constant 0 : i32
    return %c0_i32, %c0_i32_0, %c0_i32_1 : i32, i32, i32
  }
  func.func @transform_6(%arg0: i32, %arg1: i32) -> (i32, i32) {
    %c0_i32 = arith.constant 0 : i32
    %c0_i32_0 = arith.constant 0 : i32
    %c0_i32_1 = arith.constant 0 : i32
    return %c0_i32, %c0_i32_0 : i32, i32
  }
  func.func @transform_7(%arg0: i32, %arg1: i32) -> (i32, i32, i32, i32) {
    %c0_i32 = arith.constant 0 : i32
    %c0_i32_0 = arith.constant 0 : i32
    %c0_i32_1 = arith.constant 0 : i32
    return %arg0, %arg1, %c0_i32, %c0_i32_0 : i32, i32, i32, i32
  }
  func.func @transform_8(%arg0: i32, %arg1: i32) -> (i32, i32, i32, i32) {
    %c0_i32 = arith.constant 0 : i32
    %c0_i32_0 = arith.constant 0 : i32
    %c0_i32_1 = arith.constant 0 : i32
    return %arg0, %arg1, %c0_i32, %c0_i32_0 : i32, i32, i32, i32
  }
}

module attributes {stable_mosaic.version = 11 : i64} {
  func.func @_gn_act_conv_add_kernel(%arg0: i32, %arg1: i32, %arg2: memref<1x1x16xf32, #tpu.memory_space<vmem>>, %arg3: memref<1x1x16xf32, #tpu.memory_space<vmem>>, %arg4: memref<1x1x16x16xf32, #tpu.memory_space<vmem>>, %arg5: memref<1x8x16x16xf32, #tpu.memory_space<vmem>>, %arg6: memref<1x1x16x16xf32, #tpu.memory_space<vmem>>, %arg7: memref<3x48x16xbf16, #tpu.memory_space<vmem>>, %arg8: memref<1x16xf32, #tpu.memory_space<vmem>>, %arg9: memref<1x8x16x16xf32, #tpu.memory_space<vmem>>, %arg10: memref<1x8x16x16xf32, #tpu.memory_space<vmem>>, %arg11: memref<1x1x2x16xf32, #tpu.memory_space<vmem>>) attributes {dimension_semantics = [#tpu.dimension_semantics<parallel>, #tpu.dimension_semantics<parallel>], iteration_bounds = array<i64: 2, 2>, scalar_prefetch = 0 : i64, scratch_operands = 0 : i64, tpu.core_type = #tpu.core_type<tc>, window_params = [{transform_indices = @transform_0, window_bounds = array<i64: 1, 1, 16>}, {transform_indices = @transform_1, window_bounds = array<i64: 1, 1, 16>}, {transform_indices = @transform_2, window_bounds = array<i64: 1, 1, 16, 16>}, {transform_indices = @transform_3, window_bounds = array<i64: 1, 8, 16, 16>}, {transform_indices = @transform_4, window_bounds = array<i64: 1, 1, 16, 16>}, {pipeline_mode = #tpu.pipeline_mode<synchronous>, transform_indices = @transform_5, window_bounds = array<i64: 3, 48, 16>}, {pipeline_mode = #tpu.pipeline_mode<synchronous>, transform_indices = @transform_6, window_bounds = array<i64: 1, 16>}, {transform_indices = @transform_7, window_bounds = array<i64: 1, 8, 16, 16>}, {transform_indices = @transform_8, window_bounds = array<i64: 1, 8, 16, 16>}, {transform_indices = @transform_9, window_bounds = array<i64: 1, 1, 2, 16>}]} {
    %c0 = arith.constant 0 : index
    %c0_0 = arith.constant 0 : index
    %c0_1 = arith.constant 0 : index
    %0 = vector.load %arg2[%c0, %c0_0, %c0_1] : memref<1x1x16xf32, #tpu.memory_space<vmem>>, vector<1x1x16xf32>
    %1 = vector.shape_cast %0 : vector<1x1x16xf32> to vector<1x16xf32>
    %2 = vector.shape_cast %1 : vector<1x16xf32> to vector<1x1x16xf32>
    %c0_2 = arith.constant 0 : index
    %c0_3 = arith.constant 0 : index
    %c0_4 = arith.constant 0 : index
    %3 = vector.load %arg3[%c0_2, %c0_3, %c0_4] : memref<1x1x16xf32, #tpu.memory_space<vmem>>, vector<1x1x16xf32>
    %4 = vector.shape_cast %3 : vector<1x1x16xf32> to vector<1x16xf32>
    %5 = vector.shape_cast %4 : vector<1x16xf32> to vector<1x1x16xf32>
    %c0_5 = arith.constant 0 : index
    %c0_6 = arith.constant 0 : index
    %c0_7 = arith.constant 0 : index
    %c0_8 = arith.constant 0 : index
    %6 = vector.load %arg4[%c0_5, %c0_6, %c0_7, %c0_8] : memref<1x1x16x16xf32, #tpu.memory_space<vmem>>, vector<1x1x16x16xf32>
    %7 = vector.shape_cast %6 : vector<1x1x16x16xf32> to vector<1x16x16xf32>
    %8 = vector.broadcast %2 : vector<1x1x16xf32> to vector<1x16x16xf32>
    %9 = arith.mulf %7, %8 : vector<1x16x16xf32>
    %10 = vector.broadcast %5 : vector<1x1x16xf32> to vector<1x16x16xf32>
    %11 = arith.addf %9, %10 : vector<1x16x16xf32>
    %12 = arith.negf %11 : vector<1x16x16xf32>
    %13 = math.exp %12 : vector<1x16x16xf32>
    %cst = arith.constant 1.000000e+00 : f32
    %14 = vector.broadcast %cst : f32 to vector<1x16x16xf32>
    %15 = arith.addf %14, %13 : vector<1x16x16xf32>
    %16 = arith.divf %14, %15 : vector<1x16x16xf32>
    %17 = arith.mulf %11, %16 : vector<1x16x16xf32>
    %c0_i32 = arith.constant 0 : i32
    %18 = arith.cmpi sgt, %arg1, %c0_i32 : i32
    %19 = arith.extui %18 : i1 to i32
    %20 = arith.sitofp %19 : i32 to f32
    %21 = vector.broadcast %20 : f32 to vector<1x16x16xf32>
    %22 = arith.mulf %17, %21 : vector<1x16x16xf32>
    %c0_9 = arith.constant 0 : index
    %c0_10 = arith.constant 0 : index
    %c0_11 = arith.constant 0 : index
    %c0_12 = arith.constant 0 : index
    %23 = vector.load %arg6[%c0_9, %c0_10, %c0_11, %c0_12] : memref<1x1x16x16xf32, #tpu.memory_space<vmem>>, vector<1x1x16x16xf32>
    %24 = vector.shape_cast %23 : vector<1x1x16x16xf32> to vector<1x16x16xf32>
    %25 = vector.broadcast %2 : vector<1x1x16xf32> to vector<1x16x16xf32>
    %26 = arith.mulf %24, %25 : vector<1x16x16xf32>
    %27 = vector.broadcast %5 : vector<1x1x16xf32> to vector<1x16x16xf32>
    %28 = arith.addf %26, %27 : vector<1x16x16xf32>
    %29 = arith.negf %28 : vector<1x16x16xf32>
    %30 = math.exp %29 : vector<1x16x16xf32>
    %cst_13 = arith.constant 1.000000e+00 : f32
    %31 = vector.broadcast %cst_13 : f32 to vector<1x16x16xf32>
    %32 = arith.addf %31, %30 : vector<1x16x16xf32>
    %33 = arith.divf %31, %32 : vector<1x16x16xf32>
    %34 = arith.mulf %28, %33 : vector<1x16x16xf32>
    %c1_i32 = arith.constant 1 : i32
    %35 = arith.cmpi slt, %arg1, %c1_i32 : i32
    %36 = arith.extui %35 : i1 to i32
    %37 = arith.sitofp %36 : i32 to f32
    %38 = vector.broadcast %37 : f32 to vector<1x16x16xf32>
    %39 = arith.mulf %34, %38 : vector<1x16x16xf32>
    %c0_14 = arith.constant 0 : index
    %c0_15 = arith.constant 0 : index
    %c0_16 = arith.constant 0 : index
    %c0_17 = arith.constant 0 : index
    %40 = vector.load %arg5[%c0_14, %c0_15, %c0_16, %c0_17] : memref<1x8x16x16xf32, #tpu.memory_space<vmem>>, vector<1x8x16x16xf32>
    %41 = vector.shape_cast %40 : vector<1x8x16x16xf32> to vector<8x16x16xf32>
    %42 = vector.broadcast %2 : vector<1x1x16xf32> to vector<8x16x16xf32>
    %43 = arith.mulf %41, %42 : vector<8x16x16xf32>
    %44 = vector.broadcast %5 : vector<1x1x16xf32> to vector<8x16x16xf32>
    %45 = arith.addf %43, %44 : vector<8x16x16xf32>
    %46 = arith.negf %45 : vector<8x16x16xf32>
    %47 = math.exp %46 : vector<8x16x16xf32>
    %cst_18 = arith.constant 1.000000e+00 : f32
    %48 = vector.broadcast %cst_18 : f32 to vector<8x16x16xf32>
    %49 = arith.addf %48, %47 : vector<8x16x16xf32>
    %50 = arith.divf %48, %49 : vector<8x16x16xf32>
    %51 = arith.mulf %45, %50 : vector<8x16x16xf32>
    %52 = tpu.concatenate %22, %51, %39 in 0 : vector<1x16x16xf32>, vector<8x16x16xf32>, vector<1x16x16xf32> -> vector<10x16x16xf32>
    %cst_19 = arith.constant 0.000000e+00 : f32
    %53 = vector.broadcast %cst_19 : f32 to vector<8x1x16xf32>
    %cst_20 = arith.constant 0.000000e+00 : f32
    %54 = vector.broadcast %cst_20 : f32 to vector<128x16xf32>
    %55 = vector.extract_strided_slice %52 {offsets = [0, 0, 0], sizes = [8, 16, 16], strides = [1, 1, 1]} : vector<10x16x16xf32> to vector<8x16x16xf32>
    %56 = vector.extract_strided_slice %55 {offsets = [0, 0, 0], sizes = [8, 15, 16], strides = [1, 1, 1]} : vector<8x16x16xf32> to vector<8x15x16xf32>
    %57 = tpu.concatenate %53, %56 in 1 : vector<8x1x16xf32>, vector<8x15x16xf32> -> vector<8x16x16xf32>
    %58 = vector.extract_strided_slice %55 {offsets = [0, 1, 0], sizes = [8, 15, 16], strides = [1, 1, 1]} : vector<8x16x16xf32> to vector<8x15x16xf32>
    %59 = tpu.concatenate %58, %53 in 1 : vector<8x15x16xf32>, vector<8x1x16xf32> -> vector<8x16x16xf32>
    %60 = tpu.concatenate %57, %55, %59 in 2 : vector<8x16x16xf32>, vector<8x16x16xf32>, vector<8x16x16xf32> -> vector<8x16x48xf32>
    %61 = vector.shape_cast %60 : vector<8x16x48xf32> to vector<128x48xf32>
    %62 = arith.truncf %61 : vector<128x48xf32> to vector<128x48xbf16>
    %c0_21 = arith.constant 0 : index
    %c0_22 = arith.constant 0 : index
    %c0_23 = arith.constant 0 : index
    %63 = vector.load %arg7[%c0_21, %c0_22, %c0_23] : memref<3x48x16xbf16, #tpu.memory_space<vmem>>, vector<1x48x16xbf16>
    %64 = vector.shape_cast %63 : vector<1x48x16xbf16> to vector<48x16xbf16>
    %cst_24 = arith.constant dense<0.000000e+00> : vector<128x16xf32>
    %65 = tpu.matmul %62, %64, %cst_24 {dimension_numbers = #tpu.dot_dimension_numbers<[1], [0], [0], [1], [0, 0, 1, 1], [], []>} : vector<128x48xbf16>, vector<48x16xbf16>, vector<128x16xf32> -> vector<128x16xf32>
    %66 = arith.addf %54, %65 : vector<128x16xf32>
    %67 = vector.extract_strided_slice %52 {offsets = [1, 0, 0], sizes = [8, 16, 16], strides = [1, 1, 1]} : vector<10x16x16xf32> to vector<8x16x16xf32>
    %68 = vector.extract_strided_slice %67 {offsets = [0, 0, 0], sizes = [8, 15, 16], strides = [1, 1, 1]} : vector<8x16x16xf32> to vector<8x15x16xf32>
    %69 = tpu.concatenate %53, %68 in 1 : vector<8x1x16xf32>, vector<8x15x16xf32> -> vector<8x16x16xf32>
    %70 = vector.extract_strided_slice %67 {offsets = [0, 1, 0], sizes = [8, 15, 16], strides = [1, 1, 1]} : vector<8x16x16xf32> to vector<8x15x16xf32>
    %71 = tpu.concatenate %70, %53 in 1 : vector<8x15x16xf32>, vector<8x1x16xf32> -> vector<8x16x16xf32>
    %72 = tpu.concatenate %69, %67, %71 in 2 : vector<8x16x16xf32>, vector<8x16x16xf32>, vector<8x16x16xf32> -> vector<8x16x48xf32>
    %73 = vector.shape_cast %72 : vector<8x16x48xf32> to vector<128x48xf32>
    %74 = arith.truncf %73 : vector<128x48xf32> to vector<128x48xbf16>
    %c1 = arith.constant 1 : index
    %c0_25 = arith.constant 0 : index
    %c0_26 = arith.constant 0 : index
    %75 = vector.load %arg7[%c1, %c0_25, %c0_26] : memref<3x48x16xbf16, #tpu.memory_space<vmem>>, vector<1x48x16xbf16>
    %76 = vector.shape_cast %75 : vector<1x48x16xbf16> to vector<48x16xbf16>
    %cst_27 = arith.constant dense<0.000000e+00> : vector<128x16xf32>
    %77 = tpu.matmul %74, %76, %cst_27 {dimension_numbers = #tpu.dot_dimension_numbers<[1], [0], [0], [1], [0, 0, 1, 1], [], []>} : vector<128x48xbf16>, vector<48x16xbf16>, vector<128x16xf32> -> vector<128x16xf32>
    %78 = arith.addf %66, %77 : vector<128x16xf32>
    %79 = vector.extract_strided_slice %52 {offsets = [2, 0, 0], sizes = [8, 16, 16], strides = [1, 1, 1]} : vector<10x16x16xf32> to vector<8x16x16xf32>
    %80 = vector.extract_strided_slice %79 {offsets = [0, 0, 0], sizes = [8, 15, 16], strides = [1, 1, 1]} : vector<8x16x16xf32> to vector<8x15x16xf32>
    %81 = tpu.concatenate %53, %80 in 1 : vector<8x1x16xf32>, vector<8x15x16xf32> -> vector<8x16x16xf32>
    %82 = vector.extract_strided_slice %79 {offsets = [0, 1, 0], sizes = [8, 15, 16], strides = [1, 1, 1]} : vector<8x16x16xf32> to vector<8x15x16xf32>
    %83 = tpu.concatenate %82, %53 in 1 : vector<8x15x16xf32>, vector<8x1x16xf32> -> vector<8x16x16xf32>
    %84 = tpu.concatenate %81, %79, %83 in 2 : vector<8x16x16xf32>, vector<8x16x16xf32>, vector<8x16x16xf32> -> vector<8x16x48xf32>
    %85 = vector.shape_cast %84 : vector<8x16x48xf32> to vector<128x48xf32>
    %86 = arith.truncf %85 : vector<128x48xf32> to vector<128x48xbf16>
    %c2 = arith.constant 2 : index
    %c0_28 = arith.constant 0 : index
    %c0_29 = arith.constant 0 : index
    %87 = vector.load %arg7[%c2, %c0_28, %c0_29] : memref<3x48x16xbf16, #tpu.memory_space<vmem>>, vector<1x48x16xbf16>
    %88 = vector.shape_cast %87 : vector<1x48x16xbf16> to vector<48x16xbf16>
    %cst_30 = arith.constant dense<0.000000e+00> : vector<128x16xf32>
    %89 = tpu.matmul %86, %88, %cst_30 {dimension_numbers = #tpu.dot_dimension_numbers<[1], [0], [0], [1], [0, 0, 1, 1], [], []>} : vector<128x48xbf16>, vector<48x16xbf16>, vector<128x16xf32> -> vector<128x16xf32>
    %90 = arith.addf %78, %89 : vector<128x16xf32>
    %c0_31 = arith.constant 0 : index
    %c0_32 = arith.constant 0 : index
    %91 = vector.load %arg8[%c0_31, %c0_32] : memref<1x16xf32, #tpu.memory_space<vmem>>, vector<1x16xf32>
    %92 = vector.shape_cast %91 : vector<1x16xf32> to vector<16xf32>
    %93 = vector.shape_cast %92 : vector<16xf32> to vector<1x16xf32>
    %94 = vector.broadcast %93 : vector<1x16xf32> to vector<128x16xf32>
    %95 = arith.addf %90, %94 : vector<128x16xf32>
    %c0_33 = arith.constant 0 : index
    %c0_34 = arith.constant 0 : index
    %c0_35 = arith.constant 0 : index
    %c0_36 = arith.constant 0 : index
    %96 = vector.load %arg9[%c0_33, %c0_34, %c0_35, %c0_36] : memref<1x8x16x16xf32, #tpu.memory_space<vmem>>, vector<1x8x16x16xf32>
    %97 = vector.shape_cast %96 : vector<1x8x16x16xf32> to vector<8x16x16xf32>
    %98 = vector.shape_cast %97 : vector<8x16x16xf32> to vector<128x16xf32>
    %99 = arith.addf %95, %98 : vector<128x16xf32>
    %cst_37 = arith.constant dense<0.000000e+00> : vector<16xf32>
    %100 = vector.multi_reduction <add>, %99, %cst_37 [0] : vector<128x16xf32> to vector<16xf32>
    %101 = vector.shape_cast %100 : vector<16xf32> to vector<1x16xf32>
    %102 = arith.mulf %99, %99 : vector<128x16xf32>
    %cst_38 = arith.constant dense<0.000000e+00> : vector<16xf32>
    %103 = vector.multi_reduction <add>, %102, %cst_38 [0] : vector<128x16xf32> to vector<16xf32>
    %104 = vector.shape_cast %103 : vector<16xf32> to vector<1x16xf32>
    %105 = tpu.concatenate %101, %104 in 0 : vector<1x16xf32>, vector<1x16xf32> -> vector<2x16xf32>
    %c0_39 = arith.constant 0 : index
    %c0_40 = arith.constant 0 : index
    %c0_41 = arith.constant 0 : index
    %c0_42 = arith.constant 0 : index
    %106 = vector.load %arg11[%c0_39, %c0_40, %c0_41, %c0_42] : memref<1x1x2x16xf32, #tpu.memory_space<vmem>>, vector<1x1x2x16xf32>
    %107 = vector.shape_cast %106 : vector<1x1x2x16xf32> to vector<2x16xf32>
    %108 = vector.shape_cast %105 : vector<2x16xf32> to vector<1x1x2x16xf32>
    tpu.vector_store %arg11[%c0_39, %c0_40, %c0_41, %c0_42], %108 {strides = array<i32>} : memref<1x1x2x16xf32, #tpu.memory_space<vmem>>, vector<1x1x2x16xf32>,
    %109 = vector.shape_cast %99 : vector<128x16xf32> to vector<8x16x16xf32>
    %c0_43 = arith.constant 0 : index
    %c0_44 = arith.constant 0 : index
    %c0_45 = arith.constant 0 : index
    %c0_46 = arith.constant 0 : index
    %110 = vector.load %arg10[%c0_43, %c0_44, %c0_45, %c0_46] : memref<1x8x16x16xf32, #tpu.memory_space<vmem>>, vector<1x8x16x16xf32>
    %111 = vector.shape_cast %110 : vector<1x8x16x16xf32> to vector<8x16x16xf32>
    %112 = vector.shape_cast %109 : vector<8x16x16xf32> to vector<1x8x16x16xf32>
    tpu.vector_store %arg10[%c0_43, %c0_44, %c0_45, %c0_46], %112 {strides = array<i32>} : memref<1x8x16x16xf32, #tpu.memory_space<vmem>>, vector<1x8x16x16xf32>,
    return
  }
  func.func @transform_0(%arg0: i32, %arg1: i32) -> (i32, i32, i32) {
    %c0_i32 = arith.constant 0 : i32
    %c0_i32_0 = arith.constant 0 : i32
    %c0_i32_1 = arith.constant 0 : i32
    return %arg0, %c0_i32, %c0_i32_0 : i32, i32, i32
  }
  func.func @transform_1(%arg0: i32, %arg1: i32) -> (i32, i32, i32) {
    %c0_i32 = arith.constant 0 : i32
    %c0_i32_0 = arith.constant 0 : i32
    %c0_i32_1 = arith.constant 0 : i32
    return %arg0, %c0_i32, %c0_i32_0 : i32, i32, i32
  }
  func.func @transform_2(%arg0: i32, %arg1: i32) -> (i32, i32, i32, i32) {
    %c8_i32 = arith.constant 8 : i32
    %0 = arith.muli %arg1, %c8_i32 : i32
    %c1_i32 = arith.constant 1 : i32
    %1 = arith.subi %0, %c1_i32 : i32
    %c0_i32 = arith.constant 0 : i32
    %2 = arith.maxsi %1, %c0_i32 : i32
    %c0_i32_0 = arith.constant 0 : i32
    %c0_i32_1 = arith.constant 0 : i32
    %c0_i32_2 = arith.constant 0 : i32
    return %arg0, %2, %c0_i32_0, %c0_i32_1 : i32, i32, i32, i32
  }
  func.func @transform_3(%arg0: i32, %arg1: i32) -> (i32, i32, i32, i32) {
    %c0_i32 = arith.constant 0 : i32
    %c0_i32_0 = arith.constant 0 : i32
    %c0_i32_1 = arith.constant 0 : i32
    return %arg0, %arg1, %c0_i32, %c0_i32_0 : i32, i32, i32, i32
  }
  func.func @transform_4(%arg0: i32, %arg1: i32) -> (i32, i32, i32, i32) {
    %c1_i32 = arith.constant 1 : i32
    %0 = arith.addi %arg1, %c1_i32 : i32
    %c8_i32 = arith.constant 8 : i32
    %1 = arith.muli %0, %c8_i32 : i32
    %c15_i32 = arith.constant 15 : i32
    %2 = arith.minsi %1, %c15_i32 : i32
    %c0_i32 = arith.constant 0 : i32
    %c0_i32_0 = arith.constant 0 : i32
    %c0_i32_1 = arith.constant 0 : i32
    return %arg0, %2, %c0_i32, %c0_i32_0 : i32, i32, i32, i32
  }
  func.func @transform_5(%arg0: i32, %arg1: i32) -> (i32, i32, i32) {
    %c0_i32 = arith.constant 0 : i32
    %c0_i32_0 = arith.constant 0 : i32
    %c0_i32_1 = arith.constant 0 : i32
    %c0_i32_2 = arith.constant 0 : i32
    return %c0_i32, %c0_i32_0, %c0_i32_1 : i32, i32, i32
  }
  func.func @transform_6(%arg0: i32, %arg1: i32) -> (i32, i32) {
    %c0_i32 = arith.constant 0 : i32
    %c0_i32_0 = arith.constant 0 : i32
    %c0_i32_1 = arith.constant 0 : i32
    return %c0_i32, %c0_i32_0 : i32, i32
  }
  func.func @transform_7(%arg0: i32, %arg1: i32) -> (i32, i32, i32, i32) {
    %c0_i32 = arith.constant 0 : i32
    %c0_i32_0 = arith.constant 0 : i32
    %c0_i32_1 = arith.constant 0 : i32
    return %arg0, %arg1, %c0_i32, %c0_i32_0 : i32, i32, i32, i32
  }
  func.func @transform_8(%arg0: i32, %arg1: i32) -> (i32, i32, i32, i32) {
    %c0_i32 = arith.constant 0 : i32
    %c0_i32_0 = arith.constant 0 : i32
    %c0_i32_1 = arith.constant 0 : i32
    return %arg0, %arg1, %c0_i32, %c0_i32_0 : i32, i32, i32, i32
  }
  func.func @transform_9(%arg0: i32, %arg1: i32) -> (i32, i32, i32, i32) {
    %c0_i32 = arith.constant 0 : i32
    %c0_i32_0 = arith.constant 0 : i32
    %c0_i32_1 = arith.constant 0 : i32
    return %arg0, %arg1, %c0_i32, %c0_i32_0 : i32, i32, i32, i32
  }
}

module attributes {stable_mosaic.version = 11 : i64} {
  func.func @_gn_act_conv_proj_add_kernel(%arg0: i32, %arg1: i32, %arg2: memref<1x1x16xf32, #tpu.memory_space<vmem>>, %arg3: memref<1x1x16xf32, #tpu.memory_space<vmem>>, %arg4: memref<1x1x16x16xf32, #tpu.memory_space<vmem>>, %arg5: memref<1x8x16x16xf32, #tpu.memory_space<vmem>>, %arg6: memref<1x1x16x16xf32, #tpu.memory_space<vmem>>, %arg7: memref<3x48x16xbf16, #tpu.memory_space<vmem>>, %arg8: memref<1x16xf32, #tpu.memory_space<vmem>>, %arg9: memref<1x8x16x8xf32, #tpu.memory_space<vmem>>, %arg10: memref<8x16xbf16, #tpu.memory_space<vmem>>, %arg11: memref<1x16xf32, #tpu.memory_space<vmem>>, %arg12: memref<1x8x16x16xf32, #tpu.memory_space<vmem>>, %arg13: memref<1x1x2x16xf32, #tpu.memory_space<vmem>>) attributes {dimension_semantics = [#tpu.dimension_semantics<parallel>, #tpu.dimension_semantics<parallel>], iteration_bounds = array<i64: 2, 2>, scalar_prefetch = 0 : i64, scratch_operands = 0 : i64, tpu.core_type = #tpu.core_type<tc>, window_params = [{transform_indices = @transform_0, window_bounds = array<i64: 1, 1, 16>}, {transform_indices = @transform_1, window_bounds = array<i64: 1, 1, 16>}, {transform_indices = @transform_2, window_bounds = array<i64: 1, 1, 16, 16>}, {transform_indices = @transform_3, window_bounds = array<i64: 1, 8, 16, 16>}, {transform_indices = @transform_4, window_bounds = array<i64: 1, 1, 16, 16>}, {pipeline_mode = #tpu.pipeline_mode<synchronous>, transform_indices = @transform_5, window_bounds = array<i64: 3, 48, 16>}, {pipeline_mode = #tpu.pipeline_mode<synchronous>, transform_indices = @transform_6, window_bounds = array<i64: 1, 16>}, {transform_indices = @transform_7, window_bounds = array<i64: 1, 8, 16, 8>}, {pipeline_mode = #tpu.pipeline_mode<synchronous>, transform_indices = @transform_8, window_bounds = array<i64: 8, 16>}, {pipeline_mode = #tpu.pipeline_mode<synchronous>, transform_indices = @transform_9, window_bounds = array<i64: 1, 16>}, {transform_indices = @transform_10, window_bounds = array<i64: 1, 8, 16, 16>}, {transform_indices = @transform_11, window_bounds = array<i64: 1, 1, 2, 16>}]} {
    %c0 = arith.constant 0 : index
    %c0_0 = arith.constant 0 : index
    %c0_1 = arith.constant 0 : index
    %0 = vector.load %arg2[%c0, %c0_0, %c0_1] : memref<1x1x16xf32, #tpu.memory_space<vmem>>, vector<1x1x16xf32>
    %1 = vector.shape_cast %0 : vector<1x1x16xf32> to vector<1x16xf32>
    %2 = vector.shape_cast %1 : vector<1x16xf32> to vector<1x1x16xf32>
    %c0_2 = arith.constant 0 : index
    %c0_3 = arith.constant 0 : index
    %c0_4 = arith.constant 0 : index
    %3 = vector.load %arg3[%c0_2, %c0_3, %c0_4] : memref<1x1x16xf32, #tpu.memory_space<vmem>>, vector<1x1x16xf32>
    %4 = vector.shape_cast %3 : vector<1x1x16xf32> to vector<1x16xf32>
    %5 = vector.shape_cast %4 : vector<1x16xf32> to vector<1x1x16xf32>
    %c0_5 = arith.constant 0 : index
    %c0_6 = arith.constant 0 : index
    %c0_7 = arith.constant 0 : index
    %c0_8 = arith.constant 0 : index
    %6 = vector.load %arg4[%c0_5, %c0_6, %c0_7, %c0_8] : memref<1x1x16x16xf32, #tpu.memory_space<vmem>>, vector<1x1x16x16xf32>
    %7 = vector.shape_cast %6 : vector<1x1x16x16xf32> to vector<1x16x16xf32>
    %8 = vector.broadcast %2 : vector<1x1x16xf32> to vector<1x16x16xf32>
    %9 = arith.mulf %7, %8 : vector<1x16x16xf32>
    %10 = vector.broadcast %5 : vector<1x1x16xf32> to vector<1x16x16xf32>
    %11 = arith.addf %9, %10 : vector<1x16x16xf32>
    %12 = arith.negf %11 : vector<1x16x16xf32>
    %13 = math.exp %12 : vector<1x16x16xf32>
    %cst = arith.constant 1.000000e+00 : f32
    %14 = vector.broadcast %cst : f32 to vector<1x16x16xf32>
    %15 = arith.addf %14, %13 : vector<1x16x16xf32>
    %16 = arith.divf %14, %15 : vector<1x16x16xf32>
    %17 = arith.mulf %11, %16 : vector<1x16x16xf32>
    %c0_i32 = arith.constant 0 : i32
    %18 = arith.cmpi sgt, %arg1, %c0_i32 : i32
    %19 = arith.extui %18 : i1 to i32
    %20 = arith.sitofp %19 : i32 to f32
    %21 = vector.broadcast %20 : f32 to vector<1x16x16xf32>
    %22 = arith.mulf %17, %21 : vector<1x16x16xf32>
    %c0_9 = arith.constant 0 : index
    %c0_10 = arith.constant 0 : index
    %c0_11 = arith.constant 0 : index
    %c0_12 = arith.constant 0 : index
    %23 = vector.load %arg6[%c0_9, %c0_10, %c0_11, %c0_12] : memref<1x1x16x16xf32, #tpu.memory_space<vmem>>, vector<1x1x16x16xf32>
    %24 = vector.shape_cast %23 : vector<1x1x16x16xf32> to vector<1x16x16xf32>
    %25 = vector.broadcast %2 : vector<1x1x16xf32> to vector<1x16x16xf32>
    %26 = arith.mulf %24, %25 : vector<1x16x16xf32>
    %27 = vector.broadcast %5 : vector<1x1x16xf32> to vector<1x16x16xf32>
    %28 = arith.addf %26, %27 : vector<1x16x16xf32>
    %29 = arith.negf %28 : vector<1x16x16xf32>
    %30 = math.exp %29 : vector<1x16x16xf32>
    %cst_13 = arith.constant 1.000000e+00 : f32
    %31 = vector.broadcast %cst_13 : f32 to vector<1x16x16xf32>
    %32 = arith.addf %31, %30 : vector<1x16x16xf32>
    %33 = arith.divf %31, %32 : vector<1x16x16xf32>
    %34 = arith.mulf %28, %33 : vector<1x16x16xf32>
    %c1_i32 = arith.constant 1 : i32
    %35 = arith.cmpi slt, %arg1, %c1_i32 : i32
    %36 = arith.extui %35 : i1 to i32
    %37 = arith.sitofp %36 : i32 to f32
    %38 = vector.broadcast %37 : f32 to vector<1x16x16xf32>
    %39 = arith.mulf %34, %38 : vector<1x16x16xf32>
    %c0_14 = arith.constant 0 : index
    %c0_15 = arith.constant 0 : index
    %c0_16 = arith.constant 0 : index
    %c0_17 = arith.constant 0 : index
    %40 = vector.load %arg5[%c0_14, %c0_15, %c0_16, %c0_17] : memref<1x8x16x16xf32, #tpu.memory_space<vmem>>, vector<1x8x16x16xf32>
    %41 = vector.shape_cast %40 : vector<1x8x16x16xf32> to vector<8x16x16xf32>
    %42 = vector.broadcast %2 : vector<1x1x16xf32> to vector<8x16x16xf32>
    %43 = arith.mulf %41, %42 : vector<8x16x16xf32>
    %44 = vector.broadcast %5 : vector<1x1x16xf32> to vector<8x16x16xf32>
    %45 = arith.addf %43, %44 : vector<8x16x16xf32>
    %46 = arith.negf %45 : vector<8x16x16xf32>
    %47 = math.exp %46 : vector<8x16x16xf32>
    %cst_18 = arith.constant 1.000000e+00 : f32
    %48 = vector.broadcast %cst_18 : f32 to vector<8x16x16xf32>
    %49 = arith.addf %48, %47 : vector<8x16x16xf32>
    %50 = arith.divf %48, %49 : vector<8x16x16xf32>
    %51 = arith.mulf %45, %50 : vector<8x16x16xf32>
    %52 = tpu.concatenate %22, %51, %39 in 0 : vector<1x16x16xf32>, vector<8x16x16xf32>, vector<1x16x16xf32> -> vector<10x16x16xf32>
    %cst_19 = arith.constant 0.000000e+00 : f32
    %53 = vector.broadcast %cst_19 : f32 to vector<8x1x16xf32>
    %cst_20 = arith.constant 0.000000e+00 : f32
    %54 = vector.broadcast %cst_20 : f32 to vector<128x16xf32>
    %55 = vector.extract_strided_slice %52 {offsets = [0, 0, 0], sizes = [8, 16, 16], strides = [1, 1, 1]} : vector<10x16x16xf32> to vector<8x16x16xf32>
    %56 = vector.extract_strided_slice %55 {offsets = [0, 0, 0], sizes = [8, 15, 16], strides = [1, 1, 1]} : vector<8x16x16xf32> to vector<8x15x16xf32>
    %57 = tpu.concatenate %53, %56 in 1 : vector<8x1x16xf32>, vector<8x15x16xf32> -> vector<8x16x16xf32>
    %58 = vector.extract_strided_slice %55 {offsets = [0, 1, 0], sizes = [8, 15, 16], strides = [1, 1, 1]} : vector<8x16x16xf32> to vector<8x15x16xf32>
    %59 = tpu.concatenate %58, %53 in 1 : vector<8x15x16xf32>, vector<8x1x16xf32> -> vector<8x16x16xf32>
    %60 = tpu.concatenate %57, %55, %59 in 2 : vector<8x16x16xf32>, vector<8x16x16xf32>, vector<8x16x16xf32> -> vector<8x16x48xf32>
    %61 = vector.shape_cast %60 : vector<8x16x48xf32> to vector<128x48xf32>
    %62 = arith.truncf %61 : vector<128x48xf32> to vector<128x48xbf16>
    %c0_21 = arith.constant 0 : index
    %c0_22 = arith.constant 0 : index
    %c0_23 = arith.constant 0 : index
    %63 = vector.load %arg7[%c0_21, %c0_22, %c0_23] : memref<3x48x16xbf16, #tpu.memory_space<vmem>>, vector<1x48x16xbf16>
    %64 = vector.shape_cast %63 : vector<1x48x16xbf16> to vector<48x16xbf16>
    %cst_24 = arith.constant dense<0.000000e+00> : vector<128x16xf32>
    %65 = tpu.matmul %62, %64, %cst_24 {dimension_numbers = #tpu.dot_dimension_numbers<[1], [0], [0], [1], [0, 0, 1, 1], [], []>} : vector<128x48xbf16>, vector<48x16xbf16>, vector<128x16xf32> -> vector<128x16xf32>
    %66 = arith.addf %54, %65 : vector<128x16xf32>
    %67 = vector.extract_strided_slice %52 {offsets = [1, 0, 0], sizes = [8, 16, 16], strides = [1, 1, 1]} : vector<10x16x16xf32> to vector<8x16x16xf32>
    %68 = vector.extract_strided_slice %67 {offsets = [0, 0, 0], sizes = [8, 15, 16], strides = [1, 1, 1]} : vector<8x16x16xf32> to vector<8x15x16xf32>
    %69 = tpu.concatenate %53, %68 in 1 : vector<8x1x16xf32>, vector<8x15x16xf32> -> vector<8x16x16xf32>
    %70 = vector.extract_strided_slice %67 {offsets = [0, 1, 0], sizes = [8, 15, 16], strides = [1, 1, 1]} : vector<8x16x16xf32> to vector<8x15x16xf32>
    %71 = tpu.concatenate %70, %53 in 1 : vector<8x15x16xf32>, vector<8x1x16xf32> -> vector<8x16x16xf32>
    %72 = tpu.concatenate %69, %67, %71 in 2 : vector<8x16x16xf32>, vector<8x16x16xf32>, vector<8x16x16xf32> -> vector<8x16x48xf32>
    %73 = vector.shape_cast %72 : vector<8x16x48xf32> to vector<128x48xf32>
    %74 = arith.truncf %73 : vector<128x48xf32> to vector<128x48xbf16>
    %c1 = arith.constant 1 : index
    %c0_25 = arith.constant 0 : index
    %c0_26 = arith.constant 0 : index
    %75 = vector.load %arg7[%c1, %c0_25, %c0_26] : memref<3x48x16xbf16, #tpu.memory_space<vmem>>, vector<1x48x16xbf16>
    %76 = vector.shape_cast %75 : vector<1x48x16xbf16> to vector<48x16xbf16>
    %cst_27 = arith.constant dense<0.000000e+00> : vector<128x16xf32>
    %77 = tpu.matmul %74, %76, %cst_27 {dimension_numbers = #tpu.dot_dimension_numbers<[1], [0], [0], [1], [0, 0, 1, 1], [], []>} : vector<128x48xbf16>, vector<48x16xbf16>, vector<128x16xf32> -> vector<128x16xf32>
    %78 = arith.addf %66, %77 : vector<128x16xf32>
    %79 = vector.extract_strided_slice %52 {offsets = [2, 0, 0], sizes = [8, 16, 16], strides = [1, 1, 1]} : vector<10x16x16xf32> to vector<8x16x16xf32>
    %80 = vector.extract_strided_slice %79 {offsets = [0, 0, 0], sizes = [8, 15, 16], strides = [1, 1, 1]} : vector<8x16x16xf32> to vector<8x15x16xf32>
    %81 = tpu.concatenate %53, %80 in 1 : vector<8x1x16xf32>, vector<8x15x16xf32> -> vector<8x16x16xf32>
    %82 = vector.extract_strided_slice %79 {offsets = [0, 1, 0], sizes = [8, 15, 16], strides = [1, 1, 1]} : vector<8x16x16xf32> to vector<8x15x16xf32>
    %83 = tpu.concatenate %82, %53 in 1 : vector<8x15x16xf32>, vector<8x1x16xf32> -> vector<8x16x16xf32>
    %84 = tpu.concatenate %81, %79, %83 in 2 : vector<8x16x16xf32>, vector<8x16x16xf32>, vector<8x16x16xf32> -> vector<8x16x48xf32>
    %85 = vector.shape_cast %84 : vector<8x16x48xf32> to vector<128x48xf32>
    %86 = arith.truncf %85 : vector<128x48xf32> to vector<128x48xbf16>
    %c2 = arith.constant 2 : index
    %c0_28 = arith.constant 0 : index
    %c0_29 = arith.constant 0 : index
    %87 = vector.load %arg7[%c2, %c0_28, %c0_29] : memref<3x48x16xbf16, #tpu.memory_space<vmem>>, vector<1x48x16xbf16>
    %88 = vector.shape_cast %87 : vector<1x48x16xbf16> to vector<48x16xbf16>
    %cst_30 = arith.constant dense<0.000000e+00> : vector<128x16xf32>
    %89 = tpu.matmul %86, %88, %cst_30 {dimension_numbers = #tpu.dot_dimension_numbers<[1], [0], [0], [1], [0, 0, 1, 1], [], []>} : vector<128x48xbf16>, vector<48x16xbf16>, vector<128x16xf32> -> vector<128x16xf32>
    %90 = arith.addf %78, %89 : vector<128x16xf32>
    %c0_31 = arith.constant 0 : index
    %c0_32 = arith.constant 0 : index
    %91 = vector.load %arg8[%c0_31, %c0_32] : memref<1x16xf32, #tpu.memory_space<vmem>>, vector<1x16xf32>
    %92 = vector.shape_cast %91 : vector<1x16xf32> to vector<16xf32>
    %93 = vector.shape_cast %92 : vector<16xf32> to vector<1x16xf32>
    %94 = vector.broadcast %93 : vector<1x16xf32> to vector<128x16xf32>
    %95 = arith.addf %90, %94 : vector<128x16xf32>
    %c0_33 = arith.constant 0 : index
    %c0_34 = arith.constant 0 : index
    %c0_35 = arith.constant 0 : index
    %c0_36 = arith.constant 0 : index
    %96 = vector.load %arg9[%c0_33, %c0_34, %c0_35, %c0_36] : memref<1x8x16x8xf32, #tpu.memory_space<vmem>>, vector<1x8x16x8xf32>
    %97 = vector.shape_cast %96 : vector<1x8x16x8xf32> to vector<8x16x8xf32>
    %98 = vector.shape_cast %97 : vector<8x16x8xf32> to vector<128x8xf32>
    %99 = arith.truncf %98 : vector<128x8xf32> to vector<128x8xbf16>
    %c0_37 = arith.constant 0 : index
    %c0_38 = arith.constant 0 : index
    %100 = vector.load %arg10[%c0_37, %c0_38] : memref<8x16xbf16, #tpu.memory_space<vmem>>, vector<8x16xbf16>
    %cst_39 = arith.constant dense<0.000000e+00> : vector<128x16xf32>
    %101 = tpu.matmul %99, %100, %cst_39 {dimension_numbers = #tpu.dot_dimension_numbers<[1], [0], [0], [1], [0, 0, 1, 1], [], []>} : vector<128x8xbf16>, vector<8x16xbf16>, vector<128x16xf32> -> vector<128x16xf32>
    %102 = arith.addf %95, %101 : vector<128x16xf32>
    %c0_40 = arith.constant 0 : index
    %c0_41 = arith.constant 0 : index
    %103 = vector.load %arg11[%c0_40, %c0_41] : memref<1x16xf32, #tpu.memory_space<vmem>>, vector<1x16xf32>
    %104 = vector.shape_cast %103 : vector<1x16xf32> to vector<16xf32>
    %105 = vector.shape_cast %104 : vector<16xf32> to vector<1x16xf32>
    %106 = vector.broadcast %105 : vector<1x16xf32> to vector<128x16xf32>
    %107 = arith.addf %102, %106 : vector<128x16xf32>
    %cst_42 = arith.constant dense<0.000000e+00> : vector<16xf32>
    %108 = vector.multi_reduction <add>, %107, %cst_42 [0] : vector<128x16xf32> to vector<16xf32>
    %109 = vector.shape_cast %108 : vector<16xf32> to vector<1x16xf32>
    %110 = arith.mulf %107, %107 : vector<128x16xf32>
    %cst_43 = arith.constant dense<0.000000e+00> : vector<16xf32>
    %111 = vector.multi_reduction <add>, %110, %cst_43 [0] : vector<128x16xf32> to vector<16xf32>
    %112 = vector.shape_cast %111 : vector<16xf32> to vector<1x16xf32>
    %113 = tpu.concatenate %109, %112 in 0 : vector<1x16xf32>, vector<1x16xf32> -> vector<2x16xf32>
    %c0_44 = arith.constant 0 : index
    %c0_45 = arith.constant 0 : index
    %c0_46 = arith.constant 0 : index
    %c0_47 = arith.constant 0 : index
    %114 = vector.load %arg13[%c0_44, %c0_45, %c0_46, %c0_47] : memref<1x1x2x16xf32, #tpu.memory_space<vmem>>, vector<1x1x2x16xf32>
    %115 = vector.shape_cast %114 : vector<1x1x2x16xf32> to vector<2x16xf32>
    %116 = vector.shape_cast %113 : vector<2x16xf32> to vector<1x1x2x16xf32>
    tpu.vector_store %arg13[%c0_44, %c0_45, %c0_46, %c0_47], %116 {strides = array<i32>} : memref<1x1x2x16xf32, #tpu.memory_space<vmem>>, vector<1x1x2x16xf32>,
    %117 = vector.shape_cast %107 : vector<128x16xf32> to vector<8x16x16xf32>
    %c0_48 = arith.constant 0 : index
    %c0_49 = arith.constant 0 : index
    %c0_50 = arith.constant 0 : index
    %c0_51 = arith.constant 0 : index
    %118 = vector.load %arg12[%c0_48, %c0_49, %c0_50, %c0_51] : memref<1x8x16x16xf32, #tpu.memory_space<vmem>>, vector<1x8x16x16xf32>
    %119 = vector.shape_cast %118 : vector<1x8x16x16xf32> to vector<8x16x16xf32>
    %120 = vector.shape_cast %117 : vector<8x16x16xf32> to vector<1x8x16x16xf32>
    tpu.vector_store %arg12[%c0_48, %c0_49, %c0_50, %c0_51], %120 {strides = array<i32>} : memref<1x8x16x16xf32, #tpu.memory_space<vmem>>, vector<1x8x16x16xf32>,
    return
  }
  func.func @transform_0(%arg0: i32, %arg1: i32) -> (i32, i32, i32) {
    %c0_i32 = arith.constant 0 : i32
    %c0_i32_0 = arith.constant 0 : i32
    %c0_i32_1 = arith.constant 0 : i32
    return %arg0, %c0_i32, %c0_i32_0 : i32, i32, i32
  }
  func.func @transform_1(%arg0: i32, %arg1: i32) -> (i32, i32, i32) {
    %c0_i32 = arith.constant 0 : i32
    %c0_i32_0 = arith.constant 0 : i32
    %c0_i32_1 = arith.constant 0 : i32
    return %arg0, %c0_i32, %c0_i32_0 : i32, i32, i32
  }
  func.func @transform_2(%arg0: i32, %arg1: i32) -> (i32, i32, i32, i32) {
    %c8_i32 = arith.constant 8 : i32
    %0 = arith.muli %arg1, %c8_i32 : i32
    %c1_i32 = arith.constant 1 : i32
    %1 = arith.subi %0, %c1_i32 : i32
    %c0_i32 = arith.constant 0 : i32
    %2 = arith.maxsi %1, %c0_i32 : i32
    %c0_i32_0 = arith.constant 0 : i32
    %c0_i32_1 = arith.constant 0 : i32
    %c0_i32_2 = arith.constant 0 : i32
    return %arg0, %2, %c0_i32_0, %c0_i32_1 : i32, i32, i32, i32
  }
  func.func @transform_3(%arg0: i32, %arg1: i32) -> (i32, i32, i32, i32) {
    %c0_i32 = arith.constant 0 : i32
    %c0_i32_0 = arith.constant 0 : i32
    %c0_i32_1 = arith.constant 0 : i32
    return %arg0, %arg1, %c0_i32, %c0_i32_0 : i32, i32, i32, i32
  }
  func.func @transform_4(%arg0: i32, %arg1: i32) -> (i32, i32, i32, i32) {
    %c1_i32 = arith.constant 1 : i32
    %0 = arith.addi %arg1, %c1_i32 : i32
    %c8_i32 = arith.constant 8 : i32
    %1 = arith.muli %0, %c8_i32 : i32
    %c15_i32 = arith.constant 15 : i32
    %2 = arith.minsi %1, %c15_i32 : i32
    %c0_i32 = arith.constant 0 : i32
    %c0_i32_0 = arith.constant 0 : i32
    %c0_i32_1 = arith.constant 0 : i32
    return %arg0, %2, %c0_i32, %c0_i32_0 : i32, i32, i32, i32
  }
  func.func @transform_5(%arg0: i32, %arg1: i32) -> (i32, i32, i32) {
    %c0_i32 = arith.constant 0 : i32
    %c0_i32_0 = arith.constant 0 : i32
    %c0_i32_1 = arith.constant 0 : i32
    %c0_i32_2 = arith.constant 0 : i32
    return %c0_i32, %c0_i32_0, %c0_i32_1 : i32, i32, i32
  }
  func.func @transform_6(%arg0: i32, %arg1: i32) -> (i32, i32) {
    %c0_i32 = arith.constant 0 : i32
    %c0_i32_0 = arith.constant 0 : i32
    %c0_i32_1 = arith.constant 0 : i32
    return %c0_i32, %c0_i32_0 : i32, i32
  }
  func.func @transform_7(%arg0: i32, %arg1: i32) -> (i32, i32, i32, i32) {
    %c0_i32 = arith.constant 0 : i32
    %c0_i32_0 = arith.constant 0 : i32
    %c0_i32_1 = arith.constant 0 : i32
    return %arg0, %arg1, %c0_i32, %c0_i32_0 : i32, i32, i32, i32
  }
  func.func @transform_8(%arg0: i32, %arg1: i32) -> (i32, i32) {
    %c0_i32 = arith.constant 0 : i32
    %c0_i32_0 = arith.constant 0 : i32
    %c0_i32_1 = arith.constant 0 : i32
    return %c0_i32, %c0_i32_0 : i32, i32
  }
  func.func @transform_9(%arg0: i32, %arg1: i32) -> (i32, i32) {
    %c0_i32 = arith.constant 0 : i32
    %c0_i32_0 = arith.constant 0 : i32
    %c0_i32_1 = arith.constant 0 : i32
    return %c0_i32, %c0_i32_0 : i32, i32
  }
  func.func @transform_10(%arg0: i32, %arg1: i32) -> (i32, i32, i32, i32) {
    %c0_i32 = arith.constant 0 : i32
    %c0_i32_0 = arith.constant 0 : i32
    %c0_i32_1 = arith.constant 0 : i32
    return %arg0, %arg1, %c0_i32, %c0_i32_0 : i32, i32, i32, i32
  }
  func.func @transform_11(%arg0: i32, %arg1: i32) -> (i32, i32, i32, i32) {
    %c0_i32 = arith.constant 0 : i32
    %c0_i32_0 = arith.constant 0 : i32
    %c0_i32_1 = arith.constant 0 : i32
    return %arg0, %arg1, %c0_i32, %c0_i32_0 : i32, i32, i32, i32
  }
}

module attributes {stable_mosaic.version = 11 : i64} {
  func.func @_gn_act_conv_kernel(%arg0: i32, %arg1: i32, %arg2: memref<1x1x16xf32, #tpu.memory_space<vmem>>, %arg3: memref<1x1x16xf32, #tpu.memory_space<vmem>>, %arg4: memref<1x1x16x16xf32, #tpu.memory_space<vmem>>, %arg5: memref<1x8x16x16xf32, #tpu.memory_space<vmem>>, %arg6: memref<1x1x16x16xf32, #tpu.memory_space<vmem>>, %arg7: memref<3x48x16xbf16, #tpu.memory_space<vmem>>, %arg8: memref<1x16xf32, #tpu.memory_space<vmem>>, %arg9: memref<1x8x16x16xf32, #tpu.memory_space<vmem>>, %arg10: memref<1x1x2x16xf32, #tpu.memory_space<vmem>>) attributes {dimension_semantics = [#tpu.dimension_semantics<parallel>, #tpu.dimension_semantics<parallel>], iteration_bounds = array<i64: 2, 2>, scalar_prefetch = 0 : i64, scratch_operands = 0 : i64, tpu.core_type = #tpu.core_type<tc>, window_params = [{transform_indices = @transform_0, window_bounds = array<i64: 1, 1, 16>}, {transform_indices = @transform_1, window_bounds = array<i64: 1, 1, 16>}, {transform_indices = @transform_2, window_bounds = array<i64: 1, 1, 16, 16>}, {transform_indices = @transform_3, window_bounds = array<i64: 1, 8, 16, 16>}, {transform_indices = @transform_4, window_bounds = array<i64: 1, 1, 16, 16>}, {pipeline_mode = #tpu.pipeline_mode<synchronous>, transform_indices = @transform_5, window_bounds = array<i64: 3, 48, 16>}, {pipeline_mode = #tpu.pipeline_mode<synchronous>, transform_indices = @transform_6, window_bounds = array<i64: 1, 16>}, {transform_indices = @transform_7, window_bounds = array<i64: 1, 8, 16, 16>}, {transform_indices = @transform_8, window_bounds = array<i64: 1, 1, 2, 16>}]} {
    %c0 = arith.constant 0 : index
    %c0_0 = arith.constant 0 : index
    %c0_1 = arith.constant 0 : index
    %0 = vector.load %arg2[%c0, %c0_0, %c0_1] : memref<1x1x16xf32, #tpu.memory_space<vmem>>, vector<1x1x16xf32>
    %1 = vector.shape_cast %0 : vector<1x1x16xf32> to vector<1x16xf32>
    %2 = vector.shape_cast %1 : vector<1x16xf32> to vector<1x1x16xf32>
    %c0_2 = arith.constant 0 : index
    %c0_3 = arith.constant 0 : index
    %c0_4 = arith.constant 0 : index
    %3 = vector.load %arg3[%c0_2, %c0_3, %c0_4] : memref<1x1x16xf32, #tpu.memory_space<vmem>>, vector<1x1x16xf32>
    %4 = vector.shape_cast %3 : vector<1x1x16xf32> to vector<1x16xf32>
    %5 = vector.shape_cast %4 : vector<1x16xf32> to vector<1x1x16xf32>
    %c0_5 = arith.constant 0 : index
    %c0_6 = arith.constant 0 : index
    %c0_7 = arith.constant 0 : index
    %c0_8 = arith.constant 0 : index
    %6 = vector.load %arg4[%c0_5, %c0_6, %c0_7, %c0_8] : memref<1x1x16x16xf32, #tpu.memory_space<vmem>>, vector<1x1x16x16xf32>
    %7 = vector.shape_cast %6 : vector<1x1x16x16xf32> to vector<1x16x16xf32>
    %8 = vector.broadcast %2 : vector<1x1x16xf32> to vector<1x16x16xf32>
    %9 = arith.mulf %7, %8 : vector<1x16x16xf32>
    %10 = vector.broadcast %5 : vector<1x1x16xf32> to vector<1x16x16xf32>
    %11 = arith.addf %9, %10 : vector<1x16x16xf32>
    %12 = arith.negf %11 : vector<1x16x16xf32>
    %13 = math.exp %12 : vector<1x16x16xf32>
    %cst = arith.constant 1.000000e+00 : f32
    %14 = vector.broadcast %cst : f32 to vector<1x16x16xf32>
    %15 = arith.addf %14, %13 : vector<1x16x16xf32>
    %16 = arith.divf %14, %15 : vector<1x16x16xf32>
    %17 = arith.mulf %11, %16 : vector<1x16x16xf32>
    %c0_i32 = arith.constant 0 : i32
    %18 = arith.cmpi sgt, %arg1, %c0_i32 : i32
    %19 = arith.extui %18 : i1 to i32
    %20 = arith.sitofp %19 : i32 to f32
    %21 = vector.broadcast %20 : f32 to vector<1x16x16xf32>
    %22 = arith.mulf %17, %21 : vector<1x16x16xf32>
    %c0_9 = arith.constant 0 : index
    %c0_10 = arith.constant 0 : index
    %c0_11 = arith.constant 0 : index
    %c0_12 = arith.constant 0 : index
    %23 = vector.load %arg6[%c0_9, %c0_10, %c0_11, %c0_12] : memref<1x1x16x16xf32, #tpu.memory_space<vmem>>, vector<1x1x16x16xf32>
    %24 = vector.shape_cast %23 : vector<1x1x16x16xf32> to vector<1x16x16xf32>
    %25 = vector.broadcast %2 : vector<1x1x16xf32> to vector<1x16x16xf32>
    %26 = arith.mulf %24, %25 : vector<1x16x16xf32>
    %27 = vector.broadcast %5 : vector<1x1x16xf32> to vector<1x16x16xf32>
    %28 = arith.addf %26, %27 : vector<1x16x16xf32>
    %29 = arith.negf %28 : vector<1x16x16xf32>
    %30 = math.exp %29 : vector<1x16x16xf32>
    %cst_13 = arith.constant 1.000000e+00 : f32
    %31 = vector.broadcast %cst_13 : f32 to vector<1x16x16xf32>
    %32 = arith.addf %31, %30 : vector<1x16x16xf32>
    %33 = arith.divf %31, %32 : vector<1x16x16xf32>
    %34 = arith.mulf %28, %33 : vector<1x16x16xf32>
    %c1_i32 = arith.constant 1 : i32
    %35 = arith.cmpi slt, %arg1, %c1_i32 : i32
    %36 = arith.extui %35 : i1 to i32
    %37 = arith.sitofp %36 : i32 to f32
    %38 = vector.broadcast %37 : f32 to vector<1x16x16xf32>
    %39 = arith.mulf %34, %38 : vector<1x16x16xf32>
    %c0_14 = arith.constant 0 : index
    %c0_15 = arith.constant 0 : index
    %c0_16 = arith.constant 0 : index
    %c0_17 = arith.constant 0 : index
    %40 = vector.load %arg5[%c0_14, %c0_15, %c0_16, %c0_17] : memref<1x8x16x16xf32, #tpu.memory_space<vmem>>, vector<1x8x16x16xf32>
    %41 = vector.shape_cast %40 : vector<1x8x16x16xf32> to vector<8x16x16xf32>
    %42 = vector.broadcast %2 : vector<1x1x16xf32> to vector<8x16x16xf32>
    %43 = arith.mulf %41, %42 : vector<8x16x16xf32>
    %44 = vector.broadcast %5 : vector<1x1x16xf32> to vector<8x16x16xf32>
    %45 = arith.addf %43, %44 : vector<8x16x16xf32>
    %46 = arith.negf %45 : vector<8x16x16xf32>
    %47 = math.exp %46 : vector<8x16x16xf32>
    %cst_18 = arith.constant 1.000000e+00 : f32
    %48 = vector.broadcast %cst_18 : f32 to vector<8x16x16xf32>
    %49 = arith.addf %48, %47 : vector<8x16x16xf32>
    %50 = arith.divf %48, %49 : vector<8x16x16xf32>
    %51 = arith.mulf %45, %50 : vector<8x16x16xf32>
    %52 = tpu.concatenate %22, %51, %39 in 0 : vector<1x16x16xf32>, vector<8x16x16xf32>, vector<1x16x16xf32> -> vector<10x16x16xf32>
    %cst_19 = arith.constant 0.000000e+00 : f32
    %53 = vector.broadcast %cst_19 : f32 to vector<8x1x16xf32>
    %cst_20 = arith.constant 0.000000e+00 : f32
    %54 = vector.broadcast %cst_20 : f32 to vector<128x16xf32>
    %55 = vector.extract_strided_slice %52 {offsets = [0, 0, 0], sizes = [8, 16, 16], strides = [1, 1, 1]} : vector<10x16x16xf32> to vector<8x16x16xf32>
    %56 = vector.extract_strided_slice %55 {offsets = [0, 0, 0], sizes = [8, 15, 16], strides = [1, 1, 1]} : vector<8x16x16xf32> to vector<8x15x16xf32>
    %57 = tpu.concatenate %53, %56 in 1 : vector<8x1x16xf32>, vector<8x15x16xf32> -> vector<8x16x16xf32>
    %58 = vector.extract_strided_slice %55 {offsets = [0, 1, 0], sizes = [8, 15, 16], strides = [1, 1, 1]} : vector<8x16x16xf32> to vector<8x15x16xf32>
    %59 = tpu.concatenate %58, %53 in 1 : vector<8x15x16xf32>, vector<8x1x16xf32> -> vector<8x16x16xf32>
    %60 = tpu.concatenate %57, %55, %59 in 2 : vector<8x16x16xf32>, vector<8x16x16xf32>, vector<8x16x16xf32> -> vector<8x16x48xf32>
    %61 = vector.shape_cast %60 : vector<8x16x48xf32> to vector<128x48xf32>
    %62 = arith.truncf %61 : vector<128x48xf32> to vector<128x48xbf16>
    %c0_21 = arith.constant 0 : index
    %c0_22 = arith.constant 0 : index
    %c0_23 = arith.constant 0 : index
    %63 = vector.load %arg7[%c0_21, %c0_22, %c0_23] : memref<3x48x16xbf16, #tpu.memory_space<vmem>>, vector<1x48x16xbf16>
    %64 = vector.shape_cast %63 : vector<1x48x16xbf16> to vector<48x16xbf16>
    %cst_24 = arith.constant dense<0.000000e+00> : vector<128x16xf32>
    %65 = tpu.matmul %62, %64, %cst_24 {dimension_numbers = #tpu.dot_dimension_numbers<[1], [0], [0], [1], [0, 0, 1, 1], [], []>} : vector<128x48xbf16>, vector<48x16xbf16>, vector<128x16xf32> -> vector<128x16xf32>
    %66 = arith.addf %54, %65 : vector<128x16xf32>
    %67 = vector.extract_strided_slice %52 {offsets = [1, 0, 0], sizes = [8, 16, 16], strides = [1, 1, 1]} : vector<10x16x16xf32> to vector<8x16x16xf32>
    %68 = vector.extract_strided_slice %67 {offsets = [0, 0, 0], sizes = [8, 15, 16], strides = [1, 1, 1]} : vector<8x16x16xf32> to vector<8x15x16xf32>
    %69 = tpu.concatenate %53, %68 in 1 : vector<8x1x16xf32>, vector<8x15x16xf32> -> vector<8x16x16xf32>
    %70 = vector.extract_strided_slice %67 {offsets = [0, 1, 0], sizes = [8, 15, 16], strides = [1, 1, 1]} : vector<8x16x16xf32> to vector<8x15x16xf32>
    %71 = tpu.concatenate %70, %53 in 1 : vector<8x15x16xf32>, vector<8x1x16xf32> -> vector<8x16x16xf32>
    %72 = tpu.concatenate %69, %67, %71 in 2 : vector<8x16x16xf32>, vector<8x16x16xf32>, vector<8x16x16xf32> -> vector<8x16x48xf32>
    %73 = vector.shape_cast %72 : vector<8x16x48xf32> to vector<128x48xf32>
    %74 = arith.truncf %73 : vector<128x48xf32> to vector<128x48xbf16>
    %c1 = arith.constant 1 : index
    %c0_25 = arith.constant 0 : index
    %c0_26 = arith.constant 0 : index
    %75 = vector.load %arg7[%c1, %c0_25, %c0_26] : memref<3x48x16xbf16, #tpu.memory_space<vmem>>, vector<1x48x16xbf16>
    %76 = vector.shape_cast %75 : vector<1x48x16xbf16> to vector<48x16xbf16>
    %cst_27 = arith.constant dense<0.000000e+00> : vector<128x16xf32>
    %77 = tpu.matmul %74, %76, %cst_27 {dimension_numbers = #tpu.dot_dimension_numbers<[1], [0], [0], [1], [0, 0, 1, 1], [], []>} : vector<128x48xbf16>, vector<48x16xbf16>, vector<128x16xf32> -> vector<128x16xf32>
    %78 = arith.addf %66, %77 : vector<128x16xf32>
    %79 = vector.extract_strided_slice %52 {offsets = [2, 0, 0], sizes = [8, 16, 16], strides = [1, 1, 1]} : vector<10x16x16xf32> to vector<8x16x16xf32>
    %80 = vector.extract_strided_slice %79 {offsets = [0, 0, 0], sizes = [8, 15, 16], strides = [1, 1, 1]} : vector<8x16x16xf32> to vector<8x15x16xf32>
    %81 = tpu.concatenate %53, %80 in 1 : vector<8x1x16xf32>, vector<8x15x16xf32> -> vector<8x16x16xf32>
    %82 = vector.extract_strided_slice %79 {offsets = [0, 1, 0], sizes = [8, 15, 16], strides = [1, 1, 1]} : vector<8x16x16xf32> to vector<8x15x16xf32>
    %83 = tpu.concatenate %82, %53 in 1 : vector<8x15x16xf32>, vector<8x1x16xf32> -> vector<8x16x16xf32>
    %84 = tpu.concatenate %81, %79, %83 in 2 : vector<8x16x16xf32>, vector<8x16x16xf32>, vector<8x16x16xf32> -> vector<8x16x48xf32>
    %85 = vector.shape_cast %84 : vector<8x16x48xf32> to vector<128x48xf32>
    %86 = arith.truncf %85 : vector<128x48xf32> to vector<128x48xbf16>
    %c2 = arith.constant 2 : index
    %c0_28 = arith.constant 0 : index
    %c0_29 = arith.constant 0 : index
    %87 = vector.load %arg7[%c2, %c0_28, %c0_29] : memref<3x48x16xbf16, #tpu.memory_space<vmem>>, vector<1x48x16xbf16>
    %88 = vector.shape_cast %87 : vector<1x48x16xbf16> to vector<48x16xbf16>
    %cst_30 = arith.constant dense<0.000000e+00> : vector<128x16xf32>
    %89 = tpu.matmul %86, %88, %cst_30 {dimension_numbers = #tpu.dot_dimension_numbers<[1], [0], [0], [1], [0, 0, 1, 1], [], []>} : vector<128x48xbf16>, vector<48x16xbf16>, vector<128x16xf32> -> vector<128x16xf32>
    %90 = arith.addf %78, %89 : vector<128x16xf32>
    %c0_31 = arith.constant 0 : index
    %c0_32 = arith.constant 0 : index
    %91 = vector.load %arg8[%c0_31, %c0_32] : memref<1x16xf32, #tpu.memory_space<vmem>>, vector<1x16xf32>
    %92 = vector.shape_cast %91 : vector<1x16xf32> to vector<16xf32>
    %93 = vector.shape_cast %92 : vector<16xf32> to vector<1x16xf32>
    %94 = vector.broadcast %93 : vector<1x16xf32> to vector<128x16xf32>
    %95 = arith.addf %90, %94 : vector<128x16xf32>
    %cst_33 = arith.constant dense<0.000000e+00> : vector<16xf32>
    %96 = vector.multi_reduction <add>, %95, %cst_33 [0] : vector<128x16xf32> to vector<16xf32>
    %97 = vector.shape_cast %96 : vector<16xf32> to vector<1x16xf32>
    %98 = arith.mulf %95, %95 : vector<128x16xf32>
    %cst_34 = arith.constant dense<0.000000e+00> : vector<16xf32>
    %99 = vector.multi_reduction <add>, %98, %cst_34 [0] : vector<128x16xf32> to vector<16xf32>
    %100 = vector.shape_cast %99 : vector<16xf32> to vector<1x16xf32>
    %101 = tpu.concatenate %97, %100 in 0 : vector<1x16xf32>, vector<1x16xf32> -> vector<2x16xf32>
    %c0_35 = arith.constant 0 : index
    %c0_36 = arith.constant 0 : index
    %c0_37 = arith.constant 0 : index
    %c0_38 = arith.constant 0 : index
    %102 = vector.load %arg10[%c0_35, %c0_36, %c0_37, %c0_38] : memref<1x1x2x16xf32, #tpu.memory_space<vmem>>, vector<1x1x2x16xf32>
    %103 = vector.shape_cast %102 : vector<1x1x2x16xf32> to vector<2x16xf32>
    %104 = vector.shape_cast %101 : vector<2x16xf32> to vector<1x1x2x16xf32>
    tpu.vector_store %arg10[%c0_35, %c0_36, %c0_37, %c0_38], %104 {strides = array<i32>} : memref<1x1x2x16xf32, #tpu.memory_space<vmem>>, vector<1x1x2x16xf32>,
    %105 = vector.shape_cast %95 : vector<128x16xf32> to vector<8x16x16xf32>
    %c0_39 = arith.constant 0 : index
    %c0_40 = arith.constant 0 : index
    %c0_41 = arith.constant 0 : index
    %c0_42 = arith.constant 0 : index
    %106 = vector.load %arg9[%c0_39, %c0_40, %c0_41, %c0_42] : memref<1x8x16x16xf32, #tpu.memory_space<vmem>>, vector<1x8x16x16xf32>
    %107 = vector.shape_cast %106 : vector<1x8x16x16xf32> to vector<8x16x16xf32>
    %108 = vector.shape_cast %105 : vector<8x16x16xf32> to vector<1x8x16x16xf32>
    tpu.vector_store %arg9[%c0_39, %c0_40, %c0_41, %c0_42], %108 {strides = array<i32>} : memref<1x8x16x16xf32, #tpu.memory_space<vmem>>, vector<1x8x16x16xf32>,
    return
  }
  func.func @transform_0(%arg0: i32, %arg1: i32) -> (i32, i32, i32) {
    %c0_i32 = arith.constant 0 : i32
    %c0_i32_0 = arith.constant 0 : i32
    %c0_i32_1 = arith.constant 0 : i32
    return %arg0, %c0_i32, %c0_i32_0 : i32, i32, i32
  }
  func.func @transform_1(%arg0: i32, %arg1: i32) -> (i32, i32, i32) {
    %c0_i32 = arith.constant 0 : i32
    %c0_i32_0 = arith.constant 0 : i32
    %c0_i32_1 = arith.constant 0 : i32
    return %arg0, %c0_i32, %c0_i32_0 : i32, i32, i32
  }
  func.func @transform_2(%arg0: i32, %arg1: i32) -> (i32, i32, i32, i32) {
    %c8_i32 = arith.constant 8 : i32
    %0 = arith.muli %arg1, %c8_i32 : i32
    %c1_i32 = arith.constant 1 : i32
    %1 = arith.subi %0, %c1_i32 : i32
    %c0_i32 = arith.constant 0 : i32
    %2 = arith.maxsi %1, %c0_i32 : i32
    %c0_i32_0 = arith.constant 0 : i32
    %c0_i32_1 = arith.constant 0 : i32
    %c0_i32_2 = arith.constant 0 : i32
    return %arg0, %2, %c0_i32_0, %c0_i32_1 : i32, i32, i32, i32
  }
  func.func @transform_3(%arg0: i32, %arg1: i32) -> (i32, i32, i32, i32) {
    %c0_i32 = arith.constant 0 : i32
    %c0_i32_0 = arith.constant 0 : i32
    %c0_i32_1 = arith.constant 0 : i32
    return %arg0, %arg1, %c0_i32, %c0_i32_0 : i32, i32, i32, i32
  }
  func.func @transform_4(%arg0: i32, %arg1: i32) -> (i32, i32, i32, i32) {
    %c1_i32 = arith.constant 1 : i32
    %0 = arith.addi %arg1, %c1_i32 : i32
    %c8_i32 = arith.constant 8 : i32
    %1 = arith.muli %0, %c8_i32 : i32
    %c15_i32 = arith.constant 15 : i32
    %2 = arith.minsi %1, %c15_i32 : i32
    %c0_i32 = arith.constant 0 : i32
    %c0_i32_0 = arith.constant 0 : i32
    %c0_i32_1 = arith.constant 0 : i32
    return %arg0, %2, %c0_i32, %c0_i32_0 : i32, i32, i32, i32
  }
  func.func @transform_5(%arg0: i32, %arg1: i32) -> (i32, i32, i32) {
    %c0_i32 = arith.constant 0 : i32
    %c0_i32_0 = arith.constant 0 : i32
    %c0_i32_1 = arith.constant 0 : i32
    %c0_i32_2 = arith.constant 0 : i32
    return %c0_i32, %c0_i32_0, %c0_i32_1 : i32, i32, i32
  }
  func.func @transform_6(%arg0: i32, %arg1: i32) -> (i32, i32) {
    %c0_i32 = arith.constant 0 : i32
    %c0_i32_0 = arith.constant 0 : i32
    %c0_i32_1 = arith.constant 0 : i32
    return %c0_i32, %c0_i32_0 : i32, i32
  }
  func.func @transform_7(%arg0: i32, %arg1: i32) -> (i32, i32, i32, i32) {
    %c0_i32 = arith.constant 0 : i32
    %c0_i32_0 = arith.constant 0 : i32
    %c0_i32_1 = arith.constant 0 : i32
    return %arg0, %arg1, %c0_i32, %c0_i32_0 : i32, i32, i32, i32
  }
  func.func @transform_8(%arg0: i32, %arg1: i32) -> (i32, i32, i32, i32) {
    %c0_i32 = arith.constant 0 : i32
    %c0_i32_0 = arith.constant 0 : i32
    %c0_i32_1 = arith.constant 0 : i32
    return %arg0, %arg1, %c0_i32, %c0_i32_0 : i32, i32, i32, i32
  }
}

module attributes {stable_mosaic.version = 11 : i64} {
  func.func @_downsample_conv_kernel(%arg0: i32, %arg1: i32, %arg2: memref<1x1x16x16xf32, #tpu.memory_space<vmem>>, %arg3: memref<1x16x16x16xf32, #tpu.memory_space<vmem>>, %arg4: memref<3x48x16xbf16, #tpu.memory_space<vmem>>, %arg5: memref<1x16xf32, #tpu.memory_space<vmem>>, %arg6: memref<1x8x8x16xf32, #tpu.memory_space<vmem>>) attributes {dimension_semantics = [#tpu.dimension_semantics<parallel>, #tpu.dimension_semantics<parallel>], iteration_bounds = array<i64: 2, 1>, scalar_prefetch = 0 : i64, scratch_operands = 0 : i64, tpu.core_type = #tpu.core_type<tc>, window_params = [{transform_indices = @transform_0, window_bounds = array<i64: 1, 1, 16, 16>}, {transform_indices = @transform_1, window_bounds = array<i64: 1, 16, 16, 16>}, {pipeline_mode = #tpu.pipeline_mode<synchronous>, transform_indices = @transform_2, window_bounds = array<i64: 3, 48, 16>}, {pipeline_mode = #tpu.pipeline_mode<synchronous>, transform_indices = @transform_3, window_bounds = array<i64: 1, 16>}, {transform_indices = @transform_4, window_bounds = array<i64: 1, 8, 8, 16>}]} {
    %c0 = arith.constant 0 : index
    %c0_0 = arith.constant 0 : index
    %c0_1 = arith.constant 0 : index
    %c0_2 = arith.constant 0 : index
    %0 = vector.load %arg3[%c0, %c0_0, %c0_1, %c0_2] : memref<1x16x16x16xf32, #tpu.memory_space<vmem>>, vector<1x16x16x16xf32>
    %1 = vector.shape_cast %0 : vector<1x16x16x16xf32> to vector<16x16x16xf32>
    %c0_3 = arith.constant 0 : index
    %c0_4 = arith.constant 0 : index
    %c0_5 = arith.constant 0 : index
    %c0_6 = arith.constant 0 : index
    %2 = vector.load %arg2[%c0_3, %c0_4, %c0_5, %c0_6] : memref<1x1x16x16xf32, #tpu.memory_space<vmem>>, vector<1x1x16x16xf32>
    %3 = vector.shape_cast %2 : vector<1x1x16x16xf32> to vector<1x16x16xf32>
    %c0_i32 = arith.constant 0 : i32
    %4 = arith.cmpi sgt, %arg1, %c0_i32 : i32
    %5 = arith.extui %4 : i1 to i32
    %6 = arith.sitofp %5 : i32 to f32
    %7 = vector.broadcast %6 : f32 to vector<1x16x16xf32>
    %8 = arith.mulf %3, %7 : vector<1x16x16xf32>
    %9 = vector.shape_cast %1 : vector<16x16x16xf32> to vector<8x2x16x16xf32>
    %10 = vector.extract_strided_slice %9 {offsets = [0, 0, 0, 0], sizes = [8, 1, 16, 16], strides = [1, 1, 1, 1]} : vector<8x2x16x16xf32> to vector<8x1x16x16xf32>
    %11 = vector.shape_cast %10 : vector<8x1x16x16xf32> to vector<8x16x16xf32>
    %12 = vector.extract_strided_slice %9 {offsets = [0, 1, 0, 0], sizes = [8, 1, 16, 16], strides = [1, 1, 1, 1]} : vector<8x2x16x16xf32> to vector<8x1x16x16xf32>
    %13 = vector.shape_cast %12 : vector<8x1x16x16xf32> to vector<8x16x16xf32>
    %14 = vector.extract_strided_slice %13 {offsets = [0, 0, 0], sizes = [7, 16, 16], strides = [1, 1, 1]} : vector<8x16x16xf32> to vector<7x16x16xf32>
    %15 = tpu.concatenate %8, %14 in 0 : vector<1x16x16xf32>, vector<7x16x16xf32> -> vector<8x16x16xf32>
    %cst = arith.constant 0.000000e+00 : f32
    %16 = vector.broadcast %cst : f32 to vector<64x16xf32>
    %17 = vector.shape_cast %15 : vector<8x16x16xf32> to vector<8x8x2x16xf32>
    %18 = vector.extract_strided_slice %17 {offsets = [0, 0, 0, 0], sizes = [8, 8, 1, 16], strides = [1, 1, 1, 1]} : vector<8x8x2x16xf32> to vector<8x8x1x16xf32>
    %19 = vector.shape_cast %18 : vector<8x8x1x16xf32> to vector<8x8x16xf32>
    %20 = vector.extract_strided_slice %17 {offsets = [0, 0, 1, 0], sizes = [8, 8, 1, 16], strides = [1, 1, 1, 1]} : vector<8x8x2x16xf32> to vector<8x8x1x16xf32>
    %21 = vector.shape_cast %20 : vector<8x8x1x16xf32> to vector<8x8x16xf32>
    %cst_7 = arith.constant 0.000000e+00 : f32
    %22 = vector.broadcast %cst_7 : f32 to vector<8x1x16xf32>
    %23 = vector.extract_strided_slice %21 {offsets = [0, 0, 0], sizes = [8, 7, 16], strides = [1, 1, 1]} : vector<8x8x16xf32> to vector<8x7x16xf32>
    %24 = tpu.concatenate %22, %23 in 1 : vector<8x1x16xf32>, vector<8x7x16xf32> -> vector<8x8x16xf32>
    %25 = tpu.concatenate %24, %19, %21 in 2 : vector<8x8x16xf32>, vector<8x8x16xf32>, vector<8x8x16xf32> -> vector<8x8x48xf32>
    %26 = vector.shape_cast %25 : vector<8x8x48xf32> to vector<64x48xf32>
    %27 = arith.truncf %26 : vector<64x48xf32> to vector<64x48xbf16>
    %c0_8 = arith.constant 0 : index
    %c0_9 = arith.constant 0 : index
    %c0_10 = arith.constant 0 : index
    %28 = vector.load %arg4[%c0_8, %c0_9, %c0_10] : memref<3x48x16xbf16, #tpu.memory_space<vmem>>, vector<1x48x16xbf16>
    %29 = vector.shape_cast %28 : vector<1x48x16xbf16> to vector<48x16xbf16>
    %cst_11 = arith.constant dense<0.000000e+00> : vector<64x16xf32>
    %30 = tpu.matmul %27, %29, %cst_11 {dimension_numbers = #tpu.dot_dimension_numbers<[1], [0], [0], [1], [0, 0, 1, 1], [], []>} : vector<64x48xbf16>, vector<48x16xbf16>, vector<64x16xf32> -> vector<64x16xf32>
    %31 = arith.addf %16, %30 : vector<64x16xf32>
    %32 = vector.shape_cast %11 : vector<8x16x16xf32> to vector<8x8x2x16xf32>
    %33 = vector.extract_strided_slice %32 {offsets = [0, 0, 0, 0], sizes = [8, 8, 1, 16], strides = [1, 1, 1, 1]} : vector<8x8x2x16xf32> to vector<8x8x1x16xf32>
    %34 = vector.shape_cast %33 : vector<8x8x1x16xf32> to vector<8x8x16xf32>
    %35 = vector.extract_strided_slice %32 {offsets = [0, 0, 1, 0], sizes = [8, 8, 1, 16], strides = [1, 1, 1, 1]} : vector<8x8x2x16xf32> to vector<8x8x1x16xf32>
    %36 = vector.shape_cast %35 : vector<8x8x1x16xf32> to vector<8x8x16xf32>
    %cst_12 = arith.constant 0.000000e+00 : f32
    %37 = vector.broadcast %cst_12 : f32 to vector<8x1x16xf32>
    %38 = vector.extract_strided_slice %36 {offsets = [0, 0, 0], sizes = [8, 7, 16], strides = [1, 1, 1]} : vector<8x8x16xf32> to vector<8x7x16xf32>
    %39 = tpu.concatenate %37, %38 in 1 : vector<8x1x16xf32>, vector<8x7x16xf32> -> vector<8x8x16xf32>
    %40 = tpu.concatenate %39, %34, %36 in 2 : vector<8x8x16xf32>, vector<8x8x16xf32>, vector<8x8x16xf32> -> vector<8x8x48xf32>
    %41 = vector.shape_cast %40 : vector<8x8x48xf32> to vector<64x48xf32>
    %42 = arith.truncf %41 : vector<64x48xf32> to vector<64x48xbf16>
    %c1 = arith.constant 1 : index
    %c0_13 = arith.constant 0 : index
    %c0_14 = arith.constant 0 : index
    %43 = vector.load %arg4[%c1, %c0_13, %c0_14] : memref<3x48x16xbf16, #tpu.memory_space<vmem>>, vector<1x48x16xbf16>
    %44 = vector.shape_cast %43 : vector<1x48x16xbf16> to vector<48x16xbf16>
    %cst_15 = arith.constant dense<0.000000e+00> : vector<64x16xf32>
    %45 = tpu.matmul %42, %44, %cst_15 {dimension_numbers = #tpu.dot_dimension_numbers<[1], [0], [0], [1], [0, 0, 1, 1], [], []>} : vector<64x48xbf16>, vector<48x16xbf16>, vector<64x16xf32> -> vector<64x16xf32>
    %46 = arith.addf %31, %45 : vector<64x16xf32>
    %47 = vector.shape_cast %13 : vector<8x16x16xf32> to vector<8x8x2x16xf32>
    %48 = vector.extract_strided_slice %47 {offsets = [0, 0, 0, 0], sizes = [8, 8, 1, 16], strides = [1, 1, 1, 1]} : vector<8x8x2x16xf32> to vector<8x8x1x16xf32>
    %49 = vector.shape_cast %48 : vector<8x8x1x16xf32> to vector<8x8x16xf32>
    %50 = vector.extract_strided_slice %47 {offsets = [0, 0, 1, 0], sizes = [8, 8, 1, 16], strides = [1, 1, 1, 1]} : vector<8x8x2x16xf32> to vector<8x8x1x16xf32>
    %51 = vector.shape_cast %50 : vector<8x8x1x16xf32> to vector<8x8x16xf32>
    %cst_16 = arith.constant 0.000000e+00 : f32
    %52 = vector.broadcast %cst_16 : f32 to vector<8x1x16xf32>
    %53 = vector.extract_strided_slice %51 {offsets = [0, 0, 0], sizes = [8, 7, 16], strides = [1, 1, 1]} : vector<8x8x16xf32> to vector<8x7x16xf32>
    %54 = tpu.concatenate %52, %53 in 1 : vector<8x1x16xf32>, vector<8x7x16xf32> -> vector<8x8x16xf32>
    %55 = tpu.concatenate %54, %49, %51 in 2 : vector<8x8x16xf32>, vector<8x8x16xf32>, vector<8x8x16xf32> -> vector<8x8x48xf32>
    %56 = vector.shape_cast %55 : vector<8x8x48xf32> to vector<64x48xf32>
    %57 = arith.truncf %56 : vector<64x48xf32> to vector<64x48xbf16>
    %c2 = arith.constant 2 : index
    %c0_17 = arith.constant 0 : index
    %c0_18 = arith.constant 0 : index
    %58 = vector.load %arg4[%c2, %c0_17, %c0_18] : memref<3x48x16xbf16, #tpu.memory_space<vmem>>, vector<1x48x16xbf16>
    %59 = vector.shape_cast %58 : vector<1x48x16xbf16> to vector<48x16xbf16>
    %cst_19 = arith.constant dense<0.000000e+00> : vector<64x16xf32>
    %60 = tpu.matmul %57, %59, %cst_19 {dimension_numbers = #tpu.dot_dimension_numbers<[1], [0], [0], [1], [0, 0, 1, 1], [], []>} : vector<64x48xbf16>, vector<48x16xbf16>, vector<64x16xf32> -> vector<64x16xf32>
    %61 = arith.addf %46, %60 : vector<64x16xf32>
    %c0_20 = arith.constant 0 : index
    %c0_21 = arith.constant 0 : index
    %62 = vector.load %arg5[%c0_20, %c0_21] : memref<1x16xf32, #tpu.memory_space<vmem>>, vector<1x16xf32>
    %63 = vector.shape_cast %62 : vector<1x16xf32> to vector<16xf32>
    %64 = vector.shape_cast %63 : vector<16xf32> to vector<1x16xf32>
    %65 = vector.broadcast %64 : vector<1x16xf32> to vector<64x16xf32>
    %66 = arith.addf %61, %65 : vector<64x16xf32>
    %67 = vector.shape_cast %66 : vector<64x16xf32> to vector<8x8x16xf32>
    %c0_22 = arith.constant 0 : index
    %c0_23 = arith.constant 0 : index
    %c0_24 = arith.constant 0 : index
    %c0_25 = arith.constant 0 : index
    %68 = vector.load %arg6[%c0_22, %c0_23, %c0_24, %c0_25] : memref<1x8x8x16xf32, #tpu.memory_space<vmem>>, vector<1x8x8x16xf32>
    %69 = vector.shape_cast %68 : vector<1x8x8x16xf32> to vector<8x8x16xf32>
    %70 = vector.shape_cast %67 : vector<8x8x16xf32> to vector<1x8x8x16xf32>
    tpu.vector_store %arg6[%c0_22, %c0_23, %c0_24, %c0_25], %70 {strides = array<i32>} : memref<1x8x8x16xf32, #tpu.memory_space<vmem>>, vector<1x8x8x16xf32>,
    return
  }
  func.func @transform_0(%arg0: i32, %arg1: i32) -> (i32, i32, i32, i32) {
    %c16_i32 = arith.constant 16 : i32
    %0 = arith.muli %arg1, %c16_i32 : i32
    %c1_i32 = arith.constant 1 : i32
    %1 = arith.subi %0, %c1_i32 : i32
    %c0_i32 = arith.constant 0 : i32
    %2 = arith.maxsi %1, %c0_i32 : i32
    %c0_i32_0 = arith.constant 0 : i32
    %c0_i32_1 = arith.constant 0 : i32
    %c0_i32_2 = arith.constant 0 : i32
    return %arg0, %2, %c0_i32_0, %c0_i32_1 : i32, i32, i32, i32
  }
  func.func @transform_1(%arg0: i32, %arg1: i32) -> (i32, i32, i32, i32) {
    %c0_i32 = arith.constant 0 : i32
    %c0_i32_0 = arith.constant 0 : i32
    %c0_i32_1 = arith.constant 0 : i32
    return %arg0, %arg1, %c0_i32, %c0_i32_0 : i32, i32, i32, i32
  }
  func.func @transform_2(%arg0: i32, %arg1: i32) -> (i32, i32, i32) {
    %c0_i32 = arith.constant 0 : i32
    %c0_i32_0 = arith.constant 0 : i32
    %c0_i32_1 = arith.constant 0 : i32
    %c0_i32_2 = arith.constant 0 : i32
    return %c0_i32, %c0_i32_0, %c0_i32_1 : i32, i32, i32
  }
  func.func @transform_3(%arg0: i32, %arg1: i32) -> (i32, i32) {
    %c0_i32 = arith.constant 0 : i32
    %c0_i32_0 = arith.constant 0 : i32
    %c0_i32_1 = arith.constant 0 : i32
    return %c0_i32, %c0_i32_0 : i32, i32
  }
  func.func @transform_4(%arg0: i32, %arg1: i32) -> (i32, i32, i32, i32) {
    %c0_i32 = arith.constant 0 : i32
    %c0_i32_0 = arith.constant 0 : i32
    %c0_i32_1 = arith.constant 0 : i32
    return %arg0, %arg1, %c0_i32, %c0_i32_0 : i32, i32, i32, i32
  }
}

</mosaic_0001>

<bundles_post_ra>
// kernel: squeeze.8
= control target key start
LH: loop header
LB: loop body
LE: loop exit
PB: predicated region body
PF: predicated region fallthrough
CT: control target
= control target key end

     0   :  { %s47_s8 = smov 122   ;;  %vm8_vm0 = vcmask 15360   ;;  %s48_s9 = smov 124   ;;  %s68_s0 = inlined_call_operand.vmem [shape: f32[2,8], index: 0, kind: input, shape index: {}]   ;;  %s69_s1 = inlined_call_operand.vmem [shape: f32[2,4,2], index: 1, kind: output, shape index: {}]  }
   0x1   :  { %v5_v0 = vld [vmem:[%s68_s0] sm:$0x3]  ;;  %s46_s0 = smov 126  }
   0x2   :  { %6 = vst [vmem:[#allocation1] sm:$0x3] %v5_v0 }
   0x9   :  { %v10_v1 = vld [vmem:[#allocation1] sm:$0x3]  }
   0xa   :  { %v22_v2 = vld [vmem:[#allocation1] sm:$0x3]   ;;  %11 = vrot.lane.b32.xlu0 %v10_v1, %s46_s0 }
   0xb   :  { %23 = vrot.lane.b32.xlu1 %v22_v2, %s47_s8  ;;  %v7_v3 = vld [vmem:[#allocation1] sm:$0x3]  }
   0xc   :  { %v16_v4 = vld [vmem:[#allocation1] sm:$0x3]   ;;  %9 = vst.msk [vmem:[#allocation0] ss:$8 sm:$0x3] %vm8_vm0, %v7_v3  }
   0xe   :  { %17 = vrot.lane.b32.xlu0 %v16_v4, %s48_s9 }
  0x7c   :  { %v12_v5 = vpop.permute.xlu0 %11  }
  0x7d   :  { %v24_v6 = vpop.permute.xlu1 %23   ;;  %15 = vst.msk [vmem:[#allocation0 + $0x1] ss:$8 sm:$0x3] %vm8_vm0, %v12_v5  }
  0x7e   :  { %27 = vst.msk [vmem:[#allocation0 + $0x3] ss:$8 sm:$0x3] %vm8_vm0, %v24_v6  }
  0x80   :  { %v18_v7 = vpop.permute.xlu0 %17  }
  0x81   :  { %21 = vst.msk [vmem:[#allocation0 + $0x2] ss:$8 sm:$0x3] %vm8_vm0, %v18_v7  }
  0x88   :  { %v32_v8 = vld [vmem:[#allocation0] sm:$0xf]  ;;  %v37_v9 = vld [vmem:[#allocation0 + $0x8] sm:$0xf] }
  0x89   :  { %35 = vst [vmem:[%s69_s1] sm:$0xf] %v32_v8  ;;  %42 = vst [vmem:[%s69_s1 + $0x4] sm:$0xf] %v37_v9 }

// kernel: squeeze.10
= control target key start
LH: loop header
LB: loop body
LE: loop exit
PB: predicated region body
PF: predicated region fallthrough
CT: control target
= control target key end

     0   :  { %s47_s8 = smov 116   ;;  %vm8_vm0 = vcmask 31744   ;;  %s48_s9 = smov 120   ;;  %s68_s0 = inlined_call_operand.vmem [shape: f32[2,16], index: 0, kind: input, shape index: {}]   ;;  %s69_s1 = inlined_call_operand.vmem [shape: f32[2,4,4], index: 1, kind: output, shape index: {}]  }
   0x1   :  { %v5_v0 = vld [vmem:[%s68_s0] sm:$0x3]  ;;  %s46_s0 = smov 124  }
   0x2   :  { %6 = vst [vmem:[#allocation1] sm:$0x3] %v5_v0 }
   0x9   :  { %v10_v1 = vld [vmem:[#allocation1] sm:$0x3]  }
   0xa   :  { %v22_v2 = vld [vmem:[#allocation1] sm:$0x3]   ;;  %11 = vrot.lane.b32.xlu0 %v10_v1, %s46_s0 }
   0xb   :  { %23 = vrot.lane.b32.xlu1 %v22_v2, %s47_s8  ;;  %v7_v3 = vld [vmem:[#allocation1] sm:$0x3]  }
   0xc   :  { %v16_v4 = vld [vmem:[#allocation1] sm:$0x3]   ;;  %9 = vst.msk [vmem:[#allocation0] ss:$8 sm:$0x3] %vm8_vm0, %v7_v3  }
   0xe   :  { %17 = vrot.lane.b32.xlu0 %v16_v4, %s48_s9 }
  0x7c   :  { %v12_v5 = vpop.permute.xlu0 %11  }
  0x7d   :  { %v24_v6 = vpop.permute.xlu1 %23   ;;  %15 = vst.msk [vmem:[#allocation0 + $0x1] ss:$8 sm:$0x3] %vm8_vm0, %v12_v5  }
  0x7e   :  { %27 = vst.msk [vmem:[#allocation0 + $0x3] ss:$8 sm:$0x3] %vm8_vm0, %v24_v6  }
  0x80   :  { %v18_v7 = vpop.permute.xlu0 %17  }
  0x81   :  { %21 = vst.msk [vmem:[#allocation0 + $0x2] ss:$8 sm:$0x3] %vm8_vm0, %v18_v7  }
  0x88   :  { %v32_v8 = vld [vmem:[#allocation0] sm:$0xf]  ;;  %v37_v9 = vld [vmem:[#allocation0 + $0x8] sm:$0xf] }
  0x89   :  { %35 = vst [vmem:[%s69_s1] sm:$0xf] %v32_v8  ;;  %42 = vst [vmem:[%s69_s1 + $0x4] sm:$0xf] %v37_v9 }

// kernel: encoder_block_2d.6
= control target key start
LH: loop header
LB: loop body
LE: loop exit
PB: predicated region body
PF: predicated region fallthrough
CT: control target
= control target key end

     0   :  { %s459_s6 = smov 0   ;;  %s461_s7 = smov 0   ;;  %s569_s0 = inlined_call_operand.vmem [shape: f32[2,16,16,8], index: 0, kind: input, shape index: {}]   ;;  %s570_s1 = inlined_call_operand.vmem [shape: f32[2,2,2,8], index: 1, kind: output, shape index: {}]  }
   0x1   :  { %s463_s8 = smov 0   ;;  %s465_s9 = smov 0  }
   0x2   :  { %s467_s10 = smov 0  }
   0x3 LB: > { %s20_s11 = sadd.s32 1, %s439_s8  ;;  %s23_s12 = sadd.s32 1, %s443_s9  ;;  %s447_s10 = sphi %s467_s10, %s11_s10   ;;  %s443_s9 = sphi %s465_s9, %s574_s9   ;;  %s439_s8 = sphi %s463_s8, %s573_s8   ;;  %s435_s7 = sphi %s461_s7, %s572_s7   ;;  %s431_s6 = sphi %s459_s6, %s571_s6  }
   0x4   : > { %p21_p0 = scmp.ge.s32.totalorder %s20_s11, 2  ;;  %p360_p1 = scmp.ge.s32.totalorder %s447_s10, 1 }
   0x5   : > { %p109_p2 = scmp.lt.s32.totalorder %s447_s10, 5 }
   0x6   : > { %s576_s11 = smov (%p21_p0, %s20_s11), 0  ;;  %s578_s12 = smov (!%p21_p0, %s23_s12), %s443_s9 }
   0x7   : > { %p110_p3 = pnand %p360_p1, %p109_p2  ;;  %p25_p4 = scmp.ge.s32.totalorder %s578_s12, 2 }
   0x8   : > { %s361_s13 = sshll.u32 (!%p110_p3), %s431_s6, 3  ;;  %p138_p5 = scmp.lt.s32.totalorder (!%p110_p3), %s435_s7, 1 }
   0x9   : > { %s580_s12 = smov (%p25_p4, %s578_s12), 0  ;;  %113 = sbr.rel (%p110_p3) target bundleno = 68 (0x44), region = 24 }
   0xa   : > { %p140_p6 = scmp.lt.s32.totalorder (!%p110_p3), %s361_s13, 15  ;;  %p150_p7 = scmp.lt.s32.totalorder (!%p110_p3), %s431_s6, 1 }
   0xe   : > { %s582_s7 = smov (!%p138_p5, %s435_s7), 1  ;;  %s584_s13 = smov (!%p140_p6, %s361_s13), 15  ;;  %vm172_vm0 = vcmask 64512   ;;  %vm263_vm1 = vcmask 1040384   ;;  %vm265_vm2 = vcmask 58368  }
   0xf   : > { %s363_s14 = sshll.u32 %s582_s7, 5  ;;  %s362_s15 = sshll.u32 %s584_s13, 1 }
  0x10   : > { %s144_s16 = sadd.s32 %s363_s14, %s362_s15  ;;  %s586_s6 = smov (!%p150_p7, %s431_s6), 1 }
  0x11   : > { %s364_s17 = sshll.u32 %s144_s16, 3  ;;  %s365_s21 = sshll.u32 %s582_s7, 1 }
  0x12   : > { %s498_s20 = scalar_lea.vmem %s569_s0, %s364_s17  ;;  %s153_s22 = sadd.s32 %s365_s21, %s586_s6 }
  0x13   : > { %v156_v0 = vld [vmem:[%s498_s20] sm:$0xff]  ;;  %v157_v1 = vld [vmem:[%s498_s20 + $0x8] sm:$0xff]  ;;  %v158_v2 = vld [vmem:[%s498_s20 + $0x10] sm:$0xff]  ;;  %s366_s23 = sshll.u32 %s153_s22, 1 }
  0x14   : > { %v173_v3 = vsel %vm172_vm0, %v156_v0, 0.0  ;;  %v174_v4 = vsel %vm172_vm0, %v157_v1, 0.0  ;;  %v176_v5 = vsel %vm172_vm0, %v158_v2, 0.0  ;;  %v159_v6 = vld [vmem:[%s498_s20 + $0x18] sm:$0xff]  ;;  %v160_v9 = vld [vmem:[%s498_s20 + $0x20] sm:$0xff]  ;;  %v161_v12 = vld [vmem:[%s498_s20 + $0x28] sm:$0xff]  ;;  %v210_v14 = vmul.f32 %v156_v0, %v156_v0  ;;  %s155_s26 = scalar_lea.vmem %s570_s1, %s366_s23 }
  0x15   : > { %v175_v7 = vadd.f32 %v174_v4, %v173_v3  ;;  %v178_v8 = vsel %vm172_vm0, %v159_v6, 0.0  ;;  %v180_v11 = vsel %vm172_vm0, %v160_v9, 0.0  ;;  %v211_v15 = vmul.f32 %v157_v1, %v157_v1  ;;  %v162_v18 = vld [vmem:[%s498_s20 + $0x30] sm:$0xff]  ;;  %v163_v23 = vld [vmem:[%s498_s20 + $0x38] sm:$0xff]  ;;  %v164_v30 = vld [vmem:[%s498_s20 + $0x40] sm:$0xff] }
  0x16   : > { %v212_v16 = vmul.f32 %v158_v2, %v158_v2  ;;  %v182_v17 = vsel %vm172_vm0, %v161_v12, 0.0  ;;  %v213_v20 = vmul.f32 %v159_v6, %v159_v6  ;;  %v184_v21 = vsel %vm172_vm0, %v162_v18, 0.0  ;;  %v165_v36 = vld [vmem:[%s498_s20 + $0x48] sm:$0xff]  ;;  %v166_v42 = vld [vmem:[%s498_s20 + $0x50] sm:$0xff]  ;;  %v167_v48 = vld [vmem:[%s498_s20 + $0x58] sm:$0xff] }
  0x17   : > { %v177_v10 = vadd.f32 %v176_v5, %v175_v7  ;;  %v214_v22 = vmul.f32 %v160_v9, %v160_v9  ;;  %v226_v25 = vsel %vm172_vm0, %v210_v14, 0.0  ;;  %v227_v26 = vsel %vm172_vm0, %v211_v15, 0.0  ;;  %v168_v54 = vld [vmem:[%s498_s20 + $0x60] sm:$0xff]  ;;  %v169_v60 = vld [vmem:[%s498_s20 + $0x68] sm:$0xff]  ;;  %v170_v2 = vld [vmem:[%s498_s20 + $0x70] sm:$0xff] }
  0x18   : > { %v229_v27 = vsel %vm172_vm0, %v212_v16, 0.0  ;;  %v186_v28 = vsel %vm172_vm0, %v163_v23, 0.0  ;;  %v228_v29 = vadd.f32 %v227_v26, %v226_v25  ;;  %v215_v32 = vmul.f32 %v161_v12, %v161_v12 }
  0x19   : > { %v179_v13 = vadd.f32 %v178_v8, %v177_v10  ;;  %v231_v33 = vsel %vm172_vm0, %v213_v20, 0.0  ;;  %v188_v34 = vsel %vm172_vm0, %v164_v30, 0.0  ;;  %v216_v38 = vmul.f32 %v162_v18, %v162_v18  ;;  %v171_v8 = vld [vmem:[%s498_s20 + $0x78] sm:$0xff] }
  0x1a   : > { %v230_v35 = vadd.f32 %v229_v27, %v228_v29  ;;  %v233_v39 = vsel %vm172_vm0, %v214_v22, 0.0  ;;  %v190_v40 = vsel %vm172_vm0, %v165_v36, 0.0  ;;  %v217_v44 = vmul.f32 %v163_v23, %v163_v23 }
  0x1b   : > { %v181_v19 = vadd.f32 %v180_v11, %v179_v13  ;;  %v235_v45 = vsel %vm172_vm0, %v215_v32, 0.0  ;;  %v192_v46 = vsel %vm172_vm0, %v166_v42, 0.0  ;;  %v218_v50 = vmul.f32 %v164_v30, %v164_v30 }
  0x1c   : > { %v232_v41 = vadd.f32 %v231_v33, %v230_v35  ;;  %v237_v51 = vsel %vm172_vm0, %v216_v38, 0.0  ;;  %v194_v52 = vsel %vm172_vm0, %v167_v48, 0.0  ;;  %v219_v56 = vmul.f32 %v165_v36, %v165_v36 }
  0x1d   : > { %v183_v24 = vadd.f32 %v182_v17, %v181_v19  ;;  %v239_v57 = vsel %vm172_vm0, %v217_v44, 0.0  ;;  %v196_v58 = vsel %vm172_vm0, %v168_v54, 0.0  ;;  %v220_v62 = vmul.f32 %v166_v42, %v166_v42 }
  0x1e   : > { %v234_v47 = vadd.f32 %v233_v39, %v232_v41  ;;  %v241_v63 = vsel %vm172_vm0, %v218_v50, 0.0  ;;  %v198_v0 = vsel %vm172_vm0, %v169_v60, 0.0  ;;  %v221_v4 = vmul.f32 %v167_v48, %v167_v48 }
  0x1f   : > { %v185_v31 = vadd.f32 %v184_v21, %v183_v24  ;;  %v243_v5 = vsel %vm172_vm0, %v219_v56, 0.0  ;;  %v200_v6 = vsel %vm172_vm0, %v170_v2, 0.0  ;;  %v222_v10 = vmul.f32 %v168_v54, %v168_v54 }
  0x20   : > { %v236_v53 = vadd.f32 %v235_v45, %v234_v47  ;;  %v245_v11 = vsel %vm172_vm0, %v220_v62, 0.0  ;;  %v202_v12 = vsel %vm172_vm0, %v171_v8, 0.0  ;;  %v223_v15 = vmul.f32 %v169_v60, %v169_v60 }
  0x21   : > { %v187_v37 = vadd.f32 %v186_v28, %v185_v31  ;;  %v247_v16 = vsel %vm172_vm0, %v221_v4, 0.0  ;;  %v224_v19 = vmul.f32 %v170_v2, %v170_v2  ;;  %v249_v20 = vsel %vm172_vm0, %v222_v10, 0.0 }
  0x22   : > { %v238_v59 = vadd.f32 %v237_v51, %v236_v53  ;;  %v225_v23 = vmul.f32 %v171_v8, %v171_v8  ;;  %v251_v24 = vsel %vm172_vm0, %v223_v15, 0.0 }
  0x23   : > { %v189_v43 = vadd.f32 %v188_v34, %v187_v37  ;;  %v253_v27 = vsel %vm172_vm0, %v224_v19, 0.0 }
  0x24   : > { %v240_v1 = vadd.f32 %v239_v57, %v238_v59  ;;  %v255_v29 = vsel %vm172_vm0, %v225_v23, 0.0 }
  0x25   : > { %v191_v49 = vadd.f32 %v190_v40, %v189_v43 }
  0x26   : > { %v242_v7 = vadd.f32 %v241_v63, %v240_v1 }
  0x27   : > { %v193_v55 = vadd.f32 %v192_v46, %v191_v49 }
  0x28   : > { %v244_v13 = vadd.f32 %v243_v5, %v242_v7 }
  0x29   : > { %v195_v61 = vadd.f32 %v194_v52, %v193_v55 }
  0x2a   : > { %v246_v17 = vadd.f32 %v245_v11, %v244_v13 }
  0x2b   : > { %v197_v3 = vadd.f32 %v196_v58, %v195_v61 }
  0x2c   : > { %v248_v21 = vadd.f32 %v247_v16, %v246_v17 }
  0x2d   : > { %v199_v9 = vadd.f32 %v198_v0, %v197_v3 }
  0x2e   : > { %v250_v25 = vadd.f32 %v249_v20, %v248_v21 }
  0x2f   : > { %v201_v14 = vadd.f32 %v200_v6, %v199_v9 }
  0x30   : > { %v252_v28 = vadd.f32 %v251_v24, %v250_v25 }
  0x31   : > { %v203_v18 = vadd.f32 %v202_v12, %v201_v14 }
  0x32   : > { %v254_v31 = vadd.f32 %v253_v27, %v252_v28 }
  0x33   : > { %v204_v22 = vrot.slane %v203_v18, 4 }
  0x34   : > { %v256_v32 = vadd.f32 %v255_v29, %v254_v31 }
  0x35   : > { %v205_v26 = vadd.f32 %v204_v22, %v203_v18 }
  0x36   : > { %v257_v34 = vrot.slane %v256_v32, 4 }
  0x37   : > { %v206_v30 = vrot.slane %v205_v26, 2 }
  0x38   : > { %v258_v35 = vadd.f32 %v257_v34, %v256_v32 }
  0x39   : > { %v207_v33 = vadd.f32 %v206_v30, %v205_v26 }
  0x3a   : > { %v259_v37 = vrot.slane %v258_v35, 2 }
  0x3b   : > { %v208_v36 = vrot.slane %v207_v33, 1 }
  0x3c   : > { %v260_v38 = vadd.f32 %v259_v37, %v258_v35 }
  0x3d   : > { %v209_v39 = vadd.f32 %v208_v36, %v207_v33 }
  0x3e   : > { %v261_v40 = vrot.slane %v260_v38, 1 }
  0x40   : > { %v262_v41 = vadd.f32 %v261_v40, %v260_v38 }
  0x42   : > { %v264_v42 = vsel %vm263_vm1, %v209_v39, %v262_v41 }
  0x43   : > { %266 = vst.msk [vmem:[%s155_s26] sm:$0x3] %vm265_vm2, %v264_v42 }
  0x44 PF: > { %s11_s10 = sadd.s32 1, %s447_s10   ;;  %s571_s6 = smov %s439_s8 }
  0x45   : > { %p8_p8 = scmp.ge.s32.totalorder %s11_s10, 6   ;;  %s572_s7 = smov %s443_s9 }
  0x46   : > { %s573_s8 = smov %s576_s11  ;;  %s574_s9 = smov %s580_s12 }
  0x47   :  { %10 = sbr.rel (!%p8_p8) target bundleno = 3 (0x3), region = 54 }

// kernel: encoder_block_2d.7
= control target key start
LH: loop header
LB: loop body
LE: loop exit
PB: predicated region body
PF: predicated region fallthrough
CT: control target
= control target key end

     0   :  { %s2308_s27 = smov 0   ;;  %s2310_s28 = smov 0   ;;  %s3069_s0 = inlined_call_operand.vmem [shape: f32[2,1,8], index: 0, kind: input, shape index: {}]   ;;  %s3070_s1 = inlined_call_operand.vmem [shape: f32[2,1,8], index: 1, kind: input, shape index: {}]   ;;  %s3071_s2 = inlined_call_operand.vmem [shape: f32[2,16,16,8], index: 2, kind: input, shape index: {}, may-alias: {2,3,4}]   ;;  %s3072_s3 = inlined_call_operand.vmem [shape: f32[2,16,16,8], index: 3, kind: input, shape index: {}, may-alias: {2,3,4}]   ;;  %s3073_s4 = inlined_call_operand.vmem [shape: f32[2,16,16,8], index: 4, kind: input, shape index: {}, may-alias: {2,3,4}]   ;;  %s3074_s5 = inlined_call_operand.vmem [shape: bf16[3,24,16], index: 5, kind: input, shape index: {}]   ;;  %s3075_s6 = inlined_call_operand.vmem [shape: f32[1,16], index: 6, kind: input, shape index: {}]   ;;  %s3076_s7 = inlined_call_operand.vmem [shape: f32[2,16,16,16], index: 7, kind: output, shape index: {0}]   ;;  %s3077_s8 = inlined_call_operand.vmem [shape: f32[2,2,2,16], index: 8, kind: output, shape index: {1}]  }
   0x1   :  { %s2312_s29 = smov 0   ;;  %s2314_s30 = smov 0  }
   0x2   :  { %s2316_s9 = smov 0  }
   0x3 LB: > { %s28_s10 = sadd.s32 1, %s2251_s29  ;;  %s31_s11 = sadd.s32 1, %s2255_s30  ;;  %s2259_s9 = sphi %s2316_s9, %s19_s9   ;;  %s2255_s30 = sphi %s2314_s30, %s3082_s30   ;;  %s2251_s29 = sphi %s2312_s29, %s3081_s29   ;;  %s2247_s28 = sphi %s2310_s28, %s3080_s28   ;;  %s2243_s27 = sphi %s2308_s27, %s3079_s27  }
   0x4   : > { %p29_p0 = scmp.ge.s32.totalorder %s28_s10, 2  ;;  %p1798_p1 = scmp.ge.s32.totalorder %s2259_s9, 1 }
   0x5   : > { %p369_p2 = scmp.lt.s32.totalorder %s2259_s9, 5 }
   0x6   : > { %s3084_s10 = smov (%p29_p0, %s28_s10), 0  ;;  %s3086_s11 = smov (!%p29_p0, %s31_s11), %s2255_s30 }
   0x7   : > { %p370_p3 = pnand %p1798_p1, %p369_p2  ;;  %p33_p4 = scmp.ge.s32.totalorder %s3086_s11, 2 }
   0x8   : > { %p453_p5 = scmp.lt.s32.totalorder (!%p370_p3), %s2247_s28, 1  ;;  %s2341_s12 = sshll.u32 (!%p370_p3), %s2243_s27, 3 }
   0x9   : > { %s3088_s11 = smov (%p33_p4, %s3086_s11), 0  ;;  %373 = sbr.rel (%p370_p3) target bundleno = 475 (0x1db), region = 48 }
   0xa   : > { %p479_p6 = scmp.lt.s32.totalorder (!%p370_p3), %s2341_s12, 15  ;;  %s2365_s24 = sadd.s32 (!%p370_p3), 4294967295, %s2341_s12 }
   0xb   : > { %p461_p7 = scmp.gt.s32.totalorder (!%p370_p3), %s2365_s24, 0  ;;  %p1801_p8 = scmp.lt.s32.totalorder (!%p370_p3), %s2365_s24, 15 }
   0xc   : > { %s1894_s15 = sadd.s32 (!%p370_p3), 8, %s2341_s12  ;;  %p517_p10 = scmp.lt.s32.totalorder (!%p370_p3), %s2243_s27, 1 }
   0xd   : > { %p2462_p9 = scmp.lt.s32.totalorder (!%p370_p3), %s1894_s15, 15  ;;  %p558_p11 = scmp.gt.s32.totalorder (!%p370_p3), %s2243_s27, 0 }
   0xe   : > { %s3090_s28 = smov (!%p453_p5, %s2247_s28), 1  ;;  %vm815_vm0 = vcmask 1046528   ;;  %vm766_vm1 = vcmask 1040384   ;;  %vm1074_vm2 = vcmask 1043456   ;;  %vm960_vm3 = vcmask 64512  }
   0xf   : > { %s480_s13 = scalar_select %p479_p6, %s2341_s12, 15  ;;  %vm977_vm4 = vcmask 130048   ;;  %vm1049_vm5 = vcmask 195584   ;;  %vm1564_vm6 = vcmask 123904  }
  0x10   : > { %s455_s16 = scalar_lea.vmem %s3069_s0, %s3090_s28  ;;  %s458_s19 = scalar_lea.vmem %s3070_s1, %s3090_s28 }
  0x11   : > { %s2356_s20 = sshll.u32 %s3090_s28, 5  ;;  %s1810_s21 = sshll.u32 %s480_s13, 1  ;;  %v2362_v0 = vld [vmem:[%s455_s16] ss:$0 sm:$0xff] }
  0x12   : > { %s2359_s22 = sadd.s32 %s1810_s21, %s2356_s20  ;;  %v2374_v1 = vld [vmem:[%s458_s19] ss:$0 sm:$0xff]  ;;  %s1824_s18 = sshll.u32 %s3090_s28, 1 }
  0x13   : > { %s1812_s23 = sshll.u32 %s2359_s22, 3  ;;  %s3094_s15 = smov (!%p2462_p9, %s1894_s15), 15 }
  0x14   : > { %s2372_s14 = scalar_lea.vmem %s3072_s3, %s1812_s23  ;;  %s3096_s15 = smov (!%p2462_p9, %s3094_s15), 15 }
  0x15   : > { %v598_v2 = vld [vmem:[%s2372_s14 + $0x40] sm:$0xff]  ;;  %v599_v3 = vld [vmem:[%s2372_s14 + $0x48] sm:$0xff]  ;;  %v600_v9 = vld [vmem:[%s2372_s14 + $0x50] sm:$0xff]  ;;  %s462_s13 = scalar_select %p461_p7, %s2365_s24, 0 }
  0x16   : > { %v590_v4 = vld [vmem:[%s2372_s14] sm:$0xff]  ;;  %v614_v5 = vmul.f32 %v2362_v0, %v598_v2  ;;  %v615_v6 = vmul.f32 %v2362_v0, %v599_v3  ;;  %v591_v7 = vld [vmem:[%s2372_s14 + $0x8] sm:$0xff]  ;;  %v601_v10 = vld [vmem:[%s2372_s14 + $0x58] sm:$0xff]  ;;  %v616_v12 = vmul.f32 %v2362_v0, %v600_v9  ;;  %s518_s19 = scalar_select %p517_p10, %s2243_s27, 1 }
  0x17   : > { %v606_v8 = vmul.f32 %v2362_v0, %v590_v4  ;;  %v607_v11 = vmul.f32 %v2362_v0, %v591_v7  ;;  %v617_v13 = vmul.f32 %v2362_v0, %v601_v10  ;;  %v592_v14 = vld [vmem:[%s2372_s14 + $0x10] sm:$0xff]  ;;  %v593_v15 = vld [vmem:[%s2372_s14 + $0x18] sm:$0xff]  ;;  %v602_v20 = vld [vmem:[%s2372_s14 + $0x60] sm:$0xff]  ;;  %s3092_s13 = smov (!%p1801_p8, %s462_s13), 15 }
  0x18   : > { %v2392_v16 = vadd.f32 %v2374_v1, %v614_v5  ;;  %v2395_v17 = vadd.f32 %v2374_v1, %v615_v6  ;;  %v608_v19 = vmul.f32 %v2362_v0, %v592_v14  ;;  %v603_v21 = vld [vmem:[%s2372_s14 + $0x68] sm:$0xff]  ;;  %v2408_v23 = vadd.f32 %v2374_v1, %v616_v12  ;;  %v594_v26 = vld [vmem:[%s2372_s14 + $0x20] sm:$0xff]  ;;  %v604_v28 = vld [vmem:[%s2372_s14 + $0x70] sm:$0xff]  ;;  %s1806_s17 = sshll.u32 %s3092_s13, 1  ;;  %s2496_s21 = sadd.s32 %s1824_s18, %s518_s19 }
  0x19   : > { %v2398_v18 = vadd.f32 %v2374_v1, %v606_v8  ;;  %v2405_v22 = vadd.f32 %v2374_v1, %v607_v11  ;;  %v2411_v24 = vadd.f32 %v2374_v1, %v617_v13  ;;  %v609_v25 = vmul.f32 %v2362_v0, %v593_v15  ;;  %v595_v27 = vld [vmem:[%s2372_s14 + $0x28] sm:$0xff]  ;;  %v605_v40 = vld [vmem:[%s2372_s14 + $0x78] sm:$0xff]  ;;  %v596_v50 = vld [vmem:[%s2372_s14 + $0x30] sm:$0xff]  ;;  %s469_s28 = sadd.s32 %s2356_s20, %s1806_s17  ;;  %s2261_s18 = smov 8  }
  0x1a   : > { %v1840_v29 = vmul.f32 -1.442695, %v2392_v16  ;;  %v1841_v30 = vmul.f32 -1.442695, %v2395_v17  ;;  %v2424_v32 = vadd.f32 %v2374_v1, %v608_v19  ;;  %v1842_v34 = vmul.f32 -1.442695, %v2408_v23 }
  0x1b   : > { %v1832_v31 = vmul.f32 -1.442695, %v2398_v18  ;;  %v1833_v33 = vmul.f32 -1.442695, %v2405_v22  ;;  %v1843_v35 = vmul.f32 -1.442695, %v2411_v24  ;;  %v2430_v36 = vadd.f32 %v2374_v1, %v609_v25 }
  0x1c   : > { %2141 = vpow2.f32 %v1840_v29  ;;  %v1834_v37 = vmul.f32 -1.442695, %v2424_v32  ;;  %v618_v38 = vmul.f32 %v2362_v0, %v602_v20  ;;  %v619_v39 = vmul.f32 %v2362_v0, %v603_v21  ;;  %v597_v51 = vld [vmem:[%s2372_s14 + $0x38] sm:$0xff]  ;;  %s1808_s12 = sshll.u32 %s469_s28, 3  ;;  %s1817_s14 = sshll.u32 %s3096_s15, 1 }
  0x1d   : > { %2143 = vpow2.f32 %v1841_v30  ;;  %v1835_v41 = vmul.f32 -1.442695, %v2430_v36  ;;  %v610_v42 = vmul.f32 %v2362_v0, %v594_v26  ;;  %v611_v43 = vmul.f32 %v2362_v0, %v595_v27  ;;  %s471_s26 = scalar_lea.vmem %s3071_s2, %s1808_s12  ;;  %s497_s13 = sadd.s32 %s1817_s14, %s2356_s20 }
  0x1e   : > { %2145 = vpow2.f32 %v1832_v31  ;;  %v2445_v44 = vadd.f32 %v2374_v1, %v618_v38  ;;  %v2448_v45 = vadd.f32 %v2374_v1, %v619_v39  ;;  %v620_v46 = vmul.f32 %v2362_v0, %v604_v28  ;;  %v526_v13 = vld [vmem:[%s471_s26] sm:$0xff]  ;;  %v527_v21 = vld [vmem:[%s471_s26 + $0x8] sm:$0xff]  ;;  %s1819_s15 = sshll.u32 %s497_s13, 3  ;;  %s2262_s19 = smov 16  }
  0x1f   : > { %2147 = vpow2.f32 %v1833_v33  ;;  %v2452_v47 = vadd.f32 %v2374_v1, %v610_v42  ;;  %v2455_v48 = vadd.f32 %v2374_v1, %v611_v43  ;;  %v621_v49 = vmul.f32 %v2362_v0, %v605_v40  ;;  %s499_s17 = scalar_lea.vmem %s3073_s4, %s1819_s15  ;;  %s2959_s13 = scalar_lea.vmem %s3076_s7, %s1812_s23 }
  0x20   : > { %2149 = vpow2.f32 %v1842_v34  ;;  %v1844_v52 = vmul.f32 -1.442695, %v2445_v44  ;;  %v2468_v53 = vadd.f32 %v2374_v1, %v620_v46  ;;  %v1845_v54 = vmul.f32 -1.442695, %v2448_v45  ;;  %s2655_s28 = scalar_select %p558_p11, 1, 0 }
  0x21   : > { %2151 = vpow2.f32 %v1843_v35  ;;  %v2473_v55 = vadd.f32 %v2374_v1, %v621_v49  ;;  %v1836_v56 = vmul.f32 -1.442695, %v2452_v47  ;;  %v612_v57 = vmul.f32 %v2362_v0, %v596_v50  ;;  %s1825_s22 = sshll.u32 %s2496_s21, 1 }
  0x22   : > { %2153 = vpow2.f32 %v1834_v37  ;;  %v613_v58 = vmul.f32 %v2362_v0, %v597_v51  ;;  %v1837_v59 = vmul.f32 -1.442695, %v2455_v48  ;;  %v1846_v60 = vmul.f32 -1.442695, %v2468_v53  ;;  %s560_s16 = scvt.s32.f32 %s2655_s28  ;;  %s522_s20 = scalar_lea.vmem %s3077_s8, %s1825_s22 }
  0x23   : > { %2155 = vpow2.f32 %v1835_v41  ;;  %v2490_v61 = vadd.f32 %v2374_v1, %v612_v57  ;;  %v1847_v63 = vmul.f32 -1.442695, %v2473_v55  ;;  %v534_v27 = vmul.f32 %v2362_v0, %v526_v13 }
  0x24   : > { %2157 = vpow2.f32 %v1844_v52  ;;  %v2493_v62 = vadd.f32 %v2374_v1, %v613_v58  ;;  %v535_v33 = vmul.f32 %v2362_v0, %v527_v21 }
  0x25   : > { %2159 = vpow2.f32 %v1845_v54  ;;  %v1838_v2 = vmul.f32 -1.442695, %v2490_v61  ;;  %v2510_v39 = vadd.f32 %v2374_v1, %v534_v27 }
  0x26   : > { %2161 = vpow2.f32 %v1836_v56  ;;  %v1839_v3 = vmul.f32 -1.442695, %v2493_v62  ;;  %v2516_v46 = vadd.f32 %v2374_v1, %v535_v33  ;;  %v564_v56 = vld [vmem:[%s499_s17] sm:$0xff] }
  0x27   : > { %2163 = vpow2.f32 %v1837_v59  ;;  %v1828_v54 = vmul.f32 -1.442695, %v2510_v39  ;;  %v565_v59 = vld [vmem:[%s499_s17 + $0x8] sm:$0xff]  ;;  %s585_s17 = scalar_select %p517_p10, 1, 0 }
  0x28   : > { %2165 = vpow2.f32 %v1846_v60 }
  0x29   : > { %v2142_v4 = vpop.eup %2141  ;;  %2167 = vpow2.f32 %v1847_v63  ;;  %s586_s28 = scvt.s32.f32 %s585_s17 }
  0x2a   : > { %v2144_v5 = vpop.eup %2143  ;;  %v694_v6 = vadd.f32 1.0, %v2142_v4  ;;  %2169 = vpow2.f32 %v1838_v2  ;;  %v1829_v2 = vmul.f32 -1.442695, %v2516_v46 }
  0x2b   : > { %v2146_v7 = vpop.eup %2145  ;;  %v695_v8 = vadd.f32 1.0, %v2144_v5  ;;  %2171 = vpow2.f32 %v1839_v3  ;;  %v566_v5 = vmul.f32 %v2362_v0, %v564_v56 }
  0x2c   : > { %v2148_v9 = vpop.eup %2147  ;;  %2173 = vrcp.f32 %v694_v6  ;;  %v686_v10 = vadd.f32 1.0, %v2146_v7 }
  0x2d   : > { %v2150_v11 = vpop.eup %2149  ;;  %2175 = vrcp.f32 %v695_v8  ;;  %v687_v12 = vadd.f32 1.0, %v2148_v9  ;;  %v567_v8 = vmul.f32 %v2362_v0, %v565_v59  ;;  %v2546_v13 = vadd.f32 %v2374_v1, %v566_v5 }
  0x2e   : > { %v2152_v14 = vpop.eup %2151  ;;  %2177 = vrcp.f32 %v686_v10  ;;  %v696_v15 = vadd.f32 1.0, %v2150_v11 }
  0x2f   : > { %v2154_v19 = vpop.eup %2153  ;;  %2179 = vrcp.f32 %v687_v12  ;;  %v697_v20 = vadd.f32 1.0, %v2152_v14 }
  0x30   : > { %v2156_v25 = vpop.eup %2155  ;;  %2181 = vrcp.f32 %v696_v15  ;;  %v688_v26 = vadd.f32 1.0, %v2154_v19  ;;  %v2553_v15 = vadd.f32 %v2374_v1, %v567_v8 }
  0x31   : > { %v2158_v28 = vpop.eup %2157  ;;  %2183 = vrcp.f32 %v697_v20  ;;  %v689_v29 = vadd.f32 1.0, %v2156_v25 }
  0x32   : > { %v2160_v30 = vpop.eup %2159  ;;  %2185 = vrcp.f32 %v688_v26  ;;  %v698_v31 = vadd.f32 1.0, %v2158_v28 }
  0x33   : > { %v2162_v34 = vpop.eup %2161  ;;  %2187 = vrcp.f32 %v689_v29  ;;  %v699_v35 = vadd.f32 1.0, %v2160_v30 }
  0x34   : > { %v2164_v37 = vpop.eup %2163  ;;  %2189 = vrcp.f32 %v698_v31  ;;  %v690_v38 = vadd.f32 1.0, %v2162_v34  ;;  %v1830_v31 = vmul.f32 -1.442695, %v2546_v13 }
  0x35   : > { %v2166_v40 = vpop.eup %2165  ;;  %2191 = vrcp.f32 %v699_v35  ;;  %v691_v41 = vadd.f32 1.0, %v2164_v37 }
  0x36   : > { %v2168_v42 = vpop.eup %2167  ;;  %2193 = vrcp.f32 %v690_v38  ;;  %v700_v43 = vadd.f32 1.0, %v2166_v40 }
  0x37   : > { %v2170_v49 = vpop.eup %2169  ;;  %2195 = vrcp.f32 %v691_v41  ;;  %v701_v50 = vadd.f32 1.0, %v2168_v42 }
  0x38   : > { %v2172_v51 = vpop.eup %2171  ;;  %2197 = vrcp.f32 %v700_v43  ;;  %v692_v52 = vadd.f32 1.0, %v2170_v49 }
  0x39   : > { %v2174_v57 = vpop.eup %2173  ;;  %2199 = vrcp.f32 %v701_v50  ;;  %v693_v58 = vadd.f32 1.0, %v2172_v51 }
  0x3a   : > { %v2176_v60 = vpop.eup %2175  ;;  %v2520_v63 = vmul.f32 %v2174_v57, %v2392_v16  ;;  %2201 = vrcp.f32 %v692_v52 }
  0x3b   : > { %v2178_v3 = vpop.eup %2177  ;;  %v2524_v4 = vmul.f32 %v2176_v60, %v2395_v17  ;;  %2203 = vrcp.f32 %v693_v58 }
  0x3c   : > { %v2180_v6 = vpop.eup %2179  ;;  %v2528_v7 = vmul.f32 %v2178_v3, %v2398_v18  ;;  %2205 = vpow2.f32 %v1828_v54 }
  0x3d   : > { %v2182_v9 = vpop.eup %2181  ;;  %v2035_v16 = vpack.i.bf16 %v2524_v4, %v2520_v63  ;;  %v2534_v10 = vmul.f32 %v2180_v6, %v2405_v22  ;;  %2207 = vpow2.f32 %v1829_v2  ;;  %v832_v21 = vrot.slane %v2524_v4, 1 }
  0x3e   : > { %v2184_v11 = vpop.eup %2183  ;;  %v2537_v17 = vmul.f32 %v2182_v9, %v2408_v23  ;;  %v831_v23 = vrot.slane %v2520_v63, 1  ;;  %v783_v34 = vrot.slane %v2524_v4, 7 }
  0x3f   : > { %v2186_v12 = vpop.eup %2185  ;;  %2036 = vrot.lane.b32.xlu0 %v2035_v16, %s2261_s18  ;;  %v2045_v18 = vpack.i.bf16 %v2534_v10, %v2528_v7  ;;  %v2543_v0 = vmul.f32 %v2184_v11, %v2411_v24  ;;  %v820_v28 = vrot.slane %v2534_v10, 1  ;;  %v853_v43 = vsel %vm815_vm0, %v832_v21, 0.0 }
  0x40   : > { %v2188_v22 = vpop.eup %2187  ;;  %v2549_v14 = vmul.f32 %v2186_v12, %v2424_v32  ;;  %v819_v32 = vrot.slane %v2528_v7, 1  ;;  %v834_v1 = vrot.slane %v2537_v17, 1  ;;  %v833_v42 = vsel %vm815_vm0, %v831_v23, %v832_v21 }
  0x41   : > { %v2190_v19 = vpop.eup %2189  ;;  %2046 = vrot.lane.b32.xlu1 %v2045_v18, %s2261_s18  ;;  %v2040_v24 = vpack.i.bf16 %v2543_v0, %v2537_v17  ;;  %v2559_v20 = vmul.f32 %v2188_v22, %v2430_v36  ;;  %v835_v27 = vrot.slane %v2543_v0, 1  ;;  %v2599_v52 = vsel %vm815_vm0, %v820_v28, 0.0 }
  0x42   : > { %v2192_v25 = vpop.eup %2191  ;;  %v2564_v26 = vmul.f32 %v2190_v19, %v2445_v44  ;;  %v782_v44 = vrot.slane %v2520_v63, 7  ;;  %v822_v37 = vrot.slane %v2549_v14, 1  ;;  %v2596_v51 = vsel %vm815_vm0, %v819_v32, %v820_v28 }
  0x43   : > { %v2194_v29 = vpop.eup %2193  ;;  %2041 = vrot.lane.b32.xlu0 %v2040_v24, %s2261_s18  ;;  %v2050_v36 = vpack.i.bf16 %v2559_v20, %v2549_v14  ;;  %v2573_v30 = vmul.f32 %v2192_v25, %v2448_v45  ;;  %v823_v38 = vrot.slane %v2559_v20, 1  ;;  %v836_v50 = vsel %vm815_vm0, %v834_v1, %v835_v27 }
  0x44   : > { %v2196_v33 = vpop.eup %2195  ;;  %v2579_v35 = vmul.f32 %v2194_v29, %v2452_v47  ;;  %v837_v57 = vrot.slane %v2564_v26, 1  ;;  %v771_v8 = vrot.slane %v2534_v10, 7  ;;  %v2075_v9 = vpack.i.bf16 %v853_v43, %v833_v42 }
  0x45   : > { %v2198_v40 = vpop.eup %2197  ;;  %2051 = vrot.lane.b32.xlu1 %v2050_v36, %s2261_s18  ;;  %v2055_v45 = vpack.i.bf16 %v2573_v30, %v2564_v26  ;;  %v2587_v41 = vmul.f32 %v2196_v33, %v2455_v48  ;;  %v2613_v60 = vsel %vm815_vm0, %v822_v37, %v823_v38  ;;  %v2616_v2 = vsel %vm815_vm0, %v823_v38, 0.0 }
  0x46   : > { %v2200_v49 = vpop.eup %2199  ;;  %v2592_v47 = vmul.f32 %v2198_v40, %v2468_v53  ;;  %v854_v53 = vsel %vm815_vm0, %v835_v27, 0.0  ;;  %v838_v3 = vrot.slane %v2573_v30, 1  ;;  %v1831_v11 = vmul.f32 -1.442695, %v2553_v15  ;;  %v2135_v40 = vld [vmem:[%s3074_s5 + $0x14] ss:$0 sps:$4 sm:$0xff]  }
  0x47   : > { %v2202_v54 = vpop.eup %2201  ;;  %2056 = vrot.lane.b32.xlu0 %v2055_v45, %s2261_s18  ;;  %v2065_v48 = vpack.i.bf16 %v2587_v41, %v2579_v35  ;;  %v2605_v56 = vmul.f32 %v2200_v49, %v2473_v55  ;;  %v2080_v22 = vpack.i.bf16 %v854_v53, %v836_v50  ;;  %v825_v23 = vrot.slane %v2579_v35, 1  ;;  %1990 = vmatprep.subr.msk.bf16.mxu1 %vm1074_vm2, %v2135_v40 }
  0x48   : > { %v2204_v58 = vpop.eup %2203  ;;  %v2610_v59 = vmul.f32 %v2202_v54, %v2490_v61  ;;  %v1013_v61 = vrot.slane %v2592_v47, 1  ;;  %v2090_v19 = vpack.i.bf16 %v2616_v2, %v2613_v60  ;;  %v2639_v24 = vsel %vm815_vm0, %v837_v57, %v838_v3  ;;  %v2136_v54 = vld [vmem:[%s3074_s5 + $0xc] sm:$0xff]   ;;  %1989 = vmatprep.subr.msk.bf16.mxu0 %vm1074_vm2, %v2135_v40 }
  0x49   : > { %v2206_v4 = vpop.eup %2205  ;;  %2066 = vrot.lane.b32.xlu1 %v2065_v48, %s2261_s18  ;;  %v2060_v55 = vpack.i.bf16 %v2605_v56, %v2592_v47  ;;  %v2623_v5 = vmul.f32 %v2204_v58, %v2493_v62  ;;  %v1014_v6 = vrot.slane %v2605_v56, 1  ;;  %v2085_v62 = vpack.i.bf16 %v2599_v52, %v2596_v51 }
  0x4a   : > { %v550_v16 = vadd.f32 1.0, %v2206_v4  ;;  %v2208_v12 = vpop.eup %2207  ;;  %v855_v32 = vsel %vm815_vm0, %v838_v3, 0.0  ;;  %v2647_v1 = vsel %vm766_vm1, %v782_v44, %v783_v34  ;;  %v785_v28 = vrot.slane %v2537_v17, 7 }
  0x4b   : > { %2061 = vrot.lane.b32.xlu0 %v2060_v55, %s2261_s18  ;;  %v2070_v18 = vpack.i.bf16 %v2623_v5, %v2610_v59  ;;  %v551_v21 = vadd.f32 1.0, %v2208_v12  ;;  %v1015_v25 = vsel %vm815_vm0, %v1013_v61, %v1014_v6  ;;  %v1017_v27 = vsel %vm815_vm0, %v1014_v6, 0.0 }
  0x4c   : > { %2209 = vrcp.f32 %v550_v16  ;;  %v786_v29 = vrot.slane %v2543_v0, 7  ;;  %v773_v36 = vrot.slane %v2549_v14, 7  ;;  %v788_v33 = vrot.slane %v2564_v26, 7 }
  0x4d   : > { %2071 = vrot.lane.b32.xlu1 %v2070_v18, %s2261_s18  ;;  %2211 = vpow2.f32 %v1830_v31  ;;  %v774_v31 = vrot.slane %v2559_v20, 7  ;;  %v826_v34 = vrot.slane %v2587_v41, 1  ;;  %v789_v0 = vrot.slane %v2573_v30, 7  ;;  %v2137_v30 = vld [vmem:[%s3074_s5 + $0x8] ss:$0 sps:$4 sm:$0xff]  }
  0x4e   : > { %2213 = vrcp.f32 %v551_v21  ;;  %v2664_v37 = vsel %vm766_vm1, %v785_v28, %v786_v29  ;;  %v776_v38 = vrot.slane %v2579_v35, 7  ;;  %v828_v20 = vrot.slane %v2610_v59, 1 }
  0x4f   : > { %2081 = vrot.lane.b32.xlu0 %v2080_v22, %s2262_s19  ;;  %2215 = vpow2.f32 %v1831_v11  ;;  %v829_v45 = vrot.slane %v2623_v5, 1  ;;  %v2677_v42 = vsel %vm766_vm1, %v773_v36, %v774_v31  ;;  %v777_v43 = vrot.slane %v2587_v41, 7  ;;  %v2138_v41 = vld [vmem:[%s3074_s5 + $0x20] ss:$0 sps:$4 sm:$0xff]  }
  0x50   : > { %v2100_v49 = vpack.i.bf16 %v1017_v27, %v1015_v25  ;;  %v2686_v50 = vsel %vm766_vm1, %v788_v33, %v789_v0  ;;  %v1007_v51 = vrot.slane %v2592_v47, 7  ;;  %v1008_v52 = vrot.slane %v2605_v56, 7 }
  0x51   : > { %2076 = vrot.lane.b32.xlu1 %v2075_v9, %s2262_s19  ;;  %v2700_v48 = vsel %vm766_vm1, %v776_v38, %v777_v43  ;;  %v779_v53 = vrot.slane %v2610_v59, 7  ;;  %v780_v56 = vrot.slane %v2623_v5, 7  ;;  %v827_v57 = vsel %vm815_vm0, %v825_v23, %v826_v34 }
  0x52   : > { %v851_v58 = vsel %vm815_vm0, %v826_v34, 0.0  ;;  %v2709_v60 = vsel %vm766_vm1, %v1007_v51, %v1008_v52  ;;  %v1076_v2 = vsel %vm1074_vm2, %v2135_v40, 0  ;;  %v2095_v3 = vpack.i.bf16 %v855_v32, %v2639_v24 }
  0x53   : > { %2086 = vrot.lane.b32.xlu0 %v2085_v62, %s2262_s19  ;;  %v2720_v4 = vsel %vm766_vm1, %v779_v53, %v780_v56  ;;  %1987 = vmatpush3.bf16.msra.mxu1 %v1076_v2  ;;  %v2723_v55 = vsel %vm1074_vm2, %v2137_v30, 0  ;;  %v830_v5 = vsel %vm815_vm0, %v828_v20, %v829_v45  ;;  %v852_v61 = vsel %vm815_vm0, %v829_v45, 0.0 }
  0x54   : > { %1926 = vmatpush3.bf16.msra.mxu0 %v1076_v2  ;;  %1986 = vmatprep.subr.bf16.mxu1 %v2136_v54  ;;  %v770_v6 = vrot.slane %v2528_v7, 7  ;;  %v2729_v9 = vsel %vm1074_vm2, %v2138_v41, 0  ;;  %v2105_v16 = vpack.i.bf16 %v851_v58, %v827_v57  ;;  %v2110_v18 = vpack.i.bf16 %v852_v61, %v830_v5 }
  0x55   : > { %2091 = vrot.lane.b32.xlu1 %v2090_v19, %s2262_s19  ;;  %1927 = vmatprep.subr.bf16.mxu0 %v2136_v54  ;;  %v561_v22 = vstv %s560_s16  ;;  %v587_v43 = vstv %s586_s28  ;;  %v2796_v63 = vsel %vm766_vm1, 0.0, %v788_v33  ;;  %v2803_v17 = vsel %vm766_vm1, 0.0, %v776_v38 }
  0x56   : > { %v2737_v11 = vsel %vm766_vm1, %v770_v6, %v771_v8  ;;  %v1012_v14 = vsel %vm766_vm1, 0.0, %v1007_v51  ;;  %v2814_v33 = vsel %vm766_vm1, 0.0, %v779_v53 }
  0x57   : > { %2101 = vrot.lane.b32.xlu0 %v2100_v49, %s2262_s19  ;;  %1988 = vmatpush3.bf16.msra.mxu1 %v2136_v54 }
  0x58   : > { %1928 = vmatpush3.bf16.msra.mxu0 %v2136_v54  ;;  %1991 = vmatprep.subr.msk.bf16.mxu1 %vm1074_vm2, %v2137_v30 }
  0x59   : > { %v2210_v12 = vpop.eup %2209  ;;  %2096 = vrot.lane.b32.xlu1 %v2095_v3, %s2262_s19  ;;  %1992 = vmatprep.subr.msk.bf16.mxu0 %vm1074_vm2, %v2138_v41 }
  0x5a   : > { %v2212_v62 = vpop.eup %2211  ;;  %v556_v23 = vmul.f32 %v2210_v12, %v2510_v39 }
  0x5b   : > { %v2214_v19 = vpop.eup %2213  ;;  %2106 = vrot.lane.b32.xlu0 %v2105_v16, %s2262_s19  ;;  %v576_v10 = vadd.f32 1.0, %v2212_v62 }
  0x5c   : > { %v2216_v8 = vpop.eup %2215  ;;  %v557_v24 = vmul.f32 %v2214_v19, %v2516_v46  ;;  %v2745_v21 = vmul.f32 %v561_v22, %v556_v23  ;;  %v812_v19 = vsel %vm766_vm1, 0.0, %v782_v44 }
  0x5d   : > { %2111 = vrot.lane.b32.xlu1 %v2110_v18, %s2262_s19  ;;  %v577_v32 = vadd.f32 1.0, %v2216_v8  ;;  %2217 = vrcp.f32 %v576_v10 }
  0x5e   : > { %v563_v39 = vmul.f32 %v561_v22, %v557_v24  ;;  %v816_v25 = vrot.slane %v2745_v21, 1  ;;  %v767_v27 = vrot.slane %v2745_v21, 7 }
  0x5f   : > { %2219 = vrcp.f32 %v577_v32  ;;  %v813_v32 = vsel %vm766_vm1, 0.0, %v785_v28  ;;  %v808_v28 = vsel %vm766_vm1, 0.0, %v770_v6 }
  0x60   : > { %v2115_v29 = vpack.i.bf16 %v563_v39, %v2745_v21  ;;  %v817_v31 = vrot.slane %v563_v39, 1  ;;  %v768_v34 = vrot.slane %v563_v39, 7  ;;  %v809_v39 = vsel %vm766_vm1, 0.0, %v773_v36 }
  0x62   : > { %2116 = vrot.lane.b32.xlu0 %v2115_v29, %s2261_s18  ;;  %v818_v46 = vsel %vm815_vm0, %v816_v25, %v817_v31  ;;  %v848_v0 = vsel %vm815_vm0, %v817_v31, 0.0  ;;  %v2759_v40 = vsel %vm766_vm1, %v767_v27, %v768_v34 }
  0x63   : > { %v2120_v20 = vpack.i.bf16 %v848_v0, %v818_v46 }
  0x65   : > { %2121 = vrot.lane.b32.xlu1 %v2120_v20, %s2262_s19 }
  0x6a   : > { %v2218_v45 = vpop.eup %2217 }
  0x6b   : > { %v582_v30 = vmul.f32 %v2218_v45, %v2546_v13 }
  0x6c   : > { %v2220_v49 = vpop.eup %2219 }
  0x6d   : > { %v583_v52 = vmul.f32 %v2220_v49, %v2553_v15  ;;  %v2764_v54 = vmul.f32 %v587_v43, %v582_v30 }
  0x6f   : > { %v589_v41 = vmul.f32 %v587_v43, %v583_v52  ;;  %v1295_v56 = vrot.slane %v2764_v54, 1  ;;  %v1289_v57 = vrot.slane %v2764_v54, 7 }
  0x71   : > { %v2125_v58 = vpack.i.bf16 %v589_v41, %v2764_v54  ;;  %v1296_v2 = vrot.slane %v589_v41, 1  ;;  %v1290_v3 = vrot.slane %v589_v41, 7 }
  0x73   : > { %2126 = vrot.lane.b32.xlu0 %v2125_v58, %s2261_s18  ;;  %v1297_v5 = vsel %vm815_vm0, %v1295_v56, %v1296_v2  ;;  %v1299_v13 = vsel %vm815_vm0, %v1296_v2, 0.0  ;;  %v2775_v15 = vsel %vm766_vm1, %v1289_v57, %v1290_v3 }
  0x74   : > { %v2130_v61 = vpack.i.bf16 %v1299_v13, %v1297_v5 }
  0x76   : > { %2131 = vrot.lane.b32.xlu1 %v2130_v61, %s2262_s19 }
  0xb1   : > { %v2037_v16 = vpop.permute.xlu0 %2036 }
  0xb2   : > { %v2039_v8 = vunpack.i.h.bf16 %v2037_v16  ;;  %v2038_v24 = vunpack.i.l.bf16 %v2037_v16 }
  0xb3   : > { %v2047_v12 = vpop.permute.xlu1 %2046 }
  0xb4   : > { %v2048_v25 = vunpack.i.l.bf16 %v2047_v12  ;;  %v2049_v26 = vunpack.i.h.bf16 %v2047_v12  ;;  %v971_v38 = vsel %vm960_vm3, %v812_v19, %v2038_v24  ;;  %v972_v47 = vsel %vm960_vm3, %v2647_v1, %v2039_v8 }
  0xb5   : > { %v2042_v18 = vpop.permute.xlu0 %2041 }
  0xb6   : > { %v2044_v29 = vunpack.i.h.bf16 %v2042_v18  ;;  %v2043_v31 = vunpack.i.l.bf16 %v2042_v18  ;;  %v963_v59 = vsel %vm960_vm3, %v808_v28, %v2048_v25  ;;  %v964_v52 = vsel %vm960_vm3, %v2737_v11, %v2049_v26 }
  0xb7   : > { %v2052_v22 = vpop.permute.xlu1 %2051 }
  0xb8   : > { %v2054_v36 = vunpack.i.h.bf16 %v2052_v22  ;;  %v974_v7 = vsel %vm960_vm3, %v2664_v37, %v2044_v29  ;;  %v973_v6 = vsel %vm960_vm3, %v813_v32, %v2043_v31  ;;  %v2053_v46 = vunpack.i.l.bf16 %v2052_v22  ;;  %v2139_v22 = vld [vmem:[%s3074_s5] sm:$0xff]  }
  0xb9   : > { %v2778_v62 = vpop.permute.xlu0 %2056 }
  0xba   : > { %v966_v1 = vsel %vm960_vm3, %v2677_v42, %v2054_v36  ;;  %v2059_v30 = vunpack.i.h.bf16 %v2778_v62  ;;  %v965_v3 = vsel %vm960_vm3, %v809_v39, %v2053_v46  ;;  %v2058_v8 = vunpack.i.l.bf16 %v2778_v62 }
  0xbb   : > { %v2780_v23 = vpop.permute.xlu1 %2066 }
  0xbc   : > { %v976_v19 = vsel %vm960_vm3, %v2686_v50, %v2059_v30  ;;  %v2068_v50 = vunpack.i.l.bf16 %v2780_v23 }
  0xbd   : > { %v2785_v10 = vpop.permute.xlu0 %2061 }
  0xbe   : > { %v2064_v5 = vunpack.i.h.bf16 %v2785_v10  ;;  %v2063_v42 = vunpack.i.l.bf16 %v2785_v10  ;;  %v2069_v10 = vunpack.i.h.bf16 %v2780_v23 }
  0xbf   : > { %v2798_v44 = vpop.permute.xlu1 %2071 }
  0xc0   : > { %v1032_v62 = vsel %vm960_vm3, %v2709_v60, %v2064_v5  ;;  %v1031_v28 = vsel %vm960_vm3, %v1012_v14, %v2063_v42  ;;  %v975_v60 = vsel %vm960_vm3, %v2796_v63, %v2058_v8  ;;  %v2074_v14 = vunpack.i.h.bf16 %v2798_v44 }
  0xc1   : > { %v2082_v35 = vpop.permute.xlu0 %2081  ;;  %v968_v63 = vsel %vm960_vm3, %v2700_v48, %v2069_v10 }
  0xc2   : > { %v2084_v51 = vunpack.i.h.bf16 %v2082_v35  ;;  %v2083_v34 = vunpack.i.l.bf16 %v2082_v35  ;;  %v2140_v35 = vld [vmem:[%s3074_s5 + $0x18] sm:$0xff]  }
  0xc3   : > { %v2077_v0 = vpop.permute.xlu1 %2076 }
  0xc4   : > { %v990_v53 = vsel %vm977_vm4, %v973_v6, %v2083_v34  ;;  %v991_v20 = vsel %vm977_vm4, %v974_v7, %v2084_v51  ;;  %v2079_v45 = vunpack.i.h.bf16 %v2077_v0  ;;  %v2078_v43 = vunpack.i.l.bf16 %v2077_v0 }
  0xc5   : > { %v2828_v49 = vpack.c.bf16 %v991_v20, %v990_v53  ;;  %v2087_v37 = vpop.permute.xlu0 %2086  ;;  %v967_v53 = vsel %vm960_vm3, %v2803_v17, %v2068_v50 }
  0xc6   : > { %v2089_v41 = vunpack.i.h.bf16 %v2087_v37  ;;  %v2088_v56 = vunpack.i.l.bf16 %v2087_v37  ;;  %v988_v58 = vsel %vm977_vm4, %v971_v38, %v2078_v43  ;;  %v989_v2 = vsel %vm977_vm4, %v972_v47, %v2079_v45 }
  0xc7   : > { %v2092_v13 = vpop.permute.xlu1 %2091  ;;  %v2837_v61 = vpack.c.bf16 %v989_v2, %v988_v58 }
  0xc8   : > { %v2094_v16 = vunpack.i.h.bf16 %v2092_v13  ;;  %v2093_v12 = vunpack.i.l.bf16 %v2092_v13  ;;  %v980_v18 = vsel %vm977_vm4, %v963_v59, %v2088_v56  ;;  %v981_v11 = vsel %vm977_vm4, %v964_v52, %v2089_v41 }
  0xc9   : > { %1937 = vmatprep.mubr.msk.bf16.mxu1 %vm1049_vm5, %v2837_v61  ;;  %v2102_v24 = vpop.permute.xlu0 %2101  ;;  %v2850_v32 = vpack.c.bf16 %v981_v11, %v980_v18 }
  0xca   : > { %v982_v39 = vsel %vm977_vm4, %v965_v3, %v2093_v12  ;;  %v983_v25 = vsel %vm977_vm4, %v966_v1, %v2094_v16  ;;  %1938 = vmatmul.mubr.msk.bf16.vlgmr.msra.gmra.mxu1 %vm1049_vm5, %v2828_v49  ;;  %v2104_v29 = vunpack.i.h.bf16 %v2102_v24  ;;  %v2103_v31 = vunpack.i.l.bf16 %v2102_v24 }
  0xcb   : > { %v996_v26 = vpack.c.bf16 %v983_v25, %v982_v39  ;;  %v2097_v36 = vpop.permute.xlu1 %2096  ;;  %1946 = vmatpush3.bf16.msra.mxu1 %v2723_v55  ;;  %1929 = vmatprep.mubr.msk.bf16.mxu0 %vm1049_vm5, %v2850_v32  ;;  %v2073_v55 = vunpack.i.l.bf16 %v2798_v44 }
  0xcc   : > { %v2099_v38 = vunpack.i.h.bf16 %v2097_v36  ;;  %v2098_v47 = vunpack.i.l.bf16 %v2097_v36  ;;  %v1034_v23 = vsel %vm977_vm4, %v1032_v62, %v2104_v29  ;;  %v1033_v51 = vsel %vm977_vm4, %v1031_v28, %v2103_v31  ;;  %1947 = vmatprep.subr.bf16.mxu1 %v2139_v22 }
  0xcd   : > { %v2872_v34 = vpack.c.bf16 %v1034_v23, %v1033_v51  ;;  %1930 = vmatmul.mubr.msk.bf16.vlgmr.msra.gmra.mxu0 %vm1049_vm5, %v996_v26  ;;  %v2107_v7 = vpop.permute.xlu0 %2106  ;;  %v969_v37 = vsel %vm960_vm3, %v2814_v33, %v2073_v55 }
  0xce   : > { %v993_v6 = vsel %vm977_vm4, %v976_v19, %v2099_v38  ;;  %v992_v46 = vsel %vm977_vm4, %v975_v60, %v2098_v47  ;;  %1966 = vmatpush3.bf16.msra.mxu0 %v2729_v9  ;;  %v2109_v0 = vunpack.i.h.bf16 %v2107_v7  ;;  %v2108_v59 = vunpack.i.l.bf16 %v2107_v7  ;;  %v2952_v7 = vld [vmem:[%s3075_s6] ss:$0 sm:$0xff] }
  0xcf   : > { %v1001_v44 = vpack.c.bf16 %v993_v6, %v992_v46  ;;  %v2112_v20 = vpop.permute.xlu1 %2111  ;;  %1948 = vmatpush3.bf16.msra.mxu1 %v2139_v22  ;;  %1967 = vmatprep.subr.bf16.mxu0 %v2140_v35  ;;  %v970_v9 = vsel %vm960_vm3, %v2720_v4, %v2074_v14  ;;  %v807_v4 = vsel %vm766_vm1, 0.0, %v767_v27  ;;  %v1294_v27 = vsel %vm766_vm1, 0.0, %v1289_v57 }
  0xd0   : > { %v2114_v45 = vunpack.i.h.bf16 %v2112_v20  ;;  %v2113_v43 = vunpack.i.l.bf16 %v2112_v20  ;;  %v985_v1 = vsel %vm977_vm4, %v968_v63, %v2109_v0  ;;  %v984_v30 = vsel %vm977_vm4, %v967_v53, %v2108_v59 }
  0xd1   : > { %v997_v48 = vpack.c.bf16 %v985_v1, %v984_v30  ;;  %1941 = vmatprep.mubr.msk.bf16.mxu1 %vm1049_vm5, %v1001_v44 }
  0xd2   : > { %v986_v17 = vsel %vm977_vm4, %v969_v37, %v2113_v43  ;;  %v987_v52 = vsel %vm977_vm4, %v970_v9, %v2114_v45  ;;  %1942 = vmatmul.mubr.msk.bf16.gmra.mxu1 %vm1049_vm5, %v2872_v34  ;;  %1968 = vmatpush3.bf16.msra.mxu0 %v2140_v35 }
  0xd3   : > { %v998_v41 = vpack.c.bf16 %v987_v52, %v986_v17  ;;  %1933 = vmatprep.mubr.msk.bf16.mxu0 %vm1049_vm5, %v997_v48 }
  0xd4   : > { %v2117_v56 = vpop.permute.xlu0 %2116 }
  0xd5   : > { %v2119_v33 = vunpack.i.h.bf16 %v2117_v56  ;;  %v2118_v58 = vunpack.i.l.bf16 %v2117_v56  ;;  %1934 = vmatmul.mubr.msk.bf16.gmra.mxu0 %vm1049_vm5, %v998_v41 }
  0xd6   : > { %1969 = vmatprep.mubr.msk.bf16.mxu0 %vm1049_vm5, %v996_v26 }
  0xd7   : > { %v961_v2 = vsel %vm960_vm3, %v807_v4, %v2118_v58  ;;  %v962_v3 = vsel %vm960_vm3, %v2759_v40, %v2119_v33  ;;  %v2122_v5 = vpop.permute.xlu1 %2121 }
  0xd8   : > { %v2124_v42 = vunpack.i.h.bf16 %v2122_v5  ;;  %v2123_v13 = vunpack.i.l.bf16 %v2122_v5 }
  0xda   : > { %v978_v16 = vsel %vm977_vm4, %v961_v2, %v2123_v13  ;;  %v979_v21 = vsel %vm977_vm4, %v962_v3, %v2124_v42 }
  0xdb   : > { %v994_v12 = vpack.c.bf16 %v979_v21, %v978_v16 }
  0xdd   : > { %1949 = vmatprep.mubr.msk.bf16.mxu1 %vm1049_vm5, %v994_v12  ;;  %1970 = vmatmul.mubr.msk.bf16.vlgmr.msra.gmra.mxu0 %vm1049_vm5, %v997_v48 }
  0xde   : > { %1950 = vmatmul.mubr.msk.bf16.vlgmr.msra.gmra.mxu1 %vm1049_vm5, %v2850_v32  ;;  %1973 = vmatprep.mubr.msk.bf16.mxu0 %vm1049_vm5, %v998_v41 }
  0xdf   : > { %1953 = vmatprep.mubr.msk.bf16.mxu1 %vm1049_vm5, %v996_v26 }
  0xe5   : > { %1974 = vmatmul.mubr.msk.bf16.gmra.mxu0 %vm1049_vm5, %v2837_v61  ;;  %v2127_v40 = vpop.permute.xlu0 %2126 }
  0xe6   : > { %1954 = vmatmul.mubr.msk.bf16.gmra.mxu1 %vm1049_vm5, %v997_v48  ;;  %1977 = vmatprep.mubr.msk.bf16.mxu0 %vm1049_vm5, %v2828_v49  ;;  %v2129_v18 = vunpack.i.h.bf16 %v2127_v40  ;;  %v2128_v11 = vunpack.i.l.bf16 %v2127_v40 }
  0xe7   : > { %1957 = vmatprep.mubr.msk.bf16.mxu1 %vm1049_vm5, %v998_v41 }
  0xe8   : > { %v1314_v22 = vsel %vm960_vm3, %v2775_v15, %v2129_v18  ;;  %v1313_v19 = vsel %vm960_vm3, %v1294_v27, %v2128_v11  ;;  %v2132_v8 = vpop.permute.xlu1 %2131 }
  0xe9   : > { %v2134_v10 = vunpack.i.h.bf16 %v2132_v8  ;;  %v2133_v54 = vunpack.i.l.bf16 %v2132_v8 }
  0xeb   : > { %v1316_v57 = vsel %vm977_vm4, %v1314_v22, %v2134_v10  ;;  %v1315_v24 = vsel %vm977_vm4, %v1313_v19, %v2133_v54 }
  0xec   : > { %v1317_v32 = vpack.c.bf16 %v1316_v57, %v1315_v24 }
  0xed   : > { %1978 = vmatmul.mubr.msk.bf16.gmra.mxu0 %vm1049_vm5, %v1001_v44 }
  0xee   : > { %1958 = vmatmul.mubr.msk.bf16.gmra.mxu1 %vm1049_vm5, %v2837_v61  ;;  %1981 = vmatprep.mubr.msk.bf16.mxu0 %vm1049_vm5, %v2872_v34 }
  0xef   : > { %1961 = vmatprep.mubr.msk.bf16.mxu1 %vm1049_vm5, %v2828_v49 }
  0xf5   : > { %1982 = vmatmul.mubr.msk.bf16.gmra.mxu0 %vm1049_vm5, %v1317_v32 }
  0xf6   : > { %1962 = vmatmul.mubr.msk.bf16.gmra.mxu1 %vm1049_vm5, %v1001_v44 }
 0x18a   : > { %v2933_v15 = vpop.f32.mrf.mxu1 }
 0x18c   : > { %v2935_v39 = vpop.f32.mrf.mxu1 }
 0x18d   : > { %v1931_v25 = vpop.f32.mrf.mxu0 }
 0x18e   : > { %v2937_v29 = vpop.f32.mrf.mxu1 }
 0x18f   : > { %v1112_v31 = vpop.f32.mrf.mxu0 }
 0x190   : > { %v2939_v50 = vpop.f32.mrf.mxu1 }
 0x191   : > { %v1932_v61 = vpop.f32.mrf.mxu0 }
 0x192   : > { %v2941_v62 = vpop.f32.mrf.mxu1 }
 0x193   : > { %v1115_v28 = vpop.f32.mrf.mxu0 }
 0x194   : > { %v2943_v26 = vpop.f32.mrf.mxu1 }
 0x195   : > { %v1935_v49 = vpop.f32.mrf.mxu0 }
 0x196   : > { %v2945_v36 = vpop.f32.mrf.mxu1 }
 0x197   : > { %v1128_v35 = vpop.f32.mrf.mxu0 }
 0x198   : > { %v2947_v47 = vpop.f32.mrf.mxu1 }
 0x199   : > { %v1936_v38 = vpop.f32.mrf.mxu0 }
 0x19b   : > { %v1131_v23 = vpop.f32.mrf.mxu0 }
 0x19d   : > { %v1971_v51 = vpop.f32.mrf.mxu0 }
 0x19e   : > { %v1951_v60 = vpop.f32.mrf.mxu1 }
 0x19f   : > { %v1233_v14 = vadd.f32 %v1951_v60, %v1931_v25  ;;  %v1371_v55 = vpop.f32.mrf.mxu0 }
 0x1a0   : > { %v1224_v34 = vpop.f32.mrf.mxu1 }
 0x1a1   : > { %v1225_v6 = vadd.f32 %v1224_v34, %v1112_v31  ;;  %v1436_v46 = vadd.f32 %v1971_v51, %v1233_v14  ;;  %v1972_v0 = vpop.f32.mrf.mxu0 }
 0x1a2   : > { %v1952_v59 = vpop.f32.mrf.mxu1 }
 0x1a3   : > { %v1459_v63 = vadd.f32 %v2952_v7, %v1436_v46  ;;  %v1236_v53 = vadd.f32 %v1952_v59, %v1932_v61  ;;  %v1434_v44 = vadd.f32 %v1371_v55, %v1225_v6  ;;  %v1374_v20 = vpop.f32.mrf.mxu0 }
 0x1a4   : > { %v1227_v45 = vpop.f32.mrf.mxu1 }
 0x1a5   : > { %1568 = vst.msk [vmem:[%s2959_s13 + $0x10] sm:$0xff] %vm977_vm4, %v1459_v63  ;;  %v1457_v43 = vadd.f32 %v2952_v7, %v1434_v44  ;;  %v1228_v1 = vadd.f32 %v1227_v45, %v1115_v28  ;;  %v1975_v30 = vpop.f32.mrf.mxu0  ;;  %v1437_v9 = vadd.f32 %v1972_v0, %v1236_v53  ;;  %v1512_v42 = vmul.f32 %v1459_v63, %v1459_v63 }
 0x1a6   : > { %v1955_v37 = vpop.f32.mrf.mxu1  ;;  %v1476_v22 = vsel %vm977_vm4, %v1459_v63, 0.0 }
 0x1a7   : > { %1566 = vst.msk [vmem:[%s2959_s13] sm:$0xff] %vm977_vm4, %v1457_v43  ;;  %v1249_v48 = vadd.f32 %v1955_v37, %v1935_v49  ;;  %v1387_v17 = vpop.f32.mrf.mxu0  ;;  %v1460_v52 = vadd.f32 %v2952_v7, %v1437_v9  ;;  %v1435_v41 = vadd.f32 %v1374_v20, %v1228_v1  ;;  %v1510_v2 = vmul.f32 %v1457_v43, %v1457_v43 }
 0x1a8   : > { %v1240_v56 = vpop.f32.mrf.mxu1  ;;  %v1473_v27 = vsel %vm977_vm4, %v1457_v43, 0.0  ;;  %v1529_v61 = vsel %vm977_vm4, %v1512_v42, 0.0 }
 0x1a9   : > { %v1241_v4 = vadd.f32 %v1240_v56, %v1128_v35  ;;  %v1440_v33 = vadd.f32 %v1975_v30, %v1249_v48  ;;  %v1976_v58 = vpop.f32.mrf.mxu0  ;;  %1569 = vst.msk [vmem:[%s2959_s13 + $0x18] sm:$0xff] %vm977_vm4, %v1460_v52  ;;  %v1458_v3 = vadd.f32 %v2952_v7, %v1435_v41  ;;  %v1513_v19 = vmul.f32 %v1460_v52, %v1460_v52 }
 0x1aa   : > { %v1956_v5 = vpop.f32.mrf.mxu1  ;;  %v1526_v57 = vsel %vm977_vm4, %v1510_v2, 0.0  ;;  %v1478_v28 = vsel %vm977_vm4, %v1460_v52, 0.0 }
 0x1ab   : > { %v1463_v13 = vadd.f32 %v2952_v7, %v1440_v33  ;;  %v1252_v16 = vadd.f32 %v1956_v5, %v1936_v38  ;;  %v1438_v21 = vadd.f32 %v1387_v17, %v1241_v4  ;;  %v1390_v12 = vpop.f32.mrf.mxu0  ;;  %v1474_v40 = vsel %vm977_vm4, %v1458_v3, 0.0  ;;  %1567 = vst.msk [vmem:[%s2959_s13 + $0x8] sm:$0xff] %vm977_vm4, %v1458_v3 }
 0x1ac   : > { %v1511_v18 = vmul.f32 %v1458_v3, %v1458_v3  ;;  %v1243_v11 = vpop.f32.mrf.mxu1  ;;  %v1475_v8 = vadd.f32 %v1474_v40, %v1473_v27 }
 0x1ad   : > { %1572 = vst.msk [vmem:[%s2959_s13 + $0x30] sm:$0xff] %vm977_vm4, %v1463_v13  ;;  %v1461_v10 = vadd.f32 %v2952_v7, %v1438_v21  ;;  %v1979_v54 = vpop.f32.mrf.mxu0  ;;  %v1244_v32 = vadd.f32 %v1243_v11, %v1131_v23  ;;  %v1441_v25 = vadd.f32 %v1976_v58, %v1252_v16  ;;  %v1531_v23 = vsel %vm977_vm4, %v1513_v19, 0.0 }
 0x1ae   : > { %v1527_v24 = vsel %vm977_vm4, %v1511_v18, 0.0  ;;  %v1959_v31 = vpop.f32.mrf.mxu1  ;;  %v1477_v49 = vadd.f32 %v1476_v22, %v1475_v8  ;;  %v1484_v63 = vsel %vm977_vm4, %v1463_v13, 0.0  ;;  %v1516_v53 = vmul.f32 %v1463_v13, %v1463_v13 }
 0x1af   : > { %v1528_v35 = vadd.f32 %v1527_v24, %v1526_v57  ;;  %1570 = vst.msk [vmem:[%s2959_s13 + $0x20] sm:$0xff] %vm977_vm4, %v1461_v10  ;;  %v1403_v38 = vpop.f32.mrf.mxu0  ;;  %v1514_v51 = vmul.f32 %v1461_v10, %v1461_v10  ;;  %v1464_v60 = vadd.f32 %v2952_v7, %v1441_v25  ;;  %v1265_v14 = vadd.f32 %v1959_v31, %v2933_v15 }
 0x1b0   : > { %v1439_v55 = vadd.f32 %v1390_v12, %v1244_v32  ;;  %v1256_v34 = vpop.f32.mrf.mxu1  ;;  %v1479_v46 = vadd.f32 %v1478_v28, %v1477_v49  ;;  %v1480_v44 = vsel %vm977_vm4, %v1461_v10, 0.0  ;;  %v1537_v13 = vsel %vm977_vm4, %v1516_v53, 0.0 }
 0x1b1   : > { %v1530_v6 = vadd.f32 %v1529_v61, %v1528_v35  ;;  %v1257_v0 = vadd.f32 %v1256_v34, %v2935_v39  ;;  %v1980_v59 = vpop.f32.mrf.mxu0  ;;  %1573 = vst.msk [vmem:[%s2959_s13 + $0x38] sm:$0xff] %vm977_vm4, %v1464_v60  ;;  %v1444_v1 = vadd.f32 %v1979_v54, %v1265_v14  ;;  %v1533_v39 = vsel %vm977_vm4, %v1514_v51, 0.0 }
 0x1b2   : > { %v1462_v20 = vadd.f32 %v2952_v7, %v1439_v55  ;;  %v1960_v15 = vpop.f32.mrf.mxu1  ;;  %v1481_v45 = vadd.f32 %v1480_v44, %v1479_v46  ;;  %v1486_v27 = vsel %vm977_vm4, %v1464_v60, 0.0 }
 0x1b3   : > { %v1532_v43 = vadd.f32 %v1531_v23, %v1530_v6  ;;  %v1268_v30 = vadd.f32 %v1960_v15, %v2937_v29  ;;  %v1406_v9 = vpop.f32.mrf.mxu0  ;;  %v1442_v17 = vadd.f32 %v1403_v38, %v1257_v0  ;;  %v1467_v4 = vadd.f32 %v2952_v7, %v1444_v1 }
 0x1b4   : > { %v1482_v37 = vsel %vm977_vm4, %v1462_v20, 0.0  ;;  %v1515_v48 = vmul.f32 %v1462_v20, %v1462_v20  ;;  %1571 = vst.msk [vmem:[%s2959_s13 + $0x28] sm:$0xff] %vm977_vm4, %v1462_v20  ;;  %v1259_v52 = vpop.f32.mrf.mxu1  ;;  %v1517_v29 = vmul.f32 %v1464_v60, %v1464_v60 }
 0x1b5   : > { %v1534_v41 = vadd.f32 %v1533_v39, %v1532_v43  ;;  %v1483_v56 = vadd.f32 %v1482_v37, %v1481_v45  ;;  %v1260_v33 = vadd.f32 %v1259_v52, %v2939_v50  ;;  %v1983_v58 = vpop.f32.mrf.mxu0  ;;  %v1465_v3 = vadd.f32 %v2952_v7, %v1442_v17  ;;  %1576 = vst.msk [vmem:[%s2959_s13 + $0x50] sm:$0xff] %vm977_vm4, %v1467_v4 }
 0x1b6   : > { %v1535_v2 = vsel %vm977_vm4, %v1515_v48, 0.0  ;;  %v1445_v5 = vadd.f32 %v1980_v59, %v1268_v30  ;;  %v1963_v42 = vpop.f32.mrf.mxu1  ;;  %v1539_v10 = vsel %vm977_vm4, %v1517_v29, 0.0  ;;  %v1520_v28 = vmul.f32 %v1467_v4, %v1467_v4 }
 0x1b7   : > { %v1485_v16 = vadd.f32 %v1484_v63, %v1483_v56  ;;  %v1536_v21 = vadd.f32 %v1535_v2, %v1534_v41  ;;  %v1419_v12 = vpop.f32.mrf.mxu0  ;;  %v1518_v40 = vmul.f32 %v1465_v3, %v1465_v3  ;;  %1574 = vst.msk [vmem:[%s2959_s13 + $0x40] sm:$0xff] %vm977_vm4, %v1465_v3  ;;  %v1281_v18 = vadd.f32 %v1963_v42, %v2941_v62 }
 0x1b8   : > { %v1468_v50 = vadd.f32 %v2952_v7, %v1445_v5  ;;  %v1272_v11 = vpop.f32.mrf.mxu1  ;;  %v1443_v8 = vadd.f32 %v1406_v9, %v1260_v33  ;;  %v1488_v54 = vsel %vm977_vm4, %v1465_v3, 0.0  ;;  %v1545_v53 = vsel %vm977_vm4, %v1520_v28, 0.0 }
 0x1b9   : > { %v1538_v22 = vadd.f32 %v1537_v13, %v1536_v21  ;;  %v1487_v19 = vadd.f32 %v1486_v27, %v1485_v16  ;;  %v1273_v57 = vadd.f32 %v1272_v11, %v2943_v26  ;;  %v1984_v32 = vpop.f32.mrf.mxu0  ;;  %v1448_v62 = vadd.f32 %v1983_v58, %v1281_v18 }
 0x1ba   : > { %1577 = vst.msk [vmem:[%s2959_s13 + $0x58] sm:$0xff] %vm977_vm4, %v1468_v50  ;;  %v1964_v24 = vpop.f32.mrf.mxu1  ;;  %v1466_v61 = vadd.f32 %v2952_v7, %v1443_v8  ;;  %v1541_v49 = vsel %vm977_vm4, %v1518_v40, 0.0  ;;  %v1521_v59 = vmul.f32 %v1468_v50, %v1468_v50  ;;  %v1494_v15 = vsel %vm977_vm4, %v1468_v50, 0.0 }
 0x1bb   : > { %v1489_v25 = vadd.f32 %v1488_v54, %v1487_v19  ;;  %v1540_v31 = vadd.f32 %v1539_v10, %v1538_v22  ;;  %v1284_v35 = vadd.f32 %v1964_v24, %v2945_v36  ;;  %v1446_v38 = vadd.f32 %v1419_v12, %v1273_v57  ;;  %v1422_v0 = vpop.f32.mrf.mxu0 }
 0x1bc   : > { %v1275_v51 = vpop.f32.mrf.mxu1  ;;  %v1490_v14 = vsel %vm977_vm4, %v1466_v61, 0.0  ;;  %v1519_v26 = vmul.f32 %v1466_v61, %v1466_v61  ;;  %1575 = vst.msk [vmem:[%s2959_s13 + $0x48] sm:$0xff] %vm977_vm4, %v1466_v61  ;;  %v1471_v55 = vadd.f32 %v2952_v7, %v1448_v62  ;;  %v1492_v36 = vsel %vm977_vm4, %v1467_v4, 0.0 }
 0x1bd   : > { %v1542_v60 = vadd.f32 %v1541_v49, %v1540_v31  ;;  %v1491_v34 = vadd.f32 %v1490_v14, %v1489_v25  ;;  %v1469_v23 = vadd.f32 %v2952_v7, %v1446_v38  ;;  %v1276_v6 = vadd.f32 %v1275_v51, %v2947_v47 }
 0x1be   : > { %v1449_v46 = vadd.f32 %v1984_v32, %v1284_v35  ;;  %v1543_v63 = vsel %vm977_vm4, %v1519_v26, 0.0  ;;  %1580 = vst.msk [vmem:[%s2959_s13 + $0x70] sm:$0xff] %vm977_vm4, %v1471_v55  ;;  %v1547_v9 = vsel %vm977_vm4, %v1521_v59, 0.0  ;;  %v1524_v52 = vmul.f32 %v1471_v55, %v1471_v55 }
 0x1bf   : > { %v1493_v44 = vadd.f32 %v1492_v36, %v1491_v34  ;;  %v1544_v20 = vadd.f32 %v1543_v63, %v1542_v60  ;;  %1578 = vst.msk [vmem:[%s2959_s13 + $0x60] sm:$0xff] %vm977_vm4, %v1469_v23  ;;  %v1522_v47 = vmul.f32 %v1469_v23, %v1469_v23  ;;  %v1447_v43 = vadd.f32 %v1422_v0, %v1276_v6 }
 0x1c0   : > { %v1472_v45 = vadd.f32 %v2952_v7, %v1449_v46  ;;  %v1496_v39 = vsel %vm977_vm4, %v1469_v23, 0.0  ;;  %v1500_v29 = vsel %vm977_vm4, %v1471_v55, 0.0 }
 0x1c1   : > { %v1546_v1 = vadd.f32 %v1545_v53, %v1544_v20  ;;  %v1495_v30 = vadd.f32 %v1494_v15, %v1493_v44  ;;  %v1470_v37 = vadd.f32 %v2952_v7, %v1447_v43  ;;  %v1549_v41 = vsel %vm977_vm4, %v1522_v47, 0.0 }
 0x1c2   : > { %1581 = vst.msk [vmem:[%s2959_s13 + $0x78] sm:$0xff] %vm977_vm4, %v1472_v45  ;;  %v1525_v2 = vmul.f32 %v1472_v45, %v1472_v45  ;;  %v1553_v7 = vsel %vm977_vm4, %v1524_v52, 0.0  ;;  %v1502_v13 = vsel %vm977_vm4, %v1472_v45, 0.0 }
 0x1c3   : > { %v1497_v48 = vadd.f32 %v1496_v39, %v1495_v30  ;;  %v1548_v17 = vadd.f32 %v1547_v9, %v1546_v1  ;;  %v1498_v56 = vsel %vm977_vm4, %v1470_v37, 0.0  ;;  %v1523_v4 = vmul.f32 %v1470_v37, %v1470_v37  ;;  %1579 = vst.msk [vmem:[%s2959_s13 + $0x68] sm:$0xff] %vm977_vm4, %v1470_v37 }
 0x1c4   : > { %v1555_v12 = vsel %vm977_vm4, %v1525_v2, 0.0 }
 0x1c5   : > { %v1550_v33 = vadd.f32 %v1549_v41, %v1548_v17  ;;  %v1499_v58 = vadd.f32 %v1498_v56, %v1497_v48  ;;  %v1551_v3 = vsel %vm977_vm4, %v1523_v4, 0.0 }
 0x1c7   : > { %v1501_v5 = vadd.f32 %v1500_v29, %v1499_v58  ;;  %v1552_v42 = vadd.f32 %v1551_v3, %v1550_v33 }
 0x1c9   : > { %v1503_v16 = vadd.f32 %v1502_v13, %v1501_v5  ;;  %v1554_v21 = vadd.f32 %v1553_v7, %v1552_v42 }
 0x1cb   : > { %v1504_v27 = vrot.slane %v1503_v16, 4  ;;  %v1556_v40 = vadd.f32 %v1555_v12, %v1554_v21 }
 0x1cd   : > { %v1505_v50 = vadd.f32 %v1504_v27, %v1503_v16  ;;  %v1557_v18 = vrot.slane %v1556_v40, 4 }
 0x1cf   : > { %v1506_v11 = vrot.slane %v1505_v50, 2  ;;  %v1558_v22 = vadd.f32 %v1557_v18, %v1556_v40 }
 0x1d1   : > { %v1507_v19 = vadd.f32 %v1506_v11, %v1505_v50  ;;  %v1559_v8 = vrot.slane %v1558_v22, 2 }
 0x1d3   : > { %v1508_v10 = vrot.slane %v1507_v19, 1  ;;  %v1560_v54 = vadd.f32 %v1559_v8, %v1558_v22 }
 0x1d5   : > { %v1561_v57 = vrot.slane %v1560_v54, 1  ;;  %v1509_v24 = vadd.f32 %v1508_v10, %v1507_v19 }
 0x1d7   : > { %v1562_v32 = vadd.f32 %v1561_v57, %v1560_v54 }
 0x1d9   : > { %v1563_v25 = vsel %vm766_vm1, %v1509_v24, %v1562_v32 }
 0x1da   : > { %1565 = vst.msk [vmem:[%s522_s20] sm:$0x3] %vm1564_vm6, %v1563_v25 }
 0x1db PF: > { %s19_s9 = sadd.s32 1, %s2259_s9   ;;  %s3079_s27 = smov %s2251_s29 }
 0x1dc   : > { %p16_p12 = scmp.ge.s32.totalorder %s19_s9, 6   ;;  %s3080_s28 = smov %s2255_s30 }
 0x1dd   : > { %s3081_s29 = smov %s3084_s10  ;;  %s3082_s30 = smov %s3088_s11 }
 0x1de   :  { %18 = sbr.rel (!%p16_p12) target bundleno = 3 (0x3), region = 104 }

// kernel: encoder_block_2d.10
= control target key start
LH: loop header
LB: loop body
LE: loop exit
PB: predicated region body
PF: predicated region fallthrough
CT: control target
= control target key end

     0   :  { %15 = vsyncpa [#allocation3], 0  ;;  %s3420_s0 = inlined_call_operand.vmem [shape: f32[2,1,16], index: 0, kind: input, shape index: {}]   ;;  %s3421_s1 = inlined_call_operand.vmem [shape: f32[2,1,16], index: 1, kind: input, shape index: {}]   ;;  %s3422_s2 = inlined_call_operand.vmem [shape: f32[2,16,16,16], index: 2, kind: input, shape index: {}, may-alias: {2,3,4}]   ;;  %s3423_s3 = inlined_call_operand.vmem [shape: f32[2,16,16,16], index: 3, kind: input, shape index: {}, may-alias: {2,3,4}]   ;;  %s3424_s4 = inlined_call_operand.vmem [shape: f32[2,16,16,16], index: 4, kind: input, shape index: {}, may-alias: {2,3,4}]   ;;  %s3425_s5 = inlined_call_operand.vmem [shape: bf16[3,48,16], index: 5, kind: input, shape index: {}]   ;;  %s3426_s6 = inlined_call_operand.vmem [shape: f32[1,16], index: 6, kind: input, shape index: {}]   ;;  %s3427_s7 = inlined_call_operand.vmem [shape: f32[2,16,16,16], index: 7, kind: input, shape index: {}]   ;;  %s3428_s8 = inlined_call_operand.vmem [shape: f32[2,16,16,16], index: 8, kind: output, shape index: {0}]   ;;  %s3429_s9 = inlined_call_operand.hbm [shape: f32[2,2,2,16], index: 9, kind: output, shape index: {1}]  }
   0x1   :  { %17 = vsyncpa [#allocation3 + $0x1], 0  ;;  %s2568_s30 = smov 0   ;;  %s2570_s10 = smov 0  }
   0x2   :  { %s2572_s11 = smov 0   ;;  %s2574_s12 = smov 0  }
   0x3   :  { %s2576_s13 = smov 0   ;;  %s2578_s14 = smov 0  }
   0x4   :  { %s2580_s15 = smov 0   ;;  %s2582_s16 = smov 0  }
   0x5 LB: > { %3435 = sst [smem:[#allocation5_spill]] %s2493_s11  ;;  %s1932_s17 = sadd.s32 4294967295, %s2513_s16   ;;  %s2513_s16 = sphi %s2582_s16, %s23_s16   ;;  %s2509_s15 = sphi %s2580_s15, %s3449_s15   ;;  %s2505_s14 = sphi %s2578_s14, %s3448_s14   ;;  %s2501_s13 = sphi %s2576_s13, %s3447_s13   ;;  %s2497_s12 = sphi %s2574_s12, %s3446_s12   ;;  %s2493_s11 = sphi %s2572_s11, %s3445_s11   ;;  %s2489_s10 = sphi %s2570_s10, %s3451_s10   ;;  %s2485_s30 = sphi %s2568_s30, %s3450_s30  }
   0x6   : > { %3436 = sst [smem:[#allocation6_spill]] %s2505_s14  ;;  %s1933_s18 = sadd.s32 4294967294, %s2513_s16  }
   0x7   : > { %3437 = sst [smem:[#allocation7_spill]] %s2509_s15  ;;  %s32_s19 = sadd.s32 1, %s2505_s14 }
   0x8   : > { %p33_p0 = scmp.ge.s32.totalorder %s32_s19, 2  ;;  %s35_s20 = sadd.s32 1, %s2509_s15 }
   0x9   : > { %p304_p1 = scmp.ne.s32.totalorder %s2493_s11, %s2489_s10  ;;  %p305_p2 = scmp.eq.s32.totalorder %s1932_s17, 3 }
   0xa   : > { %s3453_s19 = smov (%p33_p0, %s32_s19), 0  ;;  %s3455_s20 = smov (!%p33_p0, %s35_s20), %s2509_s15 }
   0xb   : > { %3438 = sst [smem:[#allocation8_spill]] %s3453_s19  ;;  %s290_s21 = ssub.s32 %s2505_s14, %s3453_s19 }
   0xc   : > { %p2619_p3 = por %p305_p2, %p304_p1  ;;  %p37_p4 = scmp.ge.s32.totalorder %s3455_s20, 2 }
   0xd   : > { %p310_p5 = scmp.ne.s32.totalorder %s2489_s10, %s2485_s30  ;;  %p311_p6 = scmp.eq.s32.totalorder %s1933_s18, 3 }
   0xe   : > { %p1942_p7 = scmp.ge.s32.totalorder %s2513_s16, 1  ;;  %s3457_s20 = smov (%p37_p4, %s3455_s20), 0 }
   0xf   : > { %3440 = sst [smem:[#allocation9_spill]] %s3457_s20  ;;  %p2628_p8 = por %p311_p6, %p310_p5 }
  0x10   : > { %p415_p9 = scmp.lt.s32.totalorder %s2513_s16, 5  ;;  %s289_s24 = ssub.s32 %s2509_s15, %s3457_s20 }
  0x11   : > { %s294_s25 = sadd.s32 1, %s2493_s11  ;;  %s291_s26 = sor.u32 %s290_s21, %s289_s24 }
  0x12   : > { %p416_p10 = pnand %p1942_p7, %p415_p9  ;;  %p292_p11 = scmp.eq.s32.totalorder %s291_s26, 0 }
  0x13   : > { %p508_p12 = scmp.lt.s32.totalorder (!%p416_p10), %s2501_s13, 1  ;;  %s2641_s28 = sshll.u32 (!%p416_p10), %s2497_s12, 3 }
  0x14   : > { %s2637_s27 = scalar_select %p292_p11, %s2493_s11, %s294_s25  }
  0x15   : > { %419 = sbr.rel (%p416_p10) target bundleno = 502 (0x1f6), region = 52  ;;  %p534_p13 = scmp.lt.s32.totalorder (!%p416_p10), %s2641_s28, 15 }
  0x16   : > { %3442 = sst [smem:[#allocation10_spill]] %s2637_s27  ;;  %s2662_s11 = sadd.s32 (!%p416_p10), 4294967295, %s2641_s28 }
  0x17   : > { %p516_p0 = scmp.gt.s32.totalorder (!%p416_p10), %s2662_s11, 0  ;;  %p1946_p1 = scmp.lt.s32.totalorder (!%p416_p10), %s2662_s11, 15 }
  0x18   : > { %p616_p4 = scmp.gt.s32.totalorder (!%p416_p10), %s2497_s12, 0  ;;  %p642_p5 = scmp.lt.s32.totalorder (!%p416_p10), %s2497_s12, 1 }
  0x1a   : > { %s509_s29 = scalar_select %p508_p12, %s2501_s13, 1  ;;  %vm873_vm0 = vcmask 1046528   ;;  %vm824_vm1 = vcmask 1040384   ;;  %vm1018_vm2 = vcmask 130048   ;;  %vm1035_vm3 = vcmask 261120  }
  0x1b   : > { %s535_s17 = scalar_select %p534_p13, %s2641_s28, 15  ;;  %vm1122_vm4 = vcmask 392192   ;;  %vm1680_vm5 = vcmask 123904  }
  0x1c   : > { %s510_s21 = scalar_lea.vmem %s3420_s0, %s509_s29  ;;  %s513_s26 = scalar_lea.vmem %s3421_s1, %s509_s29 }
  0x1d   : > { %s2652_s19 = sshll.u32 %s509_s29, 5  ;;  %s1955_s15 = sshll.u32 %s535_s17, 1  ;;  %v2655_v0 = vld [vmem:[%s510_s21] ss:$0 sm:$0xff] }
  0x1e   : > { %s538_s14 = sadd.s32 %s1955_s15, %s2652_s19  ;;  %v2659_v1 = vld [vmem:[%s513_s26] ss:$0 sm:$0xff]  ;;  %s2053_s15 = sadd.s32 8, %s2641_s28 }
  0x1f   : > { %s2657_s27 = sshll.u32 %s538_s14, 3  ;;  %p2747_p2 = scmp.lt.s32.totalorder %s2053_s15, 15 }
  0x20   : > { %s2668_s24 = scalar_lea.vmem %s3423_s3, %s2657_s27  ;;  %s3263_s25 = scalar_lea.vmem %s3428_s8, %s2657_s27 }
  0x21   : > { %v656_v2 = vld [vmem:[%s2668_s24 + $0x40] sm:$0xff]  ;;  %v657_v3 = vld [vmem:[%s2668_s24 + $0x48] sm:$0xff]  ;;  %v658_v9 = vld [vmem:[%s2668_s24 + $0x50] sm:$0xff]  ;;  %s517_s14 = scalar_select %p516_p0, %s2662_s11, 0 }
  0x22   : > { %v648_v4 = vld [vmem:[%s2668_s24] sm:$0xff]  ;;  %v672_v5 = vmul.f32 %v2655_v0, %v656_v2  ;;  %v673_v6 = vmul.f32 %v2655_v0, %v657_v3  ;;  %v649_v7 = vld [vmem:[%s2668_s24 + $0x8] sm:$0xff]  ;;  %v659_v10 = vld [vmem:[%s2668_s24 + $0x58] sm:$0xff]  ;;  %v674_v12 = vmul.f32 %v2655_v0, %v658_v9  ;;  %s3461_s15 = smov (!%p2747_p2, %s2053_s15), 15 }
  0x23   : > { %v664_v8 = vmul.f32 %v2655_v0, %v648_v4  ;;  %v665_v11 = vmul.f32 %v2655_v0, %v649_v7  ;;  %v675_v13 = vmul.f32 %v2655_v0, %v659_v10  ;;  %v650_v14 = vld [vmem:[%s2668_s24 + $0x10] sm:$0xff]  ;;  %v651_v15 = vld [vmem:[%s2668_s24 + $0x18] sm:$0xff]  ;;  %v660_v20 = vld [vmem:[%s2668_s24 + $0x60] sm:$0xff]  ;;  %s3459_s14 = smov (!%p1946_p1, %s517_s14), 15  ;;  %s3463_s15 = smov (!%p2747_p2, %s3461_s15), 15 }
  0x24   : > { %v2686_v16 = vadd.f32 %v2659_v1, %v672_v5  ;;  %v2689_v17 = vadd.f32 %v2659_v1, %v673_v6  ;;  %v666_v19 = vmul.f32 %v2655_v0, %v650_v14  ;;  %v661_v21 = vld [vmem:[%s2668_s24 + $0x68] sm:$0xff]  ;;  %v2704_v23 = vadd.f32 %v2659_v1, %v674_v12  ;;  %v652_v26 = vld [vmem:[%s2668_s24 + $0x20] sm:$0xff]  ;;  %v662_v28 = vld [vmem:[%s2668_s24 + $0x70] sm:$0xff]  ;;  %s1951_s11 = sshll.u32 %s3459_s14, 1  ;;  %s1962_s20 = sshll.u32 %s3463_s15, 1 }
  0x25   : > { %v2692_v18 = vadd.f32 %v2659_v1, %v664_v8  ;;  %v2701_v22 = vadd.f32 %v2659_v1, %v665_v11  ;;  %v2707_v24 = vadd.f32 %v2659_v1, %v675_v13  ;;  %v667_v25 = vmul.f32 %v2655_v0, %v651_v15  ;;  %v653_v27 = vld [vmem:[%s2668_s24 + $0x28] sm:$0xff]  ;;  %v663_v40 = vld [vmem:[%s2668_s24 + $0x78] sm:$0xff]  ;;  %v654_v50 = vld [vmem:[%s2668_s24 + $0x30] sm:$0xff]  ;;  %s524_s17 = sadd.s32 %s2652_s19, %s1951_s11  ;;  %s552_s18 = sadd.s32 %s1962_s20, %s2652_s19 }
  0x26   : > { %v1987_v29 = vmul.f32 -1.442695, %v2686_v16  ;;  %v1988_v30 = vmul.f32 -1.442695, %v2689_v17  ;;  %v2719_v32 = vadd.f32 %v2659_v1, %v666_v19  ;;  %v1989_v34 = vmul.f32 -1.442695, %v2704_v23 }
  0x27   : > { %v1979_v31 = vmul.f32 -1.442695, %v2692_v18  ;;  %v1980_v33 = vmul.f32 -1.442695, %v2701_v22  ;;  %v1990_v35 = vmul.f32 -1.442695, %v2707_v24  ;;  %v2725_v36 = vadd.f32 %v2659_v1, %v667_v25 }
  0x28   : > { %2341 = vpow2.f32 %v1987_v29  ;;  %v1981_v37 = vmul.f32 -1.442695, %v2719_v32  ;;  %v676_v38 = vmul.f32 %v2655_v0, %v660_v20  ;;  %v677_v39 = vmul.f32 %v2655_v0, %v661_v21  ;;  %v655_v51 = vld [vmem:[%s2668_s24 + $0x38] sm:$0xff]  ;;  %s1953_s28 = sshll.u32 %s524_s17, 3  ;;  %s1964_s24 = sshll.u32 %s552_s18, 3 }
  0x29   : > { %2343 = vpow2.f32 %v1988_v30  ;;  %v1982_v41 = vmul.f32 -1.442695, %v2725_v36  ;;  %v668_v42 = vmul.f32 %v2655_v0, %v652_v26  ;;  %v669_v43 = vmul.f32 %v2655_v0, %v653_v27  ;;  %s526_s26 = scalar_lea.vmem %s3422_s2, %s1953_s28  ;;  %s554_s15 = scalar_lea.vmem %s3424_s4, %s1964_s24 }
  0x2a   : > { %2345 = vpow2.f32 %v1979_v31  ;;  %v2739_v44 = vadd.f32 %v2659_v1, %v676_v38  ;;  %v2742_v45 = vadd.f32 %v2659_v1, %v677_v39  ;;  %v678_v46 = vmul.f32 %v2655_v0, %v662_v28  ;;  %v584_v13 = vld [vmem:[%s526_s26] sm:$0xff]  ;;  %v585_v21 = vld [vmem:[%s526_s26 + $0x8] sm:$0xff]  ;;  %s2515_s17 = smov 16   ;;  %s2516_s24 = smov 32  }
  0x2b   : > { %2347 = vpow2.f32 %v1980_v33  ;;  %v2752_v47 = vadd.f32 %v2659_v1, %v668_v42  ;;  %v2755_v48 = vadd.f32 %v2659_v1, %v669_v43  ;;  %v679_v49 = vmul.f32 %v2655_v0, %v663_v40  ;;  %s643_s11 = scalar_select %p642_p5, 1, 0 }
  0x2c   : > { %2349 = vpow2.f32 %v1989_v34  ;;  %v1991_v52 = vmul.f32 -1.442695, %v2739_v44  ;;  %v2762_v53 = vadd.f32 %v2659_v1, %v678_v46  ;;  %v1992_v54 = vmul.f32 -1.442695, %v2742_v45  ;;  %s2042_s20 = sshll.u32 %s2501_s13, 1 }
  0x2d   : > { %2351 = vpow2.f32 %v1990_v35  ;;  %v2766_v55 = vadd.f32 %v2659_v1, %v679_v49  ;;  %v1983_v56 = vmul.f32 -1.442695, %v2752_v47  ;;  %v670_v57 = vmul.f32 %v2655_v0, %v654_v50  ;;  %v622_v49 = vld [vmem:[%s554_s15] sm:$0xff]  ;;  %s644_s28 = scvt.s32.f32 %s643_s11  ;;  %s1724_s18 = sadd.s32 %s2497_s12, %s2042_s20 }
  0x2e   : > { %2353 = vpow2.f32 %v1981_v37  ;;  %v671_v58 = vmul.f32 %v2655_v0, %v655_v51  ;;  %v1984_v59 = vmul.f32 -1.442695, %v2755_v48  ;;  %v1993_v60 = vmul.f32 -1.442695, %v2762_v53 }
  0x2f   : > { %2355 = vpow2.f32 %v1982_v41  ;;  %v2779_v61 = vadd.f32 %v2659_v1, %v670_v57  ;;  %v1994_v63 = vmul.f32 -1.442695, %v2766_v55  ;;  %v592_v27 = vmul.f32 %v2655_v0, %v584_v13 }
  0x30   : > { %2357 = vpow2.f32 %v1991_v52  ;;  %v2782_v62 = vadd.f32 %v2659_v1, %v671_v58  ;;  %v593_v33 = vmul.f32 %v2655_v0, %v585_v21 }
  0x31   : > { %2359 = vpow2.f32 %v1992_v54  ;;  %v1985_v2 = vmul.f32 -1.442695, %v2779_v61  ;;  %v2800_v39 = vadd.f32 %v2659_v1, %v592_v27 }
  0x32   : > { %2361 = vpow2.f32 %v1983_v56  ;;  %v1986_v3 = vmul.f32 -1.442695, %v2782_v62  ;;  %v2803_v46 = vadd.f32 %v2659_v1, %v593_v33 }
  0x33   : > { %2363 = vpow2.f32 %v1984_v59  ;;  %v1975_v56 = vmul.f32 -1.442695, %v2800_v39  ;;  %v623_v59 = vld [vmem:[%s554_s15 + $0x8] sm:$0xff]  ;;  %s2973_s15 = scalar_select %p616_p4, 1, 0 }
  0x34   : > { %2365 = vpow2.f32 %v1993_v60  ;;  %v624_v60 = vmul.f32 %v2655_v0, %v622_v49  ;;  %v2334_v49 = vld [vmem:[%s3425_s5 + $0x18] sm:$0xff]  }
  0x35   : > { %v2342_v4 = vpop.eup %2341  ;;  %2367 = vpow2.f32 %v1994_v63  ;;  %s618_s29 = scvt.s32.f32 %s2973_s15 }
  0x36   : > { %v2344_v5 = vpop.eup %2343  ;;  %v752_v6 = vadd.f32 1.0, %v2342_v4  ;;  %2369 = vpow2.f32 %v1985_v2 }
  0x37   : > { %v2346_v7 = vpop.eup %2345  ;;  %v753_v8 = vadd.f32 1.0, %v2344_v5  ;;  %2371 = vpow2.f32 %v1986_v3  ;;  %v1976_v3 = vmul.f32 -1.442695, %v2803_v46 }
  0x38   : > { %v2348_v9 = vpop.eup %2347  ;;  %2373 = vrcp.f32 %v752_v6  ;;  %v744_v10 = vadd.f32 1.0, %v2346_v7 }
  0x39   : > { %v2350_v11 = vpop.eup %2349  ;;  %2375 = vrcp.f32 %v753_v8  ;;  %v745_v12 = vadd.f32 1.0, %v2348_v9  ;;  %v625_v8 = vmul.f32 %v2655_v0, %v623_v59 }
  0x3a   : > { %v2352_v14 = vpop.eup %2351  ;;  %2377 = vrcp.f32 %v744_v10  ;;  %v754_v15 = vadd.f32 1.0, %v2350_v11  ;;  %v2824_v11 = vadd.f32 %v2659_v1, %v624_v60 }
  0x3b   : > { %v2354_v19 = vpop.eup %2353  ;;  %2379 = vrcp.f32 %v745_v12  ;;  %v755_v20 = vadd.f32 1.0, %v2352_v14 }
  0x3c   : > { %v2356_v25 = vpop.eup %2355  ;;  %2381 = vrcp.f32 %v754_v15  ;;  %v746_v26 = vadd.f32 1.0, %v2354_v19 }
  0x3d   : > { %v2358_v28 = vpop.eup %2357  ;;  %2383 = vrcp.f32 %v755_v20  ;;  %v747_v29 = vadd.f32 1.0, %v2356_v25 }
  0x3e   : > { %v2360_v30 = vpop.eup %2359  ;;  %2385 = vrcp.f32 %v746_v26  ;;  %v756_v31 = vadd.f32 1.0, %v2358_v28 }
  0x3f   : > { %v2362_v34 = vpop.eup %2361  ;;  %2387 = vrcp.f32 %v747_v29  ;;  %v757_v35 = vadd.f32 1.0, %v2360_v30 }
  0x40   : > { %v2364_v37 = vpop.eup %2363  ;;  %2389 = vrcp.f32 %v756_v31  ;;  %v748_v38 = vadd.f32 1.0, %v2362_v34 }
  0x41   : > { %v2366_v40 = vpop.eup %2365  ;;  %2391 = vrcp.f32 %v757_v35  ;;  %v749_v41 = vadd.f32 1.0, %v2364_v37 }
  0x42   : > { %v2368_v42 = vpop.eup %2367  ;;  %2393 = vrcp.f32 %v748_v38  ;;  %v758_v43 = vadd.f32 1.0, %v2366_v40 }
  0x43   : > { %v2370_v50 = vpop.eup %2369  ;;  %2395 = vrcp.f32 %v749_v41  ;;  %v759_v51 = vadd.f32 1.0, %v2368_v42 }
  0x44   : > { %v2372_v52 = vpop.eup %2371  ;;  %2397 = vrcp.f32 %v758_v43  ;;  %v750_v54 = vadd.f32 1.0, %v2370_v50 }
  0x45   : > { %v2374_v57 = vpop.eup %2373  ;;  %2399 = vrcp.f32 %v759_v51  ;;  %v751_v58 = vadd.f32 1.0, %v2372_v52 }
  0x46   : > { %v2376_v63 = vpop.eup %2375  ;;  %v2808_v2 = vmul.f32 %v2374_v57, %v2686_v16  ;;  %2401 = vrcp.f32 %v750_v54 }
  0x47   : > { %v2378_v4 = vpop.eup %2377  ;;  %v2812_v5 = vmul.f32 %v2376_v63, %v2689_v17  ;;  %2403 = vrcp.f32 %v751_v58 }
  0x48   : > { %v2380_v6 = vpop.eup %2379  ;;  %v2815_v7 = vmul.f32 %v2378_v4, %v2692_v18  ;;  %2405 = vpow2.f32 %v1975_v56  ;;  %v2332_v18 = vld [vmem:[%s3425_s5 + $0x28] sm:$0xff]   ;;  %v840_v40 = vrot.slane %v2808_v2, 7 }
  0x49   : > { %v2382_v9 = vpop.eup %2381  ;;  %v2232_v16 = vpack.i.bf16 %v2812_v5, %v2808_v2  ;;  %v2821_v10 = vmul.f32 %v2380_v6, %v2701_v22  ;;  %2407 = vpow2.f32 %v1976_v3  ;;  %2153 = vmatprep.subr.bf16.mxu1 %v2332_v18  ;;  %2087 = vmatprep.subr.bf16.mxu0 %v2332_v18  ;;  %v890_v26 = vrot.slane %v2812_v5, 1 }
  0x4a   : > { %v2384_v17 = vpop.eup %2383  ;;  %v2827_v12 = vmul.f32 %v2382_v9, %v2704_v23  ;;  %v2842_v23 = vadd.f32 %v2659_v1, %v625_v8  ;;  %2156 = vmatpush3.bf16.msra.mxu1 %v2332_v18  ;;  %v877_v27 = vrot.slane %v2815_v7, 1  ;;  %2088 = vmatpush3.bf16.msra.mxu0 %v2332_v18  ;;  %v841_v35 = vrot.slane %v2812_v5, 7 }
  0x4b   : > { %v2386_v0 = vpop.eup %2385  ;;  %2233 = vrot.lane.b32.xlu0 %v2232_v16, %s2515_s17  ;;  %v2242_v22 = vpack.i.bf16 %v2821_v10, %v2815_v7  ;;  %v2836_v13 = vmul.f32 %v2384_v17, %v2707_v24  ;;  %v889_v24 = vrot.slane %v2808_v2, 1  ;;  %v878_v28 = vrot.slane %v2821_v10, 1 }
  0x4c   : > { %v2388_v14 = vpop.eup %2387  ;;  %v2839_v15 = vmul.f32 %v2386_v0, %v2719_v32  ;;  %v2852_v32 = vmul.f32 -1.442695, %v2824_v11  ;;  %v892_v31 = vrot.slane %v2827_v12, 1  ;;  %v2876_v38 = vmul.f32 -1.442695, %v2842_v23 }
  0x4d   : > { %v2390_v19 = vpop.eup %2389  ;;  %2243 = vrot.lane.b32.xlu1 %v2242_v22, %s2515_s17  ;;  %v2237_v20 = vpack.i.bf16 %v2836_v13, %v2827_v12  ;;  %v2848_v21 = vmul.f32 %v2388_v14, %v2725_v36  ;;  %v2333_v36 = vld [vmem:[%s3425_s5 + $0x20] sm:$0xff]   ;;  %v893_v33 = vrot.slane %v2836_v13, 1  ;;  %v891_v52 = vsel %vm873_vm0, %v889_v24, %v890_v26  ;;  %v2933_v24 = vld [vmem:[%s3425_s5 + $0x10] sm:$0xff]  }
  0x4e   : > { %v2392_v25 = vpop.eup %2391  ;;  %v2855_v1 = vmul.f32 %v2390_v19, %v2739_v44  ;;  %2154 = vmatprep.subr.bf16.mxu1 %v2333_v36  ;;  %2089 = vmatprep.subr.bf16.mxu0 %v2333_v36  ;;  %v880_v43 = vrot.slane %v2839_v15, 1  ;;  %v911_v54 = vsel %vm873_vm0, %v890_v26, 0.0  ;;  %v2906_v59 = vsel %vm873_vm0, %v878_v28, 0.0 }
  0x4f   : > { %v2394_v29 = vpop.eup %2393  ;;  %2238 = vrot.lane.b32.xlu0 %v2237_v20, %s2515_s17  ;;  %v2247_v30 = vpack.i.bf16 %v2848_v21, %v2839_v15  ;;  %v2867_v44 = vmul.f32 %v2392_v25, %v2742_v45  ;;  %2157 = vmatpush3.bf16.msra.mxu1 %v2333_v36  ;;  %v912_v3 = vsel %vm873_vm0, %v893_v33, 0.0  ;;  %v829_v16 = vrot.slane %v2821_v10, 7 }
  0x50   : > { %v2396_v34 = vpop.eup %2395  ;;  %v2873_v37 = vmul.f32 %v2394_v29, %v2752_v47  ;;  %v881_v47 = vrot.slane %v2848_v21, 1  ;;  %2090 = vmatpush3.bf16.msra.mxu0 %v2333_v36  ;;  %v895_v4 = vrot.slane %v2855_v1, 1  ;;  %2155 = vmatprep.subr.bf16.mxu1 %v2334_v49  ;;  %v2272_v19 = vpack.i.bf16 %v911_v54, %v891_v52 }
  0x51   : > { %v2398_v41 = vpop.eup %2397  ;;  %2248 = vrot.lane.b32.xlu1 %v2247_v30, %s2515_s17  ;;  %v2252_v45 = vpack.i.bf16 %v2867_v44, %v2855_v1  ;;  %v2883_v42 = vmul.f32 %v2396_v34, %v2755_v48  ;;  %v2896_v48 = vsel %vm873_vm0, %v877_v27, %v878_v28  ;;  %v896_v5 = vrot.slane %v2867_v44, 1  ;;  %2091 = vmatprep.subr.bf16.mxu0 %v2334_v49 }
  0x52   : > { %v2400_v50 = vpop.eup %2399  ;;  %v2891_v51 = vmul.f32 %v2398_v41, %v2762_v53  ;;  %v894_v53 = vsel %vm873_vm0, %v892_v31, %v893_v33  ;;  %v908_v9 = vsel %vm873_vm0, %v881_v47, 0.0  ;;  %v2282_v20 = vpack.i.bf16 %v2906_v59, %v2896_v48  ;;  %v2958_v41 = vld [vmem:[%s3425_s5 + $0x40] sm:$0xff]  }
  0x53   : > { %v2402_v56 = vpop.eup %2401  ;;  %2253 = vrot.lane.b32.xlu0 %v2252_v45, %s2515_s17  ;;  %v2262_v57 = vpack.i.bf16 %v2883_v42, %v2873_v37  ;;  %v2902_v58 = vmul.f32 %v2400_v50, %v2766_v55  ;;  %2158 = vmatpush3.bf16.msra.mxu1 %v2334_v49  ;;  %v2277_v14 = vpack.i.bf16 %v912_v3, %v894_v53  ;;  %v883_v26 = vrot.slane %v2873_v37, 1 }
  0x54   : > { %v2404_v60 = vpop.eup %2403  ;;  %v2909_v63 = vmul.f32 %v2402_v56, %v2779_v61  ;;  %v882_v61 = vsel %vm873_vm0, %v880_v43, %v881_v47  ;;  %v1074_v17 = vrot.slane %v2891_v51, 1  ;;  %2092 = vmatpush3.bf16.msra.mxu0 %v2334_v49  ;;  %v897_v28 = vsel %vm873_vm0, %v895_v4, %v896_v5  ;;  %2109 = vmatprep.subr.bf16.mxu1 %v2933_v24 }
  0x55   : > { %v2406_v6 = vpop.eup %2405  ;;  %2263 = vrot.lane.b32.xlu1 %v2262_v57, %s2515_s17  ;;  %v2257_v55 = vpack.i.bf16 %v2902_v58, %v2891_v51  ;;  %v2918_v8 = vmul.f32 %v2404_v60, %v2782_v62  ;;  %v1075_v18 = vrot.slane %v2902_v58, 1  ;;  %v2287_v25 = vpack.i.bf16 %v908_v9, %v882_v61  ;;  %2131 = vmatprep.subr.bf16.mxu0 %v2958_v41 }
  0x56   : > { %v608_v0 = vadd.f32 1.0, %v2406_v6  ;;  %v2408_v22 = vpop.eup %2407  ;;  %v884_v36 = vrot.slane %v2883_v42, 1  ;;  %v2944_v29 = vsel %vm824_vm1, %v840_v40, %v841_v35  ;;  %v843_v31 = vrot.slane %v2827_v12, 7 }
  0x57   : > { %2258 = vrot.lane.b32.xlu0 %v2257_v55, %s2515_s17  ;;  %v2267_v62 = vpack.i.bf16 %v2918_v8, %v2909_v63  ;;  %v609_v27 = vadd.f32 1.0, %v2408_v22  ;;  %v1076_v30 = vsel %vm873_vm0, %v1074_v17, %v1075_v18  ;;  %v844_v33 = vrot.slane %v2836_v13, 7 }
  0x58   : > { %2409 = vrcp.f32 %v608_v0  ;;  %v832_v34 = vrot.slane %v2848_v21, 7  ;;  %v846_v35 = vrot.slane %v2855_v1, 7  ;;  %v1078_v45 = vsel %vm873_vm0, %v1075_v18, 0.0 }
  0x59   : > { %2268 = vrot.lane.b32.xlu1 %v2267_v62, %s2515_s17  ;;  %2411 = vpow2.f32 %v2852_v32  ;;  %v831_v32 = vrot.slane %v2839_v15, 7  ;;  %v2964_v13 = vsel %vm824_vm1, %v843_v31, %v844_v33  ;;  %v834_v43 = vrot.slane %v2873_v37, 7 }
  0x5a   : > { %2413 = vrcp.f32 %v609_v27  ;;  %v913_v21 = vsel %vm873_vm0, %v896_v5, 0.0  ;;  %v886_v47 = vrot.slane %v2909_v63, 1  ;;  %v835_v50 = vrot.slane %v2883_v42, 7 }
  0x5b   : > { %2278 = vrot.lane.b32.xlu0 %v2277_v14, %s2516_s24  ;;  %2415 = vpow2.f32 %v2876_v38  ;;  %v847_v38 = vrot.slane %v2867_v44, 7  ;;  %v2978_v49 = vsel %vm824_vm1, %v831_v32, %v832_v34  ;;  %v887_v44 = vrot.slane %v2918_v8, 1 }
  0x5c   : > { %v1068_v54 = vrot.slane %v2891_v51, 7  ;;  %v1069_v48 = vrot.slane %v2902_v58, 7  ;;  %v2297_v56 = vpack.i.bf16 %v1078_v45, %v1076_v30  ;;  %v2994_v42 = vsel %vm824_vm1, %v834_v43, %v835_v50 }
  0x5d   : > { %2273 = vrot.lane.b32.xlu1 %v2272_v19, %s2516_s24  ;;  %v2986_v52 = vsel %vm824_vm1, %v846_v35, %v847_v38  ;;  %v837_v57 = vrot.slane %v2909_v63, 7  ;;  %v838_v53 = vrot.slane %v2918_v8, 7  ;;  %v885_v59 = vsel %vm873_vm0, %v883_v26, %v884_v36 }
  0x5e   : > { %v909_v60 = vsel %vm873_vm0, %v884_v36, 0.0  ;;  %v3003_v58 = vsel %vm824_vm1, %v1068_v54, %v1069_v48  ;;  %v828_v3 = vrot.slane %v2815_v7, 7  ;;  %v2292_v4 = vpack.i.bf16 %v913_v21, %v897_v28 }
  0x5f   : > { %2283 = vrot.lane.b32.xlu0 %v2282_v20, %s2516_s24  ;;  %v3011_v5 = vsel %vm824_vm1, %v837_v57, %v838_v53  ;;  %v888_v6 = vsel %vm873_vm0, %v886_v47, %v887_v44  ;;  %v910_v55 = vsel %vm873_vm0, %v887_v44, 0.0  ;;  %v2302_v61 = vpack.i.bf16 %v909_v60, %v885_v59 }
  0x60   : > { %v3020_v8 = vsel %vm824_vm1, %v828_v3, %v829_v16  ;;  %v2307_v17 = vpack.i.bf16 %v910_v55, %v888_v6  ;;  %v619_v18 = vstv %s618_s29  ;;  %v645_v38 = vstv %s644_s28  ;;  %s3250_s29 = scalar_lea.vmem %s3427_s7, %s2657_s27  ;;  %s505_s27 = sand.u32 1, %s2489_s10  }
  0x61   : > { %2288 = vrot.lane.b32.xlu1 %v2287_v25, %s2516_s24  ;;  %v3077_v2 = vsel %vm824_vm1, 0.0, %v846_v35  ;;  %v3084_v12 = vsel %vm824_vm1, 0.0, %v834_v43  ;;  %v1073_v15 = vsel %vm824_vm1, 0.0, %v1068_v54  ;;  %v3095_v35 = vsel %vm824_vm1, 0.0, %v837_v57  ;;  %s1943_s26 = sshll.u32 %s505_s27, 1  ;;  %s1709_s12 = scalar_lea.sflag [#allocation3], %s505_s27 }
  0x62   : > { %s507_s19 = scalar_lea.vmem [#allocation2], %s1943_s26  ;;  %s2517_s28 = smov [#allocation2]  }
  0x63   : > { %2298 = vrot.lane.b32.xlu0 %v2297_v56, %s2516_s24  ;;  %s1728_s14 = sshll.u32 %s507_s19, 4  ;;  %s1729_s14 = int_to_ptr.vmem [resolvable:$true] %s1728_s14 }
  0x64   : > { %s2421_s13 = scalar_lea.vmem %s1729_s14, 32 }
  0x65   : > { %v2410_v9 = vpop.eup %2409  ;;  %2293 = vrot.lane.b32.xlu1 %v2292_v4, %s2516_s24  ;;  %p2422_p6 = scmp.ne.s32.totalorder %s1729_s14, %s2421_s13 }
  0x66   : > { %v2412_v0 = vpop.eup %2411  ;;  %v614_v22 = vmul.f32 %v2410_v9, %v2800_v39 }
  0x67   : > { %v2414_v62 = vpop.eup %2413  ;;  %2303 = vrot.lane.b32.xlu0 %v2302_v61, %s2516_s24  ;;  %v634_v10 = vadd.f32 1.0, %v2412_v0  ;;  %p2423_p7 = pnand %p2422_p6, %p2619_p3 }
  0x68   : > { %v2416_v14 = vpop.eup %2415  ;;  %v615_v16 = vmul.f32 %v2414_v62, %v2803_v46  ;;  %v3027_v19 = vmul.f32 %v619_v18, %v614_v22  ;;  %v870_v62 = vsel %vm824_vm1, 0.0, %v840_v40 }
  0x69   : > { %2308 = vrot.lane.b32.xlu1 %v2307_v17, %s2516_s24  ;;  %v635_v20 = vadd.f32 1.0, %v2416_v14  ;;  %2417 = vrcp.f32 %v634_v10  ;;  %p2424_p9 = pneg %p2423_p7 }
  0x6a   : > { %v621_v25 = vmul.f32 %v619_v18, %v615_v16  ;;  %v874_v26 = vrot.slane %v3027_v19, 1  ;;  %v825_v27 = vrot.slane %v3027_v19, 7 }
  0x6b   : > { %2419 = vrcp.f32 %v635_v20  ;;  %v871_v20 = vsel %vm824_vm1, 0.0, %v843_v31  ;;  %v866_v31 = vsel %vm824_vm1, 0.0, %v828_v3 }
  0x6c   : > { %v2312_v39 = vpack.i.bf16 %v621_v25, %v3027_v19  ;;  %v875_v28 = vrot.slane %v621_v25, 1  ;;  %v826_v36 = vrot.slane %v621_v25, 7  ;;  %v867_v25 = vsel %vm824_vm1, 0.0, %v831_v32 }
  0x6e   : > { %2313 = vrot.lane.b32.xlu0 %v2312_v39, %s2515_s17  ;;  %v876_v46 = vsel %vm873_vm0, %v874_v26, %v875_v28  ;;  %v906_v30 = vsel %vm873_vm0, %v875_v28, 0.0  ;;  %v3040_v33 = vsel %vm824_vm1, %v825_v27, %v826_v36 }
  0x6f   : > { %v2317_v34 = vpack.i.bf16 %v906_v30, %v876_v46 }
  0x71   : > { %2318 = vrot.lane.b32.xlu1 %v2317_v34, %s2516_s24 }
  0x76   : > { %v2418_v45 = vpop.eup %2417 }
  0x77   : > { %v640_v21 = vmul.f32 %v2418_v45, %v2824_v11 }
  0x78   : > { %v2420_v47 = vpop.eup %2419 }
  0x79   : > { %v641_v50 = vmul.f32 %v2420_v47, %v2842_v23  ;;  %v3045_v44 = vmul.f32 %v645_v38, %v640_v21 }
  0x7b   : > { %v647_v48 = vmul.f32 %v645_v38, %v641_v50  ;;  %v1370_v56 = vrot.slane %v3045_v44, 1  ;;  %v1364_v53 = vrot.slane %v3045_v44, 7 }
  0x7d   : > { %v2322_v59 = vpack.i.bf16 %v647_v48, %v3045_v44  ;;  %v1371_v60 = vrot.slane %v647_v48, 1  ;;  %v1365_v4 = vrot.slane %v647_v48, 7 }
  0x7f   : > { %2323 = vrot.lane.b32.xlu0 %v2322_v59, %s2515_s17  ;;  %v1372_v6 = vsel %vm873_vm0, %v1370_v56, %v1371_v60  ;;  %v1374_v11 = vsel %vm873_vm0, %v1371_v60, 0.0  ;;  %v3056_v23 = vsel %vm824_vm1, %v1364_v53, %v1365_v4  ;;  %s2425_s17 = sshll.u32 %s2517_s28, 4  ;;  %s2426_s17 = int_to_ptr.vmem [resolvable:$false] %s2425_s17 }
  0x80   : > { %v2327_v55 = vpack.i.bf16 %v1374_v11, %v1372_v6  ;;  %s2427_s21 = scalar_lea.vmem %s2426_s17, 64  ;;  %p2428_p10 = scmp.lt.s32.totalorder %s1729_s14, %s2426_s17 }
  0x81   : > { %p2429_p11 = scmp.lt.s32.totalorder %s2427_s21, %s2421_s13 }
  0x82   : > { %2328 = vrot.lane.b32.xlu1 %v2327_v55, %s2516_s24  ;;  %s2043_s24 = sshll.u32 %s1724_s18, 5 }
  0x83   : > { %s3373_s11 = scalar_lea.hbm %s3429_s9, %s2043_s24  ;;  %p2430_p12 = por %p2429_p11, %p2428_p10 }
  0x85   : > { %p2431_p13 = pnand %p2430_p12, %p2424_p9 }
  0xbd   : > { %v2234_v61 = vpop.permute.xlu0 %2233 }
  0xbe   : > { %v2236_v14 = vunpack.i.h.bf16 %v2234_v61  ;;  %v2235_v16 = vunpack.i.l.bf16 %v2234_v61 }
  0xbf   : > { %v2244_v9 = vpop.permute.xlu1 %2243 }
  0xc0   : > { %v2245_v26 = vunpack.i.l.bf16 %v2244_v9  ;;  %v2246_v1 = vunpack.i.h.bf16 %v2244_v9  ;;  %v1029_v43 = vsel %vm1018_vm2, %v870_v62, %v2235_v16  ;;  %v1030_v51 = vsel %vm1018_vm2, %v2944_v29, %v2236_v14 }
  0xc1   : > { %v2239_v17 = vpop.permute.xlu0 %2238 }
  0xc2   : > { %v2241_v39 = vunpack.i.h.bf16 %v2239_v17  ;;  %v2240_v28 = vunpack.i.l.bf16 %v2239_v17  ;;  %v1021_v63 = vsel %vm1018_vm2, %v866_v31, %v2245_v26  ;;  %v1022_v50 = vsel %vm1018_vm2, %v3020_v8, %v2246_v1 }
  0xc3   : > { %v2249_v18 = vpop.permute.xlu1 %2248 }
  0xc4   : > { %v2251_v32 = vunpack.i.h.bf16 %v2249_v18  ;;  %v1032_v7 = vsel %vm1018_vm2, %v2964_v13, %v2241_v39  ;;  %v1031_v3 = vsel %vm1018_vm2, %v871_v20, %v2240_v28  ;;  %v2250_v46 = vunpack.i.l.bf16 %v2249_v18  ;;  %v2337_v18 = vld [vmem:[%s3425_s5 + $0x8] sm:$0xff]  }
  0xc5   : > { %v3059_v0 = vpop.permute.xlu0 %2253 }
  0xc6   : > { %v1024_v29 = vsel %vm1018_vm2, %v2978_v49, %v2251_v32  ;;  %v2256_v21 = vunpack.i.h.bf16 %v3059_v0  ;;  %v1023_v4 = vsel %vm1018_vm2, %v867_v25, %v2250_v46  ;;  %v2255_v14 = vunpack.i.l.bf16 %v3059_v0 }
  0xc7   : > { %v3061_v22 = vpop.permute.xlu1 %2263 }
  0xc8   : > { %v1034_v62 = vsel %vm1018_vm2, %v2986_v52, %v2256_v21  ;;  %v2265_v52 = vunpack.i.l.bf16 %v3061_v22 }
  0xc9   : > { %v3066_v10 = vpop.permute.xlu0 %2258 }
  0xca   : > { %v2261_v6 = vunpack.i.h.bf16 %v3066_v10  ;;  %v2260_v49 = vunpack.i.l.bf16 %v3066_v10  ;;  %v2266_v10 = vunpack.i.h.bf16 %v3061_v22 }
  0xcb   : > { %v3079_v40 = vpop.permute.xlu1 %2268 }
  0xcc   : > { %v1093_v0 = vsel %vm1018_vm2, %v3003_v58, %v2261_v6  ;;  %v1092_v31 = vsel %vm1018_vm2, %v1073_v15, %v2260_v49  ;;  %v2339_v15 = vld [vmem:[%s3425_s5] sm:$0xff]  }
  0xcd   : > { %v2279_v37 = vpop.permute.xlu0 %2278 }
  0xce   : > { %v2281_v54 = vunpack.i.h.bf16 %v2279_v37  ;;  %v2280_v36 = vunpack.i.l.bf16 %v2279_v37  ;;  %v2338_v37 = vld [vmem:[%s3425_s5 + $0x38] sm:$0xff]  }
  0xcf   : > { %v2274_v30 = vpop.permute.xlu1 %2273 }
  0xd0   : > { %v1048_v57 = vsel %vm1035_vm3, %v1031_v3, %v2280_v36  ;;  %v1049_v34 = vsel %vm1035_vm3, %v1032_v7, %v2281_v54  ;;  %v2276_v45 = vunpack.i.h.bf16 %v2274_v30  ;;  %v2275_v38 = vunpack.i.l.bf16 %v2274_v30 }
  0xd1   : > { %v3109_v47 = vpack.c.bf16 %v1049_v34, %v1048_v57  ;;  %v2284_v13 = vpop.permute.xlu0 %2283  ;;  %v2271_v54 = vunpack.i.h.bf16 %v3079_v40  ;;  %v2270_v36 = vunpack.i.l.bf16 %v3079_v40  ;;  %v1025_v40 = vsel %vm1018_vm2, %v3084_v12, %v2265_v52 }
  0xd2   : > { %v2286_v48 = vunpack.i.h.bf16 %v2284_v13  ;;  %v2285_v56 = vunpack.i.l.bf16 %v2284_v13  ;;  %v1046_v59 = vsel %vm1035_vm3, %v1029_v43, %v2275_v38  ;;  %v1047_v60 = vsel %vm1035_vm3, %v1030_v51, %v2276_v45 }
  0xd3   : > { %v2289_v11 = vpop.permute.xlu1 %2288  ;;  %v3118_v55 = vpack.c.bf16 %v1047_v60, %v1046_v59  ;;  %v1027_v12 = vsel %vm1018_vm2, %v3095_v35, %v2270_v36  ;;  %v865_v35 = vsel %vm824_vm1, 0.0, %v825_v27 }
  0xd4   : > { %v2291_v61 = vunpack.i.h.bf16 %v2289_v11  ;;  %v2290_v9 = vunpack.i.l.bf16 %v2289_v11  ;;  %v1038_v17 = vsel %vm1035_vm3, %v1021_v63, %v2285_v56  ;;  %v1039_v8 = vsel %vm1035_vm3, %v1022_v50, %v2286_v48 }
  0xd5   : > { %2101 = vmatprep.mubr.msk.bf16.mxu1 %vm1122_vm4, %v3118_v55  ;;  %v2299_v16 = vpop.permute.xlu0 %2298  ;;  %v3131_v20 = vpack.c.bf16 %v1039_v8, %v1038_v17 }
  0xd6   : > { %v1040_v25 = vsel %vm1035_vm3, %v1023_v4, %v2290_v9  ;;  %v1041_v26 = vsel %vm1035_vm3, %v1024_v29, %v2291_v61  ;;  %2102 = vmatmul.mubr.msk.bf16.vlgmr.msra.gmra.mxu1 %vm1122_vm4, %v3109_v47  ;;  %v2301_v39 = vunpack.i.h.bf16 %v2299_v16  ;;  %v2300_v28 = vunpack.i.l.bf16 %v2299_v16 }
  0xd7   : > { %v3141_v1 = vpack.c.bf16 %v1041_v26, %v1040_v25  ;;  %v2294_v32 = vpop.permute.xlu1 %2293  ;;  %2110 = vmatpush3.bf16.msra.mxu1 %v2933_v24  ;;  %2093 = vmatprep.mubr.msk.bf16.mxu0 %vm1122_vm4, %v3131_v20  ;;  %v1033_v24 = vsel %vm1018_vm2, %v3077_v2, %v2255_v14  ;;  %v1026_v2 = vsel %vm1018_vm2, %v2994_v42, %v2266_v10 }
  0xd8   : > { %v2296_v43 = vunpack.i.h.bf16 %v2294_v32  ;;  %v2295_v51 = vunpack.i.l.bf16 %v2294_v32  ;;  %v1095_v22 = vsel %vm1035_vm3, %v1093_v0, %v2301_v39  ;;  %v1094_v58 = vsel %vm1035_vm3, %v1092_v31, %v2300_v28  ;;  %2111 = vmatprep.subr.bf16.mxu1 %v2337_v18 }
  0xd9   : > { %v3158_v7 = vpack.c.bf16 %v1095_v22, %v1094_v58  ;;  %2094 = vmatmul.mubr.msk.bf16.vlgmr.msra.gmra.mxu0 %vm1122_vm4, %v3141_v1  ;;  %v2304_v3 = vpop.permute.xlu0 %2303  ;;  %v1028_v42 = vsel %vm1018_vm2, %v3011_v5, %v2271_v54 }
  0xda   : > { %v1051_v46 = vsel %vm1035_vm3, %v1034_v62, %v2296_v43  ;;  %v1050_v30 = vsel %vm1035_vm3, %v1033_v24, %v2295_v51  ;;  %2132 = vmatpush3.bf16.msra.mxu0 %v2958_v41  ;;  %v2306_v63 = vunpack.i.h.bf16 %v2304_v3  ;;  %v2305_v57 = vunpack.i.l.bf16 %v2304_v3  ;;  %v2340_v41 = vld [vmem:[%s3425_s5 + $0x30] sm:$0xff]  }
  0xdb   : > { %v3169_v34 = vpack.c.bf16 %v1051_v46, %v1050_v30  ;;  %v2309_v45 = vpop.permute.xlu1 %2308  ;;  %2112 = vmatpush3.bf16.msra.mxu1 %v2337_v18  ;;  %2133 = vmatprep.subr.bf16.mxu0 %v2338_v37  ;;  %v3255_v46 = vld [vmem:[%s3426_s6] ss:$0 sm:$0xff] }
  0xdc   : > { %v2311_v38 = vunpack.i.h.bf16 %v2309_v45  ;;  %v2310_v29 = vunpack.i.l.bf16 %v2309_v45  ;;  %v1043_v21 = vsel %vm1035_vm3, %v1026_v2, %v2306_v63  ;;  %v1042_v13 = vsel %vm1035_vm3, %v1025_v40, %v2305_v57  ;;  %2113 = vmatprep.subr.bf16.mxu1 %v2339_v15  ;;  %v1559_v2 = vld [vmem:[%s3250_s29 + $0x10] sm:$0xff] }
  0xdd   : > { %v1055_v50 = vpack.c.bf16 %v1043_v21, %v1042_v13  ;;  %2105 = vmatprep.mubr.msk.bf16.mxu1 %vm1122_vm4, %v3169_v34  ;;  %v1557_v21 = vld [vmem:[%s3250_s29] sm:$0xff] }
  0xde   : > { %v1044_v48 = vsel %vm1035_vm3, %v1027_v12, %v2310_v29  ;;  %v1045_v56 = vsel %vm1035_vm3, %v1028_v42, %v2311_v38  ;;  %2106 = vmatmul.mubr.msk.bf16.gmra.mxu1 %vm1122_vm4, %v3158_v7  ;;  %2134 = vmatpush3.bf16.msra.mxu0 %v2338_v37 }
  0xdf   : > { %v1056_v59 = vpack.c.bf16 %v1045_v56, %v1044_v48  ;;  %2097 = vmatprep.mubr.msk.bf16.mxu0 %vm1122_vm4, %v1055_v50  ;;  %2114 = vmatpush3.bf16.msra.mxu1 %v2339_v15  ;;  %v1560_v56 = vld [vmem:[%s3250_s29 + $0x18] sm:$0xff] }
  0xe0   : > { %v2314_v5 = vpop.permute.xlu0 %2313  ;;  %2135 = vmatprep.subr.bf16.mxu0 %v2340_v41 }
  0xe1   : > { %v2316_v60 = vunpack.i.h.bf16 %v2314_v5  ;;  %v2315_v4 = vunpack.i.l.bf16 %v2314_v5  ;;  %2098 = vmatmul.mubr.msk.bf16.gmra.mxu0 %vm1122_vm4, %v1056_v59 }
  0xe2   : > { %2137 = vmatprep.mubr.msk.bf16.mxu0 %vm1122_vm4, %v3141_v1  ;;  %2136 = vmatpush3.bf16.msra.mxu0 %v2340_v41 }
  0xe3   : > { %v1019_v6 = vsel %vm1018_vm2, %v865_v35, %v2315_v4  ;;  %v1020_v49 = vsel %vm1018_vm2, %v3040_v33, %v2316_v60  ;;  %v2319_v11 = vpop.permute.xlu1 %2318  ;;  %v1369_v33 = vsel %vm824_vm1, 0.0, %v1364_v53 }
  0xe4   : > { %v2321_v61 = vunpack.i.h.bf16 %v2319_v11  ;;  %v2320_v9 = vunpack.i.l.bf16 %v2319_v11 }
  0xe6   : > { %v1036_v19 = vsel %vm1035_vm3, %v1019_v6, %v2320_v9  ;;  %v1037_v27 = vsel %vm1035_vm3, %v1020_v49, %v2321_v61  ;;  %v1558_v9 = vld [vmem:[%s3250_s29 + $0x8] sm:$0xff] }
  0xe7   : > { %v1052_v17 = vpack.c.bf16 %v1037_v27, %v1036_v19 }
  0xe9   : > { %2115 = vmatprep.mubr.msk.bf16.mxu1 %vm1122_vm4, %v1052_v17  ;;  %2138 = vmatmul.mubr.msk.bf16.vlgmr.msra.gmra.mxu0 %vm1122_vm4, %v1055_v50 }
  0xea   : > { %2116 = vmatmul.mubr.msk.bf16.vlgmr.msra.gmra.mxu1 %vm1122_vm4, %v3131_v20  ;;  %2141 = vmatprep.mubr.msk.bf16.mxu0 %vm1122_vm4, %v1056_v59 }
  0xeb   : > { %2119 = vmatprep.mubr.msk.bf16.mxu1 %vm1122_vm4, %v3141_v1 }
  0xf1   : > { %2142 = vmatmul.mubr.msk.bf16.gmra.mxu0 %vm1122_vm4, %v3118_v55  ;;  %v2324_v8 = vpop.permute.xlu0 %2323 }
  0xf2   : > { %2120 = vmatmul.mubr.msk.bf16.gmra.mxu1 %vm1122_vm4, %v1055_v50  ;;  %2145 = vmatprep.mubr.msk.bf16.mxu0 %vm1122_vm4, %v3109_v47  ;;  %v2326_v18 = vunpack.i.h.bf16 %v2324_v8  ;;  %v2325_v62 = vunpack.i.l.bf16 %v2324_v8 }
  0xf3   : > { %2123 = vmatprep.mubr.msk.bf16.mxu1 %vm1122_vm4, %v1056_v59 }
  0xf4   : > { %v1389_v14 = vsel %vm1018_vm2, %v3056_v23, %v2326_v18  ;;  %v1388_v10 = vsel %vm1018_vm2, %v1369_v33, %v2325_v62  ;;  %v2329_v16 = vpop.permute.xlu1 %2328 }
  0xf5   : > { %v2331_v20 = vunpack.i.h.bf16 %v2329_v16  ;;  %v2330_v44 = vunpack.i.l.bf16 %v2329_v16 }
  0xf7   : > { %v1391_v53 = vsel %vm1035_vm3, %v1389_v14, %v2331_v20  ;;  %v1390_v25 = vsel %vm1035_vm3, %v1388_v10, %v2330_v44  ;;  %v1563_v14 = vld [vmem:[%s3250_s29 + $0x30] sm:$0xff] }
  0xf8   : > { %v1392_v26 = vpack.c.bf16 %v1391_v53, %v1390_v25 }
  0xf9   : > { %2146 = vmatmul.mubr.msk.bf16.gmra.mxu0 %vm1122_vm4, %v3169_v34 }
  0xfa   : > { %2124 = vmatmul.mubr.msk.bf16.gmra.mxu1 %vm1122_vm4, %v3118_v55  ;;  %2149 = vmatprep.mubr.msk.bf16.mxu0 %vm1122_vm4, %v3158_v7 }
  0xfb   : > { %2127 = vmatprep.mubr.msk.bf16.mxu1 %vm1122_vm4, %v3109_v47 }
 0x101   : > { %2150 = vmatmul.mubr.msk.bf16.gmra.mxu0 %vm1122_vm4, %v1392_v26 }
 0x102   : > { %2128 = vmatmul.mubr.msk.bf16.gmra.mxu1 %vm1122_vm4, %v3169_v34 }
 0x196   : > { %v3230_v23 = vpop.f32.mrf.mxu1 }
 0x198   : > { %v3232_v39 = vpop.f32.mrf.mxu1 }
 0x199   : > { %v2095_v28 = vpop.f32.mrf.mxu0 }
 0x19a   : > { %v3234_v52 = vpop.f32.mrf.mxu1 }
 0x19b   : > { %v1181_v55 = vpop.f32.mrf.mxu0 }
 0x19c   : > { %v3236_v0 = vpop.f32.mrf.mxu1 }
 0x19d   : > { %v2096_v31 = vpop.f32.mrf.mxu0 }
 0x19e   : > { %v3238_v1 = vpop.f32.mrf.mxu1 }
 0x19f   : > { %v1184_v47 = vpop.f32.mrf.mxu0 }
 0x1a0   : > { %v3240_v32 = vpop.f32.mrf.mxu1 }
 0x1a1   : > { %v2099_v37 = vpop.f32.mrf.mxu0 }
 0x1a2   : > { %v3242_v43 = vpop.f32.mrf.mxu1 }
 0x1a3   : > { %v1197_v51 = vpop.f32.mrf.mxu0 }
 0x1a4   : > { %v3244_v58 = vpop.f32.mrf.mxu1 }
 0x1a5   : > { %v2100_v22 = vpop.f32.mrf.mxu0 }
 0x1a7   : > { %v1200_v15 = vpop.f32.mrf.mxu0 }
 0x1a9   : > { %v2139_v24 = vpop.f32.mrf.mxu0 }
 0x1aa   : > { %v2117_v54 = vpop.f32.mrf.mxu1 }
 0x1ab   : > { %v1308_v36 = vadd.f32 %v2117_v54, %v2095_v28  ;;  %v1455_v7 = vpop.f32.mrf.mxu0 }
 0x1ac   : > { %v1299_v3 = vpop.f32.mrf.mxu1 }
 0x1ad   : > { %v1300_v30 = vadd.f32 %v1299_v3, %v1181_v55  ;;  %v1520_v63 = vadd.f32 %v2139_v24, %v1308_v36  ;;  %v2140_v57 = vpop.f32.mrf.mxu0 }
 0x1ae   : > { %v2118_v40 = vpop.f32.mrf.mxu1 }
 0x1af   : > { %v1543_v34 = vadd.f32 %v3255_v46, %v1520_v63  ;;  %v1311_v45 = vadd.f32 %v2118_v40, %v2096_v31  ;;  %v1518_v38 = vadd.f32 %v1455_v7, %v1300_v30  ;;  %v1458_v29 = vpop.f32.mrf.mxu0  ;;  %v1561_v31 = vld [vmem:[%s3250_s29 + $0x20] sm:$0xff]  ;;  %v1564_v7 = vld [vmem:[%s3250_s29 + $0x38] sm:$0xff] }
 0x1b0   : > { %v1302_v13 = vpop.f32.mrf.mxu1 }
 0x1b1   : > { %v1575_v41 = vadd.f32 %v1559_v2, %v1543_v34  ;;  %v1541_v42 = vadd.f32 %v3255_v46, %v1518_v38  ;;  %v1303_v12 = vadd.f32 %v1302_v13, %v1184_v47  ;;  %v1521_v50 = vadd.f32 %v2140_v57, %v1311_v45  ;;  %v2143_v48 = vpop.f32.mrf.mxu0 }
 0x1b2   : > { %v2121_v59 = vpop.f32.mrf.mxu1 }
 0x1b3   : > { %1684 = vst.msk [vmem:[%s3263_s25 + $0x10] sm:$0xff] %vm1018_vm2, %v1575_v41  ;;  %v1573_v5 = vadd.f32 %v1557_v21, %v1541_v42  ;;  %v1544_v35 = vadd.f32 %v3255_v46, %v1521_v50  ;;  %v1471_v60 = vpop.f32.mrf.mxu0  ;;  %v1628_v4 = vmul.f32 %v1575_v41, %v1575_v41  ;;  %v1324_v6 = vadd.f32 %v2121_v59, %v2099_v37 }
 0x1b4   : > { %v1519_v49 = vadd.f32 %v1458_v29, %v1303_v12  ;;  %v1315_v11 = vpop.f32.mrf.mxu1  ;;  %v1592_v18 = vsel %vm1018_vm2, %v1575_v41, 0.0  ;;  %v1562_v12 = vld [vmem:[%s3250_s29 + $0x28] sm:$0xff] }
 0x1b5   : > { %1682 = vst.msk [vmem:[%s3263_s25] sm:$0xff] %vm1018_vm2, %v1573_v5  ;;  %v1576_v61 = vadd.f32 %v1560_v56, %v1544_v35  ;;  %v2144_v19 = vpop.f32.mrf.mxu0  ;;  %v1316_v17 = vadd.f32 %v1315_v11, %v1197_v51  ;;  %v1524_v33 = vadd.f32 %v2143_v48, %v1324_v6  ;;  %v1626_v62 = vmul.f32 %v1573_v5, %v1573_v5 }
 0x1b6   : > { %v1542_v27 = vadd.f32 %v3255_v46, %v1519_v49  ;;  %v2122_v8 = vpop.f32.mrf.mxu1  ;;  %v1645_v20 = vsel %vm1018_vm2, %v1628_v4, 0.0  ;;  %v1589_v28 = vsel %vm1018_vm2, %v1573_v5, 0.0 }
 0x1b7   : > { %1685 = vst.msk [vmem:[%s3263_s25 + $0x18] sm:$0xff] %vm1018_vm2, %v1576_v61  ;;  %v1327_v10 = vadd.f32 %v2122_v8, %v2100_v22  ;;  %v1474_v16 = vpop.f32.mrf.mxu0  ;;  %v1547_v53 = vadd.f32 %v3255_v46, %v1524_v33  ;;  %v1522_v25 = vadd.f32 %v1471_v60, %v1316_v17  ;;  %v1629_v55 = vmul.f32 %v1576_v61, %v1576_v61  ;;  %v1567_v8 = vld [vmem:[%s3250_s29 + $0x50] sm:$0xff] }
 0x1b8   : > { %v1574_v44 = vadd.f32 %v1558_v9, %v1542_v27  ;;  %v1318_v26 = vpop.f32.mrf.mxu1  ;;  %v1642_v30 = vsel %vm1018_vm2, %v1626_v62, 0.0  ;;  %v1594_v40 = vsel %vm1018_vm2, %v1576_v61, 0.0 }
 0x1b9   : > { %v1319_v47 = vadd.f32 %v1318_v26, %v1200_v15  ;;  %v1525_v37 = vadd.f32 %v2144_v19, %v1327_v10  ;;  %v2147_v51 = vpop.f32.mrf.mxu0  ;;  %v1579_v54 = vadd.f32 %v1563_v14, %v1547_v53  ;;  %v1545_v36 = vadd.f32 %v3255_v46, %v1522_v25 }
 0x1ba   : > { %v1590_v24 = vsel %vm1018_vm2, %v1574_v44, 0.0  ;;  %v1627_v22 = vmul.f32 %v1574_v44, %v1574_v44  ;;  %1683 = vst.msk [vmem:[%s3263_s25 + $0x8] sm:$0xff] %vm1018_vm2, %v1574_v44  ;;  %v2125_v3 = vpop.f32.mrf.mxu1  ;;  %v1647_v48 = vsel %vm1018_vm2, %v1629_v55, 0.0 }
 0x1bb   : > { %v1591_v63 = vadd.f32 %v1590_v24, %v1589_v28  ;;  %v1548_v57 = vadd.f32 %v3255_v46, %v1525_v37  ;;  %v1523_v15 = vadd.f32 %v1474_v16, %v1319_v47  ;;  %v1487_v2 = vpop.f32.mrf.mxu0  ;;  %1688 = vst.msk [vmem:[%s3263_s25 + $0x30] sm:$0xff] %vm1018_vm2, %v1579_v54  ;;  %v1577_v45 = vadd.f32 %v1561_v31, %v1545_v36 }
 0x1bc   : > { %v1643_v34 = vsel %vm1018_vm2, %v1627_v22, 0.0  ;;  %v1340_v38 = vadd.f32 %v2125_v3, %v3230_v23  ;;  %v1331_v29 = vpop.f32.mrf.mxu1  ;;  %v1600_v56 = vsel %vm1018_vm2, %v1579_v54, 0.0  ;;  %v1632_v60 = vmul.f32 %v1579_v54, %v1579_v54  ;;  %v1566_v3 = vld [vmem:[%s3250_s29 + $0x48] sm:$0xff] }
 0x1bd   : > { %v1593_v21 = vadd.f32 %v1592_v18, %v1591_v63  ;;  %v1644_v13 = vadd.f32 %v1643_v34, %v1642_v30  ;;  %v1580_v41 = vadd.f32 %v1564_v7, %v1548_v57  ;;  %v1546_v42 = vadd.f32 %v3255_v46, %v1523_v15  ;;  %v2148_v50 = vpop.f32.mrf.mxu0  ;;  %1686 = vst.msk [vmem:[%s3263_s25 + $0x20] sm:$0xff] %vm1018_vm2, %v1577_v45  ;;  %v1568_v7 = vld [vmem:[%s3250_s29 + $0x58] sm:$0xff] }
 0x1be   : > { %v1630_v59 = vmul.f32 %v1577_v45, %v1577_v45  ;;  %v1332_v5 = vadd.f32 %v1331_v29, %v3232_v39  ;;  %v2126_v23 = vpop.f32.mrf.mxu1  ;;  %v1596_v6 = vsel %vm1018_vm2, %v1577_v45, 0.0  ;;  %v1528_v9 = vadd.f32 %v2147_v51, %v1340_v38 }
 0x1bf   : > { %v1646_v35 = vadd.f32 %v1645_v20, %v1644_v13  ;;  %v1595_v4 = vadd.f32 %v1594_v40, %v1593_v21  ;;  %1689 = vst.msk [vmem:[%s3263_s25 + $0x38] sm:$0xff] %vm1018_vm2, %v1580_v41  ;;  %v1490_v49 = vpop.f32.mrf.mxu0  ;;  %v1633_v11 = vmul.f32 %v1580_v41, %v1580_v41  ;;  %v1578_v61 = vadd.f32 %v1562_v12, %v1546_v42  ;;  %v1565_v20 = vld [vmem:[%s3250_s29 + $0x40] sm:$0xff] }
 0x1c0   : > { %v1343_v19 = vadd.f32 %v2126_v23, %v3234_v52  ;;  %v1334_v27 = vpop.f32.mrf.mxu1  ;;  %v1649_v33 = vsel %vm1018_vm2, %v1630_v59, 0.0  ;;  %v1526_v18 = vadd.f32 %v1487_v2, %v1332_v5  ;;  %v1551_v16 = vadd.f32 %v3255_v46, %v1528_v9  ;;  %v1569_v9 = vld [vmem:[%s3250_s29 + $0x60] sm:$0xff] }
 0x1c1   : > { %v1597_v17 = vadd.f32 %v1596_v6, %v1595_v4  ;;  %v1648_v39 = vadd.f32 %v1647_v48, %v1646_v35  ;;  %v2151_v62 = vpop.f32.mrf.mxu0  ;;  %v1598_v14 = vsel %vm1018_vm2, %v1578_v61, 0.0  ;;  %v1631_v10 = vmul.f32 %v1578_v61, %v1578_v61  ;;  %1687 = vst.msk [vmem:[%s3263_s25 + $0x28] sm:$0xff] %vm1018_vm2, %v1578_v61  ;;  %v1571_v35 = vld [vmem:[%s3250_s29 + $0x70] sm:$0xff] }
 0x1c2   : > { %v1335_v44 = vadd.f32 %v1334_v27, %v3236_v0  ;;  %v2129_v52 = vpop.f32.mrf.mxu1  ;;  %v1549_v26 = vadd.f32 %v3255_v46, %v1526_v18  ;;  %v1529_v28 = vadd.f32 %v2148_v50, %v1343_v19  ;;  %v1583_v47 = vadd.f32 %v1567_v8, %v1551_v16  ;;  %v1572_v18 = vld [vmem:[%s3250_s29 + $0x78] sm:$0xff] }
 0x1c3   : > { %v1650_v53 = vadd.f32 %v1649_v33, %v1648_v39  ;;  %v1599_v25 = vadd.f32 %v1598_v14, %v1597_v17  ;;  %v1503_v55 = vpop.f32.mrf.mxu0  ;;  %v1651_v31 = vsel %vm1018_vm2, %v1631_v10, 0.0  ;;  %v1356_v37 = vadd.f32 %v2129_v52, %v3238_v1 }
 0x1c4   : > { %v1527_v51 = vadd.f32 %v1490_v49, %v1335_v44  ;;  %v1347_v24 = vpop.f32.mrf.mxu1  ;;  %v1581_v54 = vadd.f32 %v1565_v20, %v1549_v26  ;;  %v1552_v36 = vadd.f32 %v3255_v46, %v1529_v28  ;;  %v1653_v30 = vsel %vm1018_vm2, %v1632_v60, 0.0  ;;  %1692 = vst.msk [vmem:[%s3263_s25 + $0x50] sm:$0xff] %vm1018_vm2, %v1583_v47  ;;  %v1570_v44 = vld [vmem:[%s3250_s29 + $0x68] sm:$0xff] }
 0x1c5   : > { %v1601_v22 = vadd.f32 %v1600_v56, %v1599_v25  ;;  %v1652_v0 = vadd.f32 %v1651_v31, %v1650_v53  ;;  %v1602_v63 = vsel %vm1018_vm2, %v1580_v41, 0.0  ;;  %v1655_v57 = vsel %vm1018_vm2, %v1633_v11, 0.0  ;;  %v2152_v38 = vpop.f32.mrf.mxu0 }
 0x1c6   : > { %v1550_v1 = vadd.f32 %v3255_v46, %v1527_v51  ;;  %v2130_v15 = vpop.f32.mrf.mxu1  ;;  %v1634_v34 = vmul.f32 %v1581_v54, %v1581_v54  ;;  %1690 = vst.msk [vmem:[%s3263_s25 + $0x40] sm:$0xff] %vm1018_vm2, %v1581_v54  ;;  %v1348_v45 = vadd.f32 %v1347_v24, %v3240_v32  ;;  %v1604_v29 = vsel %vm1018_vm2, %v1581_v54, 0.0 }
 0x1c7   : > { %v1654_v2 = vadd.f32 %v1653_v30, %v1652_v0  ;;  %v1603_v40 = vadd.f32 %v1602_v63, %v1601_v22  ;;  %v1584_v21 = vadd.f32 %v1568_v7, %v1552_v36  ;;  %v1532_v41 = vadd.f32 %v2151_v62, %v1356_v37 }
 0x1c8   : > { %v1582_v13 = vadd.f32 %v1566_v3, %v1550_v1  ;;  %v1608_v42 = vsel %vm1018_vm2, %v1583_v47, 0.0  ;;  %v1359_v48 = vadd.f32 %v2130_v15, %v3242_v43  ;;  %v1350_v56 = vpop.f32.mrf.mxu1  ;;  %v1636_v59 = vmul.f32 %v1583_v47, %v1583_v47  ;;  %v1506_v43 = vpop.f32.mrf.mxu0 }
 0x1c9   : > { %v1605_v12 = vadd.f32 %v1604_v29, %v1603_v40  ;;  %v1656_v50 = vadd.f32 %v1655_v57, %v1654_v2  ;;  %v1657_v5 = vsel %vm1018_vm2, %v1634_v34, 0.0  ;;  %1693 = vst.msk [vmem:[%s3263_s25 + $0x58] sm:$0xff] %vm1018_vm2, %v1584_v21  ;;  %v1555_v6 = vadd.f32 %v3255_v46, %v1532_v41 }
 0x1ca   : > { %v1606_v32 = vsel %vm1018_vm2, %v1582_v13, 0.0  ;;  %v1635_v23 = vmul.f32 %v1582_v13, %v1582_v13  ;;  %1691 = vst.msk [vmem:[%s3263_s25 + $0x48] sm:$0xff] %vm1018_vm2, %v1582_v13  ;;  %v1530_v49 = vadd.f32 %v1503_v55, %v1348_v45  ;;  %v1637_v11 = vmul.f32 %v1584_v21, %v1584_v21 }
 0x1cb   : > { %v1658_v60 = vadd.f32 %v1657_v5, %v1656_v50  ;;  %v1607_v4 = vadd.f32 %v1606_v32, %v1605_v12  ;;  %v1351_v19 = vadd.f32 %v1350_v56, %v3244_v58  ;;  %v1533_v27 = vadd.f32 %v2152_v38, %v1359_v48 }
 0x1cc   : > { %v1659_v61 = vsel %vm1018_vm2, %v1635_v23, 0.0  ;;  %v1587_v33 = vadd.f32 %v1571_v35, %v1555_v6  ;;  %v1553_v8 = vadd.f32 %v3255_v46, %v1530_v49  ;;  %v1661_v62 = vsel %vm1018_vm2, %v1636_v59, 0.0 }
 0x1cd   : > { %v1609_v17 = vadd.f32 %v1608_v42, %v1607_v4  ;;  %v1660_v39 = vadd.f32 %v1659_v61, %v1658_v60  ;;  %v1556_v14 = vadd.f32 %v3255_v46, %v1533_v27  ;;  %v1531_v10 = vadd.f32 %v1506_v43, %v1351_v19 }
 0x1ce   : > { %v1610_v16 = vsel %vm1018_vm2, %v1584_v21, 0.0  ;;  %1696 = vst.msk [vmem:[%s3263_s25 + $0x70] sm:$0xff] %vm1018_vm2, %v1587_v33  ;;  %v1585_v58 = vadd.f32 %v1569_v9, %v1553_v8  ;;  %v1663_v52 = vsel %vm1018_vm2, %v1637_v11, 0.0  ;;  %v1640_v24 = vmul.f32 %v1587_v33, %v1587_v33 }
 0x1cf   : > { %v1662_v20 = vadd.f32 %v1661_v62, %v1660_v39  ;;  %v1611_v53 = vadd.f32 %v1610_v16, %v1609_v17  ;;  %v1588_v25 = vadd.f32 %v1572_v18, %v1556_v14  ;;  %v1554_v26 = vadd.f32 %v3255_v46, %v1531_v10 }
 0x1d0   : > { %v1612_v28 = vsel %vm1018_vm2, %v1585_v58, 0.0  ;;  %v1638_v55 = vmul.f32 %v1585_v58, %v1585_v58  ;;  %1694 = vst.msk [vmem:[%s3263_s25 + $0x60] sm:$0xff] %vm1018_vm2, %v1585_v58  ;;  %v1616_v36 = vsel %vm1018_vm2, %v1587_v33, 0.0  ;;  %v1669_v57 = vsel %vm1018_vm2, %v1640_v24, 0.0 }
 0x1d1   : > { %v1664_v31 = vadd.f32 %v1663_v52, %v1662_v20  ;;  %v1613_v47 = vadd.f32 %v1612_v28, %v1611_v53  ;;  %1697 = vst.msk [vmem:[%s3263_s25 + $0x78] sm:$0xff] %vm1018_vm2, %v1588_v25  ;;  %v1586_v37 = vadd.f32 %v1570_v44, %v1554_v26  ;;  %v1641_v7 = vmul.f32 %v1588_v25, %v1588_v25 }
 0x1d2   : > { %v1665_v51 = vsel %vm1018_vm2, %v1638_v55, 0.0  ;;  %v1618_v1 = vsel %vm1018_vm2, %v1588_v25, 0.0 }
 0x1d3   : > { %v1666_v22 = vadd.f32 %v1665_v51, %v1664_v31  ;;  %v1614_v0 = vsel %vm1018_vm2, %v1586_v37, 0.0  ;;  %v1639_v54 = vmul.f32 %v1586_v37, %v1586_v37  ;;  %1695 = vst.msk [vmem:[%s3263_s25 + $0x68] sm:$0xff] %vm1018_vm2, %v1586_v37  ;;  %v1671_v40 = vsel %vm1018_vm2, %v1641_v7, 0.0 }
 0x1d4   : > { %v1615_v46 = vadd.f32 %v1614_v0, %v1613_v47 }
 0x1d5   : > { %v1667_v3 = vsel %vm1018_vm2, %v1639_v54, 0.0 }
 0x1d6   : > { %v1617_v30 = vadd.f32 %v1616_v36, %v1615_v46  ;;  %v1668_v63 = vadd.f32 %v1667_v3, %v1666_v22 }
 0x1d8   : > { %v1619_v15 = vadd.f32 %v1618_v1, %v1617_v30  ;;  %v1670_v2 = vadd.f32 %v1669_v57, %v1668_v63 }
 0x1da   : > { %v1620_v34 = vrot.slane %v1619_v15, 4  ;;  %v1672_v45 = vadd.f32 %v1671_v40, %v1670_v2 }
 0x1dc   : > { %v1621_v38 = vadd.f32 %v1620_v34, %v1619_v15  ;;  %v1673_v29 = vrot.slane %v1672_v45, 4 }
 0x1de   : > { %v1622_v21 = vrot.slane %v1621_v38, 2  ;;  %v1674_v13 = vadd.f32 %v1673_v29, %v1672_v45 }
 0x1e0   : > { %v1623_v41 = vadd.f32 %v1622_v21, %v1621_v38  ;;  %v1675_v42 = vrot.slane %v1674_v13, 2 }
 0x1e2   : > { %v1624_v12 = vrot.slane %v1623_v41, 1  ;;  %v1676_v50 = vadd.f32 %v1675_v42, %v1674_v13 }
 0x1e4   : > { %v1677_v48 = vrot.slane %v1676_v50, 1  ;;  %v1625_v56 = vadd.f32 %v1624_v12, %v1623_v41 }
 0x1e6   : > { %v1678_v59 = vadd.f32 %v1677_v48, %v1676_v50 }
 0x1e8   : > { %v1679_v5 = vsel %vm824_vm1, %v1625_v56, %v1678_v59 }
 0x1e9   : > { %1681 = vst.msk [vmem:[%s507_s19] sm:$0x3] %vm1680_vm5, %v1679_v5 }
 0x1ea   : > { %2434 = shalt.err (!%p2431_p13)
}
 0x1eb   : > { %s2435_s25 = scalar_lea.hbm %s3373_s11, 32  ;;  %s2439_s20 = scalar_lea.hbm %s3429_s9, 128 }
 0x1ec   : > { %p2436_p0 = scmp.ne.s32.totalorder %s3373_s11, %s2435_s25  ;;  %p2440_p4 = scmp.lt.s32.totalorder %s3373_s11, %s3429_s9 }
 0x1ed   : > { %p2441_p5 = scmp.lt.s32.totalorder %s2439_s20, %s2435_s25 }
 0x1ee   : > { %p2437_p1 = pnand %p2436_p0, %p2619_p3 }
 0x1ef   : > { %p2442_p6 = por %p2441_p5, %p2440_p4 }
 0x1f0   : > { %p2438_p2 = pneg %p2437_p1 }
 0x1f2   : > { %p2443_p7 = pnand %p2442_p6, %p2438_p2 }
 0x1f4   : > { %2446 = shalt.err (!%p2443_p7)
}
 0x1f5   : > { %2159 = dma.vmem_to_hbm [thread:$0]  (%p2619_p3), %s1729_s14, 32, %s3373_s11, %s1709_s12  }
 0x1f6 PF: > { %p2165_p9 = scmp.ge.s32.totalorder %s2513_s16, 2  ;;  %s1753_s19 = sand.u32 1, %s2485_s30  }
 0x1f7   : > { %s1754_s15 = scalar_lea.sflag [#allocation3], %s1753_s19 }
 0x1f8   : > { %p2162_p10 = pnand %p2165_p9, %p2628_p8 }
 0x1fa   : > { %p2163_p11 = pneg %p2162_p10 }
 0x1fc   : > { %2480 = dma.done.wait (%p2163_p11), %s1754_s15, 32  }
 0x1fd   : > { %2482 = vsyncadd (%p2163_p11), %s1754_s15, 4294967264  ;;  %s23_s16 = sadd.s32 1, %s2513_s16   ;;  %s3444_s29 = sld [smem:[#allocation5_spill]] }
 0x1fe   : > { %p20_p12 = scmp.ge.s32.totalorder %s23_s16, 6   ;;  %s3445_s11 = sld [smem:[#allocation10_spill]] }
 0x1ff   : > { %s3446_s12 = sld [smem:[#allocation6_spill]]  ;;  %s3450_s30 = smov %s2489_s10 }
 0x200   : > { %s3447_s13 = sld [smem:[#allocation7_spill]]  ;;  %22 = sbr.rel (!%p20_p12) target bundleno = 5 (0x5), region = 116 }
 0x201   : > { %s3448_s14 = sld [smem:[#allocation8_spill]] }
 0x202   : > { %s3449_s15 = sld [smem:[#allocation9_spill]] }
 0x203   : > { %s3451_s10 = smov %s3444_s29 }
 0x205   :  { %1759 = vsyncpa [#allocation3], 1 }
 0x206   :  { %1761 = vsyncpa [#allocation3 + $0x1], 1 }

// kernel: encoder_block_2d.8
= control target key start
LH: loop header
LB: loop body
LE: loop exit
PB: predicated region body
PF: predicated region fallthrough
CT: control target
= control target key end

     0   :  { %s2734_s17 = smov 0   ;;  %s2736_s18 = smov 0   ;;  %s3496_s0 = inlined_call_operand.vmem [shape: f32[2,1,16], index: 0, kind: input, shape index: {}]   ;;  %s3497_s1 = inlined_call_operand.vmem [shape: f32[2,1,16], index: 1, kind: input, shape index: {}]   ;;  %s3498_s2 = inlined_call_operand.vmem [shape: f32[2,16,16,16], index: 2, kind: input, shape index: {}, may-alias: {2,3,4}]   ;;  %s3499_s3 = inlined_call_operand.vmem [shape: f32[2,16,16,16], index: 3, kind: input, shape index: {}, may-alias: {2,3,4}]   ;;  %s3500_s4 = inlined_call_operand.vmem [shape: f32[2,16,16,16], index: 4, kind: input, shape index: {}, may-alias: {2,3,4}]   ;;  %s3501_s5 = inlined_call_operand.vmem [shape: bf16[3,48,16], index: 5, kind: input, shape index: {}]   ;;  %s3502_s6 = inlined_call_operand.vmem [shape: f32[1,16], index: 6, kind: input, shape index: {}]   ;;  %s3503_s7 = inlined_call_operand.vmem [shape: f32[2,16,16,8], index: 7, kind: input, shape index: {}]   ;;  %s3504_s8 = inlined_call_operand.vmem [shape: bf16[8,16], index: 8, kind: input, shape index: {}]   ;;  %s3505_s9 = inlined_call_operand.vmem [shape: f32[1,16], index: 9, kind: input, shape index: {}]   ;;  %s3506_s10 = inlined_call_operand.vmem [shape: f32[2,16,16,16], index: 10, kind: output, shape index: {0}]   ;;  %s3507_s11 = inlined_call_operand.vmem [shape: f32[2,2,2,16], index: 11, kind: output, shape index: {1}]  }
   0x1   :  { %s2738_s19 = smov 0   ;;  %s2740_s20 = smov 0  }
   0x2   :  { %s2742_s21 = smov 0  }
   0x3 LB: > { %s31_s22 = sadd.s32 1, %s2662_s19  ;;  %s34_s23 = sadd.s32 1, %s2666_s20  ;;  %s2670_s21 = sphi %s2742_s21, %s22_s21   ;;  %s2666_s20 = sphi %s2740_s20, %s3516_s20   ;;  %s2662_s19 = sphi %s2738_s19, %s3515_s19   ;;  %s2658_s18 = sphi %s2736_s18, %s3514_s18   ;;  %s2654_s17 = sphi %s2734_s17, %s3513_s17  }
   0x4   : > { %p32_p0 = scmp.ge.s32.totalorder %s31_s22, 2  ;;  %p2155_p1 = scmp.ge.s32.totalorder %s2670_s21, 1 }
   0x5   : > { %p462_p2 = scmp.lt.s32.totalorder %s2670_s21, 5 }
   0x6   : > { %s3518_s22 = smov (%p32_p0, %s31_s22), 0  ;;  %s3520_s23 = smov (!%p32_p0, %s34_s23), %s2666_s20 }
   0x7   : > { %3508 = sst [smem:[#allocation2_spill]] %s3518_s22  ;;  %p463_p3 = pnand %p2155_p1, %p462_p2 }
   0x8   : > { %p36_p4 = scmp.ge.s32.totalorder %s3520_s23, 2  ;;  %p562_p5 = scmp.lt.s32.totalorder (!%p463_p3), %s2658_s18, 1 }
   0x9   : > { %466 = sbr.rel (%p463_p3) target bundleno = 486 (0x1e6), region = 60  ;;  %s2767_s24 = sshll.u32 (!%p463_p3), %s2654_s17, 3 }
   0xa   : > { %s3522_s23 = smov (%p36_p4, %s3520_s23), 0  ;;  %p588_p6 = scmp.lt.s32.totalorder (!%p463_p3), %s2767_s24, 15 }
   0xb   : > { %3509 = sst [smem:[#allocation3_spill]] %s3522_s23  ;;  %s2157_s23 = sadd.s32 (!%p463_p3), 4294967295, %s2767_s24 }
   0xc   : > { %p570_p7 = scmp.gt.s32.totalorder (!%p463_p3), %s2157_s23, 0  ;;  %p2158_p8 = scmp.lt.s32.totalorder (!%p463_p3), %s2157_s23, 15 }
   0xd   : > { %p637_p10 = scmp.lt.s32.totalorder (!%p463_p3), %s2654_s17, 1  ;;  %p678_p11 = scmp.gt.s32.totalorder (!%p463_p3), %s2654_s17, 0 }
   0xe   : > { %s3524_s18 = smov (!%p562_p5, %s2658_s18), 1  ;;  %vm935_vm0 = vcmask 1046528   ;;  %vm886_vm1 = vcmask 1040384   ;;  %vm1669_vm2 = vcmask 1043456   ;;  %vm1080_vm3 = vcmask 130048  }
   0xf   : > { %s589_s25 = scalar_select %p588_p6, %s2767_s24, 15  ;;  %vm1097_vm4 = vcmask 261120   ;;  %vm1184_vm5 = vcmask 392192   ;;  %vm1644_vm6 = vcmask 64512   ;;  %vm1900_vm7 = vcmask 123904  }
  0x10   : > { %s564_s28 = scalar_lea.vmem %s3496_s0, %s3524_s18  ;;  %s567_s12 = scalar_lea.vmem %s3497_s1, %s3524_s18 }
  0x11   : > { %s2782_s13 = sshll.u32 %s3524_s18, 5  ;;  %s2167_s14 = sshll.u32 %s589_s25, 1  ;;  %v2785_v0 = vld [vmem:[%s564_s28] ss:$0 sm:$0xff] }
  0x12   : > { %s592_s15 = sadd.s32 %s2167_s14, %s2782_s13  ;;  %v2789_v1 = vld [vmem:[%s567_s12] ss:$0 sm:$0xff]  ;;  %s2185_s26 = sshll.u32 %s3524_s18, 1 }
  0x13   : > { %s2787_s16 = sshll.u32 %s592_s15, 3 }
  0x14   : > { %s2796_s27 = scalar_lea.vmem %s3499_s3, %s2787_s16  ;;  %s3276_s12 = scalar_lea.vmem %s3503_s7, %s2787_s16 }
  0x15   : > { %v710_v2 = vld [vmem:[%s2796_s27] sm:$0xff]  ;;  %v711_v3 = vld [vmem:[%s2796_s27 + $0x8] sm:$0xff]  ;;  %v712_v4 = vld [vmem:[%s2796_s27 + $0x10] sm:$0xff]  ;;  %s571_s22 = scalar_select %p570_p7, %s2157_s23, 0 }
  0x16   : > { %v726_v5 = vmul.f32 %v2785_v0, %v710_v2  ;;  %v727_v6 = vmul.f32 %v2785_v0, %v711_v3  ;;  %v713_v7 = vld [vmem:[%s2796_s27 + $0x18] sm:$0xff]  ;;  %v728_v8 = vmul.f32 %v2785_v0, %v712_v4  ;;  %v714_v9 = vld [vmem:[%s2796_s27 + $0x20] sm:$0xff]  ;;  %v715_v10 = vld [vmem:[%s2796_s27 + $0x28] sm:$0xff]  ;;  %s2273_s23 = sadd.s32 8, %s2767_s24 }
  0x17   : > { %v729_v11 = vmul.f32 %v2785_v0, %v713_v7  ;;  %v730_v12 = vmul.f32 %v2785_v0, %v714_v9  ;;  %v731_v13 = vmul.f32 %v2785_v0, %v715_v10  ;;  %v716_v14 = vld [vmem:[%s2796_s27 + $0x30] sm:$0xff]  ;;  %v717_v15 = vld [vmem:[%s2796_s27 + $0x38] sm:$0xff]  ;;  %s3526_s22 = smov (!%p2158_p8, %s571_s22), 15  ;;  %v718_v20 = vld [vmem:[%s2796_s27 + $0x40] sm:$0xff]  ;;  %p2857_p9 = scmp.lt.s32.totalorder %s2273_s23, 15 }
  0x18   : > { %v2813_v16 = vadd.f32 %v2789_v1, %v726_v5  ;;  %v2816_v17 = vadd.f32 %v2789_v1, %v727_v6  ;;  %v2819_v18 = vadd.f32 %v2789_v1, %v728_v8  ;;  %v732_v19 = vmul.f32 %v2785_v0, %v716_v14  ;;  %v719_v25 = vld [vmem:[%s2796_s27 + $0x48] sm:$0xff]  ;;  %v720_v26 = vld [vmem:[%s2796_s27 + $0x50] sm:$0xff]  ;;  %v721_v27 = vld [vmem:[%s2796_s27 + $0x58] sm:$0xff]  ;;  %s2163_s25 = sshll.u32 %s3526_s22, 1 }
  0x19   : > { %v2825_v21 = vadd.f32 %v2789_v1, %v729_v11  ;;  %v2828_v22 = vadd.f32 %v2789_v1, %v730_v12  ;;  %v2831_v23 = vadd.f32 %v2789_v1, %v731_v13  ;;  %v733_v24 = vmul.f32 %v2785_v0, %v717_v15  ;;  %v722_v35 = vld [vmem:[%s2796_s27 + $0x60] sm:$0xff]  ;;  %s578_s28 = sadd.s32 %s2782_s13, %s2163_s25  ;;  %v723_v39 = vld [vmem:[%s2796_s27 + $0x68] sm:$0xff]  ;;  %s3528_s23 = smov (!%p2857_p9, %s2273_s23), 15  ;;  %v724_v13 = vld [vmem:[%s2796_s27 + $0x70] sm:$0xff] }
  0x1a   : > { %v2193_v28 = vmul.f32 -1.442695, %v2813_v16  ;;  %v2194_v29 = vmul.f32 -1.442695, %v2816_v17  ;;  %v2195_v30 = vmul.f32 -1.442695, %v2819_v18  ;;  %v2842_v31 = vadd.f32 %v2789_v1, %v732_v19 }
  0x1b   : > { %v2196_v32 = vmul.f32 -1.442695, %v2825_v21  ;;  %v2197_v33 = vmul.f32 -1.442695, %v2828_v22  ;;  %v2847_v34 = vadd.f32 %v2789_v1, %v733_v24  ;;  %v2198_v36 = vmul.f32 -1.442695, %v2831_v23 }
  0x1c   : > { %2552 = vpow2.f32 %v2193_v28  ;;  %v2199_v37 = vmul.f32 -1.442695, %v2842_v31  ;;  %v734_v38 = vmul.f32 %v2785_v0, %v718_v20  ;;  %s2165_s30 = sshll.u32 %s578_s28, 3  ;;  %v735_v41 = vmul.f32 %v2785_v0, %v719_v25  ;;  %s3530_s23 = smov (!%p2857_p9, %s3528_s23), 15  ;;  %v725_v24 = vld [vmem:[%s2796_s27 + $0x78] sm:$0xff] }
  0x1d   : > { %2554 = vpow2.f32 %v2194_v29  ;;  %v2200_v40 = vmul.f32 -1.442695, %v2847_v34  ;;  %v736_v42 = vmul.f32 %v2785_v0, %v720_v26  ;;  %s580_s15 = scalar_lea.vmem %s3498_s2, %s2165_s30  ;;  %v737_v44 = vmul.f32 %v2785_v0, %v721_v27  ;;  %s2174_s22 = sshll.u32 %s3530_s23, 1 }
  0x1e   : > { %2556 = vpow2.f32 %v2195_v30  ;;  %v2869_v43 = vadd.f32 %v2789_v1, %v734_v38  ;;  %v738_v45 = vmul.f32 %v2785_v0, %v722_v35  ;;  %v646_v46 = vld [vmem:[%s580_s15] sm:$0xff]  ;;  %v647_v47 = vld [vmem:[%s580_s15 + $0x8] sm:$0xff]  ;;  %v2875_v48 = vadd.f32 %v2789_v1, %v735_v41  ;;  %s638_s18 = scalar_select %p637_p10, %s2654_s17, 1 }
  0x1f   : > { %2558 = vpow2.f32 %v2196_v32  ;;  %v2878_v49 = vadd.f32 %v2789_v1, %v736_v42  ;;  %v739_v50 = vmul.f32 %v2785_v0, %v723_v39  ;;  %v654_v51 = vmul.f32 %v2785_v0, %v646_v46  ;;  %s606_s25 = sadd.s32 %s2174_s22, %s2782_s13  ;;  %s2672_s23 = smov 16  }
  0x20   : > { %v655_v52 = vmul.f32 %v2785_v0, %v647_v47  ;;  %2560 = vpow2.f32 %v2197_v33  ;;  %v2201_v53 = vmul.f32 -1.442695, %v2869_v43  ;;  %v2202_v54 = vmul.f32 -1.442695, %v2875_v48  ;;  %s2906_s24 = sadd.s32 %s2185_s26, %s638_s18  ;;  %s2176_s28 = sshll.u32 %s606_s25, 3 }
  0x21   : > { %2562 = vpow2.f32 %v2198_v36  ;;  %v2893_v55 = vadd.f32 %v2789_v1, %v737_v44  ;;  %v2898_v56 = vadd.f32 %v2789_v1, %v654_v51  ;;  %v2904_v58 = vadd.f32 %v2789_v1, %v738_v45  ;;  %s608_s29 = scalar_lea.vmem %s3500_s4, %s2176_s28  ;;  %v2543_v36 = vld [vmem:[%s3501_s5 + $0x28] sm:$0xff]   ;;  %s2673_s27 = smov 32  }
  0x22   : > { %v2901_v57 = vadd.f32 %v2789_v1, %v655_v52  ;;  %2564 = vpow2.f32 %v2199_v37  ;;  %v2909_v59 = vadd.f32 %v2789_v1, %v739_v50  ;;  %v2203_v62 = vmul.f32 -1.442695, %v2878_v49  ;;  %v684_v30 = vld [vmem:[%s608_s29] sm:$0xff]  ;;  %v685_v42 = vld [vmem:[%s608_s29 + $0x8] sm:$0xff]  ;;  %2316 = vmatprep.subr.bf16.mxu0 %v2543_v36  ;;  %s2956_s18 = scalar_select %p678_p11, 1, 0 }
  0x23   : > { %2566 = vpow2.f32 %v2200_v40  ;;  %v2189_v60 = vmul.f32 -1.442695, %v2898_v56  ;;  %v2204_v63 = vmul.f32 -1.442695, %v2893_v55  ;;  %v2205_v2 = vmul.f32 -1.442695, %v2904_v58  ;;  %2317 = vmatpush3.bf16.msra.mxu0 %v2543_v36 }
  0x24   : > { %v2190_v61 = vmul.f32 -1.442695, %v2901_v57  ;;  %2568 = vpow2.f32 %v2201_v53  ;;  %v2206_v3 = vmul.f32 -1.442695, %v2909_v59  ;;  %v740_v27 = vmul.f32 %v2785_v0, %v724_v13  ;;  %s680_s29 = scvt.s32.f32 %s2956_s18 }
  0x25   : > { %2570 = vpow2.f32 %v2202_v54  ;;  %v741_v35 = vmul.f32 %v2785_v0, %v725_v24  ;;  %v686_v44 = vmul.f32 %v2785_v0, %v684_v30  ;;  %v687_v54 = vmul.f32 %v2785_v0, %v685_v42  ;;  %s705_s22 = scalar_select %p637_p10, 1, 0 }
  0x26   : > { %2572 = vpow2.f32 %v2189_v60  ;;  %v2929_v41 = vadd.f32 %v2789_v1, %v740_v27 }
  0x27   : > { %2574 = vpow2.f32 %v2190_v61  ;;  %v2933_v51 = vadd.f32 %v2789_v1, %v741_v35  ;;  %s706_s17 = scvt.s32.f32 %s705_s22 }
  0x28   : > { %2576 = vpow2.f32 %v2203_v62  ;;  %v2207_v61 = vmul.f32 -1.442695, %v2929_v41  ;;  %v2939_v62 = vadd.f32 %v2789_v1, %v686_v44 }
  0x29   : > { %v2553_v4 = vpop.eup %2552  ;;  %2578 = vpow2.f32 %v2204_v63  ;;  %v2544_v63 = vld [vmem:[%s3501_s5 + $0x20] sm:$0xff]  }
  0x2a   : > { %v2555_v5 = vpop.eup %2554  ;;  %v806_v6 = vadd.f32 1.0, %v2553_v4  ;;  %2580 = vpow2.f32 %v2205_v2  ;;  %v2545_v2 = vld [vmem:[%s3501_s5 + $0x10] sm:$0xff]   ;;  %2318 = vmatprep.subr.bf16.mxu0 %v2544_v63 }
  0x2b   : > { %v2557_v7 = vpop.eup %2556  ;;  %v807_v8 = vadd.f32 1.0, %v2555_v5  ;;  %2582 = vpow2.f32 %v2206_v3  ;;  %2338 = vmatprep.subr.bf16.mxu1 %v2545_v2  ;;  %2319 = vmatpush3.bf16.msra.mxu0 %v2544_v63  ;;  %v3022_v63 = vld [vmem:[%s3501_s5 + $0x40] sm:$0xff]  }
  0x2c   : > { %v2559_v9 = vpop.eup %2558  ;;  %2584 = vrcp.f32 %v806_v6  ;;  %v808_v10 = vadd.f32 1.0, %v2557_v7  ;;  %v2208_v6 = vmul.f32 -1.442695, %v2933_v51  ;;  %2339 = vmatpush3.bf16.msra.mxu1 %v2545_v2 }
  0x2d   : > { %v2561_v11 = vpop.eup %2560  ;;  %2586 = vrcp.f32 %v807_v8  ;;  %v809_v12 = vadd.f32 1.0, %v2559_v9  ;;  %v2959_v9 = vadd.f32 %v2789_v1, %v687_v54 }
  0x2e   : > { %v2563_v14 = vpop.eup %2562  ;;  %2588 = vrcp.f32 %v808_v10  ;;  %v810_v15 = vadd.f32 1.0, %v2561_v11 }
  0x2f   : > { %v2565_v19 = vpop.eup %2564  ;;  %2590 = vrcp.f32 %v809_v12  ;;  %v811_v20 = vadd.f32 1.0, %v2563_v14  ;;  %v2546_v12 = vld [vmem:[%s3501_s5 + $0x18] sm:$0xff]  }
  0x30   : > { %v2567_v25 = vpop.eup %2566  ;;  %2592 = vrcp.f32 %v810_v15  ;;  %v812_v26 = vadd.f32 1.0, %v2565_v19  ;;  %2320 = vmatprep.subr.bf16.mxu0 %v2546_v12 }
  0x31   : > { %v2569_v28 = vpop.eup %2568  ;;  %2594 = vrcp.f32 %v811_v20  ;;  %v813_v29 = vadd.f32 1.0, %v2567_v25  ;;  %2321 = vmatpush3.bf16.msra.mxu0 %v2546_v12 }
  0x32   : > { %v2571_v32 = vpop.eup %2570  ;;  %2596 = vrcp.f32 %v812_v26  ;;  %v814_v33 = vadd.f32 1.0, %v2569_v28  ;;  %2360 = vmatprep.subr.bf16.mxu0 %v3022_v63 }
  0x33   : > { %v2573_v37 = vpop.eup %2572  ;;  %2598 = vrcp.f32 %v813_v29  ;;  %v815_v40 = vadd.f32 1.0, %v2571_v32 }
  0x34   : > { %v2575_v38 = vpop.eup %2574  ;;  %v670_v39 = vadd.f32 1.0, %v2573_v37  ;;  %2600 = vrcp.f32 %v814_v33  ;;  %v2192_v33 = vmul.f32 -1.442695, %v2959_v9 }
  0x35   : > { %v2577_v45 = vpop.eup %2576  ;;  %v671_v46 = vadd.f32 1.0, %v2575_v38  ;;  %v2548_v38 = vld [vmem:[%s3501_s5] sm:$0xff]  }
  0x36   : > { %v2579_v47 = vpop.eup %2578  ;;  %2602 = vrcp.f32 %v670_v39  ;;  %v816_v50 = vadd.f32 1.0, %v2577_v45 }
  0x37   : > { %v2581_v52 = vpop.eup %2580  ;;  %2604 = vrcp.f32 %v671_v46  ;;  %v817_v53 = vadd.f32 1.0, %v2579_v47 }
  0x38   : > { %v2583_v60 = vpop.eup %2582  ;;  %2606 = vrcp.f32 %v815_v40  ;;  %v818_v4 = vadd.f32 1.0, %v2581_v52 }
  0x39   : > { %v2585_v3 = vpop.eup %2584  ;;  %2608 = vrcp.f32 %v816_v50  ;;  %v819_v24 = vadd.f32 1.0, %v2583_v60 }
  0x3a   : > { %v2587_v5 = vpop.eup %2586  ;;  %v2948_v0 = vmul.f32 %v2585_v3, %v2813_v16  ;;  %2610 = vrcp.f32 %v817_v53 }
  0x3b   : > { %v2589_v7 = vpop.eup %2588  ;;  %v2952_v8 = vmul.f32 %v2587_v5, %v2816_v17  ;;  %2612 = vpow2.f32 %v2207_v61  ;;  %v2191_v17 = vmul.f32 -1.442695, %v2939_v62 }
  0x3c   : > { %v2591_v16 = vpop.eup %2590  ;;  %v939_v10 = vrot.slane %v2948_v0, 1  ;;  %v2963_v11 = vmul.f32 %v2589_v7, %v2819_v18  ;;  %2614 = vrcp.f32 %v818_v4  ;;  %v2547_v18 = vld [vmem:[%s3501_s5 + $0x8] sm:$0xff]  }
  0x3d   : > { %v2593_v13 = vpop.eup %2592  ;;  %v2443_v1 = vpack.i.bf16 %v2952_v8, %v2948_v0  ;;  %v940_v14 = vrot.slane %v2952_v8, 1  ;;  %v2973_v15 = vmul.f32 %v2591_v16, %v2825_v21  ;;  %2616 = vpow2.f32 %v2208_v6  ;;  %2340 = vmatprep.subr.bf16.mxu1 %v2547_v18 }
  0x3e   : > { %v2595_v19 = vpop.eup %2594  ;;  %v942_v20 = vrot.slane %v2963_v11, 1  ;;  %v2987_v32 = vmul.f32 %v2593_v13, %v2828_v22  ;;  %2618 = vpow2.f32 %v2191_v17  ;;  %2341 = vmatpush3.bf16.msra.mxu1 %v2547_v18  ;;  %v893_v6 = vrot.slane %v2963_v11, 7 }
  0x3f   : > { %v2597_v25 = vpop.eup %2596  ;;  %2444 = vrot.lane.b32.xlu0 %v2443_v1, %s2672_s23  ;;  %v941_v26 = vsel %vm935_vm0, %v939_v10, %v940_v14  ;;  %v969_v21 = vsel %vm935_vm0, %v940_v14, 0.0  ;;  %v2448_v27 = vpack.i.bf16 %v2973_v15, %v2963_v11  ;;  %v943_v28 = vrot.slane %v2973_v15, 1  ;;  %2342 = vmatprep.subr.bf16.mxu1 %v2548_v38 }
  0x40   : > { %v2599_v29 = vpop.eup %2598  ;;  %v2453_v30 = vpack.i.bf16 %v969_v21, %v941_v26  ;;  %v2993_v37 = vmul.f32 %v2595_v19, %v2831_v23  ;;  %v3000_v40 = vmul.f32 %v2597_v25, %v2842_v31  ;;  %v681_v23 = vstv %s680_s29 }
  0x41   : > { %v944_v35 = vsel %vm935_vm0, %v942_v20, %v943_v28  ;;  %v970_v36 = vsel %vm935_vm0, %v943_v28, 0.0  ;;  %v2601_v39 = vpop.eup %2600  ;;  %v3003_v42 = vmul.f32 %v2599_v29, %v2847_v34  ;;  %2620 = vrcp.f32 %v819_v24 }
  0x42   : > { %2454 = vrot.lane.b32.xlu1 %v2453_v30, %s2673_s27  ;;  %v2458_v22 = vpack.i.bf16 %v970_v36, %v944_v35  ;;  %2622 = vpow2.f32 %v2192_v33  ;;  %v945_v52 = vrot.slane %v2987_v32, 1  ;;  %v946_v31 = vrot.slane %v2993_v37, 1  ;;  %2343 = vmatpush3.bf16.msra.mxu1 %v2548_v38 }
  0x43   : > { %v2603_v44 = vpop.eup %2602  ;;  %2449 = vrot.lane.b32.xlu0 %v2448_v27, %s2672_s23  ;;  %v948_v53 = vrot.slane %v3000_v40, 1  ;;  %v949_v54 = vrot.slane %v3003_v42, 1  ;;  %v3026_v4 = vmul.f32 %v2601_v39, %v2869_v43  ;;  %v2468_v10 = vpack.i.bf16 %v2993_v37, %v2987_v32 }
  0x44   : > { %v2605_v45 = vpop.eup %2604  ;;  %v676_v46 = vmul.f32 %v2603_v44, %v2898_v56  ;;  %v891_v56 = vrot.slane %v2952_v8, 7  ;;  %v947_v17 = vsel %vm935_vm0, %v945_v52, %v946_v31  ;;  %v971_v12 = vsel %vm935_vm0, %v946_v31, 0.0  ;;  %v1643_v31 = vld [vmem:[%s3504_s8] sm:$0xf] }
  0x45   : > { %v2607_v47 = vpop.eup %2606  ;;  %v677_v50 = vmul.f32 %v2605_v45, %v2901_v57  ;;  %v890_v57 = vrot.slane %v2948_v0, 7  ;;  %v972_v13 = vsel %vm935_vm0, %v949_v54, 0.0  ;;  %v894_v1 = vrot.slane %v2973_v15, 7  ;;  %2400 = vmatprep.subr.msk.bf16.mxu1 %vm1669_vm2, %v1643_v31 }
  0x46   : > { %2459 = vrot.lane.b32.xlu1 %v2458_v22, %s2673_s27  ;;  %v3011_v34 = vmul.f32 %v681_v23, %v676_v46  ;;  %v2609_v60 = vpop.eup %2608  ;;  %v3029_v5 = vmul.f32 %v2607_v47, %v2875_v48  ;;  %v950_v48 = vsel %vm935_vm0, %v948_v53, %v949_v54  ;;  %v951_v21 = vrot.slane %v3026_v4, 1 }
  0x47   : > { %v3016_v61 = vmul.f32 %v681_v23, %v677_v50  ;;  %v2611_v2 = vpop.eup %2610  ;;  %v3047_v20 = vmul.f32 %v2609_v60, %v2878_v49  ;;  %v2478_v15 = vpack.i.bf16 %v3003_v42, %v3000_v40  ;;  %v2483_v28 = vpack.i.bf16 %v971_v12, %v947_v17 }
  0x48   : > { %v936_v3 = vrot.slane %v3011_v34, 1  ;;  %v2613_v7 = vpop.eup %2612  ;;  %v865_v26 = vmul.f32 %v2611_v2, %v2893_v55  ;;  %v952_v27 = vrot.slane %v3029_v5, 1  ;;  %v2488_v33 = vpack.i.bf16 %v972_v13, %v950_v48 }
  0x49   : > { %v2463_v8 = vpack.i.bf16 %v3016_v61, %v3011_v34  ;;  %v937_v16 = vrot.slane %v3016_v61, 1  ;;  %v2615_v43 = vpop.eup %2614  ;;  %v820_v24 = vadd.f32 1.0, %v2613_v7  ;;  %v2493_v49 = vpack.i.bf16 %v3029_v5, %v3026_v4 }
  0x4a   : > { %v2617_v14 = vpop.eup %2616  ;;  %v3060_v55 = vsel %vm886_vm1, %v893_v6, %v894_v1  ;;  %v3065_v35 = vsel %vm886_vm1, %v890_v57, %v891_v56  ;;  %v954_v36 = vrot.slane %v3047_v20, 1  ;;  %v3070_v38 = vmul.f32 %v2615_v43, %v2904_v58 }
  0x4b   : > { %2464 = vrot.lane.b32.xlu0 %v2463_v8, %s2672_s23  ;;  %v938_v18 = vsel %vm935_vm0, %v936_v3, %v937_v16  ;;  %v968_v19 = vsel %vm935_vm0, %v937_v16, 0.0  ;;  %v821_v29 = vadd.f32 1.0, %v2617_v14  ;;  %2624 = vrcp.f32 %v820_v24  ;;  %v2619_v30 = vpop.eup %2618 }
  0x4c   : > { %v2473_v25 = vpack.i.bf16 %v968_v19, %v938_v18  ;;  %v696_v39 = vadd.f32 1.0, %v2619_v30  ;;  %v2498_v44 = vpack.i.bf16 %v865_v26, %v3047_v20  ;;  %v953_v23 = vsel %vm935_vm0, %v951_v21, %v952_v27 }
  0x4d   : > { %2626 = vrcp.f32 %v821_v29  ;;  %v896_v45 = vrot.slane %v2987_v32, 7  ;;  %v897_v46 = vrot.slane %v2993_v37, 7  ;;  %v899_v50 = vrot.slane %v3000_v40, 7 }
  0x4e   : > { %2474 = vrot.lane.b32.xlu1 %v2473_v25, %s2673_s27  ;;  %v2621_v22 = vpop.eup %2620  ;;  %2628 = vrcp.f32 %v696_v39  ;;  %v900_v52 = vrot.slane %v3003_v42, 7  ;;  %v887_v58 = vrot.slane %v3011_v34, 7  ;;  %v973_v53 = vsel %vm935_vm0, %v952_v27, 0.0  ;;  %v2551_v34 = vld [vmem:[%s3501_s5 + $0x30] sm:$0xff]  }
  0x4f   : > { %2469 = vrot.lane.b32.xlu0 %v2468_v10, %s2672_s23  ;;  %v2623_v47 = vpop.eup %2622  ;;  %v3087_v37 = vsel %vm886_vm1, %v896_v45, %v897_v46  ;;  %v888_v60 = vrot.slane %v3016_v61, 7  ;;  %v955_v42 = vrot.slane %v865_v26, 1  ;;  %v867_v56 = vmul.f32 %v2621_v22, %v2909_v59 }
  0x50   : > { %v697_v54 = vadd.f32 1.0, %v2623_v47  ;;  %v3095_v2 = vsel %vm886_vm1, %v899_v50, %v900_v52  ;;  %v902_v61 = vrot.slane %v3026_v4, 7  ;;  %v903_v7 = vrot.slane %v3029_v5, 7 }
  0x51   : > { %v3100_v3 = vsel %vm886_vm1, %v887_v58, %v888_v60  ;;  %v3104_v8 = vsel %vm1669_vm2, %v1643_v31, 0  ;;  %v905_v59 = vrot.slane %v3047_v20, 7  ;;  %v906_v16 = vrot.slane %v865_v26, 7 }
  0x52   : > { %2479 = vrot.lane.b32.xlu1 %v2478_v15, %s2672_s23  ;;  %2630 = vrcp.f32 %v697_v54  ;;  %v908_v10 = vrot.slane %v3070_v38, 7  ;;  %v2503_v17 = vpack.i.bf16 %v973_v53, %v953_v23  ;;  %v957_v43 = vrot.slane %v3070_v38, 1 }
  0x53   : > { %2484 = vrot.lane.b32.xlu0 %v2483_v28, %s2673_s27  ;;  %v3115_v12 = vsel %vm886_vm1, %v902_v61, %v903_v7  ;;  %v909_v5 = vrot.slane %v867_v56, 7  ;;  %v956_v48 = vsel %vm935_vm0, %v954_v36, %v955_v42  ;;  %v974_v13 = vsel %vm935_vm0, %v955_v42, 0.0 }
  0x54   : > { %v958_v1 = vrot.slane %v867_v56, 1  ;;  %v3123_v14 = vsel %vm886_vm1, %v905_v59, %v906_v16  ;;  %v2508_v24 = vpack.i.bf16 %v974_v13, %v956_v48  ;;  %v2513_v25 = vpack.i.bf16 %v867_v56, %v3070_v38 }
  0x55   : > { %v3128_v18 = vsel %vm886_vm1, %v908_v10, %v909_v5  ;;  %v707_v36 = vstv %s706_s17  ;;  %v928_v48 = vsel %vm886_vm1, 0.0, %v890_v57  ;;  %v932_v40 = vsel %vm886_vm1, 0.0, %v902_v61  ;;  %s3361_s17 = scalar_lea.vmem %s3506_s10, %s2787_s16  ;;  %s2186_s16 = sshll.u32 %s2906_s24, 1 }
  0x56   : > { %2489 = vrot.lane.b32.xlu1 %v2488_v33, %s2673_s27  ;;  %v959_v26 = vsel %vm935_vm0, %v957_v43, %v958_v1  ;;  %v975_v21 = vsel %vm935_vm0, %v958_v1, 0.0  ;;  %v934_v20 = vsel %vm886_vm1, 0.0, %v908_v10  ;;  %s642_s13 = scalar_lea.vmem %s3507_s11, %s2186_s16 }
  0x57   : > { %2494 = vrot.lane.b32.xlu0 %v2493_v49, %s2672_s23  ;;  %v2518_v49 = vpack.i.bf16 %v975_v21, %v959_v26 }
  0x58   : > { %v2625_v19 = vpop.eup %2624 }
  0x59   : > { %v3136_v27 = vmul.f32 %v2625_v19, %v2929_v41 }
  0x5a   : > { %2499 = vrot.lane.b32.xlu1 %v2498_v44, %s2672_s23  ;;  %v2627_v15 = vpop.eup %2626 }
  0x5b   : > { %2504 = vrot.lane.b32.xlu0 %v2503_v17, %s2673_s27  ;;  %v869_v28 = vmul.f32 %v2627_v15, %v2933_v51  ;;  %v1136_v29 = vrot.slane %v3136_v27, 1  ;;  %v1130_v30 = vrot.slane %v3136_v27, 7  ;;  %v2629_v33 = vpop.eup %2628  ;;  %v929_v15 = vsel %vm886_vm1, 0.0, %v893_v6 }
  0x5c   : > { %v702_v41 = vmul.f32 %v2629_v33, %v2939_v62 }
  0x5d   : > { %v2523_v39 = vpack.i.bf16 %v869_v28, %v3136_v27  ;;  %v1137_v22 = vrot.slane %v869_v28, 1  ;;  %v1131_v44 = vrot.slane %v869_v28, 7 }
  0x5e   : > { %2509 = vrot.lane.b32.xlu1 %v2508_v24, %s2673_s27  ;;  %v3147_v47 = vmul.f32 %v707_v36, %v702_v41 }
  0x5f   : > { %2514 = vrot.lane.b32.xlu0 %v2513_v25, %s2672_s23  ;;  %v2631_v23 = vpop.eup %2630  ;;  %v1138_v51 = vsel %vm935_vm0, %v1136_v29, %v1137_v22  ;;  %v1140_v46 = vsel %vm935_vm0, %v1137_v22, 0.0  ;;  %v3152_v52 = vsel %vm886_vm1, %v1130_v30, %v1131_v44 }
  0x60   : > { %v2528_v31 = vpack.i.bf16 %v1140_v46, %v1138_v51  ;;  %v703_v53 = vmul.f32 %v2631_v23, %v2959_v9  ;;  %v1432_v54 = vrot.slane %v3147_v47, 1  ;;  %v1426_v9 = vrot.slane %v3147_v47, 7  ;;  %v2550_v23 = vld [vmem:[%s3501_s5 + $0x38] sm:$0xff]  }
  0x62   : > { %2519 = vrot.lane.b32.xlu1 %v2518_v49, %s2673_s27  ;;  %v709_v62 = vmul.f32 %v707_v36, %v703_v53 }
  0x63   : > { %2524 = vrot.lane.b32.xlu0 %v2523_v39, %s2672_s23 }
  0x64   : > { %v2533_v60 = vpack.i.bf16 %v709_v62, %v3147_v47  ;;  %v1433_v42 = vrot.slane %v709_v62, 1  ;;  %v1427_v17 = vrot.slane %v709_v62, 7 }
  0x66   : > { %2529 = vrot.lane.b32.xlu1 %v2528_v31, %s2673_s27  ;;  %v1434_v56 = vsel %vm935_vm0, %v1432_v54, %v1433_v42  ;;  %v1436_v7 = vsel %vm935_vm0, %v1433_v42, 0.0  ;;  %v3168_v43 = vsel %vm886_vm1, %v1426_v9, %v1427_v17 }
  0x67   : > { %2534 = vrot.lane.b32.xlu0 %v2533_v60, %s2672_s23  ;;  %v2538_v16 = vpack.i.bf16 %v1436_v7, %v1434_v56  ;;  %v930_v56 = vsel %vm886_vm1, 0.0, %v896_v45 }
  0x6a   : > { %2539 = vrot.lane.b32.xlu1 %v2538_v16, %s2673_s27 }
  0xb1   : > { %v2445_v5 = vpop.permute.xlu0 %2444 }
  0xb2   : > { %v2447_v13 = vunpack.i.h.bf16 %v2445_v5  ;;  %v2446_v1 = vunpack.i.l.bf16 %v2445_v5 }
  0xb4   : > { %v2455_v19 = vpop.permute.xlu1 %2454  ;;  %v1083_v24 = vsel %vm1080_vm3, %v928_v48, %v2446_v1  ;;  %v1084_v25 = vsel %vm1080_vm3, %v3065_v35, %v2447_v13 }
  0xb5   : > { %v2457_v26 = vunpack.i.h.bf16 %v2455_v19  ;;  %v2456_v21 = vunpack.i.l.bf16 %v2455_v19  ;;  %v2450_v28 = vpop.permute.xlu0 %2449 }
  0xb6   : > { %v2452_v29 = vunpack.i.h.bf16 %v2450_v28  ;;  %v2451_v0 = vunpack.i.l.bf16 %v2450_v28 }
  0xb7   : > { %v1100_v57 = vsel %vm1097_vm4, %v1083_v24, %v2456_v21  ;;  %v1101_v33 = vsel %vm1097_vm4, %v1084_v25, %v2457_v26  ;;  %v931_v25 = vsel %vm886_vm1, 0.0, %v899_v50 }
  0xb8   : > { %v1086_v49 = vsel %vm1080_vm3, %v3060_v55, %v2452_v29  ;;  %v1085_v36 = vsel %vm1080_vm3, %v929_v15, %v2451_v0  ;;  %v2460_v35 = vpop.permute.xlu1 %2459  ;;  %v1115_v39 = vpack.c.bf16 %v1101_v33, %v1100_v57  ;;  %v927_v55 = vsel %vm886_vm1, 0.0, %v887_v58 }
  0xb9   : > { %v2462_v22 = vunpack.i.h.bf16 %v2460_v35  ;;  %v2461_v41 = vunpack.i.l.bf16 %v2460_v35 }
  0xba   : > { %2322 = vmatprep.mubr.msk.bf16.mxu0 %vm1184_vm5, %v1115_v39 }
  0xbb   : > { %v1103_v11 = vsel %vm1097_vm4, %v1086_v49, %v2462_v22  ;;  %v1102_v6 = vsel %vm1097_vm4, %v1085_v36, %v2461_v41 }
  0xbc   : > { %v3187_v44 = vpack.c.bf16 %v1103_v11, %v1102_v6 }
  0xbd   : > { %v2465_v51 = vpop.permute.xlu0 %2464 }
  0xbe   : > { %v2467_v46 = vunpack.i.h.bf16 %v2465_v51  ;;  %v2466_v31 = vunpack.i.l.bf16 %v2465_v51  ;;  %2323 = vmatmul.mubr.msk.bf16.vlgmr.msra.gmra.mxu0 %vm1184_vm5, %v3187_v44 }
  0xbf   : > { %2361 = vmatpush3.bf16.msra.mxu0 %v3022_v63 }
  0xc0   : > { %v2475_v53 = vpop.permute.xlu1 %2474  ;;  %v1081_v62 = vsel %vm1080_vm3, %v927_v55, %v2466_v31  ;;  %v1082_v54 = vsel %vm1080_vm3, %v3100_v3, %v2467_v46  ;;  %2362 = vmatprep.subr.bf16.mxu0 %v2550_v23 }
  0xc1   : > { %v2477_v60 = vunpack.i.h.bf16 %v2475_v53  ;;  %v2476_v58 = vunpack.i.l.bf16 %v2475_v53  ;;  %v2470_v42 = vpop.permute.xlu0 %2469 }
  0xc2   : > { %v2472_v7 = vunpack.i.h.bf16 %v2470_v42  ;;  %v2471_v63 = vunpack.i.l.bf16 %v2470_v42 }
  0xc3   : > { %v1098_v16 = vsel %vm1097_vm4, %v1081_v62, %v2476_v58  ;;  %v1099_v17 = vsel %vm1097_vm4, %v1082_v54, %v2477_v60  ;;  %2363 = vmatpush3.bf16.msra.mxu0 %v2550_v23  ;;  %v933_v23 = vsel %vm886_vm1, 0.0, %v905_v59 }
  0xc4   : > { %v2480_v3 = vpop.permute.xlu1 %2479  ;;  %v1114_v5 = vpack.c.bf16 %v1099_v17, %v1098_v16  ;;  %2364 = vmatprep.subr.bf16.mxu0 %v2551_v34  ;;  %v1088_v48 = vsel %vm1080_vm3, %v3087_v37, %v2472_v7  ;;  %v1087_v13 = vsel %vm1080_vm3, %v930_v56, %v2471_v63  ;;  %v1135_v16 = vsel %vm886_vm1, 0.0, %v1130_v30 }
  0xc5   : > { %v2485_v1 = vpop.permute.xlu0 %2484  ;;  %v2482_v19 = vunpack.i.h.bf16 %v2480_v3  ;;  %v2481_v32 = vunpack.i.l.bf16 %v2480_v3 }
  0xc6   : > { %v2487_v24 = vunpack.i.h.bf16 %v2485_v1  ;;  %v2486_v45 = vunpack.i.l.bf16 %v2485_v1  ;;  %2344 = vmatprep.mubr.msk.bf16.mxu1 %vm1184_vm5, %v1114_v5 }
  0xc7   : > { %2345 = vmatmul.mubr.msk.bf16.vlgmr.msra.gmra.mxu1 %vm1184_vm5, %v1115_v39  ;;  %2365 = vmatpush3.bf16.msra.mxu0 %v2551_v34  ;;  %v1090_v0 = vsel %vm1080_vm3, %v3095_v2, %v2482_v19  ;;  %v1089_v57 = vsel %vm1080_vm3, %v931_v25, %v2481_v32  ;;  %v1431_v25 = vsel %vm886_vm1, 0.0, %v1426_v9 }
  0xc8   : > { %v1104_v26 = vsel %vm1097_vm4, %v1087_v13, %v2486_v45  ;;  %v1105_v37 = vsel %vm1097_vm4, %v1088_v48, %v2487_v24  ;;  %v2490_v21 = vpop.permute.xlu1 %2489  ;;  %2348 = vmatprep.mubr.msk.bf16.mxu1 %vm1184_vm5, %v3187_v44  ;;  %2383 = vmatpush3.bf16.msra.mxu1 %v3104_v8  ;;  %v1619_v24 = vld [vmem:[%s3276_s12] sm:$0xff]  ;;  %v1620_v45 = vld [vmem:[%s3276_s12 + $0x8] sm:$0xff] }
  0xc9   : > { %v3222_v15 = vpack.c.bf16 %v1105_v37, %v1104_v26  ;;  %v2492_v28 = vunpack.i.h.bf16 %v2490_v21  ;;  %v2491_v29 = vunpack.i.l.bf16 %v2490_v21  ;;  %v2495_v50 = vpop.permute.xlu0 %2494 }
  0xca   : > { %v2497_v33 = vunpack.i.h.bf16 %v2495_v50  ;;  %v2496_v49 = vunpack.i.l.bf16 %v2495_v50 }
  0xcb   : > { %v1106_v36 = vsel %vm1097_vm4, %v1089_v57, %v2491_v29  ;;  %v1107_v8 = vsel %vm1097_vm4, %v1090_v0, %v2492_v28  ;;  %2326 = vmatprep.mubr.msk.bf16.mxu0 %vm1184_vm5, %v3222_v15 }
  0xcc   : > { %v3234_v35 = vpack.c.bf16 %v1107_v8, %v1106_v36  ;;  %v2500_v4 = vpop.permute.xlu1 %2499  ;;  %v1092_v61 = vsel %vm1080_vm3, %v3115_v12, %v2497_v33  ;;  %v1091_v39 = vsel %vm1080_vm3, %v932_v40, %v2496_v49  ;;  %v1635_v40 = vpack.c.bf16 %v1620_v45, %v1619_v24  ;;  %v1621_v33 = vld [vmem:[%s3276_s12 + $0x10] sm:$0xff]  ;;  %v1623_v8 = vld [vmem:[%s3276_s12 + $0x20] sm:$0xff] }
  0xcd   : > { %v2505_v2 = vpop.permute.xlu0 %2504  ;;  %v2502_v22 = vunpack.i.h.bf16 %v2500_v4  ;;  %v2501_v41 = vunpack.i.l.bf16 %v2500_v4  ;;  %v1624_v4 = vld [vmem:[%s3276_s12 + $0x28] sm:$0xff] }
  0xce   : > { %v2507_v11 = vunpack.i.h.bf16 %v2505_v2  ;;  %v2506_v6 = vunpack.i.l.bf16 %v2505_v2  ;;  %2327 = vmatmul.mubr.msk.bf16.gmra.mxu0 %vm1184_vm5, %v3234_v35  ;;  %v1637_v2 = vpack.c.bf16 %v1624_v4, %v1623_v8 }
  0xcf   : > { %2349 = vmatmul.mubr.msk.bf16.gmra.mxu1 %vm1184_vm5, %v3222_v15  ;;  %v1094_v62 = vsel %vm1080_vm3, %v3123_v14, %v2502_v22  ;;  %v1093_v54 = vsel %vm1080_vm3, %v933_v23, %v2501_v41  ;;  %v1626_v22 = vld [vmem:[%s3276_s12 + $0x38] sm:$0xff]  ;;  %v1627_v41 = vld [vmem:[%s3276_s12 + $0x40] sm:$0xff] }
  0xd0   : > { %v1108_v51 = vsel %vm1097_vm4, %v1091_v39, %v2506_v6  ;;  %v1109_v12 = vsel %vm1097_vm4, %v1092_v61, %v2507_v11  ;;  %v2510_v55 = vpop.permute.xlu1 %2509  ;;  %2352 = vmatprep.mubr.msk.bf16.mxu1 %vm1184_vm5, %v3234_v35  ;;  %v1628_v11 = vld [vmem:[%s3276_s12 + $0x48] sm:$0xff] }
  0xd1   : > { %v3250_v46 = vpack.c.bf16 %v1109_v12, %v1108_v51  ;;  %v2512_v31 = vunpack.i.h.bf16 %v2510_v55  ;;  %v2511_v53 = vunpack.i.l.bf16 %v2510_v55  ;;  %v2515_v59 = vpop.permute.xlu0 %2514  ;;  %v1639_v23 = vpack.c.bf16 %v1628_v11, %v1627_v41  ;;  %v1631_v51 = vld [vmem:[%s3276_s12 + $0x60] sm:$0xff]  ;;  %v1632_v12 = vld [vmem:[%s3276_s12 + $0x68] sm:$0xff] }
  0xd2   : > { %v2517_v34 = vunpack.i.h.bf16 %v2515_v59  ;;  %v2516_v60 = vunpack.i.l.bf16 %v2515_v59 }
  0xd3   : > { %v1110_v58 = vsel %vm1097_vm4, %v1093_v54, %v2511_v53  ;;  %v1111_v42 = vsel %vm1097_vm4, %v1094_v62, %v2512_v31  ;;  %2330 = vmatprep.mubr.msk.bf16.mxu0 %vm1184_vm5, %v3250_v46  ;;  %v1641_v31 = vpack.c.bf16 %v1632_v12, %v1631_v51  ;;  %v1634_v53 = vld [vmem:[%s3276_s12 + $0x78] sm:$0xff] }
  0xd4   : > { %v3262_v56 = vpack.c.bf16 %v1111_v42, %v1110_v58  ;;  %v1096_v38 = vsel %vm1080_vm3, %v3128_v18, %v2517_v34  ;;  %v1095_v10 = vsel %vm1080_vm3, %v934_v20, %v2516_v60  ;;  %v2520_v14 = vpop.permute.xlu1 %2519 }
  0xd5   : > { %v2522_v7 = vunpack.i.h.bf16 %v2520_v14  ;;  %v2521_v63 = vunpack.i.l.bf16 %v2520_v14  ;;  %v2525_v17 = vpop.permute.xlu0 %2524 }
  0xd6   : > { %2331 = vmatmul.mubr.msk.bf16.gmra.mxu0 %vm1184_vm5, %v3262_v56  ;;  %v2527_v3 = vunpack.i.h.bf16 %v2525_v17  ;;  %v2526_v5 = vunpack.i.l.bf16 %v2525_v17 }
  0xd7   : > { %v1113_v18 = vsel %vm1097_vm4, %v1096_v38, %v2522_v7  ;;  %v1112_v48 = vsel %vm1097_vm4, %v1095_v10, %v2521_v63  ;;  %2353 = vmatmul.mubr.msk.bf16.gmra.mxu1 %vm1184_vm5, %v3250_v46 }
  0xd8   : > { %v1121_v27 = vpack.c.bf16 %v1113_v18, %v1112_v48  ;;  %v1155_v30 = vsel %vm1080_vm3, %v3152_v52, %v2527_v3  ;;  %v1154_v13 = vsel %vm1080_vm3, %v1135_v16, %v2526_v5  ;;  %v2530_v1 = vpop.permute.xlu1 %2529  ;;  %2356 = vmatprep.mubr.msk.bf16.mxu1 %vm1184_vm5, %v3262_v56 }
  0xd9   : > { %v2532_v19 = vunpack.i.h.bf16 %v2530_v1  ;;  %v2531_v32 = vunpack.i.l.bf16 %v2530_v1  ;;  %v2535_v26 = vpop.permute.xlu0 %2534 }
  0xda   : > { %2334 = vmatprep.mubr.msk.bf16.mxu0 %vm1184_vm5, %v1121_v27  ;;  %v2537_v21 = vunpack.i.h.bf16 %v2535_v26  ;;  %v2536_v28 = vunpack.i.l.bf16 %v2535_v26 }
  0xdb   : > { %v1157_v37 = vsel %vm1097_vm4, %v1155_v30, %v2532_v19  ;;  %v1156_v52 = vsel %vm1097_vm4, %v1154_v13, %v2531_v32 }
  0xdc   : > { %v1158_v29 = vpack.c.bf16 %v1157_v37, %v1156_v52  ;;  %v1451_v50 = vsel %vm1080_vm3, %v3168_v43, %v2537_v21  ;;  %v1450_v47 = vsel %vm1080_vm3, %v1431_v25, %v2536_v28  ;;  %v2540_v9 = vpop.permute.xlu1 %2539  ;;  %v1622_v43 = vld [vmem:[%s3276_s12 + $0x18] sm:$0xff] }
  0xdd   : > { %v2542_v0 = vunpack.i.h.bf16 %v2540_v9  ;;  %v2541_v57 = vunpack.i.l.bf16 %v2540_v9  ;;  %v1636_v39 = vpack.c.bf16 %v1622_v43, %v1621_v33 }
  0xde   : > { %2335 = vmatmul.mubr.msk.bf16.gmra.mxu0 %vm1184_vm5, %v1158_v29 }
  0xdf   : > { %2357 = vmatmul.mubr.msk.bf16.gmra.mxu1 %vm1184_vm5, %v1121_v27  ;;  %2366 = vmatprep.mubr.msk.bf16.mxu0 %vm1184_vm5, %v3187_v44  ;;  %v1453_v49 = vsel %vm1097_vm4, %v1451_v50, %v2542_v0  ;;  %v1452_v36 = vsel %vm1097_vm4, %v1450_v47, %v2541_v57  ;;  %v1625_v44 = vld [vmem:[%s3276_s12 + $0x30] sm:$0xff] }
  0xe0   : > { %2384 = vmatprep.mubr.msk.bf16.mxu1 %vm1644_vm6, %v1635_v40  ;;  %v1454_v61 = vpack.c.bf16 %v1453_v49, %v1452_v36  ;;  %v1638_v6 = vpack.c.bf16 %v1626_v22, %v1625_v44  ;;  %v3348_v40 = vld [vmem:[%s3502_s6] ss:$0 sm:$0xff] }
  0xe1   : > { %v3354_v36 = vld [vmem:[%s3505_s9] ss:$0 sm:$0xff] }
  0xe6   : > { %2367 = vmatmul.mubr.msk.bf16.vlgmr.msra.gmra.mxu0 %vm1184_vm5, %v3222_v15  ;;  %v1629_v15 = vld [vmem:[%s3276_s12 + $0x50] sm:$0xff] }
  0xe7   : > { %2370 = vmatprep.mubr.msk.bf16.mxu0 %vm1184_vm5, %v3234_v35  ;;  %2385 = vmatmul.mubr.msk.bf16.vlgmr.msra.gmra.mxu1 %vm1644_vm6, %v1636_v39  ;;  %v1630_v35 = vld [vmem:[%s3276_s12 + $0x58] sm:$0xff] }
  0xe8   : > { %2388 = vmatprep.mubr.msk.bf16.mxu1 %vm1644_vm6, %v1637_v2  ;;  %v1640_v55 = vpack.c.bf16 %v1630_v35, %v1629_v15 }
  0xee   : > { %2371 = vmatmul.mubr.msk.bf16.gmra.mxu0 %vm1184_vm5, %v3250_v46  ;;  %v1633_v46 = vld [vmem:[%s3276_s12 + $0x70] sm:$0xff] }
  0xef   : > { %2374 = vmatprep.mubr.msk.bf16.mxu0 %vm1184_vm5, %v3262_v56  ;;  %2389 = vmatmul.mubr.msk.bf16.gmra.mxu1 %vm1644_vm6, %v1638_v6  ;;  %v1642_v20 = vpack.c.bf16 %v1634_v53, %v1633_v46 }
  0xf0   : > { %2392 = vmatprep.mubr.msk.bf16.mxu1 %vm1644_vm6, %v1639_v23 }
  0xf6   : > { %2375 = vmatmul.mubr.msk.bf16.gmra.mxu0 %vm1184_vm5, %v1121_v27 }
  0xf7   : > { %2378 = vmatprep.mubr.msk.bf16.mxu0 %vm1184_vm5, %v1158_v29  ;;  %2393 = vmatmul.mubr.msk.bf16.gmra.mxu1 %vm1644_vm6, %v1640_v55 }
  0xf8   : > { %2396 = vmatprep.mubr.msk.bf16.mxu1 %vm1644_vm6, %v1641_v31 }
  0xfe   : > { %2379 = vmatmul.mubr.msk.bf16.gmra.mxu0 %vm1184_vm5, %v1454_v61 }
  0xff   : > { %2397 = vmatmul.mubr.msk.bf16.gmra.mxu1 %vm1644_vm6, %v1642_v20 }
 0x17e   : > { %v2324_v59 = vpop.f32.mrf.mxu0 }
 0x180   : > { %v1243_v62 = vpop.f32.mrf.mxu0 }
 0x182   : > { %v2325_v34 = vpop.f32.mrf.mxu0 }
 0x184   : > { %v1246_v42 = vpop.f32.mrf.mxu0 }
 0x187   : > { %v2346_v54 = vpop.f32.mrf.mxu1 }
 0x188   : > { %v1370_v21 = vadd.f32 %v2346_v54, %v2324_v59 }
 0x189   : > { %v1361_v60 = vpop.f32.mrf.mxu1 }
 0x18a   : > { %v1362_v50 = vadd.f32 %v1361_v60, %v1243_v62 }
 0x18b   : > { %v2347_v58 = vpop.f32.mrf.mxu1 }
 0x18c   : > { %v1373_v57 = vadd.f32 %v2347_v58, %v2325_v34 }
 0x18d   : > { %v1364_v56 = vpop.f32.mrf.mxu1 }
 0x18e   : > { %v2328_v38 = vpop.f32.mrf.mxu0  ;;  %v1365_v4 = vadd.f32 %v1364_v56, %v1246_v42 }
 0x18f   : > { %v2350_v10 = vpop.f32.mrf.mxu1 }
 0x190   : > { %v1259_v14 = vpop.f32.mrf.mxu0  ;;  %v1386_v35 = vadd.f32 %v2350_v10, %v2328_v38 }
 0x191   : > { %v1377_v7 = vpop.f32.mrf.mxu1 }
 0x192   : > { %v2329_v63 = vpop.f32.mrf.mxu0  ;;  %v1378_v51 = vadd.f32 %v1377_v7, %v1259_v14 }
 0x193   : > { %v2351_v16 = vpop.f32.mrf.mxu1 }
 0x194   : > { %v1262_v17 = vpop.f32.mrf.mxu0  ;;  %v1389_v55 = vadd.f32 %v2351_v16, %v2329_v63 }
 0x195   : > { %v1380_v3 = vpop.f32.mrf.mxu1 }
 0x196   : > { %v2332_v5 = vpop.f32.mrf.mxu0  ;;  %v1381_v59 = vadd.f32 %v1380_v3, %v1262_v17 }
 0x197   : > { %v2354_v18 = vpop.f32.mrf.mxu1 }
 0x198   : > { %v1275_v48 = vpop.f32.mrf.mxu0  ;;  %v1402_v62 = vadd.f32 %v2354_v18, %v2332_v5 }
 0x199   : > { %v1393_v27 = vpop.f32.mrf.mxu1 }
 0x19a   : > { %v2333_v30 = vpop.f32.mrf.mxu0  ;;  %v3369_v58 = vadd.f32 %v1393_v27, %v1275_v48 }
 0x19b   : > { %v2355_v13 = vpop.f32.mrf.mxu1 }
 0x19c   : > { %v1278_v1 = vpop.f32.mrf.mxu0  ;;  %v3371_v42 = vadd.f32 %v2355_v13, %v2333_v30 }
 0x19d   : > { %v1396_v19 = vpop.f32.mrf.mxu1 }
 0x19e   : > { %v2336_v32 = vpop.f32.mrf.mxu0  ;;  %v3373_v56 = vadd.f32 %v1396_v19, %v1278_v1 }
 0x19f   : > { %v2358_v24 = vpop.f32.mrf.mxu1 }
 0x1a0   : > { %v1291_v45 = vpop.f32.mrf.mxu0  ;;  %v3378_v14 = vadd.f32 %v2358_v24, %v2336_v32 }
 0x1a1   : > { %v1409_v25 = vpop.f32.mrf.mxu1 }
 0x1a2   : > { %v3337_v26 = vpop.f32.mrf.mxu0  ;;  %v3381_v3 = vadd.f32 %v1409_v25, %v1291_v45 }
 0x1a3   : > { %v3339_v37 = vpop.f32.mrf.mxu1 }
 0x1a4   : > { %v3341_v52 = vpop.f32.mrf.mxu0 }
 0x1a5   : > { %v3343_v28 = vpop.f32.mrf.mxu1 }
 0x1a6   : > { %v2368_v29 = vpop.f32.mrf.mxu0 }
 0x1a7   : > { %v1582_v47 = vadd.f32 %v2368_v29, %v1370_v21  ;;  %v2386_v9 = vpop.f32.mrf.mxu1 }
 0x1a8   : > { %v1517_v0 = vpop.f32.mrf.mxu0 }
 0x1a9   : > { %v1605_v33 = vadd.f32 %v3348_v40, %v1582_v47  ;;  %v1580_v43 = vadd.f32 %v1517_v0, %v1362_v50  ;;  %v1707_v49 = vpop.f32.mrf.mxu1 }
 0x1aa   : > { %v2369_v8 = vpop.f32.mrf.mxu0 }
 0x1ab   : > { %v1772_v61 = vadd.f32 %v2386_v9, %v1605_v33  ;;  %v1603_v39 = vadd.f32 %v3348_v40, %v1580_v43  ;;  %v1583_v2 = vadd.f32 %v2369_v8, %v1373_v57  ;;  %v2387_v44 = vpop.f32.mrf.mxu1 }
 0x1ac   : > { %v1520_v22 = vpop.f32.mrf.mxu0 }
 0x1ad   : > { %v1795_v41 = vadd.f32 %v3354_v36, %v1772_v61  ;;  %v1770_v11 = vadd.f32 %v1707_v49, %v1603_v39  ;;  %v1606_v6 = vadd.f32 %v3348_v40, %v1583_v2  ;;  %v1581_v23 = vadd.f32 %v1520_v22, %v1365_v4  ;;  %v1710_v15 = vpop.f32.mrf.mxu1 }
 0x1ae   : > { %v2372_v12 = vpop.f32.mrf.mxu0 }
 0x1af   : > { %v1848_v31 = vmul.f32 %v1795_v41, %v1795_v41  ;;  %1904 = vst.msk [vmem:[%s3361_s17 + $0x10] sm:$0xff] %vm1080_vm3, %v1795_v41  ;;  %v1793_v46 = vadd.f32 %v3354_v36, %v1770_v11  ;;  %v1773_v53 = vadd.f32 %v2387_v44, %v1606_v6  ;;  %v2390_v20 = vpop.f32.mrf.mxu1  ;;  %v1604_v54 = vadd.f32 %v3348_v40, %v1581_v23 }
 0x1b0   : > { %v1586_v34 = vadd.f32 %v2372_v12, %v1386_v35  ;;  %v1533_v60 = vpop.f32.mrf.mxu0  ;;  %v1812_v5 = vsel %vm1080_vm3, %v1795_v41, 0.0 }
 0x1b1   : > { %1902 = vst.msk [vmem:[%s3361_s17] sm:$0xff] %vm1080_vm3, %v1793_v46  ;;  %v1796_v38 = vadd.f32 %v3354_v36, %v1773_v53  ;;  %v1723_v10 = vpop.f32.mrf.mxu1  ;;  %v1771_v7 = vadd.f32 %v1710_v15, %v1604_v54  ;;  %v1584_v16 = vadd.f32 %v1533_v60, %v1378_v51  ;;  %v1865_v18 = vsel %vm1080_vm3, %v1848_v31, 0.0 }
 0x1b2   : > { %v1609_v63 = vadd.f32 %v3348_v40, %v1586_v34  ;;  %v2373_v17 = vpop.f32.mrf.mxu0  ;;  %v1846_v30 = vmul.f32 %v1793_v46, %v1793_v46  ;;  %v1809_v24 = vsel %vm1080_vm3, %v1793_v46, 0.0 }
 0x1b3   : > { %1905 = vst.msk [vmem:[%s3361_s17 + $0x18] sm:$0xff] %vm1080_vm3, %v1796_v38  ;;  %v1587_v48 = vadd.f32 %v2373_v17, %v1389_v55  ;;  %v2391_v27 = vpop.f32.mrf.mxu1  ;;  %v1794_v13 = vadd.f32 %v3354_v36, %v1771_v7  ;;  %v1607_v19 = vadd.f32 %v3348_v40, %v1584_v16  ;;  %v1849_v45 = vmul.f32 %v1796_v38, %v1796_v38 }
 0x1b4   : > { %v1776_v1 = vadd.f32 %v2390_v20, %v1609_v63  ;;  %v1536_v32 = vpop.f32.mrf.mxu0  ;;  %v1862_v61 = vsel %vm1080_vm3, %v1846_v30, 0.0  ;;  %v1814_v39 = vsel %vm1080_vm3, %v1796_v38, 0.0 }
 0x1b5   : > { %v1610_v25 = vadd.f32 %v3348_v40, %v1587_v48  ;;  %v1585_v21 = vadd.f32 %v1536_v32, %v1381_v59  ;;  %v1726_v29 = vpop.f32.mrf.mxu1  ;;  %v1810_v50 = vsel %vm1080_vm3, %v1794_v13, 0.0  ;;  %v1847_v47 = vmul.f32 %v1794_v13, %v1794_v13  ;;  %1903 = vst.msk [vmem:[%s3361_s17 + $0x8] sm:$0xff] %vm1080_vm3, %v1794_v13 }
 0x1b6   : > { %v1799_v9 = vadd.f32 %v3354_v36, %v1776_v1  ;;  %v1774_v0 = vadd.f32 %v1723_v10, %v1607_v19  ;;  %v2376_v57 = vpop.f32.mrf.mxu0  ;;  %v1811_v33 = vadd.f32 %v1810_v50, %v1809_v24  ;;  %v1867_v35 = vsel %vm1080_vm3, %v1849_v45, 0.0 }
 0x1b7   : > { %v1777_v43 = vadd.f32 %v2391_v27, %v1610_v25  ;;  %v1608_v49 = vadd.f32 %v3348_v40, %v1585_v21  ;;  %v1590_v8 = vadd.f32 %v2376_v57, %v1402_v62  ;;  %v2394_v4 = vpop.f32.mrf.mxu1  ;;  %v1863_v2 = vsel %vm1080_vm3, %v1847_v47, 0.0 }
 0x1b8   : > { %1908 = vst.msk [vmem:[%s3361_s17 + $0x30] sm:$0xff] %vm1080_vm3, %v1799_v9  ;;  %v1797_v44 = vadd.f32 %v3354_v36, %v1774_v0  ;;  %v1549_v22 = vpop.f32.mrf.mxu0  ;;  %v1813_v41 = vadd.f32 %v1812_v5, %v1811_v33  ;;  %v1864_v11 = vadd.f32 %v1863_v2, %v1862_v61  ;;  %v1820_v51 = vsel %vm1080_vm3, %v1799_v9, 0.0 }
 0x1b9   : > { %v1800_v6 = vadd.f32 %v3354_v36, %v1777_v43  ;;  %v1775_v23 = vadd.f32 %v1726_v29, %v1608_v49  ;;  %v1739_v15 = vpop.f32.mrf.mxu1  ;;  %v1613_v55 = vadd.f32 %v3348_v40, %v1590_v8  ;;  %v1852_v53 = vmul.f32 %v1799_v9, %v1799_v9 }
 0x1ba   : > { %v1850_v12 = vmul.f32 %v1797_v44, %v1797_v44  ;;  %1906 = vst.msk [vmem:[%s3361_s17 + $0x20] sm:$0xff] %vm1080_vm3, %v1797_v44  ;;  %v2377_v31 = vpop.f32.mrf.mxu0  ;;  %v1866_v46 = vadd.f32 %v1865_v18, %v1864_v11  ;;  %v1815_v20 = vadd.f32 %v1814_v39, %v1813_v41  ;;  %v1816_v59 = vsel %vm1080_vm3, %v1797_v44, 0.0 }
 0x1bb   : > { %1909 = vst.msk [vmem:[%s3361_s17 + $0x38] sm:$0xff] %vm1080_vm3, %v1800_v6  ;;  %v2395_v62 = vpop.f32.mrf.mxu1  ;;  %v1853_v54 = vmul.f32 %v1800_v6, %v1800_v6  ;;  %v1798_v34 = vadd.f32 %v3354_v36, %v1775_v23  ;;  %v1780_v60 = vadd.f32 %v2394_v4, %v1613_v55  ;;  %v1588_v38 = vadd.f32 %v1549_v22, %v3369_v58 }
 0x1bc   : > { %v1552_v10 = vpop.f32.mrf.mxu0  ;;  %v1817_v7 = vadd.f32 %v1816_v59, %v1815_v20  ;;  %v1868_v63 = vadd.f32 %v1867_v35, %v1866_v46  ;;  %v1869_v16 = vsel %vm1080_vm3, %v1850_v12, 0.0  ;;  %v1591_v17 = vadd.f32 %v2377_v31, %v3371_v42 }
 0x1bd   : > { %v1742_v5 = vpop.f32.mrf.mxu1  ;;  %v1818_v18 = vsel %vm1080_vm3, %v1798_v34, 0.0  ;;  %v1851_v48 = vmul.f32 %v1798_v34, %v1798_v34  ;;  %1907 = vst.msk [vmem:[%s3361_s17 + $0x28] sm:$0xff] %vm1080_vm3, %v1798_v34  ;;  %v1803_v27 = vadd.f32 %v3354_v36, %v1780_v60  ;;  %v1611_v30 = vadd.f32 %v3348_v40, %v1588_v38 }
 0x1be   : > { %v2380_v13 = vpop.f32.mrf.mxu0  ;;  %v1870_v58 = vadd.f32 %v1869_v16, %v1868_v63  ;;  %v1819_v1 = vadd.f32 %v1818_v18, %v1817_v7  ;;  %v1614_v19 = vadd.f32 %v3348_v40, %v1591_v17  ;;  %v1589_v32 = vadd.f32 %v1552_v10, %v3373_v56 }
 0x1bf   : > { %v2398_v24 = vpop.f32.mrf.mxu1  ;;  %v1873_v42 = vsel %vm1080_vm3, %v1852_v53, 0.0  ;;  %v1822_v45 = vsel %vm1080_vm3, %v1800_v6, 0.0  ;;  %v1871_v25 = vsel %vm1080_vm3, %v1851_v48, 0.0  ;;  %1912 = vst.msk [vmem:[%s3361_s17 + $0x50] sm:$0xff] %vm1080_vm3, %v1803_v27  ;;  %v1778_v21 = vadd.f32 %v1739_v15, %v1611_v30 }
 0x1c0   : > { %v1565_v29 = vpop.f32.mrf.mxu0  ;;  %v1821_v50 = vadd.f32 %v1820_v51, %v1819_v1  ;;  %v1872_v47 = vadd.f32 %v1871_v25, %v1870_v58  ;;  %v1781_v9 = vadd.f32 %v2395_v62, %v1614_v19  ;;  %v1612_v0 = vadd.f32 %v3348_v40, %v1589_v32 }
 0x1c1   : > { %v1875_v57 = vsel %vm1080_vm3, %v1853_v54, 0.0  ;;  %v1801_v56 = vadd.f32 %v3354_v36, %v1778_v21  ;;  %v1594_v33 = vadd.f32 %v2380_v13, %v3378_v14  ;;  %v1592_v43 = vadd.f32 %v1565_v29, %v3381_v3  ;;  %v1755_v2 = vpop.f32.mrf.mxu1 }
 0x1c2   : > { %v2381_v49 = vpop.f32.mrf.mxu0  ;;  %v1874_v8 = vadd.f32 %v1873_v42, %v1872_v47  ;;  %v1823_v4 = vadd.f32 %v1822_v45, %v1821_v50  ;;  %v1804_v61 = vadd.f32 %v3354_v36, %v1781_v9  ;;  %v1779_v39 = vadd.f32 %v1742_v5, %v1612_v0 }
 0x1c3   : > { %v1824_v44 = vsel %vm1080_vm3, %v1801_v56, 0.0  ;;  %v1854_v22 = vmul.f32 %v1801_v56, %v1801_v56  ;;  %1910 = vst.msk [vmem:[%s3361_s17 + $0x40] sm:$0xff] %vm1080_vm3, %v1801_v56  ;;  %v1617_v41 = vadd.f32 %v3348_v40, %v1594_v33  ;;  %v1615_v11 = vadd.f32 %v3348_v40, %v1592_v43 }
 0x1c4   : > { %v1568_v14 = vpop.f32.mrf.mxu0  ;;  %v1421_v3 = vadd.f32 %v3339_v37, %v3337_v26  ;;  %v1413_v6 = vadd.f32 %v3343_v28, %v3341_v52  ;;  %v1825_v23 = vadd.f32 %v1824_v44, %v1823_v4  ;;  %v1876_v15 = vadd.f32 %v1875_v57, %v1874_v8  ;;  %1913 = vst.msk [vmem:[%s3361_s17 + $0x58] sm:$0xff] %vm1080_vm3, %v1804_v61  ;;  %v2399_v26 = vpop.f32.mrf.mxu1 }
 0x1c5   : > { %v1877_v35 = vsel %vm1080_vm3, %v1854_v22, 0.0  ;;  %v1802_v51 = vadd.f32 %v3354_v36, %v1779_v39  ;;  %v1784_v12 = vadd.f32 %v2398_v24, %v1617_v41  ;;  %v1782_v55 = vadd.f32 %v1755_v2, %v1615_v11 }
 0x1c6   : > { %v1856_v31 = vmul.f32 %v1803_v27, %v1803_v27  ;;  %v1878_v46 = vadd.f32 %v1877_v35, %v1876_v15  ;;  %v1595_v53 = vadd.f32 %v2381_v49, %v1421_v3  ;;  %v1593_v37 = vadd.f32 %v1568_v14, %v1413_v6  ;;  %v1758_v17 = vpop.f32.mrf.mxu1 }
 0x1c7   : > { %v1826_v20 = vsel %vm1080_vm3, %v1802_v51, 0.0  ;;  %v1855_v52 = vmul.f32 %v1802_v51, %v1802_v51  ;;  %1911 = vst.msk [vmem:[%s3361_s17 + $0x48] sm:$0xff] %vm1080_vm3, %v1802_v51  ;;  %v1807_v28 = vadd.f32 %v3354_v36, %v1784_v12  ;;  %v1805_v59 = vadd.f32 %v3354_v36, %v1782_v55 }
 0x1c8   : > { %v1827_v62 = vadd.f32 %v1826_v20, %v1825_v23  ;;  %v1618_v54 = vadd.f32 %v3348_v40, %v1595_v53  ;;  %v1616_v34 = vadd.f32 %v3348_v40, %v1593_v37  ;;  %v1828_v60 = vsel %vm1080_vm3, %v1803_v27, 0.0 }
 0x1c9   : > { %v1857_v38 = vmul.f32 %v1804_v61, %v1804_v61  ;;  %v1879_v10 = vsel %vm1080_vm3, %v1855_v52, 0.0  ;;  %1916 = vst.msk [vmem:[%s3361_s17 + $0x70] sm:$0xff] %vm1080_vm3, %v1807_v28  ;;  %1914 = vst.msk [vmem:[%s3361_s17 + $0x60] sm:$0xff] %vm1080_vm3, %v1805_v59  ;;  %v1881_v5 = vsel %vm1080_vm3, %v1856_v31, 0.0  ;;  %v1830_v18 = vsel %vm1080_vm3, %v1804_v61, 0.0 }
 0x1ca   : > { %v1829_v7 = vadd.f32 %v1828_v60, %v1827_v62  ;;  %v1880_v63 = vadd.f32 %v1879_v10, %v1878_v46  ;;  %v1785_v16 = vadd.f32 %v2399_v26, %v1618_v54  ;;  %v1858_v40 = vmul.f32 %v1805_v59, %v1805_v59 }
 0x1cb   : > { %v1783_v48 = vadd.f32 %v1758_v17, %v1616_v34  ;;  %v1883_v58 = vsel %vm1080_vm3, %v1857_v38, 0.0  ;;  %v1832_v1 = vsel %vm1080_vm3, %v1805_v59, 0.0  ;;  %v1860_v42 = vmul.f32 %v1807_v28, %v1807_v28 }
 0x1cc   : > { %v1882_v27 = vadd.f32 %v1881_v5, %v1880_v63  ;;  %v1831_v30 = vadd.f32 %v1830_v18, %v1829_v7  ;;  %v1808_v13 = vadd.f32 %v3354_v36, %v1785_v16  ;;  %v1885_v45 = vsel %vm1080_vm3, %v1858_v40, 0.0 }
 0x1cd   : > { %v1806_v19 = vadd.f32 %v3354_v36, %v1783_v48  ;;  %v1836_v47 = vsel %vm1080_vm3, %v1807_v28, 0.0  ;;  %v1889_v56 = vsel %vm1080_vm3, %v1860_v42, 0.0 }
 0x1ce   : > { %v1833_v32 = vadd.f32 %v1832_v1, %v1831_v30  ;;  %v1884_v24 = vadd.f32 %v1883_v58, %v1882_v27  ;;  %1917 = vst.msk [vmem:[%s3361_s17 + $0x78] sm:$0xff] %vm1080_vm3, %v1808_v13  ;;  %v1861_v9 = vmul.f32 %v1808_v13, %v1808_v13  ;;  %v1838_v33 = vsel %vm1080_vm3, %v1808_v13, 0.0 }
 0x1cf   : > { %v1834_v25 = vsel %vm1080_vm3, %v1806_v19, 0.0  ;;  %v1859_v21 = vmul.f32 %v1806_v19, %v1806_v19  ;;  %1915 = vst.msk [vmem:[%s3361_s17 + $0x68] sm:$0xff] %vm1080_vm3, %v1806_v19 }
 0x1d0   : > { %v1886_v29 = vadd.f32 %v1885_v45, %v1884_v24  ;;  %v1835_v50 = vadd.f32 %v1834_v25, %v1833_v32  ;;  %v1891_v8 = vsel %vm1080_vm3, %v1861_v9, 0.0 }
 0x1d1   : > { %v1887_v0 = vsel %vm1080_vm3, %v1859_v21, 0.0 }
 0x1d2   : > { %v1837_v36 = vadd.f32 %v1836_v47, %v1835_v50  ;;  %v1888_v57 = vadd.f32 %v1887_v0, %v1886_v29 }
 0x1d4   : > { %v1839_v43 = vadd.f32 %v1838_v33, %v1837_v36  ;;  %v1890_v49 = vadd.f32 %v1889_v56, %v1888_v57 }
 0x1d6   : > { %v1840_v4 = vrot.slane %v1839_v43, 4  ;;  %v1892_v61 = vadd.f32 %v1891_v8, %v1890_v49 }
 0x1d8   : > { %v1841_v39 = vadd.f32 %v1840_v4, %v1839_v43  ;;  %v1893_v2 = vrot.slane %v1892_v61, 4 }
 0x1da   : > { %v1842_v44 = vrot.slane %v1841_v39, 2  ;;  %v1894_v22 = vadd.f32 %v1893_v2, %v1892_v61 }
 0x1dc   : > { %v1843_v41 = vadd.f32 %v1842_v44, %v1841_v39  ;;  %v1895_v11 = vrot.slane %v1894_v22, 2 }
 0x1de   : > { %v1844_v14 = vrot.slane %v1843_v41, 1  ;;  %v1896_v3 = vadd.f32 %v1895_v11, %v1894_v22 }
 0x1e0   : > { %v1897_v6 = vrot.slane %v1896_v3, 1  ;;  %v1845_v23 = vadd.f32 %v1844_v14, %v1843_v41 }
 0x1e2   : > { %v1898_v15 = vadd.f32 %v1897_v6, %v1896_v3 }
 0x1e4   : > { %v1899_v35 = vsel %vm886_vm1, %v1845_v23, %v1898_v15 }
 0x1e5   : > { %1901 = vst.msk [vmem:[%s642_s13] sm:$0x3] %vm1900_vm7, %v1899_v35 }
 0x1e6 PF: > { %s22_s21 = sadd.s32 1, %s2670_s21   ;;  %s3511_s23 = sld [smem:[#allocation2_spill]] }
 0x1e7   : > { %p19_p12 = scmp.ge.s32.totalorder %s22_s21, 6   ;;  %s3512_s29 = sld [smem:[#allocation3_spill]] }
 0x1e8   : > { %s3513_s17 = smov %s2662_s19  ;;  %s3514_s18 = smov %s2666_s20 }
 0x1e9   :  { %21 = sbr.rel (!%p19_p12) target bundleno = 3 (0x3), region = 119 }
 0x1ec   : > { %s3515_s19 = smov %s3511_s23 }
 0x1ed   : > { %s3516_s20 = smov %s3512_s29 }

// kernel: encoder_block_2d.9
= control target key start
LH: loop header
LB: loop body
LE: loop exit
PB: predicated region body
PF: predicated region fallthrough
CT: control target
= control target key end

     0   :  { %s2353_s27 = smov 0   ;;  %s2355_s28 = smov 0   ;;  %s3120_s0 = inlined_call_operand.vmem [shape: f32[2,1,16], index: 0, kind: input, shape index: {}]   ;;  %s3121_s1 = inlined_call_operand.vmem [shape: f32[2,1,16], index: 1, kind: input, shape index: {}]   ;;  %s3122_s2 = inlined_call_operand.vmem [shape: f32[2,16,16,16], index: 2, kind: input, shape index: {}, may-alias: {2,3,4}]   ;;  %s3123_s3 = inlined_call_operand.vmem [shape: f32[2,16,16,16], index: 3, kind: input, shape index: {}, may-alias: {2,3,4}]   ;;  %s3124_s4 = inlined_call_operand.vmem [shape: f32[2,16,16,16], index: 4, kind: input, shape index: {}, may-alias: {2,3,4}]   ;;  %s3125_s5 = inlined_call_operand.vmem [shape: bf16[3,48,16], index: 5, kind: input, shape index: {}]   ;;  %s3126_s6 = inlined_call_operand.vmem [shape: f32[1,16], index: 6, kind: input, shape index: {}]   ;;  %s3127_s7 = inlined_call_operand.vmem [shape: f32[2,16,16,16], index: 7, kind: output, shape index: {0}]   ;;  %s3128_s8 = inlined_call_operand.vmem [shape: f32[2,2,2,16], index: 8, kind: output, shape index: {1}]  }
   0x1   :  { %s2357_s29 = smov 0   ;;  %s2359_s30 = smov 0  }
   0x2   :  { %s2361_s9 = smov 0  }
   0x3 LB: > { %s28_s10 = sadd.s32 1, %s2296_s29  ;;  %s31_s11 = sadd.s32 1, %s2300_s30  ;;  %s2304_s9 = sphi %s2361_s9, %s19_s9   ;;  %s2300_s30 = sphi %s2359_s30, %s3133_s30   ;;  %s2296_s29 = sphi %s2357_s29, %s3132_s29   ;;  %s2292_s28 = sphi %s2355_s28, %s3131_s28   ;;  %s2288_s27 = sphi %s2353_s27, %s3130_s27  }
   0x4   : > { %p29_p0 = scmp.ge.s32.totalorder %s28_s10, 2  ;;  %p1824_p1 = scmp.ge.s32.totalorder %s2304_s9, 1 }
   0x5   : > { %p369_p2 = scmp.lt.s32.totalorder %s2304_s9, 5 }
   0x6   : > { %s3135_s10 = smov (%p29_p0, %s28_s10), 0  ;;  %s3137_s11 = smov (!%p29_p0, %s31_s11), %s2300_s30 }
   0x7   : > { %p370_p3 = pnand %p1824_p1, %p369_p2  ;;  %p33_p4 = scmp.ge.s32.totalorder %s3137_s11, 2 }
   0x8   : > { %p453_p5 = scmp.lt.s32.totalorder (!%p370_p3), %s2292_s28, 1  ;;  %s2386_s12 = sshll.u32 (!%p370_p3), %s2288_s27, 3 }
   0x9   : > { %s3139_s11 = smov (%p33_p4, %s3137_s11), 0  ;;  %373 = sbr.rel (%p370_p3) target bundleno = 475 (0x1db), region = 48 }
   0xa   : > { %p479_p6 = scmp.lt.s32.totalorder (!%p370_p3), %s2386_s12, 15  ;;  %s1826_s24 = sadd.s32 (!%p370_p3), 4294967295, %s2386_s12 }
   0xb   : > { %p461_p7 = scmp.gt.s32.totalorder (!%p370_p3), %s1826_s24, 0  ;;  %p1827_p8 = scmp.lt.s32.totalorder (!%p370_p3), %s1826_s24, 15 }
   0xc   : > { %s1929_s15 = sadd.s32 (!%p370_p3), 8, %s2386_s12  ;;  %p517_p10 = scmp.lt.s32.totalorder (!%p370_p3), %s2288_s27, 1 }
   0xd   : > { %p2483_p9 = scmp.lt.s32.totalorder (!%p370_p3), %s1929_s15, 15  ;;  %p558_p11 = scmp.gt.s32.totalorder (!%p370_p3), %s2288_s27, 0 }
   0xe   : > { %s3141_s28 = smov (!%p453_p5, %s2292_s28), 1  ;;  %vm815_vm0 = vcmask 1046528   ;;  %vm766_vm1 = vcmask 1040384   ;;  %vm960_vm2 = vcmask 130048   ;;  %vm977_vm3 = vcmask 261120  }
   0xf   : > { %s480_s13 = scalar_select %p479_p6, %s2386_s12, 15  ;;  %vm1064_vm4 = vcmask 392192   ;;  %vm1590_vm5 = vcmask 123904  }
  0x10   : > { %s455_s16 = scalar_lea.vmem %s3120_s0, %s3141_s28  ;;  %s458_s19 = scalar_lea.vmem %s3121_s1, %s3141_s28 }
  0x11   : > { %s2401_s20 = sshll.u32 %s3141_s28, 5  ;;  %s1836_s21 = sshll.u32 %s480_s13, 1  ;;  %v2406_v0 = vld [vmem:[%s455_s16] ss:$0 sm:$0xff] }
  0x12   : > { %s2404_s22 = sadd.s32 %s1836_s21, %s2401_s20  ;;  %v2409_v1 = vld [vmem:[%s458_s19] ss:$0 sm:$0xff]  ;;  %s1850_s18 = sshll.u32 %s3141_s28, 1 }
  0x13   : > { %s1838_s23 = sshll.u32 %s2404_s22, 3  ;;  %s3145_s15 = smov (!%p2483_p9, %s1929_s15), 15 }
  0x14   : > { %s2417_s14 = scalar_lea.vmem %s3123_s3, %s1838_s23  ;;  %s3147_s15 = smov (!%p2483_p9, %s3145_s15), 15 }
  0x15   : > { %v598_v2 = vld [vmem:[%s2417_s14 + $0x40] sm:$0xff]  ;;  %v599_v3 = vld [vmem:[%s2417_s14 + $0x48] sm:$0xff]  ;;  %v600_v9 = vld [vmem:[%s2417_s14 + $0x50] sm:$0xff]  ;;  %s462_s13 = scalar_select %p461_p7, %s1826_s24, 0 }
  0x16   : > { %v590_v4 = vld [vmem:[%s2417_s14] sm:$0xff]  ;;  %v614_v5 = vmul.f32 %v2406_v0, %v598_v2  ;;  %v615_v6 = vmul.f32 %v2406_v0, %v599_v3  ;;  %v591_v7 = vld [vmem:[%s2417_s14 + $0x8] sm:$0xff]  ;;  %v601_v10 = vld [vmem:[%s2417_s14 + $0x58] sm:$0xff]  ;;  %v616_v12 = vmul.f32 %v2406_v0, %v600_v9  ;;  %s518_s28 = scalar_select %p517_p10, %s2288_s27, 1 }
  0x17   : > { %v606_v8 = vmul.f32 %v2406_v0, %v590_v4  ;;  %v607_v11 = vmul.f32 %v2406_v0, %v591_v7  ;;  %v617_v13 = vmul.f32 %v2406_v0, %v601_v10  ;;  %v592_v14 = vld [vmem:[%s2417_s14 + $0x10] sm:$0xff]  ;;  %v593_v15 = vld [vmem:[%s2417_s14 + $0x18] sm:$0xff]  ;;  %v602_v20 = vld [vmem:[%s2417_s14 + $0x60] sm:$0xff]  ;;  %s3143_s13 = smov (!%p1827_p8, %s462_s13), 15 }
  0x18   : > { %v2434_v16 = vadd.f32 %v2409_v1, %v614_v5  ;;  %v2437_v17 = vadd.f32 %v2409_v1, %v615_v6  ;;  %v608_v19 = vmul.f32 %v2406_v0, %v592_v14  ;;  %v603_v21 = vld [vmem:[%s2417_s14 + $0x68] sm:$0xff]  ;;  %v2452_v23 = vadd.f32 %v2409_v1, %v616_v12  ;;  %v594_v26 = vld [vmem:[%s2417_s14 + $0x20] sm:$0xff]  ;;  %v604_v28 = vld [vmem:[%s2417_s14 + $0x70] sm:$0xff]  ;;  %s1832_s17 = sshll.u32 %s3143_s13, 1  ;;  %s2535_s19 = sadd.s32 %s1850_s18, %s518_s28 }
  0x19   : > { %v2440_v18 = vadd.f32 %v2409_v1, %v606_v8  ;;  %v2449_v22 = vadd.f32 %v2409_v1, %v607_v11  ;;  %v2455_v24 = vadd.f32 %v2409_v1, %v617_v13  ;;  %v609_v25 = vmul.f32 %v2406_v0, %v593_v15  ;;  %v595_v27 = vld [vmem:[%s2417_s14 + $0x28] sm:$0xff]  ;;  %v605_v40 = vld [vmem:[%s2417_s14 + $0x78] sm:$0xff]  ;;  %v596_v50 = vld [vmem:[%s2417_s14 + $0x30] sm:$0xff]  ;;  %s469_s12 = sadd.s32 %s2401_s20, %s1832_s17  ;;  %s1851_s22 = sshll.u32 %s2535_s19, 1 }
  0x1a   : > { %v1866_v29 = vmul.f32 -1.442695, %v2434_v16  ;;  %v1867_v30 = vmul.f32 -1.442695, %v2437_v17  ;;  %v2466_v32 = vadd.f32 %v2409_v1, %v608_v19  ;;  %v1868_v34 = vmul.f32 -1.442695, %v2452_v23  ;;  %s522_s27 = scalar_lea.vmem %s3128_s8, %s1851_s22 }
  0x1b   : > { %v1858_v31 = vmul.f32 -1.442695, %v2440_v18  ;;  %v1859_v33 = vmul.f32 -1.442695, %v2449_v22  ;;  %v1869_v35 = vmul.f32 -1.442695, %v2455_v24  ;;  %v2472_v36 = vadd.f32 %v2409_v1, %v609_v25 }
  0x1c   : > { %2186 = vpow2.f32 %v1866_v29  ;;  %v1860_v37 = vmul.f32 -1.442695, %v2466_v32  ;;  %v618_v38 = vmul.f32 %v2406_v0, %v602_v20  ;;  %v619_v39 = vmul.f32 %v2406_v0, %v603_v21  ;;  %v597_v51 = vld [vmem:[%s2417_s14 + $0x38] sm:$0xff]  ;;  %s1834_s21 = sshll.u32 %s469_s12, 3  ;;  %s1843_s14 = sshll.u32 %s3147_s15, 1 }
  0x1d   : > { %2188 = vpow2.f32 %v1867_v30  ;;  %v1861_v41 = vmul.f32 -1.442695, %v2472_v36  ;;  %v610_v42 = vmul.f32 %v2406_v0, %v594_v26  ;;  %v611_v43 = vmul.f32 %v2406_v0, %v595_v27  ;;  %s471_s26 = scalar_lea.vmem %s3122_s2, %s1834_s21  ;;  %s497_s13 = sadd.s32 %s1843_s14, %s2401_s20 }
  0x1e   : > { %2190 = vpow2.f32 %v1858_v31  ;;  %v2488_v44 = vadd.f32 %v2409_v1, %v618_v38  ;;  %v2491_v45 = vadd.f32 %v2409_v1, %v619_v39  ;;  %v620_v46 = vmul.f32 %v2406_v0, %v604_v28  ;;  %v526_v13 = vld [vmem:[%s471_s26] sm:$0xff]  ;;  %v527_v21 = vld [vmem:[%s471_s26 + $0x8] sm:$0xff]  ;;  %s1845_s15 = sshll.u32 %s497_s13, 3  ;;  %s2306_s12 = smov 16  }
  0x1f   : > { %2192 = vpow2.f32 %v1859_v33  ;;  %v2495_v47 = vadd.f32 %v2409_v1, %v610_v42  ;;  %v2498_v48 = vadd.f32 %v2409_v1, %v611_v43  ;;  %v621_v49 = vmul.f32 %v2406_v0, %v605_v40  ;;  %s499_s17 = scalar_lea.vmem %s3124_s4, %s1845_s15  ;;  %s2307_s15 = smov 32  }
  0x20   : > { %2194 = vpow2.f32 %v1868_v34  ;;  %v1870_v52 = vmul.f32 -1.442695, %v2488_v44  ;;  %v2506_v53 = vadd.f32 %v2409_v1, %v620_v46  ;;  %v1871_v54 = vmul.f32 -1.442695, %v2491_v45  ;;  %s585_s28 = scalar_select %p517_p10, 1, 0 }
  0x21   : > { %2196 = vpow2.f32 %v1869_v35  ;;  %v2512_v55 = vadd.f32 %v2409_v1, %v621_v49  ;;  %v1862_v56 = vmul.f32 -1.442695, %v2495_v47  ;;  %v612_v57 = vmul.f32 %v2406_v0, %v596_v50  ;;  %v564_v49 = vld [vmem:[%s499_s17] sm:$0xff] }
  0x22   : > { %2198 = vpow2.f32 %v1860_v37  ;;  %v613_v58 = vmul.f32 %v2406_v0, %v597_v51  ;;  %v1863_v59 = vmul.f32 -1.442695, %v2498_v48  ;;  %v1872_v60 = vmul.f32 -1.442695, %v2506_v53  ;;  %s586_s21 = scvt.s32.f32 %s585_s28  ;;  %s3010_s28 = scalar_lea.vmem %s3127_s7, %s1838_s23 }
  0x23   : > { %2200 = vpow2.f32 %v1861_v41  ;;  %v2529_v61 = vadd.f32 %v2409_v1, %v612_v57  ;;  %v1873_v63 = vmul.f32 -1.442695, %v2512_v55  ;;  %v534_v27 = vmul.f32 %v2406_v0, %v526_v13 }
  0x24   : > { %2202 = vpow2.f32 %v1870_v52  ;;  %v2532_v62 = vadd.f32 %v2409_v1, %v613_v58  ;;  %v535_v33 = vmul.f32 %v2406_v0, %v527_v21 }
  0x25   : > { %2204 = vpow2.f32 %v1871_v54  ;;  %v1864_v2 = vmul.f32 -1.442695, %v2529_v61  ;;  %v2553_v39 = vadd.f32 %v2409_v1, %v534_v27 }
  0x26   : > { %2206 = vpow2.f32 %v1862_v56  ;;  %v1865_v3 = vmul.f32 -1.442695, %v2532_v62  ;;  %v2556_v46 = vadd.f32 %v2409_v1, %v535_v33 }
  0x27   : > { %2208 = vpow2.f32 %v1863_v59  ;;  %v1854_v56 = vmul.f32 -1.442695, %v2553_v39  ;;  %v565_v59 = vld [vmem:[%s499_s17 + $0x8] sm:$0xff]  ;;  %s2726_s17 = scalar_select %p558_p11, 1, 0 }
  0x28   : > { %2210 = vpow2.f32 %v1872_v60  ;;  %v566_v60 = vmul.f32 %v2406_v0, %v564_v49  ;;  %v2179_v49 = vld [vmem:[%s3125_s5 + $0x18] sm:$0xff]  }
  0x29   : > { %v2187_v4 = vpop.eup %2186  ;;  %2212 = vpow2.f32 %v1873_v63  ;;  %s560_s18 = scvt.s32.f32 %s2726_s17 }
  0x2a   : > { %v2189_v5 = vpop.eup %2188  ;;  %v694_v6 = vadd.f32 1.0, %v2187_v4  ;;  %2214 = vpow2.f32 %v1864_v2 }
  0x2b   : > { %v2191_v7 = vpop.eup %2190  ;;  %v695_v8 = vadd.f32 1.0, %v2189_v5  ;;  %2216 = vpow2.f32 %v1865_v3  ;;  %v1855_v3 = vmul.f32 -1.442695, %v2556_v46 }
  0x2c   : > { %v2193_v9 = vpop.eup %2192  ;;  %2218 = vrcp.f32 %v694_v6  ;;  %v686_v10 = vadd.f32 1.0, %v2191_v7 }
  0x2d   : > { %v2195_v11 = vpop.eup %2194  ;;  %2220 = vrcp.f32 %v695_v8  ;;  %v687_v12 = vadd.f32 1.0, %v2193_v9  ;;  %v567_v8 = vmul.f32 %v2406_v0, %v565_v59 }
  0x2e   : > { %v2197_v14 = vpop.eup %2196  ;;  %2222 = vrcp.f32 %v686_v10  ;;  %v696_v15 = vadd.f32 1.0, %v2195_v11  ;;  %v2577_v11 = vadd.f32 %v2409_v1, %v566_v60 }
  0x2f   : > { %v2199_v19 = vpop.eup %2198  ;;  %2224 = vrcp.f32 %v687_v12  ;;  %v697_v20 = vadd.f32 1.0, %v2197_v14 }
  0x30   : > { %v2201_v25 = vpop.eup %2200  ;;  %2226 = vrcp.f32 %v696_v15  ;;  %v688_v26 = vadd.f32 1.0, %v2199_v19 }
  0x31   : > { %v2203_v28 = vpop.eup %2202  ;;  %2228 = vrcp.f32 %v697_v20  ;;  %v689_v29 = vadd.f32 1.0, %v2201_v25 }
  0x32   : > { %v2205_v30 = vpop.eup %2204  ;;  %2230 = vrcp.f32 %v688_v26  ;;  %v698_v31 = vadd.f32 1.0, %v2203_v28 }
  0x33   : > { %v2207_v34 = vpop.eup %2206  ;;  %2232 = vrcp.f32 %v689_v29  ;;  %v699_v35 = vadd.f32 1.0, %v2205_v30 }
  0x34   : > { %v2209_v37 = vpop.eup %2208  ;;  %2234 = vrcp.f32 %v698_v31  ;;  %v690_v38 = vadd.f32 1.0, %v2207_v34 }
  0x35   : > { %v2211_v40 = vpop.eup %2210  ;;  %2236 = vrcp.f32 %v699_v35  ;;  %v691_v41 = vadd.f32 1.0, %v2209_v37 }
  0x36   : > { %v2213_v42 = vpop.eup %2212  ;;  %2238 = vrcp.f32 %v690_v38  ;;  %v700_v43 = vadd.f32 1.0, %v2211_v40 }
  0x37   : > { %v2215_v50 = vpop.eup %2214  ;;  %2240 = vrcp.f32 %v691_v41  ;;  %v701_v51 = vadd.f32 1.0, %v2213_v42 }
  0x38   : > { %v2217_v52 = vpop.eup %2216  ;;  %2242 = vrcp.f32 %v700_v43  ;;  %v692_v54 = vadd.f32 1.0, %v2215_v50 }
  0x39   : > { %v2219_v57 = vpop.eup %2218  ;;  %2244 = vrcp.f32 %v701_v51  ;;  %v693_v58 = vadd.f32 1.0, %v2217_v52 }
  0x3a   : > { %v2221_v63 = vpop.eup %2220  ;;  %v2561_v2 = vmul.f32 %v2219_v57, %v2434_v16  ;;  %2246 = vrcp.f32 %v692_v54 }
  0x3b   : > { %v2223_v4 = vpop.eup %2222  ;;  %v2565_v5 = vmul.f32 %v2221_v63, %v2437_v17  ;;  %2248 = vrcp.f32 %v693_v58 }
  0x3c   : > { %v2225_v6 = vpop.eup %2224  ;;  %v2568_v7 = vmul.f32 %v2223_v4, %v2440_v18  ;;  %2250 = vpow2.f32 %v1854_v56  ;;  %v2177_v18 = vld [vmem:[%s3125_s5 + $0x28] sm:$0xff]   ;;  %v782_v40 = vrot.slane %v2561_v2, 7 }
  0x3d   : > { %v2227_v9 = vpop.eup %2226  ;;  %v2077_v16 = vpack.i.bf16 %v2565_v5, %v2561_v2  ;;  %v2574_v10 = vmul.f32 %v2225_v6, %v2449_v22  ;;  %2252 = vpow2.f32 %v1855_v3  ;;  %2029 = vmatprep.subr.bf16.mxu1 %v2177_v18  ;;  %1963 = vmatprep.subr.bf16.mxu0 %v2177_v18  ;;  %v832_v26 = vrot.slane %v2565_v5, 1 }
  0x3e   : > { %v2229_v17 = vpop.eup %2228  ;;  %v2580_v12 = vmul.f32 %v2227_v9, %v2452_v23  ;;  %v2595_v23 = vadd.f32 %v2409_v1, %v567_v8  ;;  %2032 = vmatpush3.bf16.msra.mxu1 %v2177_v18  ;;  %v819_v27 = vrot.slane %v2568_v7, 1  ;;  %1964 = vmatpush3.bf16.msra.mxu0 %v2177_v18  ;;  %v783_v35 = vrot.slane %v2565_v5, 7 }
  0x3f   : > { %v2231_v0 = vpop.eup %2230  ;;  %2078 = vrot.lane.b32.xlu0 %v2077_v16, %s2306_s12  ;;  %v2087_v22 = vpack.i.bf16 %v2574_v10, %v2568_v7  ;;  %v2589_v13 = vmul.f32 %v2229_v17, %v2455_v24  ;;  %v831_v24 = vrot.slane %v2561_v2, 1  ;;  %v820_v28 = vrot.slane %v2574_v10, 1 }
  0x40   : > { %v2233_v14 = vpop.eup %2232  ;;  %v2592_v15 = vmul.f32 %v2231_v0, %v2466_v32  ;;  %v2605_v32 = vmul.f32 -1.442695, %v2577_v11  ;;  %v834_v31 = vrot.slane %v2580_v12, 1  ;;  %v2629_v38 = vmul.f32 -1.442695, %v2595_v23 }
  0x41   : > { %v2235_v19 = vpop.eup %2234  ;;  %2088 = vrot.lane.b32.xlu1 %v2087_v22, %s2306_s12  ;;  %v2082_v20 = vpack.i.bf16 %v2589_v13, %v2580_v12  ;;  %v2601_v21 = vmul.f32 %v2233_v14, %v2472_v36  ;;  %v2178_v36 = vld [vmem:[%s3125_s5 + $0x20] sm:$0xff]   ;;  %v835_v33 = vrot.slane %v2589_v13, 1  ;;  %v833_v52 = vsel %vm815_vm0, %v831_v24, %v832_v26  ;;  %v2686_v24 = vld [vmem:[%s3125_s5 + $0x10] sm:$0xff]  }
  0x42   : > { %v2237_v25 = vpop.eup %2236  ;;  %v2608_v1 = vmul.f32 %v2235_v19, %v2488_v44  ;;  %2030 = vmatprep.subr.bf16.mxu1 %v2178_v36  ;;  %1965 = vmatprep.subr.bf16.mxu0 %v2178_v36  ;;  %v822_v43 = vrot.slane %v2592_v15, 1  ;;  %v853_v54 = vsel %vm815_vm0, %v832_v26, 0.0  ;;  %v2659_v59 = vsel %vm815_vm0, %v820_v28, 0.0 }
  0x43   : > { %v2239_v29 = vpop.eup %2238  ;;  %2083 = vrot.lane.b32.xlu0 %v2082_v20, %s2306_s12  ;;  %v2092_v30 = vpack.i.bf16 %v2601_v21, %v2592_v15  ;;  %v2620_v44 = vmul.f32 %v2237_v25, %v2491_v45  ;;  %2033 = vmatpush3.bf16.msra.mxu1 %v2178_v36  ;;  %v854_v3 = vsel %vm815_vm0, %v835_v33, 0.0  ;;  %v771_v16 = vrot.slane %v2574_v10, 7 }
  0x44   : > { %v2241_v34 = vpop.eup %2240  ;;  %v2626_v37 = vmul.f32 %v2239_v29, %v2495_v47  ;;  %v823_v47 = vrot.slane %v2601_v21, 1  ;;  %1966 = vmatpush3.bf16.msra.mxu0 %v2178_v36  ;;  %v837_v4 = vrot.slane %v2608_v1, 1  ;;  %2031 = vmatprep.subr.bf16.mxu1 %v2179_v49  ;;  %v2117_v19 = vpack.i.bf16 %v853_v54, %v833_v52 }
  0x45   : > { %v2243_v41 = vpop.eup %2242  ;;  %2093 = vrot.lane.b32.xlu1 %v2092_v30, %s2306_s12  ;;  %v2097_v45 = vpack.i.bf16 %v2620_v44, %v2608_v1  ;;  %v2636_v42 = vmul.f32 %v2241_v34, %v2498_v48  ;;  %v2649_v48 = vsel %vm815_vm0, %v819_v27, %v820_v28  ;;  %v838_v5 = vrot.slane %v2620_v44, 1  ;;  %1967 = vmatprep.subr.bf16.mxu0 %v2179_v49 }
  0x46   : > { %v2245_v50 = vpop.eup %2244  ;;  %v2644_v51 = vmul.f32 %v2243_v41, %v2506_v53  ;;  %v836_v53 = vsel %vm815_vm0, %v834_v31, %v835_v33  ;;  %v850_v9 = vsel %vm815_vm0, %v823_v47, 0.0  ;;  %v2127_v20 = vpack.i.bf16 %v2659_v59, %v2649_v48  ;;  %v2711_v41 = vld [vmem:[%s3125_s5 + $0x40] sm:$0xff]  }
  0x47   : > { %v2247_v56 = vpop.eup %2246  ;;  %2098 = vrot.lane.b32.xlu0 %v2097_v45, %s2306_s12  ;;  %v2107_v57 = vpack.i.bf16 %v2636_v42, %v2626_v37  ;;  %v2655_v58 = vmul.f32 %v2245_v50, %v2512_v55  ;;  %2034 = vmatpush3.bf16.msra.mxu1 %v2179_v49  ;;  %v2122_v14 = vpack.i.bf16 %v854_v3, %v836_v53  ;;  %v825_v26 = vrot.slane %v2626_v37, 1 }
  0x48   : > { %v2249_v60 = vpop.eup %2248  ;;  %v2662_v63 = vmul.f32 %v2247_v56, %v2529_v61  ;;  %v824_v61 = vsel %vm815_vm0, %v822_v43, %v823_v47  ;;  %v1016_v17 = vrot.slane %v2644_v51, 1  ;;  %1968 = vmatpush3.bf16.msra.mxu0 %v2179_v49  ;;  %v839_v28 = vsel %vm815_vm0, %v837_v4, %v838_v5  ;;  %1985 = vmatprep.subr.bf16.mxu1 %v2686_v24 }
  0x49   : > { %v2251_v6 = vpop.eup %2250  ;;  %2108 = vrot.lane.b32.xlu1 %v2107_v57, %s2306_s12  ;;  %v2102_v55 = vpack.i.bf16 %v2655_v58, %v2644_v51  ;;  %v2671_v8 = vmul.f32 %v2249_v60, %v2532_v62  ;;  %v1017_v18 = vrot.slane %v2655_v58, 1  ;;  %v2132_v25 = vpack.i.bf16 %v850_v9, %v824_v61  ;;  %2007 = vmatprep.subr.bf16.mxu0 %v2711_v41 }
  0x4a   : > { %v550_v0 = vadd.f32 1.0, %v2251_v6  ;;  %v2253_v22 = vpop.eup %2252  ;;  %v826_v36 = vrot.slane %v2636_v42, 1  ;;  %v2697_v29 = vsel %vm766_vm1, %v782_v40, %v783_v35  ;;  %v785_v31 = vrot.slane %v2580_v12, 7 }
  0x4b   : > { %2103 = vrot.lane.b32.xlu0 %v2102_v55, %s2306_s12  ;;  %v2112_v62 = vpack.i.bf16 %v2671_v8, %v2662_v63  ;;  %v551_v27 = vadd.f32 1.0, %v2253_v22  ;;  %v1018_v30 = vsel %vm815_vm0, %v1016_v17, %v1017_v18  ;;  %v786_v33 = vrot.slane %v2589_v13, 7 }
  0x4c   : > { %2254 = vrcp.f32 %v550_v0  ;;  %v774_v34 = vrot.slane %v2601_v21, 7  ;;  %v788_v35 = vrot.slane %v2608_v1, 7  ;;  %v1020_v45 = vsel %vm815_vm0, %v1017_v18, 0.0 }
  0x4d   : > { %2113 = vrot.lane.b32.xlu1 %v2112_v62, %s2306_s12  ;;  %2256 = vpow2.f32 %v2605_v32  ;;  %v773_v32 = vrot.slane %v2592_v15, 7  ;;  %v2717_v13 = vsel %vm766_vm1, %v785_v31, %v786_v33  ;;  %v776_v43 = vrot.slane %v2626_v37, 7 }
  0x4e   : > { %2258 = vrcp.f32 %v551_v27  ;;  %v855_v21 = vsel %vm815_vm0, %v838_v5, 0.0  ;;  %v828_v47 = vrot.slane %v2662_v63, 1  ;;  %v777_v50 = vrot.slane %v2636_v42, 7 }
  0x4f   : > { %2123 = vrot.lane.b32.xlu0 %v2122_v14, %s2307_s15  ;;  %2260 = vpow2.f32 %v2629_v38  ;;  %v789_v38 = vrot.slane %v2620_v44, 7  ;;  %v2731_v49 = vsel %vm766_vm1, %v773_v32, %v774_v34  ;;  %v829_v44 = vrot.slane %v2671_v8, 1 }
  0x50   : > { %v1010_v54 = vrot.slane %v2644_v51, 7  ;;  %v1011_v48 = vrot.slane %v2655_v58, 7  ;;  %v2142_v56 = vpack.i.bf16 %v1020_v45, %v1018_v30  ;;  %v2747_v42 = vsel %vm766_vm1, %v776_v43, %v777_v50 }
  0x51   : > { %2118 = vrot.lane.b32.xlu1 %v2117_v19, %s2307_s15  ;;  %v2739_v52 = vsel %vm766_vm1, %v788_v35, %v789_v38  ;;  %v779_v57 = vrot.slane %v2662_v63, 7  ;;  %v780_v53 = vrot.slane %v2671_v8, 7  ;;  %v827_v59 = vsel %vm815_vm0, %v825_v26, %v826_v36 }
  0x52   : > { %v851_v60 = vsel %vm815_vm0, %v826_v36, 0.0  ;;  %v2756_v58 = vsel %vm766_vm1, %v1010_v54, %v1011_v48  ;;  %v770_v3 = vrot.slane %v2568_v7, 7  ;;  %v2137_v4 = vpack.i.bf16 %v855_v21, %v839_v28 }
  0x53   : > { %2128 = vrot.lane.b32.xlu0 %v2127_v20, %s2307_s15  ;;  %v2764_v5 = vsel %vm766_vm1, %v779_v57, %v780_v53  ;;  %v830_v6 = vsel %vm815_vm0, %v828_v47, %v829_v44  ;;  %v852_v55 = vsel %vm815_vm0, %v829_v44, 0.0  ;;  %v2147_v61 = vpack.i.bf16 %v851_v60, %v827_v59 }
  0x54   : > { %v2773_v8 = vsel %vm766_vm1, %v770_v3, %v771_v16  ;;  %v2152_v17 = vpack.i.bf16 %v852_v55, %v830_v6  ;;  %v561_v18 = vstv %s560_s18  ;;  %v587_v38 = vstv %s586_s21 }
  0x55   : > { %2133 = vrot.lane.b32.xlu1 %v2132_v25, %s2307_s15  ;;  %v2831_v2 = vsel %vm766_vm1, 0.0, %v788_v35  ;;  %v2838_v12 = vsel %vm766_vm1, 0.0, %v776_v43  ;;  %v1015_v15 = vsel %vm766_vm1, 0.0, %v1010_v54  ;;  %v2849_v35 = vsel %vm766_vm1, 0.0, %v779_v57 }
  0x57   : > { %2143 = vrot.lane.b32.xlu0 %v2142_v56, %s2307_s15 }
  0x59   : > { %v2255_v9 = vpop.eup %2254  ;;  %2138 = vrot.lane.b32.xlu1 %v2137_v4, %s2307_s15 }
  0x5a   : > { %v2257_v0 = vpop.eup %2256  ;;  %v556_v22 = vmul.f32 %v2255_v9, %v2553_v39 }
  0x5b   : > { %v2259_v62 = vpop.eup %2258  ;;  %2148 = vrot.lane.b32.xlu0 %v2147_v61, %s2307_s15  ;;  %v576_v10 = vadd.f32 1.0, %v2257_v0 }
  0x5c   : > { %v2261_v14 = vpop.eup %2260  ;;  %v557_v16 = vmul.f32 %v2259_v62, %v2556_v46  ;;  %v2780_v19 = vmul.f32 %v561_v18, %v556_v22  ;;  %v812_v62 = vsel %vm766_vm1, 0.0, %v782_v40 }
  0x5d   : > { %2153 = vrot.lane.b32.xlu1 %v2152_v17, %s2307_s15  ;;  %v577_v20 = vadd.f32 1.0, %v2261_v14  ;;  %2262 = vrcp.f32 %v576_v10 }
  0x5e   : > { %v563_v25 = vmul.f32 %v561_v18, %v557_v16  ;;  %v816_v26 = vrot.slane %v2780_v19, 1  ;;  %v767_v27 = vrot.slane %v2780_v19, 7 }
  0x5f   : > { %2264 = vrcp.f32 %v577_v20  ;;  %v813_v20 = vsel %vm766_vm1, 0.0, %v785_v31  ;;  %v808_v31 = vsel %vm766_vm1, 0.0, %v770_v3 }
  0x60   : > { %v2157_v39 = vpack.i.bf16 %v563_v25, %v2780_v19  ;;  %v817_v28 = vrot.slane %v563_v25, 1  ;;  %v768_v36 = vrot.slane %v563_v25, 7  ;;  %v809_v25 = vsel %vm766_vm1, 0.0, %v773_v32 }
  0x62   : > { %2158 = vrot.lane.b32.xlu0 %v2157_v39, %s2306_s12  ;;  %v818_v46 = vsel %vm815_vm0, %v816_v26, %v817_v28  ;;  %v848_v30 = vsel %vm815_vm0, %v817_v28, 0.0  ;;  %v2794_v33 = vsel %vm766_vm1, %v767_v27, %v768_v36 }
  0x63   : > { %v2162_v34 = vpack.i.bf16 %v848_v30, %v818_v46 }
  0x65   : > { %2163 = vrot.lane.b32.xlu1 %v2162_v34, %s2307_s15 }
  0x6a   : > { %v2263_v45 = vpop.eup %2262 }
  0x6b   : > { %v582_v21 = vmul.f32 %v2263_v45, %v2577_v11 }
  0x6c   : > { %v2265_v47 = vpop.eup %2264 }
  0x6d   : > { %v583_v50 = vmul.f32 %v2265_v47, %v2595_v23  ;;  %v2799_v44 = vmul.f32 %v587_v38, %v582_v21 }
  0x6f   : > { %v589_v48 = vmul.f32 %v587_v38, %v583_v50  ;;  %v1312_v56 = vrot.slane %v2799_v44, 1  ;;  %v1306_v53 = vrot.slane %v2799_v44, 7 }
  0x71   : > { %v2167_v59 = vpack.i.bf16 %v589_v48, %v2799_v44  ;;  %v1313_v60 = vrot.slane %v589_v48, 1  ;;  %v1307_v4 = vrot.slane %v589_v48, 7 }
  0x73   : > { %2168 = vrot.lane.b32.xlu0 %v2167_v59, %s2306_s12  ;;  %v1314_v6 = vsel %vm815_vm0, %v1312_v56, %v1313_v60  ;;  %v1316_v11 = vsel %vm815_vm0, %v1313_v60, 0.0  ;;  %v2810_v23 = vsel %vm766_vm1, %v1306_v53, %v1307_v4 }
  0x74   : > { %v2172_v55 = vpack.i.bf16 %v1316_v11, %v1314_v6 }
  0x76   : > { %2173 = vrot.lane.b32.xlu1 %v2172_v55, %s2307_s15 }
  0xb1   : > { %v2079_v61 = vpop.permute.xlu0 %2078 }
  0xb2   : > { %v2081_v14 = vunpack.i.h.bf16 %v2079_v61  ;;  %v2080_v16 = vunpack.i.l.bf16 %v2079_v61 }
  0xb3   : > { %v2089_v9 = vpop.permute.xlu1 %2088 }
  0xb4   : > { %v2090_v26 = vunpack.i.l.bf16 %v2089_v9  ;;  %v2091_v1 = vunpack.i.h.bf16 %v2089_v9  ;;  %v971_v43 = vsel %vm960_vm2, %v812_v62, %v2080_v16  ;;  %v972_v51 = vsel %vm960_vm2, %v2697_v29, %v2081_v14 }
  0xb5   : > { %v2084_v17 = vpop.permute.xlu0 %2083 }
  0xb6   : > { %v2086_v39 = vunpack.i.h.bf16 %v2084_v17  ;;  %v2085_v28 = vunpack.i.l.bf16 %v2084_v17  ;;  %v963_v63 = vsel %vm960_vm2, %v808_v31, %v2090_v26  ;;  %v964_v50 = vsel %vm960_vm2, %v2773_v8, %v2091_v1 }
  0xb7   : > { %v2094_v18 = vpop.permute.xlu1 %2093 }
  0xb8   : > { %v2096_v32 = vunpack.i.h.bf16 %v2094_v18  ;;  %v974_v7 = vsel %vm960_vm2, %v2717_v13, %v2086_v39  ;;  %v973_v3 = vsel %vm960_vm2, %v813_v20, %v2085_v28  ;;  %v2095_v46 = vunpack.i.l.bf16 %v2094_v18  ;;  %v2182_v18 = vld [vmem:[%s3125_s5 + $0x8] sm:$0xff]  }
  0xb9   : > { %v2813_v0 = vpop.permute.xlu0 %2098 }
  0xba   : > { %v966_v29 = vsel %vm960_vm2, %v2731_v49, %v2096_v32  ;;  %v2101_v21 = vunpack.i.h.bf16 %v2813_v0  ;;  %v965_v4 = vsel %vm960_vm2, %v809_v25, %v2095_v46  ;;  %v2100_v14 = vunpack.i.l.bf16 %v2813_v0 }
  0xbb   : > { %v2815_v22 = vpop.permute.xlu1 %2108 }
  0xbc   : > { %v976_v62 = vsel %vm960_vm2, %v2739_v52, %v2101_v21  ;;  %v2110_v52 = vunpack.i.l.bf16 %v2815_v22 }
  0xbd   : > { %v2820_v10 = vpop.permute.xlu0 %2103 }
  0xbe   : > { %v2106_v6 = vunpack.i.h.bf16 %v2820_v10  ;;  %v2105_v49 = vunpack.i.l.bf16 %v2820_v10  ;;  %v2111_v10 = vunpack.i.h.bf16 %v2815_v22 }
  0xbf   : > { %v2833_v40 = vpop.permute.xlu1 %2113 }
  0xc0   : > { %v1035_v0 = vsel %vm960_vm2, %v2756_v58, %v2106_v6  ;;  %v1034_v31 = vsel %vm960_vm2, %v1015_v15, %v2105_v49  ;;  %v2184_v15 = vld [vmem:[%s3125_s5] sm:$0xff]  }
  0xc1   : > { %v2124_v37 = vpop.permute.xlu0 %2123 }
  0xc2   : > { %v2126_v54 = vunpack.i.h.bf16 %v2124_v37  ;;  %v2125_v36 = vunpack.i.l.bf16 %v2124_v37  ;;  %v2183_v37 = vld [vmem:[%s3125_s5 + $0x38] sm:$0xff]  }
  0xc3   : > { %v2119_v30 = vpop.permute.xlu1 %2118 }
  0xc4   : > { %v990_v57 = vsel %vm977_vm3, %v973_v3, %v2125_v36  ;;  %v991_v34 = vsel %vm977_vm3, %v974_v7, %v2126_v54  ;;  %v2121_v45 = vunpack.i.h.bf16 %v2119_v30  ;;  %v2120_v38 = vunpack.i.l.bf16 %v2119_v30 }
  0xc5   : > { %v2863_v47 = vpack.c.bf16 %v991_v34, %v990_v57  ;;  %v2129_v13 = vpop.permute.xlu0 %2128  ;;  %v2116_v54 = vunpack.i.h.bf16 %v2833_v40  ;;  %v2115_v36 = vunpack.i.l.bf16 %v2833_v40  ;;  %v967_v40 = vsel %vm960_vm2, %v2838_v12, %v2110_v52 }
  0xc6   : > { %v2131_v48 = vunpack.i.h.bf16 %v2129_v13  ;;  %v2130_v56 = vunpack.i.l.bf16 %v2129_v13  ;;  %v988_v59 = vsel %vm977_vm3, %v971_v43, %v2120_v38  ;;  %v989_v60 = vsel %vm977_vm3, %v972_v51, %v2121_v45 }
  0xc7   : > { %v2134_v11 = vpop.permute.xlu1 %2133  ;;  %v2872_v55 = vpack.c.bf16 %v989_v60, %v988_v59  ;;  %v969_v12 = vsel %vm960_vm2, %v2849_v35, %v2115_v36  ;;  %v807_v35 = vsel %vm766_vm1, 0.0, %v767_v27 }
  0xc8   : > { %v2136_v61 = vunpack.i.h.bf16 %v2134_v11  ;;  %v2135_v9 = vunpack.i.l.bf16 %v2134_v11  ;;  %v980_v17 = vsel %vm977_vm3, %v963_v63, %v2130_v56  ;;  %v981_v8 = vsel %vm977_vm3, %v964_v50, %v2131_v48 }
  0xc9   : > { %1977 = vmatprep.mubr.msk.bf16.mxu1 %vm1064_vm4, %v2872_v55  ;;  %v2144_v16 = vpop.permute.xlu0 %2143  ;;  %v2885_v20 = vpack.c.bf16 %v981_v8, %v980_v17 }
  0xca   : > { %v982_v25 = vsel %vm977_vm3, %v965_v4, %v2135_v9  ;;  %v983_v26 = vsel %vm977_vm3, %v966_v29, %v2136_v61  ;;  %1978 = vmatmul.mubr.msk.bf16.vlgmr.msra.gmra.mxu1 %vm1064_vm4, %v2863_v47  ;;  %v2146_v39 = vunpack.i.h.bf16 %v2144_v16  ;;  %v2145_v28 = vunpack.i.l.bf16 %v2144_v16 }
  0xcb   : > { %v2895_v1 = vpack.c.bf16 %v983_v26, %v982_v25  ;;  %v2139_v32 = vpop.permute.xlu1 %2138  ;;  %1986 = vmatpush3.bf16.msra.mxu1 %v2686_v24  ;;  %1969 = vmatprep.mubr.msk.bf16.mxu0 %vm1064_vm4, %v2885_v20  ;;  %v975_v24 = vsel %vm960_vm2, %v2831_v2, %v2100_v14  ;;  %v968_v2 = vsel %vm960_vm2, %v2747_v42, %v2111_v10 }
  0xcc   : > { %v2141_v43 = vunpack.i.h.bf16 %v2139_v32  ;;  %v2140_v51 = vunpack.i.l.bf16 %v2139_v32  ;;  %v1037_v22 = vsel %vm977_vm3, %v1035_v0, %v2146_v39  ;;  %v1036_v58 = vsel %vm977_vm3, %v1034_v31, %v2145_v28  ;;  %1987 = vmatprep.subr.bf16.mxu1 %v2182_v18 }
  0xcd   : > { %v2912_v7 = vpack.c.bf16 %v1037_v22, %v1036_v58  ;;  %1970 = vmatmul.mubr.msk.bf16.vlgmr.msra.gmra.mxu0 %vm1064_vm4, %v2895_v1  ;;  %v2149_v3 = vpop.permute.xlu0 %2148  ;;  %v970_v42 = vsel %vm960_vm2, %v2764_v5, %v2116_v54 }
  0xce   : > { %v993_v46 = vsel %vm977_vm3, %v976_v62, %v2141_v43  ;;  %v992_v30 = vsel %vm977_vm3, %v975_v24, %v2140_v51  ;;  %2008 = vmatpush3.bf16.msra.mxu0 %v2711_v41  ;;  %v2151_v63 = vunpack.i.h.bf16 %v2149_v3  ;;  %v2150_v57 = vunpack.i.l.bf16 %v2149_v3  ;;  %v2185_v41 = vld [vmem:[%s3125_s5 + $0x30] sm:$0xff]  }
  0xcf   : > { %v2923_v34 = vpack.c.bf16 %v993_v46, %v992_v30  ;;  %v2154_v45 = vpop.permute.xlu1 %2153  ;;  %1988 = vmatpush3.bf16.msra.mxu1 %v2182_v18  ;;  %2009 = vmatprep.subr.bf16.mxu0 %v2183_v37  ;;  %v3003_v46 = vld [vmem:[%s3126_s6] ss:$0 sm:$0xff] }
  0xd0   : > { %v2156_v38 = vunpack.i.h.bf16 %v2154_v45  ;;  %v2155_v29 = vunpack.i.l.bf16 %v2154_v45  ;;  %v985_v21 = vsel %vm977_vm3, %v968_v2, %v2151_v63  ;;  %v984_v13 = vsel %vm977_vm3, %v967_v40, %v2150_v57  ;;  %1989 = vmatprep.subr.bf16.mxu1 %v2184_v15 }
  0xd1   : > { %v997_v50 = vpack.c.bf16 %v985_v21, %v984_v13  ;;  %1981 = vmatprep.mubr.msk.bf16.mxu1 %vm1064_vm4, %v2923_v34 }
  0xd2   : > { %v986_v48 = vsel %vm977_vm3, %v969_v12, %v2155_v29  ;;  %v987_v56 = vsel %vm977_vm3, %v970_v42, %v2156_v38  ;;  %1982 = vmatmul.mubr.msk.bf16.gmra.mxu1 %vm1064_vm4, %v2912_v7  ;;  %2010 = vmatpush3.bf16.msra.mxu0 %v2183_v37 }
  0xd3   : > { %v998_v59 = vpack.c.bf16 %v987_v56, %v986_v48  ;;  %1973 = vmatprep.mubr.msk.bf16.mxu0 %vm1064_vm4, %v997_v50  ;;  %1990 = vmatpush3.bf16.msra.mxu1 %v2184_v15 }
  0xd4   : > { %v2159_v5 = vpop.permute.xlu0 %2158  ;;  %2011 = vmatprep.subr.bf16.mxu0 %v2185_v41 }
  0xd5   : > { %v2161_v60 = vunpack.i.h.bf16 %v2159_v5  ;;  %v2160_v4 = vunpack.i.l.bf16 %v2159_v5  ;;  %1974 = vmatmul.mubr.msk.bf16.gmra.mxu0 %vm1064_vm4, %v998_v59 }
  0xd6   : > { %2013 = vmatprep.mubr.msk.bf16.mxu0 %vm1064_vm4, %v2895_v1  ;;  %2012 = vmatpush3.bf16.msra.mxu0 %v2185_v41 }
  0xd7   : > { %v961_v6 = vsel %vm960_vm2, %v807_v35, %v2160_v4  ;;  %v962_v49 = vsel %vm960_vm2, %v2794_v33, %v2161_v60  ;;  %v2164_v11 = vpop.permute.xlu1 %2163  ;;  %v1311_v33 = vsel %vm766_vm1, 0.0, %v1306_v53 }
  0xd8   : > { %v2166_v61 = vunpack.i.h.bf16 %v2164_v11  ;;  %v2165_v9 = vunpack.i.l.bf16 %v2164_v11 }
  0xda   : > { %v978_v19 = vsel %vm977_vm3, %v961_v6, %v2165_v9  ;;  %v979_v27 = vsel %vm977_vm3, %v962_v49, %v2166_v61 }
  0xdb   : > { %v994_v17 = vpack.c.bf16 %v979_v27, %v978_v19 }
  0xdd   : > { %1991 = vmatprep.mubr.msk.bf16.mxu1 %vm1064_vm4, %v994_v17  ;;  %2014 = vmatmul.mubr.msk.bf16.vlgmr.msra.gmra.mxu0 %vm1064_vm4, %v997_v50 }
  0xde   : > { %1992 = vmatmul.mubr.msk.bf16.vlgmr.msra.gmra.mxu1 %vm1064_vm4, %v2885_v20  ;;  %2017 = vmatprep.mubr.msk.bf16.mxu0 %vm1064_vm4, %v998_v59 }
  0xdf   : > { %1995 = vmatprep.mubr.msk.bf16.mxu1 %vm1064_vm4, %v2895_v1 }
  0xe5   : > { %2018 = vmatmul.mubr.msk.bf16.gmra.mxu0 %vm1064_vm4, %v2872_v55  ;;  %v2169_v8 = vpop.permute.xlu0 %2168 }
  0xe6   : > { %1996 = vmatmul.mubr.msk.bf16.gmra.mxu1 %vm1064_vm4, %v997_v50  ;;  %2021 = vmatprep.mubr.msk.bf16.mxu0 %vm1064_vm4, %v2863_v47  ;;  %v2171_v18 = vunpack.i.h.bf16 %v2169_v8  ;;  %v2170_v62 = vunpack.i.l.bf16 %v2169_v8 }
  0xe7   : > { %1999 = vmatprep.mubr.msk.bf16.mxu1 %vm1064_vm4, %v998_v59 }
  0xe8   : > { %v1331_v14 = vsel %vm960_vm2, %v2810_v23, %v2171_v18  ;;  %v1330_v10 = vsel %vm960_vm2, %v1311_v33, %v2170_v62  ;;  %v2174_v16 = vpop.permute.xlu1 %2173 }
  0xe9   : > { %v2176_v20 = vunpack.i.h.bf16 %v2174_v16  ;;  %v2175_v44 = vunpack.i.l.bf16 %v2174_v16 }
  0xeb   : > { %v1333_v53 = vsel %vm977_vm3, %v1331_v14, %v2176_v20  ;;  %v1332_v25 = vsel %vm977_vm3, %v1330_v10, %v2175_v44 }
  0xec   : > { %v1334_v26 = vpack.c.bf16 %v1333_v53, %v1332_v25 }
  0xed   : > { %2022 = vmatmul.mubr.msk.bf16.gmra.mxu0 %vm1064_vm4, %v2923_v34 }
  0xee   : > { %2000 = vmatmul.mubr.msk.bf16.gmra.mxu1 %vm1064_vm4, %v2872_v55  ;;  %2025 = vmatprep.mubr.msk.bf16.mxu0 %vm1064_vm4, %v2912_v7 }
  0xef   : > { %2003 = vmatprep.mubr.msk.bf16.mxu1 %vm1064_vm4, %v2863_v47 }
  0xf5   : > { %2026 = vmatmul.mubr.msk.bf16.gmra.mxu0 %vm1064_vm4, %v1334_v26 }
  0xf6   : > { %2004 = vmatmul.mubr.msk.bf16.gmra.mxu1 %vm1064_vm4, %v2923_v34 }
 0x18a   : > { %v2984_v23 = vpop.f32.mrf.mxu1 }
 0x18c   : > { %v2986_v39 = vpop.f32.mrf.mxu1 }
 0x18d   : > { %v1971_v28 = vpop.f32.mrf.mxu0 }
 0x18e   : > { %v2988_v52 = vpop.f32.mrf.mxu1 }
 0x18f   : > { %v1123_v0 = vpop.f32.mrf.mxu0 }
 0x190   : > { %v2990_v55 = vpop.f32.mrf.mxu1 }
 0x191   : > { %v1972_v31 = vpop.f32.mrf.mxu0 }
 0x192   : > { %v2992_v1 = vpop.f32.mrf.mxu1 }
 0x193   : > { %v1126_v32 = vpop.f32.mrf.mxu0 }
 0x194   : > { %v2994_v47 = vpop.f32.mrf.mxu1 }
 0x195   : > { %v1975_v37 = vpop.f32.mrf.mxu0 }
 0x196   : > { %v2996_v43 = vpop.f32.mrf.mxu1 }
 0x197   : > { %v1139_v51 = vpop.f32.mrf.mxu0 }
 0x198   : > { %v2998_v58 = vpop.f32.mrf.mxu1 }
 0x199   : > { %v1976_v22 = vpop.f32.mrf.mxu0 }
 0x19b   : > { %v1142_v15 = vpop.f32.mrf.mxu0 }
 0x19d   : > { %v2015_v24 = vpop.f32.mrf.mxu0 }
 0x19e   : > { %v1993_v54 = vpop.f32.mrf.mxu1 }
 0x19f   : > { %v1250_v36 = vadd.f32 %v1993_v54, %v1971_v28  ;;  %v1397_v7 = vpop.f32.mrf.mxu0 }
 0x1a0   : > { %v1241_v3 = vpop.f32.mrf.mxu1 }
 0x1a1   : > { %v1242_v30 = vadd.f32 %v1241_v3, %v1123_v0  ;;  %v1462_v63 = vadd.f32 %v2015_v24, %v1250_v36  ;;  %v2016_v57 = vpop.f32.mrf.mxu0 }
 0x1a2   : > { %v1994_v2 = vpop.f32.mrf.mxu1 }
 0x1a3   : > { %v1485_v40 = vadd.f32 %v3003_v46, %v1462_v63  ;;  %v1253_v34 = vadd.f32 %v1994_v2, %v1972_v31  ;;  %v1460_v45 = vadd.f32 %v1397_v7, %v1242_v30  ;;  %v1400_v38 = vpop.f32.mrf.mxu0 }
 0x1a4   : > { %v1244_v29 = vpop.f32.mrf.mxu1 }
 0x1a5   : > { %1594 = vst.msk [vmem:[%s3010_s28 + $0x10] sm:$0xff] %vm960_vm2, %v1485_v40  ;;  %v1483_v21 = vadd.f32 %v3003_v46, %v1460_v45  ;;  %v1245_v13 = vadd.f32 %v1244_v29, %v1126_v32  ;;  %v2019_v41 = vpop.f32.mrf.mxu0  ;;  %v1463_v42 = vadd.f32 %v2016_v57, %v1253_v34  ;;  %v1538_v61 = vmul.f32 %v1485_v40, %v1485_v40 }
 0x1a6   : > { %v1997_v12 = vpop.f32.mrf.mxu1  ;;  %v1502_v14 = vsel %vm960_vm2, %v1485_v40, 0.0 }
 0x1a7   : > { %1592 = vst.msk [vmem:[%s3010_s28] sm:$0xff] %vm960_vm2, %v1483_v21  ;;  %v1266_v50 = vadd.f32 %v1997_v12, %v1975_v37  ;;  %v1413_v48 = vpop.f32.mrf.mxu0  ;;  %v1486_v56 = vadd.f32 %v3003_v46, %v1463_v42  ;;  %v1461_v59 = vadd.f32 %v1400_v38, %v1245_v13  ;;  %v1536_v6 = vmul.f32 %v1483_v21, %v1483_v21 }
 0x1a8   : > { %v1257_v5 = vpop.f32.mrf.mxu1  ;;  %v1499_v33 = vsel %vm960_vm2, %v1483_v21, 0.0  ;;  %v1555_v31 = vsel %vm960_vm2, %v1538_v61, 0.0 }
 0x1a9   : > { %v1258_v35 = vadd.f32 %v1257_v5, %v1139_v51  ;;  %v1466_v60 = vadd.f32 %v2019_v41, %v1266_v50  ;;  %v2020_v4 = vpop.f32.mrf.mxu0  ;;  %1595 = vst.msk [vmem:[%s3010_s28 + $0x18] sm:$0xff] %vm960_vm2, %v1486_v56  ;;  %v1484_v49 = vadd.f32 %v3003_v46, %v1461_v59  ;;  %v1539_v10 = vmul.f32 %v1486_v56, %v1486_v56 }
 0x1aa   : > { %v1998_v11 = vpop.f32.mrf.mxu1  ;;  %v1552_v53 = vsel %vm960_vm2, %v1536_v6, 0.0  ;;  %v1504_v32 = vsel %vm960_vm2, %v1486_v56, 0.0 }
 0x1ab   : > { %v1489_v9 = vadd.f32 %v3003_v46, %v1466_v60  ;;  %v1269_v19 = vadd.f32 %v1998_v11, %v1976_v22  ;;  %v1464_v27 = vadd.f32 %v1413_v48, %v1258_v35  ;;  %v1416_v17 = vpop.f32.mrf.mxu0  ;;  %v1500_v8 = vsel %vm960_vm2, %v1484_v49, 0.0  ;;  %1593 = vst.msk [vmem:[%s3010_s28 + $0x8] sm:$0xff] %vm960_vm2, %v1484_v49 }
 0x1ac   : > { %v1537_v18 = vmul.f32 %v1484_v49, %v1484_v49  ;;  %v1260_v62 = vpop.f32.mrf.mxu1  ;;  %v1501_v16 = vadd.f32 %v1500_v8, %v1499_v33 }
 0x1ad   : > { %1598 = vst.msk [vmem:[%s3010_s28 + $0x30] sm:$0xff] %vm960_vm2, %v1489_v9  ;;  %v1487_v20 = vadd.f32 %v3003_v46, %v1464_v27  ;;  %v2023_v44 = vpop.f32.mrf.mxu0  ;;  %v1261_v26 = vadd.f32 %v1260_v62, %v1142_v15  ;;  %v1467_v28 = vadd.f32 %v2020_v4, %v1269_v19  ;;  %v1557_v15 = vsel %vm960_vm2, %v1539_v10, 0.0 }
 0x1ae   : > { %v1553_v25 = vsel %vm960_vm2, %v1537_v18, 0.0  ;;  %v2001_v0 = vpop.f32.mrf.mxu1  ;;  %v1503_v37 = vadd.f32 %v1502_v14, %v1501_v16  ;;  %v1510_v40 = vsel %vm960_vm2, %v1489_v9, 0.0  ;;  %v1542_v34 = vmul.f32 %v1489_v9, %v1489_v9 }
 0x1af   : > { %v1554_v51 = vadd.f32 %v1553_v25, %v1552_v53  ;;  %1596 = vst.msk [vmem:[%s3010_s28 + $0x20] sm:$0xff] %vm960_vm2, %v1487_v20  ;;  %v1429_v22 = vpop.f32.mrf.mxu0  ;;  %v1540_v24 = vmul.f32 %v1487_v20, %v1487_v20  ;;  %v1490_v54 = vadd.f32 %v3003_v46, %v1467_v28  ;;  %v1282_v36 = vadd.f32 %v2001_v0, %v2984_v23 }
 0x1b0   : > { %v1465_v7 = vadd.f32 %v1416_v17, %v1261_v26  ;;  %v1273_v3 = vpop.f32.mrf.mxu1  ;;  %v1505_v63 = vadd.f32 %v1504_v32, %v1503_v37  ;;  %v1506_v45 = vsel %vm960_vm2, %v1487_v20, 0.0  ;;  %v1563_v9 = vsel %vm960_vm2, %v1542_v34, 0.0 }
 0x1b1   : > { %v1556_v30 = vadd.f32 %v1555_v31, %v1554_v51  ;;  %v1274_v57 = vadd.f32 %v1273_v3, %v2986_v39  ;;  %v2024_v2 = vpop.f32.mrf.mxu0  ;;  %1599 = vst.msk [vmem:[%s3010_s28 + $0x38] sm:$0xff] %vm960_vm2, %v1490_v54  ;;  %v1470_v13 = vadd.f32 %v2023_v44, %v1282_v36  ;;  %v1559_v39 = vsel %vm960_vm2, %v1540_v24, 0.0 }
 0x1b2   : > { %v1488_v38 = vadd.f32 %v3003_v46, %v1465_v7  ;;  %v2002_v23 = vpop.f32.mrf.mxu1  ;;  %v1507_v29 = vadd.f32 %v1506_v45, %v1505_v63  ;;  %v1512_v33 = vsel %vm960_vm2, %v1490_v54, 0.0 }
 0x1b3   : > { %v1558_v21 = vadd.f32 %v1557_v15, %v1556_v30  ;;  %v1285_v41 = vadd.f32 %v2002_v23, %v2988_v52  ;;  %v1432_v42 = vpop.f32.mrf.mxu0  ;;  %v1468_v48 = vadd.f32 %v1429_v22, %v1274_v57  ;;  %v1493_v35 = vadd.f32 %v3003_v46, %v1470_v13 }
 0x1b4   : > { %v1508_v12 = vsel %vm960_vm2, %v1488_v38, 0.0  ;;  %v1541_v50 = vmul.f32 %v1488_v38, %v1488_v38  ;;  %1597 = vst.msk [vmem:[%s3010_s28 + $0x28] sm:$0xff] %vm960_vm2, %v1488_v38  ;;  %v1276_v56 = vpop.f32.mrf.mxu1  ;;  %v1543_v52 = vmul.f32 %v1490_v54, %v1490_v54 }
 0x1b5   : > { %v1560_v59 = vadd.f32 %v1559_v39, %v1558_v21  ;;  %v1509_v5 = vadd.f32 %v1508_v12, %v1507_v29  ;;  %v1277_v60 = vadd.f32 %v1276_v56, %v2990_v55  ;;  %v2027_v4 = vpop.f32.mrf.mxu0  ;;  %v1491_v49 = vadd.f32 %v3003_v46, %v1468_v48  ;;  %1602 = vst.msk [vmem:[%s3010_s28 + $0x50] sm:$0xff] %vm960_vm2, %v1493_v35 }
 0x1b6   : > { %v1561_v6 = vsel %vm960_vm2, %v1541_v50, 0.0  ;;  %v1471_v11 = vadd.f32 %v2024_v2, %v1285_v41  ;;  %v2005_v61 = vpop.f32.mrf.mxu1  ;;  %v1565_v20 = vsel %vm960_vm2, %v1543_v52, 0.0  ;;  %v1546_v32 = vmul.f32 %v1493_v35, %v1493_v35 }
 0x1b7   : > { %v1511_v19 = vadd.f32 %v1510_v40, %v1509_v5  ;;  %v1562_v27 = vadd.f32 %v1561_v6, %v1560_v59  ;;  %v1445_v17 = vpop.f32.mrf.mxu0  ;;  %v1544_v8 = vmul.f32 %v1491_v49, %v1491_v49  ;;  %1600 = vst.msk [vmem:[%s3010_s28 + $0x40] sm:$0xff] %vm960_vm2, %v1491_v49  ;;  %v1298_v18 = vadd.f32 %v2005_v61, %v2992_v1 }
 0x1b8   : > { %v1494_v55 = vadd.f32 %v3003_v46, %v1471_v11  ;;  %v1289_v62 = vpop.f32.mrf.mxu1  ;;  %v1469_v16 = vadd.f32 %v1432_v42, %v1277_v60  ;;  %v1514_v44 = vsel %vm960_vm2, %v1491_v49, 0.0  ;;  %v1571_v34 = vsel %vm960_vm2, %v1546_v32, 0.0 }
 0x1b9   : > { %v1564_v14 = vadd.f32 %v1563_v9, %v1562_v27  ;;  %v1513_v10 = vadd.f32 %v1512_v33, %v1511_v19  ;;  %v1290_v53 = vadd.f32 %v1289_v62, %v2994_v47  ;;  %v2028_v26 = vpop.f32.mrf.mxu0  ;;  %v1474_v1 = vadd.f32 %v2027_v4, %v1298_v18 }
 0x1ba   : > { %1603 = vst.msk [vmem:[%s3010_s28 + $0x58] sm:$0xff] %vm960_vm2, %v1494_v55  ;;  %v2006_v25 = vpop.f32.mrf.mxu1  ;;  %v1492_v31 = vadd.f32 %v3003_v46, %v1469_v16  ;;  %v1567_v37 = vsel %vm960_vm2, %v1544_v8, 0.0  ;;  %v1547_v2 = vmul.f32 %v1494_v55, %v1494_v55  ;;  %v1520_v23 = vsel %vm960_vm2, %v1494_v55, 0.0 }
 0x1bb   : > { %v1515_v28 = vadd.f32 %v1514_v44, %v1513_v10  ;;  %v1566_v0 = vadd.f32 %v1565_v20, %v1564_v14  ;;  %v1301_v51 = vadd.f32 %v2006_v25, %v2996_v43  ;;  %v1472_v22 = vadd.f32 %v1445_v17, %v1290_v53  ;;  %v1448_v57 = vpop.f32.mrf.mxu0 }
 0x1bc   : > { %v1292_v24 = vpop.f32.mrf.mxu1  ;;  %v1516_v36 = vsel %vm960_vm2, %v1492_v31, 0.0  ;;  %v1545_v47 = vmul.f32 %v1492_v31, %v1492_v31  ;;  %1601 = vst.msk [vmem:[%s3010_s28 + $0x48] sm:$0xff] %vm960_vm2, %v1492_v31  ;;  %v1497_v7 = vadd.f32 %v3003_v46, %v1474_v1  ;;  %v1518_v43 = vsel %vm960_vm2, %v1493_v35, 0.0 }
 0x1bd   : > { %v1568_v54 = vadd.f32 %v1567_v37, %v1566_v0  ;;  %v1517_v3 = vadd.f32 %v1516_v36, %v1515_v28  ;;  %v1495_v15 = vadd.f32 %v3003_v46, %v1472_v22  ;;  %v1293_v30 = vadd.f32 %v1292_v24, %v2998_v58 }
 0x1be   : > { %v1475_v63 = vadd.f32 %v2028_v26, %v1301_v51  ;;  %v1569_v40 = vsel %vm960_vm2, %v1545_v47, 0.0  ;;  %1606 = vst.msk [vmem:[%s3010_s28 + $0x70] sm:$0xff] %vm960_vm2, %v1497_v7  ;;  %v1573_v42 = vsel %vm960_vm2, %v1547_v2, 0.0  ;;  %v1550_v56 = vmul.f32 %v1497_v7, %v1497_v7 }
 0x1bf   : > { %v1519_v45 = vadd.f32 %v1518_v43, %v1517_v3  ;;  %v1570_v38 = vadd.f32 %v1569_v40, %v1568_v54  ;;  %1604 = vst.msk [vmem:[%s3010_s28 + $0x60] sm:$0xff] %vm960_vm2, %v1495_v15  ;;  %v1548_v58 = vmul.f32 %v1495_v15, %v1495_v15  ;;  %v1473_v21 = vadd.f32 %v1448_v57, %v1293_v30 }
 0x1c0   : > { %v1498_v29 = vadd.f32 %v3003_v46, %v1475_v63  ;;  %v1522_v39 = vsel %vm960_vm2, %v1495_v15, 0.0  ;;  %v1526_v52 = vsel %vm960_vm2, %v1497_v7, 0.0 }
 0x1c1   : > { %v1572_v13 = vadd.f32 %v1571_v34, %v1570_v38  ;;  %v1521_v41 = vadd.f32 %v1520_v23, %v1519_v45  ;;  %v1496_v12 = vadd.f32 %v3003_v46, %v1473_v21  ;;  %v1575_v59 = vsel %vm960_vm2, %v1548_v58, 0.0 }
 0x1c2   : > { %1607 = vst.msk [vmem:[%s3010_s28 + $0x78] sm:$0xff] %vm960_vm2, %v1498_v29  ;;  %v1551_v6 = vmul.f32 %v1498_v29, %v1498_v29  ;;  %v1579_v46 = vsel %vm960_vm2, %v1550_v56, 0.0  ;;  %v1528_v9 = vsel %vm960_vm2, %v1498_v29, 0.0 }
 0x1c3   : > { %v1523_v50 = vadd.f32 %v1522_v39, %v1521_v41  ;;  %v1574_v48 = vadd.f32 %v1573_v42, %v1572_v13  ;;  %v1524_v5 = vsel %vm960_vm2, %v1496_v12, 0.0  ;;  %v1549_v35 = vmul.f32 %v1496_v12, %v1496_v12  ;;  %1605 = vst.msk [vmem:[%s3010_s28 + $0x68] sm:$0xff] %vm960_vm2, %v1496_v12 }
 0x1c4   : > { %v1581_v17 = vsel %vm960_vm2, %v1551_v6, 0.0 }
 0x1c5   : > { %v1576_v60 = vadd.f32 %v1575_v59, %v1574_v48  ;;  %v1525_v4 = vadd.f32 %v1524_v5, %v1523_v50  ;;  %v1577_v49 = vsel %vm960_vm2, %v1549_v35, 0.0 }
 0x1c7   : > { %v1527_v11 = vadd.f32 %v1526_v52, %v1525_v4  ;;  %v1578_v61 = vadd.f32 %v1577_v49, %v1576_v60 }
 0x1c9   : > { %v1529_v19 = vadd.f32 %v1528_v9, %v1527_v11  ;;  %v1580_v27 = vadd.f32 %v1579_v46, %v1578_v61 }
 0x1cb   : > { %v1530_v33 = vrot.slane %v1529_v19, 4  ;;  %v1582_v8 = vadd.f32 %v1581_v17, %v1580_v27 }
 0x1cd   : > { %v1531_v55 = vadd.f32 %v1530_v33, %v1529_v19  ;;  %v1583_v18 = vrot.slane %v1582_v8, 4 }
 0x1cf   : > { %v1532_v62 = vrot.slane %v1531_v55, 2  ;;  %v1584_v14 = vadd.f32 %v1583_v18, %v1582_v8 }
 0x1d1   : > { %v1533_v10 = vadd.f32 %v1532_v62, %v1531_v55  ;;  %v1585_v16 = vrot.slane %v1584_v14, 2 }
 0x1d3   : > { %v1534_v20 = vrot.slane %v1533_v10, 1  ;;  %v1586_v44 = vadd.f32 %v1585_v16, %v1584_v14 }
 0x1d5   : > { %v1587_v53 = vrot.slane %v1586_v44, 1  ;;  %v1535_v25 = vadd.f32 %v1534_v20, %v1533_v10 }
 0x1d7   : > { %v1588_v26 = vadd.f32 %v1587_v53, %v1586_v44 }
 0x1d9   : > { %v1589_v28 = vsel %vm766_vm1, %v1535_v25, %v1588_v26 }
 0x1da   : > { %1591 = vst.msk [vmem:[%s522_s27] sm:$0x3] %vm1590_vm5, %v1589_v28 }
 0x1db PF: > { %s19_s9 = sadd.s32 1, %s2304_s9   ;;  %s3130_s27 = smov %s2296_s29 }
 0x1dc   : > { %p16_p12 = scmp.ge.s32.totalorder %s19_s9, 6   ;;  %s3131_s28 = smov %s2300_s30 }
 0x1dd   : > { %s3132_s29 = smov %s3135_s10  ;;  %s3133_s30 = smov %s3139_s11 }
 0x1de   :  { %18 = sbr.rel (!%p16_p12) target bundleno = 3 (0x3), region = 104 }

// kernel: encoder_block_2d.11
= control target key start
LH: loop header
LB: loop body
LE: loop exit
PB: predicated region body
PF: predicated region fallthrough
CT: control target
= control target key end

     0   :  { %9 = vsyncpa [#allocation3], 0  ;;  %s5513_s0 = inlined_call_operand.vmem [shape: f32[2,16,16,16], index: 0, kind: input, shape index: {}, may-alias: {0,1}]   ;;  %s5514_s1 = inlined_call_operand.vmem [shape: f32[2,16,16,16], index: 1, kind: input, shape index: {}, may-alias: {0,1}]   ;;  %s5515_s2 = inlined_call_operand.vmem [shape: bf16[3,48,16], index: 2, kind: input, shape index: {}]   ;;  %s5516_s3 = inlined_call_operand.vmem [shape: f32[1,16], index: 3, kind: input, shape index: {}]   ;;  %s5517_s4 = inlined_call_operand.hbm [shape: f32[2,8,8,16], index: 4, kind: output, shape index: {}]  }
   0x1   :  { %11 = vsyncpa [#allocation3 + $0x1], 0  ;;  %s3432_s15 = smov 0   ;;  %s3434_s16 = smov 0  }
   0x2   :  { %s3436_s17 = smov 0   ;;  %s3438_s18 = smov 0  }
   0x3   :  { %s3440_s19 = smov 0   ;;  %s3442_s20 = smov 0  }
   0x4 LB: > { %s3021_s21 = sadd.s32 4294967295, %s3399_s20   ;;  %s3022_s22 = sadd.s32 4294967294, %s3399_s20   ;;  %s3399_s20 = sphi %s3442_s20, %s17_s20   ;;  %s3395_s19 = sphi %s3440_s19, %s5844_s19   ;;  %s3391_s18 = sphi %s3438_s18, %s5843_s18   ;;  %s3387_s17 = sphi %s3436_s17, %s5842_s17   ;;  %s3383_s16 = sphi %s3434_s16, %s5841_s16   ;;  %s3379_s15 = sphi %s3432_s15, %s5840_s15  }
   0x5   : > { %s29_s23 = sadd.s32 1, %s3395_s19  ;;  %s144_s24 = sadd.s32 1, %s3387_s17 }
   0x6   : > { %p31_p0 = scmp.ge.s32.totalorder %s29_s23, 2  ;;  %p154_p1 = scmp.ne.s32.totalorder %s3387_s17, %s3383_s16 }
   0x7   : > { %p155_p2 = scmp.eq.s32.totalorder %s3021_s21, 1  ;;  %p160_p3 = scmp.ne.s32.totalorder %s3383_s16, %s3379_s15 }
   0x8   : > { %s5846_s23 = smov (%p31_p0, %s29_s23), 0  ;;  %p161_p5 = scmp.eq.s32.totalorder %s3022_s22, 1 }
   0x9   : > { %p3472_p4 = por %p155_p2, %p154_p1  ;;  %s139_s26 = ssub.s32 %s3395_s19, %s5846_s23 }
   0xa   : > { %p3025_p6 = scmp.ge.s32.totalorder %s3399_s20, 1  ;;  %p142_p7 = scmp.eq.s32.totalorder %s139_s26, 0 }
   0xb   : > { %p3479_p8 = por %p161_p5, %p160_p3  ;;  %p219_p9 = scmp.lt.s32.totalorder %s3399_s20, 3 }
   0xc   : > { %s3485_s28 = scalar_select %p142_p7, %s3387_s17, %s144_s24  }
   0xd   : > { %p220_p10 = pnand %p3025_p6, %p219_p9 }
   0xf   : > { %223 = sbr.rel (%p220_p10) target bundleno = 552 (0x228), region = 36 }
  0x14   : > { %p267_p11 = scmp.lt.s32.totalorder %s3391_s18, 1  ;;  %v353_v0 = vlaneseq  ;;  %v3401_v1 = vmov 1983009808   ;;  %vm845_vm0 = vcmask 1042434   ;;  %vm1172_vm1 = vcmask 1041409   ;;  %s3402_s8 = smov 16  }
  0x15   : > { %v351_v2 = vunpack.c.l.s4 %v3401_v1  ;;  %vm847_vm2 = vcmask 1043459   ;;  %vm849_vm3 = vcmask 1044484   ;;  %vm851_vm4 = vcmask 1045509   ;;  %s3403_s9 = smov 32   ;;  %s260_s21 = sand.u32 1, %s3383_s16  }
  0x16   : > { %s3489_s29 = scalar_select %p267_p11, %s3391_s18, 1  ;;  %v354_v3 = vshrl.u32 %v353_v0, 7  ;;  %vm853_vm5 = vcmask 1046534   ;;  %vm855_vm6 = vcmask 1047559   ;;  %vm907_vm7 = vcmask 1040384  }
  0x17   : > { %v352_v4 = vunpack.c.0.s8 %v351_v2  ;;  %vm1365_vm8 = vcmask 130048   ;;  %vm1374_vm9 = vcmask 261120   ;;  %vm2462_vm10 = vcmask 392192   ;;  %s3026_s22 = sshll.u32 %s260_s21, 6  ;;  %s3404_s13 = smov [#allocation2]  }
  0x18   : > { %s3070_s30 = sshll.u32 %s3489_s29, 8  ;;  %v3504_v9 = vsub.s32 1, %v354_v3  ;;  %v3506_v10 = vsub.s32 0, %v354_v3  ;;  %s262_s5 = scalar_lea.vmem [#allocation2], %s3026_s22 }
  0x19   : > { %s3497_s7 = scalar_lea.vmem %s5514_s1, %s3070_s30  ;;  %v3499_v5 = vsub.s32 %v352_v4, %v354_v3  ;;  %s275_s6 = scalar_lea.vmem %s5513_s0, %s3070_s30 }
  0x1a   : > { %v299_v6 = vld [vmem:[%s3497_s7 + $0x30] sm:$0xff]  ;;  %v300_v7 = vld [vmem:[%s3497_s7 + $0x38] sm:$0xff]  ;;  %5629 = vst [vmem:[#allocation6_spill] sm:$0xff] %v3506_v10  ;;  %v293_v40 = vld [vmem:[%s3497_s7] sm:$0xff]  ;;  %s2918_s29 = sshll.u32 %s262_s5, 4  ;;  %s5461_s29 = int_to_ptr.vmem [resolvable:$true] %s2918_s29 }
  0x1b   : > { %5628 = vst [vmem:[#allocation5_spill] sm:$0xff] %v3499_v5  ;;  %v303_v8 = vld [vmem:[%s3497_s7 + $0x50] sm:$0xff]  ;;  %v304_v11 = vld [vmem:[%s3497_s7 + $0x58] sm:$0xff]  ;;  %v417_v12 = vcombine.high %v299_v6, %v299_v6  ;;  %v3510_v13 = vrot.slane %v299_v6, %v3499_v5  ;;  %v434_v14 = vcombine.high %v300_v7, %v300_v7  ;;  %v3513_v15 = vrot.slane %v300_v7, %v3499_v5  ;;  %v294_v45 = vld [vmem:[%s3497_s7 + $0x8] sm:$0xff]  ;;  %s3323_s12 = scalar_lea.vmem %s5461_s29, 1024 }
  0x1c   : > { %v451_v16 = vcombine.high %v303_v8, %v303_v8  ;;  %v3516_v17 = vrot.slane %v303_v8, %v3499_v5  ;;  %v468_v18 = vcombine.high %v304_v11, %v304_v11  ;;  %v3519_v19 = vrot.slane %v304_v11, %v3499_v5  ;;  %v297_v52 = vld [vmem:[%s3497_s7 + $0x20] sm:$0xff]  ;;  %v298_v1 = vld [vmem:[%s3497_s7 + $0x28] sm:$0xff]  ;;  %p3324_p12 = scmp.ne.s32.totalorder %s5461_s29, %s3323_s12 }
  0x1d   : > { %v3522_v20 = vrot.slane %v417_v12, %v3499_v5  ;;  %v3526_v21 = vcombine.high %v3510_v13, %v3510_v13  ;;  %v3529_v22 = vrot.slane %v434_v14, %v3499_v5  ;;  %v3533_v23 = vcombine.high %v3513_v15, %v3513_v15 }
  0x1e   : > { %v3536_v24 = vrot.slane %v451_v16, %v3499_v5  ;;  %v3540_v25 = vcombine.high %v3516_v17, %v3516_v17  ;;  %v3543_v26 = vrot.slane %v468_v18, %v3499_v5  ;;  %v3547_v27 = vcombine.high %v3519_v19, %v3519_v19  ;;  %p3325_p13 = pnand %p3324_p12, %p3472_p4 }
  0x1f   : > { %v3551_v28 = vcombine.high %v3522_v20, %v3522_v20  ;;  %v3555_v29 = vcombine.high %v3529_v22, %v3529_v22  ;;  %v983_v30 = vrot.slane %v3510_v13, %v3506_v10  ;;  %v987_v31 = vrot.slane %v3526_v21, %v3506_v10 }
  0x20   : > { %v3563_v32 = vcombine.high %v3536_v24, %v3536_v24  ;;  %v3567_v33 = vcombine.high %v3543_v26, %v3543_v26  ;;  %v991_v34 = vrot.slane %v3522_v20, %v3506_v10  ;;  %v999_v35 = vrot.slane %v3513_v15, %v3506_v10  ;;  %p3326_p0 = pneg %p3325_p13 }
  0x21   : > { %v995_v36 = vrot.slane %v3551_v28, %v3506_v10  ;;  %v1003_v37 = vrot.slane %v3533_v23, %v3506_v10  ;;  %v1007_v38 = vrot.slane %v3529_v22, %v3506_v10  ;;  %v1011_v39 = vrot.slane %v3555_v29, %v3506_v10 }
  0x22   : > { %v1015_v41 = vrot.slane %v3516_v17, %v3506_v10  ;;  %v1019_v42 = vrot.slane %v3540_v25, %v3506_v10  ;;  %v1023_v43 = vrot.slane %v3536_v24, %v3506_v10  ;;  %v1027_v44 = vrot.slane %v3563_v32, %v3506_v10 }
  0x23   : > { %v1031_v46 = vrot.slane %v3519_v19, %v3506_v10  ;;  %v1035_v47 = vrot.slane %v3547_v27, %v3506_v10  ;;  %v1039_v48 = vrot.slane %v3543_v26, %v3506_v10  ;;  %v1043_v49 = vrot.slane %v3567_v33, %v3506_v10 }
  0x24   : > { %v1187_v50 = vsel %vm1172_vm1, %v987_v31, %v983_v30  ;;  %v1194_v51 = vsel %vm1172_vm1, %v1019_v42, %v1015_v41  ;;  %v1409_v53 = vcombine.high %v293_v40, %v293_v40  ;;  %v3603_v54 = vrot.slane %v293_v40, %v3499_v5 }
  0x25   : > { %v1188_v55 = vsel %vm845_vm0, %v991_v34, %v1187_v50  ;;  %v1195_v56 = vsel %vm845_vm0, %v1023_v43, %v1194_v51  ;;  %v1426_v57 = vcombine.high %v294_v45, %v294_v45  ;;  %v3608_v58 = vrot.slane %v294_v45, %v3499_v5  ;;  %v301_v51 = vld [vmem:[%s3497_s7 + $0x40] sm:$0xff] }
  0x26   : > { %v1189_v59 = vsel %vm847_vm2, %v995_v36, %v1188_v55  ;;  %v1196_v60 = vsel %vm847_vm2, %v1027_v44, %v1195_v56  ;;  %v3613_v61 = vrot.slane %v1409_v53, %v3499_v5  ;;  %v3617_v62 = vcombine.high %v3603_v54, %v3603_v54 }
  0x27   : > { %v1190_v63 = vsel %vm849_vm3, %v999_v35, %v1189_v59  ;;  %v1197_v0 = vsel %vm849_vm3, %v1031_v46, %v1196_v60  ;;  %v3623_v2 = vrot.slane %v1426_v57, %v3499_v5  ;;  %v3627_v3 = vcombine.high %v3608_v58, %v3608_v58  ;;  %v302_v57 = vld [vmem:[%s3497_s7 + $0x48] sm:$0xff] }
  0x28   : > { %v1191_v4 = vsel %vm851_vm4, %v1003_v37, %v1190_v63  ;;  %v1198_v6 = vsel %vm851_vm4, %v1035_v47, %v1197_v0  ;;  %v3633_v7 = vcombine.high %v3613_v61, %v3613_v61  ;;  %v1443_v8 = vcombine.high %v297_v52, %v297_v52 }
  0x29   : > { %v1192_v11 = vsel %vm853_vm5, %v1007_v38, %v1191_v4  ;;  %v1199_v12 = vsel %vm853_vm5, %v1039_v48, %v1198_v6  ;;  %v3639_v14 = vcombine.high %v3623_v2, %v3623_v2  ;;  %v3642_v16 = vrot.slane %v297_v52, %v3499_v5 }
  0x2a   : > { %v1193_v18 = vsel %vm855_vm6, %v1011_v39, %v1192_v11  ;;  %v1200_v30 = vsel %vm855_vm6, %v1043_v49, %v1199_v12  ;;  %v3647_v31 = vrot.slane %v1443_v8, %v3499_v5  ;;  %v1460_v34 = vcombine.high %v298_v1, %v298_v1 }
  0x2b   : > { %v3207_v35 = vpack.i.bf16 %v1200_v30, %v1193_v18  ;;  %v3651_v36 = vcombine.high %v3642_v16, %v3642_v16  ;;  %v3654_v37 = vrot.slane %v298_v1, %v3499_v5  ;;  %v1972_v38 = vrot.slane %v3603_v54, %v3506_v10  ;;  %v305_v18 = vld [vmem:[%s3497_s7 + $0x60] sm:$0xff] }
  0x2c   : > { %v3660_v39 = vcombine.high %v3647_v31, %v3647_v31  ;;  %v3663_v40 = vrot.slane %v1460_v34, %v3499_v5  ;;  %v1976_v41 = vrot.slane %v3617_v62, %v3506_v10  ;;  %v1980_v42 = vrot.slane %v3613_v61, %v3506_v10 }
  0x2d   : > { %3208 = vrot.lane.b32.xlu1 %v3207_v35, %s3402_s8  ;;  %v3672_v43 = vcombine.high %v3654_v37, %v3654_v37  ;;  %v1984_v44 = vrot.slane %v3633_v7, %v3506_v10  ;;  %v1988_v45 = vrot.slane %v3608_v58, %v3506_v10  ;;  %v1992_v46 = vrot.slane %v3627_v3, %v3506_v10 }
  0x2e   : > { %v3682_v47 = vcombine.high %v3663_v40, %v3663_v40  ;;  %v1996_v48 = vrot.slane %v3623_v2, %v3506_v10  ;;  %v2000_v49 = vrot.slane %v3639_v14, %v3506_v10  ;;  %v2004_v50 = vrot.slane %v3642_v16, %v3506_v10 }
  0x2f   : > { %v2008_v52 = vrot.slane %v3651_v36, %v3506_v10  ;;  %v2012_v53 = vrot.slane %v3647_v31, %v3506_v10  ;;  %v2016_v55 = vrot.slane %v3660_v39, %v3506_v10  ;;  %v2020_v56 = vrot.slane %v3654_v37, %v3506_v10 }
  0x30   : > { %v2024_v59 = vrot.slane %v3672_v43, %v3506_v10  ;;  %v2028_v60 = vrot.slane %v3663_v40, %v3506_v10  ;;  %v2032_v63 = vrot.slane %v3682_v47, %v3506_v10  ;;  %v2225_v0 = vsel %vm1172_vm1, %v1976_v41, %v1972_v38 }
  0x31   : > { %v2226_v1 = vsel %vm845_vm0, %v1980_v42, %v2225_v0  ;;  %v2232_v4 = vsel %vm1172_vm1, %v2008_v52, %v2004_v50  ;;  %v1477_v6 = vcombine.high %v301_v51, %v301_v51  ;;  %v3710_v8 = vrot.slane %v301_v51, %v3499_v5  ;;  %v306_v51 = vld [vmem:[%s3497_s7 + $0x68] sm:$0xff] }
  0x32   : > { %v2227_v11 = vsel %vm847_vm2, %v1984_v44, %v2226_v1  ;;  %v2233_v12 = vsel %vm845_vm0, %v2012_v53, %v2232_v4  ;;  %v1494_v30 = vcombine.high %v302_v57, %v302_v57  ;;  %v3716_v34 = vrot.slane %v302_v57, %v3499_v5 }
  0x33   : > { %v2228_v35 = vsel %vm849_vm3, %v1988_v45, %v2227_v11  ;;  %v2234_v38 = vsel %vm847_vm2, %v2016_v55, %v2233_v12  ;;  %v3721_v41 = vrot.slane %v1477_v6, %v3499_v5  ;;  %v3725_v42 = vcombine.high %v3710_v8, %v3710_v8 }
  0x34   : > { %v2229_v44 = vsel %vm851_vm4, %v1992_v46, %v2228_v35  ;;  %v2235_v50 = vsel %vm849_vm3, %v2020_v56, %v2234_v38  ;;  %v3731_v52 = vrot.slane %v1494_v30, %v3499_v5  ;;  %v3735_v45 = vcombine.high %v3716_v34, %v3716_v34 }
  0x35   : > { %v2230_v53 = vsel %vm853_vm5, %v1996_v48, %v2229_v44  ;;  %v2236_v55 = vsel %vm851_vm4, %v2024_v59, %v2235_v50  ;;  %v3741_v57 = vcombine.high %v3721_v41, %v3721_v41  ;;  %v1511_v0 = vcombine.high %v305_v18, %v305_v18 }
  0x36   : > { %5630 = vst [vmem:[#allocation7_spill] sm:$0xff] %v3731_v52  ;;  %v2231_v46 = vsel %vm855_vm6, %v2000_v49, %v2230_v53  ;;  %v2237_v56 = vsel %vm853_vm5, %v2028_v60, %v2236_v55  ;;  %v3747_v1 = vcombine.high %v3731_v52, %v3731_v52  ;;  %v3750_v4 = vrot.slane %v305_v18, %v3499_v5 }
  0x37   : > { %v2238_v48 = vsel %vm855_vm6, %v2032_v63, %v2237_v56  ;;  %v3754_v59 = vrot.slane %v1511_v0, %v3499_v5  ;;  %v1528_v6 = vcombine.high %v306_v51, %v306_v51  ;;  %v3757_v11 = vrot.slane %v306_v51, %v3499_v5 }
  0x38   : > { %5631 = vst [vmem:[#allocation8_spill] sm:$0xff] %v3747_v1  ;;  %5632 = vst [vmem:[#allocation9_spill] sm:$0xff] %v3750_v4  ;;  %v3202_v12 = vpack.i.bf16 %v2238_v48, %v2231_v46  ;;  %v3761_v49 = vcombine.high %v3750_v4, %v3750_v4  ;;  %v2036_v60 = vrot.slane %v3710_v8, %v3506_v10 }
  0x39   : > { %5633 = vst [vmem:[#allocation10_spill] sm:$0xff] %v3754_v59  ;;  %5634 = vst [vmem:[#allocation11_spill] sm:$0xff] %v3757_v11  ;;  %v2040_v18 = vrot.slane %v3725_v42, %v3506_v10  ;;  %v3769_v63 = vcombine.high %v3754_v59, %v3754_v59  ;;  %v3772_v30 = vrot.slane %v1528_v6, %v3499_v5 }
  0x3a   : > { %5635 = vst [vmem:[#allocation12_spill] sm:$0xff] %v3761_v49  ;;  %v3776_v35 = vcombine.high %v3757_v11, %v3757_v11  ;;  %v2044_v38 = vrot.slane %v3721_v41, %v3506_v10  ;;  %3203 = vrot.lane.b32.xlu0 %v3202_v12, %s3402_s8  ;;  %v2048_v44 = vrot.slane %v3741_v57, %v3506_v10 }
  0x3b   : > { %5636 = vst [vmem:[#allocation13_spill] sm:$0xff] %v3769_v63  ;;  %5637 = vst [vmem:[#allocation14_spill] sm:$0xff] %v3772_v30  ;;  %v2052_v50 = vrot.slane %v3716_v34, %v3506_v10  ;;  %v2056_v51 = vrot.slane %v3735_v45, %v3506_v10  ;;  %v2060_v53 = vrot.slane %v3731_v52, %v3506_v10 }
  0x3c   : > { %5638 = vst [vmem:[#allocation15_spill] sm:$0xff] %v3776_v35  ;;  %v3791_v55 = vcombine.high %v3772_v30, %v3772_v30  ;;  %v2064_v0 = vrot.slane %v3747_v1, %v3506_v10  ;;  %v2068_v46 = vrot.slane %v3750_v4, %v3506_v10  ;;  %v2072_v56 = vrot.slane %v3761_v49, %v3506_v10 }
  0x3d   : > { %v2076_v48 = vrot.slane %v3754_v59, %v3506_v10  ;;  %v2080_v6 = vrot.slane %v3769_v63, %v3506_v10  ;;  %v2084_v12 = vrot.slane %v3757_v11, %v3506_v10  ;;  %v2088_v5 = vrot.slane %v3776_v35, %v3506_v10 }
  0x3e   : > { %v2092_v1 = vrot.slane %v3772_v30, %v3506_v10  ;;  %v2096_v4 = vrot.slane %v3791_v55, %v3506_v10  ;;  %v2239_v49 = vsel %vm1172_vm1, %v2040_v18, %v2036_v60  ;;  %v2246_v52 = vsel %vm1172_vm1, %v2072_v56, %v2068_v46 }
  0x3f   : > { %v2240_v59 = vsel %vm845_vm0, %v2044_v38, %v2239_v49  ;;  %v2247_v63 = vsel %vm845_vm0, %v2076_v48, %v2246_v52  ;;  %v3817_v11 = vrot.slane %v3603_v54, %v3504_v9  ;;  %v3821_v35 = vrot.slane %v3617_v62, %v3504_v9 }
  0x40   : > { %v2241_v30 = vsel %vm847_vm2, %v2048_v44, %v2240_v59  ;;  %v2248_v10 = vsel %vm847_vm2, %v2080_v6, %v2247_v63  ;;  %v3827_v60 = vrot.slane %v3613_v61, %v3504_v9  ;;  %v3831_v49 = vrot.slane %v3633_v7, %v3504_v9 }
  0x41   : > { %5639 = vst [vmem:[#allocation16_spill] sm:$0xff] %v3817_v11  ;;  %5640 = vst [vmem:[#allocation17_spill] sm:$0xff] %v3821_v35  ;;  %v2242_v52 = vsel %vm849_vm3, %v2052_v50, %v2241_v30  ;;  %v2249_v54 = vsel %vm849_vm3, %v2084_v12, %v2248_v10  ;;  %v3837_v62 = vrot.slane %v3608_v58, %v3504_v9 }
  0x42   : > { %5641 = vst [vmem:[#allocation18_spill] sm:$0xff] %v3827_v60  ;;  %5642 = vst [vmem:[#allocation19_spill] sm:$0xff] %v3831_v49  ;;  %v3841_v59 = vrot.slane %v3627_v3, %v3504_v9  ;;  %v2243_v18 = vsel %vm851_vm4, %v2056_v51, %v2242_v52  ;;  %v2250_v61 = vsel %vm851_vm4, %v2088_v5, %v2249_v54 }
  0x43   : > { %5643 = vst [vmem:[#allocation20_spill] sm:$0xff] %v3837_v62  ;;  %v3847_v7 = vrot.slane %v3623_v2, %v3504_v9  ;;  %v3851_v63 = vrot.slane %v3642_v16, %v3504_v9  ;;  %v2244_v10 = vsel %vm853_vm5, %v2060_v53, %v2243_v18  ;;  %v2251_v58 = vsel %vm853_vm5, %v2092_v1, %v2250_v61 }
  0x44   : > { %5644 = vst [vmem:[#allocation21_spill] sm:$0xff] %v3841_v59  ;;  %v3857_v3 = vrot.slane %v3651_v36, %v3504_v9  ;;  %v3861_v30 = vrot.slane %v3647_v31, %v3504_v9  ;;  %v2245_v5 = vsel %vm855_vm6, %v2064_v0, %v2244_v10  ;;  %v2252_v2 = vsel %vm855_vm6, %v2096_v4, %v2251_v58 }
  0x45   : > { %5645 = vst [vmem:[#allocation22_spill] sm:$0xff] %v3847_v7  ;;  %5646 = vst [vmem:[#allocation23_spill] sm:$0xff] %v3851_v63  ;;  %v3867_v16 = vrot.slane %v3660_v39, %v3504_v9  ;;  %v3871_v38 = vrot.slane %v3654_v37, %v3504_v9  ;;  %v3212_v1 = vpack.i.bf16 %v2252_v2, %v2245_v5 }
  0x46   : > { %5647 = vst [vmem:[#allocation24_spill] sm:$0xff] %v3857_v3  ;;  %5648 = vst [vmem:[#allocation25_spill] sm:$0xff] %v3861_v30  ;;  %v3875_v36 = vrot.slane %v3672_v43, %v3504_v9  ;;  %v3879_v31 = vrot.slane %v3663_v40, %v3504_v9  ;;  %v2308_v4 = vrot.slane %v3639_v14, %v3504_v9 }
  0x47   : > { %5649 = vst [vmem:[#allocation26_spill] sm:$0xff] %v3867_v16  ;;  %5650 = vst [vmem:[#allocation27_spill] sm:$0xff] %v3871_v38  ;;  %v2312_v39 = vrot.slane %v3682_v47, %v3504_v9  ;;  %v2337_v37 = vsel %vm1172_vm1, %v3821_v35, %v3817_v11  ;;  %v2344_v44 = vsel %vm1172_vm1, %v3857_v3, %v3851_v63  ;;  %3213 = vrot.lane.b32.xlu0 %v3212_v1, %s3402_s8  ;;  %v313_v3 = vld [vmem:[%s3497_s7 + $0xa0] sm:$0xff]  ;;  %v326_v35 = vld [vmem:[%s275_s6 + $0x8] sm:$0xff] }
  0x48   : > { %5651 = vst [vmem:[#allocation28_spill] sm:$0xff] %v3875_v36  ;;  %5652 = vst [vmem:[#allocation29_spill] sm:$0xff] %v3879_v31  ;;  %v3893_v43 = vrot.slane %v3510_v13, %v3504_v9  ;;  %v2338_v14 = vsel %vm845_vm0, %v3827_v60, %v2337_v37  ;;  %v2345_v40 = vsel %vm845_vm0, %v3861_v30, %v2344_v44  ;;  %v5675_v44 = vld [vmem:[#allocation9_spill] sm:$0xff]  ;;  %v3318_v11 = vld [vmem:[%s5515_s2 + $0x8] sm:$0xff]  }
  0x49   : > { %v3902_v47 = vrot.slane %v3526_v21, %v3504_v9  ;;  %v3906_v50 = vrot.slane %v3522_v20, %v3504_v9  ;;  %v2339_v13 = vsel %vm847_vm2, %v3831_v49, %v2338_v14  ;;  %v2346_v51 = vsel %vm847_vm2, %v3867_v16, %v2345_v40  ;;  %v5677_v40 = vld [vmem:[#allocation12_spill] sm:$0xff] }
  0x4a   : > { %5653 = vst [vmem:[#allocation30_spill] sm:$0xff] %v3893_v43  ;;  %v3914_v53 = vrot.slane %v3551_v28, %v3504_v9  ;;  %v3918_v0 = vrot.slane %v3513_v15, %v3504_v9  ;;  %v2340_v21 = vsel %vm849_vm3, %v3837_v62, %v2339_v13  ;;  %v2347_v20 = vsel %vm849_vm3, %v3871_v38, %v2346_v51  ;;  %v5679_v51 = vld [vmem:[#allocation10_spill] sm:$0xff] }
  0x4b   : > { %5654 = vst [vmem:[#allocation31_spill] sm:$0xff] %v3902_v47  ;;  %5655 = vst [vmem:[#allocation32_spill] sm:$0xff] %v3906_v50  ;;  %v3926_v46 = vrot.slane %v3533_v23, %v3504_v9  ;;  %v3930_v56 = vrot.slane %v3529_v22, %v3504_v9  ;;  %v2341_v28 = vsel %vm851_vm4, %v3841_v59, %v2340_v21 }
  0x4c   : > { %5656 = vst [vmem:[#allocation33_spill] sm:$0xff] %v3914_v53  ;;  %5657 = vst [vmem:[#allocation34_spill] sm:$0xff] %v3918_v0  ;;  %v2348_v15 = vsel %vm851_vm4, %v3875_v36, %v2347_v20  ;;  %v3938_v48 = vrot.slane %v3516_v17, %v3504_v9  ;;  %v3942_v6 = vrot.slane %v3540_v25, %v3504_v9  ;;  %v3314_v20 = vld [vmem:[%s5515_s2 + $0x28] sm:$0xff]  }
  0x4d   : > { %5658 = vst [vmem:[#allocation35_spill] sm:$0xff] %v3926_v46  ;;  %5659 = vst [vmem:[#allocation36_spill] sm:$0xff] %v3930_v56  ;;  %v2342_v23 = vsel %vm853_vm5, %v3847_v7, %v2341_v28  ;;  %v2349_v22 = vsel %vm853_vm5, %v3879_v31, %v2348_v15  ;;  %v3950_v12 = vrot.slane %v3536_v24, %v3504_v9  ;;  %3094 = vmatprep.subr.bf16.mxu0 %v3314_v20 }
  0x4e   : > { %5660 = vst [vmem:[#allocation37_spill] sm:$0xff] %v3938_v48  ;;  %5661 = vst [vmem:[#allocation38_spill] sm:$0xff] %v3942_v6  ;;  %v3954_v52 = vrot.slane %v3563_v32, %v3504_v9  ;;  %v2343_v17 = vsel %vm855_vm6, %v2308_v4, %v2342_v23  ;;  %v2350_v54 = vsel %vm855_vm6, %v2312_v39, %v2349_v22  ;;  %v5673_v39 = vld [vmem:[#allocation7_spill] sm:$0xff]  ;;  %v5681_v23 = vld [vmem:[#allocation13_spill] sm:$0xff]  ;;  %3095 = vmatpush3.bf16.msra.mxu0 %v3314_v20 }
  0x4f   : > { %5662 = vst [vmem:[#allocation39_spill] sm:$0xff] %v3950_v12  ;;  %v3960_v25 = vrot.slane %v3519_v19, %v3504_v9  ;;  %v3964_v18 = vrot.slane %v3547_v27, %v3504_v9  ;;  %v3217_v61 = vpack.i.bf16 %v2350_v54, %v2343_v17  ;;  %v3968_v24 = vrot.slane %v3543_v26, %v3504_v9  ;;  %v5683_v17 = vld [vmem:[#allocation11_spill] sm:$0xff] }
  0x50   : > { %5663 = vst [vmem:[#allocation40_spill] sm:$0xff] %v3954_v52  ;;  %v1264_v32 = vrot.slane %v3555_v29, %v3504_v9  ;;  %v1268_v10 = vrot.slane %v3567_v33, %v3504_v9  ;;  %v1299_v19 = vsel %vm1172_vm1, %v3902_v47, %v3893_v43  ;;  %v1306_v27 = vsel %vm1172_vm1, %v3942_v6, %v3938_v48  ;;  %v310_v47 = vld [vmem:[%s3497_s7 + $0x88] sm:$0xff]  ;;  %v3317_v43 = vld [vmem:[%s5515_s2 + $0x10] sm:$0xff]  }
  0x51   : > { %5664 = vst [vmem:[#allocation41_spill] sm:$0xff] %v3960_v25  ;;  %5665 = vst [vmem:[#allocation42_spill] sm:$0xff] %v3964_v18  ;;  %v3982_v58 = vrot.slane %v3710_v8, %v3504_v9  ;;  %v3986_v26 = vrot.slane %v3725_v42, %v3504_v9  ;;  %3218 = vrot.lane.b32.xlu1 %v3217_v61, %s3403_s9  ;;  %v1300_v29 = vsel %vm845_vm0, %v3906_v50, %v1299_v19  ;;  %v307_v61 = vld [vmem:[%s3497_s7 + $0x70] sm:$0xff] }
  0x52   : > { %5666 = vst [vmem:[#allocation43_spill] sm:$0xff] %v3968_v24  ;;  %v1307_v33 = vsel %vm845_vm0, %v3950_v12, %v1306_v27  ;;  %v3995_v5 = vrot.slane %v3721_v41, %v3504_v9  ;;  %v3999_v8 = vrot.slane %v3741_v57, %v3504_v9  ;;  %v1301_v42 = vsel %vm847_vm2, %v3914_v53, %v1300_v29  ;;  %v5685_v29 = vld [vmem:[#allocation15_spill] sm:$0xff] }
  0x53   : > { %5667 = vst [vmem:[#allocation44_spill] sm:$0xff] %v3982_v58  ;;  %5668 = vst [vmem:[#allocation45_spill] sm:$0xff] %v3986_v26  ;;  %v1308_v2 = vsel %vm847_vm2, %v3954_v52, %v1307_v33  ;;  %v4007_v1 = vrot.slane %v3716_v34, %v3504_v9  ;;  %v4011_v4 = vrot.slane %v3735_v45, %v3504_v9  ;;  %v309_v52 = vld [vmem:[%s3497_s7 + $0x80] sm:$0xff]  ;;  %3108 = vmatprep.subr.bf16.mxu1 %v3317_v43 }
  0x54   : > { %5669 = vst [vmem:[#allocation46_spill] sm:$0xff] %v3995_v5  ;;  %5670 = vst [vmem:[#allocation47_spill] sm:$0xff] %v3999_v8  ;;  %v1302_v41 = vsel %vm849_vm3, %v3918_v0, %v1301_v42  ;;  %v1309_v57 = vsel %vm849_vm3, %v3960_v25, %v1308_v2  ;;  %v4019_v37 = vrot.slane %v5673_v39, %v3504_v9  ;;  %v5687_v42 = vld [vmem:[#allocation14_spill] sm:$0xff]  ;;  %v5689_v39 = vld [vmem:[#allocation8_spill] sm:$0xff]  ;;  %3109 = vmatpush3.bf16.msra.mxu1 %v3317_v43 }
  0x55   : > { %5671 = vst [vmem:[#allocation48_spill] sm:$0xff] %v4007_v1  ;;  %5672 = vst [vmem:[#allocation49_spill] sm:$0xff] %v4011_v4  ;;  %v4023_v14 = vrot.slane %v5675_v44, %v3504_v9  ;;  %v1303_v34 = vsel %vm851_vm4, %v3926_v46, %v1302_v41  ;;  %v1310_v45 = vsel %vm851_vm4, %v3964_v18, %v1309_v57  ;;  %v308_v41 = vld [vmem:[%s3497_s7 + $0x78] sm:$0xff]  ;;  %3110 = vmatprep.subr.bf16.mxu1 %v3318_v11 }
  0x56   : > { %5674 = vst [vmem:[#allocation7_spill] sm:$0xff] %v4019_v37  ;;  %v4031_v13 = vrot.slane %v5677_v40, %v3504_v9  ;;  %v4035_v21 = vrot.slane %v5679_v51, %v3504_v9  ;;  %v1304_v28 = vsel %vm853_vm5, %v3930_v56, %v1303_v34  ;;  %v1311_v15 = vsel %vm853_vm5, %v3968_v24, %v1310_v45  ;;  %v5690_v51 = vld [vmem:[#allocation5_spill] sm:$0xff] }
  0x57   : > { %5676 = vst [vmem:[#allocation9_spill] sm:$0xff] %v4023_v14  ;;  %v4046_v22 = vrot.slane %v5681_v23, %v3504_v9  ;;  %v4050_v54 = vrot.slane %v5683_v17, %v3504_v9  ;;  %v1305_v19 = vsel %vm855_vm6, %v1264_v32, %v1304_v28  ;;  %v1312_v27 = vsel %vm855_vm6, %v1268_v10, %v1311_v15  ;;  %v311_v23 = vld [vmem:[%s3497_s7 + $0x90] sm:$0xff] }
  0x58   : > { %5678 = vst [vmem:[#allocation12_spill] sm:$0xff] %v4031_v13  ;;  %5680 = vst [vmem:[#allocation10_spill] sm:$0xff] %v4035_v21  ;;  %v4057_v33 = vrot.slane %v5685_v29, %v3504_v9  ;;  %v4061_v2 = vrot.slane %v5687_v42, %v3504_v9  ;;  %v3222_v57 = vpack.i.bf16 %v1312_v27, %v1305_v19  ;;  %3111 = vmatpush3.bf16.msra.mxu1 %v3318_v11 }
  0x59   : > { %5682 = vst [vmem:[#allocation13_spill] sm:$0xff] %v4046_v22  ;;  %5684 = vst [vmem:[#allocation11_spill] sm:$0xff] %v4050_v54  ;;  %v2316_v44 = vrot.slane %v5689_v39, %v3504_v9  ;;  %v2320_v32 = vrot.slane %v3791_v55, %v3504_v9  ;;  %v2351_v10 = vsel %vm1172_vm1, %v3986_v26, %v3982_v58  ;;  %v3315_v55 = vld [vmem:[%s5515_s2 + $0x20] sm:$0xff]  }
  0x5a   : > { %5686 = vst [vmem:[#allocation15_spill] sm:$0xff] %v4057_v33  ;;  %5688 = vst [vmem:[#allocation14_spill] sm:$0xff] %v4061_v2  ;;  %v2352_v34 = vsel %vm845_vm0, %v3995_v5, %v2351_v10  ;;  %v2358_v45 = vsel %vm1172_vm1, %v4031_v13, %v4023_v14  ;;  %v485_v40 = vcombine.high %v307_v61, %v307_v61  ;;  %3223 = vrot.lane.b32.xlu0 %v3222_v57, %s3403_s9  ;;  %v3316_v57 = vld [vmem:[%s5515_s2 + $0x18] sm:$0xff]  }
  0x5b   : > { %v4077_v28 = vrot.slane %v307_v61, %v5690_v51  ;;  %v2353_v20 = vsel %vm847_vm2, %v3999_v8, %v2352_v34  ;;  %v2359_v15 = vsel %vm845_vm0, %v4035_v21, %v2358_v45  ;;  %v502_v17 = vcombine.high %v308_v41, %v308_v41  ;;  %3096 = vmatprep.subr.bf16.mxu0 %v3315_v55  ;;  %v312_v10 = vld [vmem:[%s3497_s7 + $0x98] sm:$0xff] }
  0x5c   : > { %v4089_v19 = vrot.slane %v308_v41, %v5690_v51  ;;  %v2354_v61 = vsel %vm849_vm3, %v4007_v1, %v2353_v20  ;;  %v2360_v27 = vsel %vm847_vm2, %v4046_v22, %v2359_v15  ;;  %v4096_v29 = vrot.slane %v485_v40, %v5690_v51  ;;  %3097 = vmatpush3.bf16.msra.mxu0 %v3315_v55 }
  0x5d   : > { %v4100_v42 = vcombine.high %v4077_v28, %v4077_v28  ;;  %v2355_v41 = vsel %vm851_vm4, %v4011_v4, %v2354_v61  ;;  %v2361_v39 = vsel %vm849_vm3, %v4050_v54, %v2360_v27  ;;  %v4111_v34 = vrot.slane %v502_v17, %v5690_v51  ;;  %3098 = vmatprep.subr.bf16.mxu0 %v3316_v57 }
  0x5e   : > { %v4115_v45 = vcombine.high %v4089_v19, %v4089_v19  ;;  %v2356_v40 = vsel %vm853_vm5, %v4019_v37, %v2355_v41  ;;  %v2362_v20 = vsel %vm851_vm4, %v4057_v33, %v2361_v39  ;;  %v4123_v15 = vcombine.high %v4096_v29, %v4096_v29 }
  0x5f   : > { %v519_v61 = vcombine.high %v311_v23, %v311_v23  ;;  %v2357_v17 = vsel %vm855_vm6, %v2316_v44, %v2356_v40  ;;  %v2363_v27 = vsel %vm853_vm5, %v4061_v2, %v2362_v20  ;;  %v4130_v55 = vcombine.high %v4111_v34, %v4111_v34  ;;  %v5691_v20 = vld [vmem:[#allocation6_spill] sm:$0xff] }
  0x60   : > { %v4133_v41 = vrot.slane %v311_v23, %v5690_v51  ;;  %v2364_v39 = vsel %vm855_vm6, %v2320_v32, %v2363_v27  ;;  %v536_v24 = vcombine.high %v312_v10, %v312_v10  ;;  %v4140_v46 = vrot.slane %v312_v10, %v5690_v51  ;;  %3099 = vmatpush3.bf16.msra.mxu0 %v3316_v57 }
  0x61   : > { %v4137_v56 = vrot.slane %v519_v61, %v5690_v51  ;;  %v3227_v44 = vpack.i.bf16 %v2364_v39, %v2357_v17  ;;  %v1047_v18 = vrot.slane %v4077_v28, %v5691_v20  ;;  %v1051_v23 = vrot.slane %v4100_v42, %v5691_v20 }
  0x62   : > { %v4144_v40 = vcombine.high %v4133_v41, %v4133_v41  ;;  %v4155_v10 = vrot.slane %v536_v24, %v5690_v51  ;;  %v4159_v61 = vcombine.high %v4140_v46, %v4140_v46  ;;  %v1055_v17 = vrot.slane %v4096_v29, %v5691_v20 }
  0x63   : > { %v4152_v32 = vcombine.high %v4137_v56, %v4137_v56  ;;  %3228 = vrot.lane.b32.xlu1 %v3227_v44, %s3403_s9  ;;  %v1059_v57 = vrot.slane %v4123_v15, %v5691_v20  ;;  %v1063_v27 = vrot.slane %v4089_v19, %v5691_v20  ;;  %v1067_v24 = vrot.slane %v4115_v45, %v5691_v20 }
  0x64   : > { %v1071_v39 = vrot.slane %v4111_v34, %v5691_v20  ;;  %v4174_v0 = vcombine.high %v4155_v10, %v4155_v10  ;;  %v1075_v25 = vrot.slane %v4130_v55, %v5691_v20  ;;  %v1079_v44 = vrot.slane %v4133_v41, %v5691_v20 }
  0x65   : > { %v1083_v53 = vrot.slane %v4144_v40, %v5691_v20  ;;  %v1087_v12 = vrot.slane %v4137_v56, %v5691_v20  ;;  %v1091_v50 = vrot.slane %v4152_v32, %v5691_v20  ;;  %v1095_v6 = vrot.slane %v4140_v46, %v5691_v20 }
  0x66   : > { %v1099_v48 = vrot.slane %v4159_v61, %v5691_v20  ;;  %v1103_v31 = vrot.slane %v4155_v10, %v5691_v20  ;;  %v1107_v7 = vrot.slane %v4174_v0, %v5691_v20  ;;  %v1201_v36 = vsel %vm1172_vm1, %v1051_v23, %v1047_v18 }
  0x67   : > { %v1208_v59 = vsel %vm1172_vm1, %v1083_v53, %v1079_v44  ;;  %v1202_v38 = vsel %vm845_vm0, %v1055_v17, %v1201_v36  ;;  %v1545_v16 = vcombine.high %v309_v52, %v309_v52  ;;  %v4204_v49 = vrot.slane %v309_v52, %v5690_v51 }
  0x68   : > { %v1209_v62 = vsel %vm845_vm0, %v1087_v12, %v1208_v59  ;;  %v1203_v30 = vsel %vm847_vm2, %v1059_v57, %v1202_v38  ;;  %v1562_v63 = vcombine.high %v310_v47, %v310_v47  ;;  %v4210_v18 = vrot.slane %v310_v47, %v5690_v51 }
  0x69   : > { %v1210_v60 = vsel %vm847_vm2, %v1091_v50, %v1209_v62  ;;  %v1204_v36 = vsel %vm849_vm3, %v1063_v27, %v1203_v30  ;;  %v4215_v53 = vrot.slane %v1545_v16, %v5690_v51  ;;  %v4219_v12 = vcombine.high %v4204_v49, %v4204_v49  ;;  %v314_v50 = vld [vmem:[%s3497_s7 + $0xa8] sm:$0xff] }
  0x6a   : > { %5692 = vst [vmem:[#allocation8_spill] sm:$0xff] %v4210_v18  ;;  %v1211_v59 = vsel %vm849_vm3, %v1095_v6, %v1210_v60  ;;  %v1205_v38 = vsel %vm851_vm4, %v1067_v24, %v1204_v36  ;;  %v4225_v47 = vrot.slane %v1562_v63, %v5690_v51  ;;  %v4229_v30 = vcombine.high %v4210_v18, %v4210_v18 }
  0x6b   : > { %v1212_v62 = vsel %vm851_vm4, %v1099_v48, %v1211_v59  ;;  %v1206_v60 = vsel %vm853_vm5, %v1071_v39, %v1205_v38  ;;  %v4235_v43 = vcombine.high %v4215_v53, %v4215_v53  ;;  %v1579_v6 = vcombine.high %v313_v3, %v313_v3 }
  0x6c   : > { %5693 = vst [vmem:[#allocation5_spill] sm:$0xff] %v4225_v47  ;;  %5694 = vst [vmem:[#allocation6_spill] sm:$0xff] %v4229_v30  ;;  %v1213_v16 = vsel %vm853_vm5, %v1103_v31, %v1212_v62  ;;  %v1207_v48 = vsel %vm855_vm6, %v1075_v25, %v1206_v60  ;;  %v4241_v63 = vcombine.high %v4225_v47, %v4225_v47  ;;  %v332_v14 = vmul.f32 0.0, %v326_v35 }
  0x6d   : > { %v1214_v52 = vsel %vm855_vm6, %v1107_v7, %v1213_v16  ;;  %v4244_v23 = vrot.slane %v313_v3, %v5690_v51  ;;  %v4247_v57 = vrot.slane %v1579_v6, %v5690_v51  ;;  %v1596_v31 = vcombine.high %v314_v50, %v314_v50  ;;  %v325_v16 = vld [vmem:[%s275_s6] sm:$0xff]  ;;  %s3072_s6 = sshll.u32 %s3391_s18, 10  ;;  %s5468_s18 = scalar_lea.sflag [#allocation3], %s260_s21 }
  0x6e   : > { %5695 = vst [vmem:[#allocation50_spill] sm:$0xff] %v4241_v63  ;;  %v3232_v17 = vpack.i.bf16 %v1214_v52, %v1207_v48  ;;  %v4250_v27 = vrot.slane %v314_v50, %v5690_v51  ;;  %v2100_v3 = vrot.slane %v4204_v49, %v5691_v20  ;;  %v2104_v25 = vrot.slane %v4219_v12, %v5691_v20  ;;  %s5459_s11 = scalar_lea.hbm %s5517_s4, %s3072_s6 }
  0x6f   : > { %5696 = vst [vmem:[#allocation51_spill] sm:$0xff] %v4244_v23  ;;  %5697 = vst [vmem:[#allocation52_spill] sm:$0xff] %v4247_v57  ;;  %v4259_v7 = vcombine.high %v4244_v23, %v4244_v23  ;;  %v2108_v24 = vrot.slane %v4215_v53, %v5691_v20  ;;  %v4270_v39 = vcombine.high %v4247_v57, %v4247_v57  ;;  %v331_v21 = vmul.f32 0.0, %v325_v16 }
  0x70   : > { %5698 = vst [vmem:[#allocation53_spill] sm:$0xff] %v4250_v27  ;;  %3233 = vrot.lane.b32.xlu0 %v3232_v17, %s3402_s8  ;;  %v4273_v44 = vrot.slane %v1596_v31, %v5690_v51  ;;  %v4277_v36 = vcombine.high %v4250_v27, %v4250_v27  ;;  %v2112_v59 = vrot.slane %v4235_v43, %v5691_v20  ;;  %v295_v31 = vld [vmem:[%s3497_s7 + $0x10] sm:$0xff] }
  0x71   : > { %5699 = vst [vmem:[#allocation54_spill] sm:$0xff] %v4259_v7  ;;  %5700 = vst [vmem:[#allocation55_spill] sm:$0xff] %v4270_v39  ;;  %v2116_v38 = vrot.slane %v4210_v18, %v5691_v20  ;;  %v2120_v62 = vrot.slane %v4229_v30, %v5691_v20  ;;  %v2124_v50 = vrot.slane %v4225_v47, %v5691_v20 }
  0x72   : > { %5701 = vst [vmem:[#allocation56_spill] sm:$0xff] %v4273_v44  ;;  %5702 = vst [vmem:[#allocation57_spill] sm:$0xff] %v4277_v36  ;;  %v2128_v60 = vrot.slane %v4241_v63, %v5691_v20  ;;  %v4291_v6 = vcombine.high %v4273_v44, %v4273_v44  ;;  %v2132_v48 = vrot.slane %v4244_v23, %v5691_v20 }
  0x73   : > { %v2136_v52 = vrot.slane %v4259_v7, %v5691_v20  ;;  %v2140_v17 = vrot.slane %v4247_v57, %v5691_v20  ;;  %v2144_v2 = vrot.slane %v4270_v39, %v5691_v20  ;;  %v2148_v33 = vrot.slane %v4250_v27, %v5691_v20 }
  0x74   : > { %5703 = vst [vmem:[#allocation58_spill] sm:$0xff] %v4291_v6  ;;  %v2152_v37 = vrot.slane %v4277_v36, %v5691_v20  ;;  %v2156_v54 = vrot.slane %v4273_v44, %v5691_v20  ;;  %v2160_v4 = vrot.slane %v4291_v6, %v5691_v20  ;;  %v2253_v22 = vsel %vm1172_vm1, %v2104_v25, %v2100_v3 }
  0x75   : > { %v2260_v1 = vsel %vm1172_vm1, %v2136_v52, %v2132_v48  ;;  %v2254_v8 = vsel %vm845_vm0, %v2108_v24, %v2253_v22  ;;  %v383_v5 = vcombine.high %v295_v31, %v295_v31  ;;  %v349_v63 = vcombine.high %v331_v21, %v331_v21 }
  0x76   : > { %v2261_v13 = vsel %vm845_vm0, %v2140_v17, %v2260_v1  ;;  %v2255_v26 = vsel %vm847_vm2, %v2112_v59, %v2254_v8  ;;  %v356_v6 = vrot.slane %v331_v21, %v5690_v51  ;;  %v366_v16 = vcombine.high %v332_v14, %v332_v14  ;;  %v296_v1 = vld [vmem:[%s3497_s7 + $0x18] sm:$0xff] }
  0x77   : > { %v2262_v58 = vsel %vm847_vm2, %v2144_v2, %v2261_v13  ;;  %v2256_v3 = vsel %vm849_vm3, %v2116_v38, %v2255_v26  ;;  %v373_v48 = vrot.slane %v332_v14, %v5690_v51  ;;  %v363_v11 = vrot.slane %v349_v63, %v5690_v51 }
  0x78   : > { %v2263_v25 = vsel %vm849_vm3, %v2148_v33, %v2262_v58  ;;  %v2257_v22 = vsel %vm851_vm4, %v2120_v62, %v2256_v3  ;;  %v364_v8 = vcombine.high %v356_v6, %v356_v6  ;;  %v380_v21 = vrot.slane %v366_v16, %v5690_v51 }
  0x79   : > { %v2264_v35 = vsel %vm851_vm4, %v2152_v37, %v2263_v25  ;;  %v2258_v13 = vsel %vm853_vm5, %v2124_v50, %v2257_v22  ;;  %v381_v26 = vcombine.high %v373_v48, %v373_v48  ;;  %v365_v14 = vcombine.high %v363_v11, %v363_v11 }
  0x7a   : > { %v2265_v2 = vsel %vm853_vm5, %v2156_v54, %v2264_v35  ;;  %v2259_v58 = vsel %vm855_vm6, %v2128_v60, %v2258_v13  ;;  %v390_v24 = vrot.slane %v295_v31, %v5690_v51  ;;  %v4333_v37 = vcombine.high %v380_v21, %v380_v21 }
  0x7b   : > { %v2266_v33 = vsel %vm855_vm6, %v2160_v4, %v2265_v2  ;;  %v397_v63 = vrot.slane %v383_v5, %v5690_v51  ;;  %v400_v38 = vcombine.high %v296_v1, %v296_v1  ;;  %v407_v50 = vrot.slane %v296_v1, %v5690_v51 }
  0x7c   : > { %v3237_v59 = vpack.i.bf16 %v2266_v33, %v2259_v58  ;;  %v398_v62 = vcombine.high %v390_v24, %v390_v24  ;;  %v919_v54 = vrot.slane %v356_v6, %v5691_v20  ;;  %v923_v52 = vrot.slane %v364_v8, %v5691_v20 }
  0x7d   : > { %v399_v60 = vcombine.high %v397_v63, %v397_v63  ;;  %v414_v4 = vrot.slane %v400_v38, %v5690_v51  ;;  %v927_v17 = vrot.slane %v363_v11, %v5691_v20  ;;  %v931_v31 = vrot.slane %v365_v14, %v5691_v20 }
  0x7e   : > { %3238 = vrot.lane.b32.xlu1 %v3237_v59, %s3402_s8  ;;  %v415_v3 = vcombine.high %v407_v50, %v407_v50  ;;  %v935_v5 = vrot.slane %v373_v48, %v5691_v20  ;;  %v939_v25 = vrot.slane %v381_v26, %v5691_v20  ;;  %v943_v16 = vrot.slane %v380_v21, %v5691_v20 }
  0x7f   : > { %v4346_v22 = vcombine.high %v414_v4, %v414_v4  ;;  %v947_v35 = vrot.slane %v4333_v37, %v5691_v20  ;;  %v951_v1 = vrot.slane %v390_v24, %v5691_v20  ;;  %v955_v13 = vrot.slane %v398_v62, %v5691_v20 }
  0x80   : > { %v959_v2 = vrot.slane %v397_v63, %v5691_v20  ;;  %v963_v58 = vrot.slane %v399_v60, %v5691_v20  ;;  %v967_v33 = vrot.slane %v407_v50, %v5691_v20  ;;  %v971_v59 = vrot.slane %v415_v3, %v5691_v20 }
  0x81   : > { %v975_v38 = vrot.slane %v414_v4, %v5691_v20  ;;  %v979_v44 = vrot.slane %v4346_v22, %v5691_v20  ;;  %v1173_v36 = vsel %vm1172_vm1, %v923_v52, %v919_v54  ;;  %v1180_v27 = vsel %vm1172_vm1, %v955_v13, %v951_v1 }
  0x82   : > { %v1174_v39 = vsel %vm845_vm0, %v927_v17, %v1173_v36  ;;  %v1181_v57 = vsel %vm845_vm0, %v959_v2, %v1180_v27  ;;  %v4364_v7 = vrot.slane %v356_v6, %v3504_v9  ;;  %v4367_v23 = vrot.slane %v364_v8, %v3504_v9  ;;  %v315_v17 = vld [vmem:[%s3497_s7 + $0xb0] sm:$0xff] }
  0x83   : > { %v1175_v47 = vsel %vm847_vm2, %v931_v31, %v1174_v39  ;;  %v1182_v30 = vsel %vm847_vm2, %v963_v58, %v1181_v57  ;;  %v4372_v18 = vrot.slane %v363_v11, %v3504_v9  ;;  %v4375_v54 = vrot.slane %v365_v14, %v3504_v9  ;;  %v319_v58 = vld [vmem:[%s3497_s7 + $0xd0] sm:$0xff] }
  0x84   : > { %5704 = vst [vmem:[#allocation59_spill] sm:$0xff] %v4364_v7  ;;  %5705 = vst [vmem:[#allocation60_spill] sm:$0xff] %v4367_v23  ;;  %v1176_v36 = vsel %vm849_vm3, %v935_v5, %v1175_v47  ;;  %v1183_v27 = vsel %vm849_vm3, %v967_v33, %v1182_v30  ;;  %v4380_v6 = vrot.slane %v373_v48, %v3504_v9  ;;  %v3319_v47 = vld [vmem:[%s5515_s2] sm:$0xff]  }
  0x85   : > { %5706 = vst [vmem:[#allocation61_spill] sm:$0xff] %v4372_v18  ;;  %5707 = vst [vmem:[#allocation62_spill] sm:$0xff] %v4375_v54  ;;  %v4383_v8 = vrot.slane %v381_v26, %v3504_v9  ;;  %v1177_v57 = vsel %vm851_vm4, %v939_v25, %v1176_v36  ;;  %v1184_v39 = vsel %vm851_vm4, %v971_v59, %v1183_v27  ;;  %v316_v25 = vld [vmem:[%s3497_s7 + $0xb8] sm:$0xff]  ;;  %3112 = vmatprep.subr.bf16.mxu1 %v3319_v47 }
  0x86   : > { %5708 = vst [vmem:[#allocation63_spill] sm:$0xff] %v4380_v6  ;;  %v4388_v11 = vrot.slane %v380_v21, %v3504_v9  ;;  %v4391_v14 = vrot.slane %v390_v24, %v3504_v9  ;;  %v1178_v30 = vsel %vm853_vm5, %v943_v16, %v1177_v57  ;;  %v1185_v48 = vsel %vm853_vm5, %v975_v38, %v1184_v39  ;;  %v320_v27 = vld [vmem:[%s3497_s7 + $0xd8] sm:$0xff] }
  0x87   : > { %5709 = vst [vmem:[#allocation64_spill] sm:$0xff] %v4383_v8  ;;  %v4399_v26 = vrot.slane %v398_v62, %v3504_v9  ;;  %v4402_v52 = vrot.slane %v397_v63, %v3504_v9  ;;  %v1179_v21 = vsel %vm855_vm6, %v947_v35, %v1178_v30  ;;  %v1186_v24 = vsel %vm855_vm6, %v979_v44, %v1185_v48 }
  0x88   : > { %5710 = vst [vmem:[#allocation65_spill] sm:$0xff] %v4388_v11  ;;  %5711 = vst [vmem:[#allocation66_spill] sm:$0xff] %v4391_v14  ;;  %v4408_v31 = vrot.slane %v399_v60, %v3504_v9  ;;  %v4411_v5 = vrot.slane %v407_v50, %v3504_v9  ;;  %v3242_v16 = vpack.i.bf16 %v1186_v24, %v1179_v21  ;;  %3113 = vmatpush3.bf16.msra.mxu1 %v3319_v47 }
  0x89   : > { %5712 = vst [vmem:[#allocation67_spill] sm:$0xff] %v4399_v26  ;;  %5713 = vst [vmem:[#allocation68_spill] sm:$0xff] %v4402_v52  ;;  %v4415_v62 = vrot.slane %v415_v3, %v3504_v9  ;;  %v4418_v63 = vrot.slane %v414_v4, %v3504_v9  ;;  %v1256_v35 = vrot.slane %v4333_v37, %v3504_v9 }
  0x8a   : > { %5714 = vst [vmem:[#allocation69_spill] sm:$0xff] %v4408_v31  ;;  %5715 = vst [vmem:[#allocation70_spill] sm:$0xff] %v4411_v5  ;;  %v1260_v44 = vrot.slane %v4346_v22, %v3504_v9  ;;  %v1285_v50 = vsel %vm1172_vm1, %v4367_v23, %v4364_v7  ;;  %v1292_v60 = vsel %vm1172_vm1, %v4399_v26, %v4391_v14  ;;  %3243 = vrot.lane.b32.xlu0 %v3242_v16, %s3402_s8 }
  0x8b   : > { %5716 = vst [vmem:[#allocation71_spill] sm:$0xff] %v4415_v62  ;;  %5717 = vst [vmem:[#allocation72_spill] sm:$0xff] %v4418_v63  ;;  %v553_v3 = vcombine.high %v315_v17, %v315_v17  ;;  %v1286_v4 = vsel %vm845_vm0, %v4372_v18, %v1285_v50  ;;  %v1293_v37 = vsel %vm845_vm0, %v4402_v52, %v1292_v60 }
  0x8c   : > { %v4436_v22 = vrot.slane %v315_v17, %v5690_v51  ;;  %v570_v1 = vcombine.high %v316_v25, %v316_v25  ;;  %v1287_v13 = vsel %vm847_vm2, %v4375_v54, %v1286_v4  ;;  %v1294_v2 = vsel %vm847_vm2, %v4408_v31, %v1293_v37 }
  0x8d   : > { %v4444_v33 = vrot.slane %v553_v3, %v5690_v51  ;;  %v4447_v59 = vrot.slane %v316_v25, %v5690_v51  ;;  %v1288_v38 = vsel %vm849_vm3, %v4380_v6, %v1287_v13  ;;  %v1295_v36 = vsel %vm849_vm3, %v4411_v5, %v1294_v2 }
  0x8e   : > { %v4456_v57 = vcombine.high %v4436_v22, %v4436_v22  ;;  %v4459_v39 = vrot.slane %v570_v1, %v5690_v51  ;;  %v1289_v47 = vsel %vm851_vm4, %v4383_v8, %v1288_v38  ;;  %v1296_v30 = vsel %vm851_vm4, %v4415_v62, %v1295_v36 }
  0x8f   : > { %v4467_v48 = vcombine.high %v4444_v33, %v4444_v33  ;;  %v4471_v17 = vcombine.high %v4447_v59, %v4447_v59  ;;  %v1290_v21 = vsel %vm853_vm5, %v4388_v11, %v1289_v47  ;;  %v1297_v24 = vsel %vm853_vm5, %v4418_v63, %v1296_v30 }
  0x90   : > { %v4479_v25 = vcombine.high %v4459_v39, %v4459_v39  ;;  %v587_v16 = vcombine.high %v319_v58, %v319_v58  ;;  %v1291_v50 = vsel %vm855_vm6, %v1256_v35, %v1290_v21  ;;  %v1298_v60 = vsel %vm855_vm6, %v1260_v44, %v1297_v24 }
  0x91   : > { %v4484_v3 = vrot.slane %v319_v58, %v5690_v51  ;;  %v604_v4 = vcombine.high %v320_v27, %v320_v27  ;;  %v3252_v37 = vpack.i.bf16 %v1298_v60, %v1291_v50  ;;  %v4490_v13 = vrot.slane %v320_v27, %v5690_v51 }
  0x92   : > { %v4487_v1 = vrot.slane %v587_v16, %v5690_v51  ;;  %v1111_v2 = vrot.slane %v4436_v22, %v5691_v20  ;;  %v1115_v44 = vrot.slane %v4456_v57, %v5691_v20  ;;  %v1119_v58 = vrot.slane %v4444_v33, %v5691_v20 }
  0x93   : > { %v4496_v38 = vcombine.high %v4484_v3, %v4484_v3  ;;  %v4499_v35 = vrot.slane %v604_v4, %v5690_v51  ;;  %3253 = vrot.lane.b32.xlu1 %v3252_v37, %s3403_s9  ;;  %v4512_v27 = vcombine.high %v4490_v13, %v4490_v13  ;;  %v1123_v47 = vrot.slane %v4467_v48, %v5691_v20 }
  0x94   : > { %v4508_v36 = vcombine.high %v4487_v1, %v4487_v1  ;;  %v1127_v30 = vrot.slane %v4447_v59, %v5691_v20  ;;  %v1131_v24 = vrot.slane %v4471_v17, %v5691_v20  ;;  %v1135_v16 = vrot.slane %v4459_v39, %v5691_v20 }
  0x95   : > { %v4520_v21 = vcombine.high %v4499_v35, %v4499_v35  ;;  %v1139_v50 = vrot.slane %v4479_v25, %v5691_v20  ;;  %v1143_v60 = vrot.slane %v4484_v3, %v5691_v20  ;;  %v1147_v4 = vrot.slane %v4496_v38, %v5691_v20 }
  0x96   : > { %v1151_v37 = vrot.slane %v4487_v1, %v5691_v20  ;;  %v1155_v63 = vrot.slane %v4508_v36, %v5691_v20  ;;  %v1159_v11 = vrot.slane %v4490_v13, %v5691_v20  ;;  %v1163_v62 = vrot.slane %v4512_v27, %v5691_v20 }
  0x97   : > { %v1167_v8 = vrot.slane %v4499_v35, %v5691_v20  ;;  %v1171_v5 = vrot.slane %v4520_v21, %v5691_v20  ;;  %v1215_v6 = vsel %vm1172_vm1, %v1115_v44, %v1111_v2  ;;  %v1222_v31 = vsel %vm1172_vm1, %v1147_v4, %v1143_v60  ;;  %v321_v60 = vld [vmem:[%s3497_s7 + $0xe0] sm:$0xff] }
  0x98   : > { %v4548_v54 = vrot.slane %v4077_v28, %v3504_v9  ;;  %v4552_v52 = vrot.slane %v4100_v42, %v3504_v9  ;;  %v1216_v18 = vsel %vm845_vm0, %v1119_v58, %v1215_v6  ;;  %v1223_v26 = vsel %vm845_vm0, %v1151_v37, %v1222_v31 }
  0x99   : > { %v4558_v14 = vrot.slane %v4096_v29, %v3504_v9  ;;  %v4562_v2 = vrot.slane %v4123_v15, %v3504_v9  ;;  %v1217_v44 = vsel %vm847_vm2, %v1123_v47, %v1216_v18  ;;  %v1224_v28 = vsel %vm847_vm2, %v1155_v63, %v1223_v26 }
  0x9a   : > { %5718 = vst [vmem:[#allocation73_spill] sm:$0xff] %v4548_v54  ;;  %5719 = vst [vmem:[#allocation74_spill] sm:$0xff] %v4552_v52  ;;  %v4568_v42 = vrot.slane %v4089_v19, %v3504_v9  ;;  %v4572_v6 = vrot.slane %v4115_v45, %v3504_v9  ;;  %v1218_v29 = vsel %vm849_vm3, %v1127_v30, %v1217_v44 }
  0x9b   : > { %5720 = vst [vmem:[#allocation75_spill] sm:$0xff] %v4558_v14  ;;  %5721 = vst [vmem:[#allocation76_spill] sm:$0xff] %v4562_v2  ;;  %v1225_v31 = vsel %vm849_vm3, %v1159_v11, %v1224_v28  ;;  %v4578_v15 = vrot.slane %v4111_v34, %v3504_v9  ;;  %v4582_v18 = vrot.slane %v4133_v41, %v3504_v9 }
  0x9c   : > { %5722 = vst [vmem:[#allocation77_spill] sm:$0xff] %v4568_v42  ;;  %5723 = vst [vmem:[#allocation78_spill] sm:$0xff] %v4572_v6  ;;  %v1219_v19 = vsel %vm851_vm4, %v1131_v24, %v1218_v29  ;;  %v1226_v26 = vsel %vm851_vm4, %v1163_v62, %v1225_v31  ;;  %v4588_v45 = vrot.slane %v4144_v40, %v3504_v9  ;;  %v317_v62 = vld [vmem:[%s3497_s7 + $0xc0] sm:$0xff] }
  0x9d   : > { %5724 = vst [vmem:[#allocation79_spill] sm:$0xff] %v4578_v15  ;;  %v4592_v11 = vrot.slane %v4137_v56, %v3504_v9  ;;  %v1220_v63 = vsel %vm853_vm5, %v1135_v16, %v1219_v19  ;;  %v1227_v34 = vsel %vm853_vm5, %v1167_v8, %v1226_v26  ;;  %v4598_v41 = vrot.slane %v4152_v32, %v3504_v9  ;;  %v318_v32 = vld [vmem:[%s3497_s7 + $0xc8] sm:$0xff] }
  0x9e   : > { %5725 = vst [vmem:[#allocation80_spill] sm:$0xff] %v4588_v45  ;;  %v4602_v58 = vrot.slane %v4140_v46, %v3504_v9  ;;  %v1221_v40 = vsel %vm855_vm6, %v1139_v50, %v1220_v63  ;;  %v1228_v47 = vsel %vm855_vm6, %v1171_v5, %v1227_v34  ;;  %v4609_v56 = vrot.slane %v4159_v61, %v3504_v9  ;;  %v322_v63 = vld [vmem:[%s3497_s7 + $0xe8] sm:$0xff] }
  0x9f   : > { %5726 = vst [vmem:[#allocation81_spill] sm:$0xff] %v4592_v11  ;;  %5727 = vst [vmem:[#allocation82_spill] sm:$0xff] %v4598_v41  ;;  %v4613_v8 = vrot.slane %v4155_v10, %v3504_v9  ;;  %v3247_v30 = vpack.i.bf16 %v1228_v47, %v1221_v40  ;;  %v1272_v46 = vrot.slane %v4130_v55, %v3504_v9 }
  0xa0   : > { %5728 = vst [vmem:[#allocation83_spill] sm:$0xff] %v4602_v58  ;;  %5729 = vst [vmem:[#allocation84_spill] sm:$0xff] %v4609_v56  ;;  %v1276_v24 = vrot.slane %v4174_v0, %v3504_v9  ;;  %v1313_v5 = vsel %vm1172_vm1, %v4552_v52, %v4548_v54  ;;  %v1320_v10 = vsel %vm1172_vm1, %v4588_v45, %v4582_v18 }
  0xa1   : > { %5730 = vst [vmem:[#allocation85_spill] sm:$0xff] %v4613_v8  ;;  %v1314_v61 = vsel %vm845_vm0, %v4558_v14, %v1313_v5  ;;  %v1613_v16 = vcombine.high %v317_v62, %v317_v62  ;;  %v4629_v50 = vrot.slane %v317_v62, %v5690_v51  ;;  %3248 = vrot.lane.b32.xlu0 %v3247_v30, %s3402_s8 }
  0xa2   : > { %v1315_v0 = vsel %vm847_vm2, %v4562_v2, %v1314_v61  ;;  %v1321_v55 = vsel %vm845_vm0, %v4592_v11, %v1320_v10  ;;  %v1630_v4 = vcombine.high %v318_v32, %v318_v32  ;;  %v4638_v37 = vrot.slane %v318_v32, %v5690_v51 }
  0xa3   : > { %v1316_v44 = vsel %vm849_vm3, %v4568_v42, %v1315_v0  ;;  %v1322_v28 = vsel %vm847_vm2, %v4598_v41, %v1321_v55  ;;  %v4645_v29 = vrot.slane %v1613_v16, %v5690_v51  ;;  %v4649_v31 = vcombine.high %v4629_v50, %v4629_v50 }
  0xa4   : > { %v1317_v19 = vsel %vm851_vm4, %v4572_v6, %v1316_v44  ;;  %v1323_v26 = vsel %vm849_vm3, %v4602_v58, %v1322_v28  ;;  %v4657_v34 = vrot.slane %v1630_v4, %v5690_v51  ;;  %v4661_v62 = vcombine.high %v4638_v37, %v4638_v37 }
  0xa5   : > { %v1318_v40 = vsel %vm853_vm5, %v4578_v15, %v1317_v19  ;;  %v1324_v47 = vsel %vm851_vm4, %v4609_v56, %v1323_v26  ;;  %v4669_v32 = vcombine.high %v4645_v29, %v4645_v29  ;;  %v1647_v30 = vcombine.high %v321_v60, %v321_v60 }
  0xa6   : > { %v1319_v5 = vsel %vm855_vm6, %v1272_v46, %v1318_v40  ;;  %v1325_v61 = vsel %vm853_vm5, %v4613_v8, %v1324_v47  ;;  %v4676_v10 = vcombine.high %v4657_v34, %v4657_v34  ;;  %v4679_v16 = vrot.slane %v321_v60, %v5690_v51 }
  0xa7   : > { %v1326_v0 = vsel %vm855_vm6, %v1276_v24, %v1325_v61  ;;  %v4683_v55 = vrot.slane %v1647_v30, %v5690_v51  ;;  %v1664_v4 = vcombine.high %v322_v63, %v322_v63  ;;  %v4686_v44 = vrot.slane %v322_v63, %v5690_v51 }
  0xa8   : > { %v3257_v46 = vpack.i.bf16 %v1326_v0, %v1319_v5  ;;  %v4690_v28 = vcombine.high %v4679_v16, %v4679_v16  ;;  %v2164_v19 = vrot.slane %v4629_v50, %v5691_v20  ;;  %v2168_v60 = vrot.slane %v4649_v31, %v5691_v20 }
  0xa9   : > { %v4698_v24 = vcombine.high %v4683_v55, %v4683_v55  ;;  %v4701_v26 = vrot.slane %v1664_v4, %v5690_v51  ;;  %v4705_v63 = vcombine.high %v4686_v44, %v4686_v44  ;;  %v2172_v40 = vrot.slane %v4645_v29, %v5691_v20 }
  0xaa   : > { %3258 = vrot.lane.b32.xlu1 %v3257_v46, %s3403_s9  ;;  %v2176_v47 = vrot.slane %v4669_v32, %v5691_v20  ;;  %v2180_v30 = vrot.slane %v4638_v37, %v5691_v20  ;;  %v2184_v5 = vrot.slane %v4661_v62, %v5691_v20  ;;  %v2188_v61 = vrot.slane %v4657_v34, %v5691_v20 }
  0xab   : > { %v4720_v0 = vcombine.high %v4701_v26, %v4701_v26  ;;  %v2192_v4 = vrot.slane %v4676_v10, %v5691_v20  ;;  %v2196_v46 = vrot.slane %v4679_v16, %v5691_v20  ;;  %v2200_v15 = vrot.slane %v4690_v28, %v5691_v20 }
  0xac   : > { %v2204_v6 = vrot.slane %v4683_v55, %v5691_v20  ;;  %v2208_v42 = vrot.slane %v4698_v24, %v5691_v20  ;;  %v2212_v2 = vrot.slane %v4686_v44, %v5691_v20  ;;  %v2216_v14 = vrot.slane %v4705_v63, %v5691_v20 }
  0xad   : > { %v2220_v52 = vrot.slane %v4701_v26, %v5691_v20  ;;  %v2224_v54 = vrot.slane %v4720_v0, %v5691_v20  ;;  %v2267_v23 = vsel %vm1172_vm1, %v2168_v60, %v2164_v19  ;;  %v2274_v7 = vsel %vm1172_vm1, %v2200_v15, %v2196_v46  ;;  %v5732_v15 = vld [vmem:[#allocation6_spill] sm:$0xff] }
  0xae   : > { %v2268_v8 = vsel %vm845_vm0, %v2172_v40, %v2267_v23  ;;  %v2275_v56 = vsel %vm845_vm0, %v2204_v6, %v2274_v7  ;;  %v4746_v58 = vrot.slane %v4204_v49, %v3504_v9  ;;  %v4750_v41 = vrot.slane %v4219_v12, %v3504_v9  ;;  %v5731_v6 = vld [vmem:[#allocation8_spill] sm:$0xff]  ;;  %v5735_v40 = vld [vmem:[#allocation54_spill] sm:$0xff] }
  0xaf   : > { %v2269_v11 = vsel %vm847_vm2, %v2176_v47, %v2268_v8  ;;  %v2276_v45 = vsel %vm847_vm2, %v2208_v42, %v2275_v56  ;;  %v4756_v19 = vrot.slane %v4215_v53, %v3504_v9  ;;  %v4760_v23 = vrot.slane %v4235_v43, %v3504_v9  ;;  %v5733_v56 = vld [vmem:[#allocation5_spill] sm:$0xff] }
  0xb0   : > { %v2270_v7 = vsel %vm849_vm3, %v2180_v30, %v2269_v11  ;;  %v2277_v49 = vsel %vm849_vm3, %v2212_v2, %v2276_v45  ;;  %v4766_v12 = vrot.slane %v5731_v6, %v3504_v9  ;;  %v4770_v8 = vrot.slane %v5732_v15, %v3504_v9  ;;  %v5734_v11 = vld [vmem:[#allocation51_spill] sm:$0xff]  ;;  %v5736_v30 = vld [vmem:[#allocation52_spill] sm:$0xff]  ;;  %v5739_v15 = vld [vmem:[#allocation57_spill] sm:$0xff] }
  0xb1   : > { %v2271_v42 = vsel %vm851_vm4, %v2184_v5, %v2270_v7  ;;  %v2278_v53 = vsel %vm851_vm4, %v2216_v14, %v2277_v49  ;;  %v4776_v43 = vrot.slane %v5733_v56, %v3504_v9  ;;  %v4780_v60 = vrot.slane %v5734_v11, %v3504_v9  ;;  %v5737_v7 = vld [vmem:[#allocation55_spill] sm:$0xff]  ;;  %v4815_v11 = vld [vmem:[%s5515_s2 + $0x40] sm:$0xff]  }
  0xb2   : > { %v2272_v2 = vsel %vm853_vm5, %v2188_v61, %v2271_v42  ;;  %v2279_v45 = vsel %vm853_vm5, %v2220_v52, %v2278_v53  ;;  %v4786_v47 = vrot.slane %v5735_v40, %v3504_v9  ;;  %v4790_v5 = vrot.slane %v5736_v30, %v3504_v9  ;;  %v5738_v61 = vld [vmem:[#allocation53_spill] sm:$0xff]  ;;  %v5740_v53 = vld [vmem:[#allocation56_spill] sm:$0xff]  ;;  %3122 = vmatprep.subr.bf16.mxu0 %v4815_v11 }
  0xb3   : > { %v2273_v14 = vsel %vm855_vm6, %v2192_v4, %v2272_v2  ;;  %v2280_v46 = vsel %vm855_vm6, %v2224_v54, %v2279_v45  ;;  %v4796_v49 = vrot.slane %v5737_v7, %v3504_v9  ;;  %v4800_v6 = vrot.slane %v5738_v61, %v3504_v9  ;;  %v5741_v4 = vld [vmem:[#allocation50_spill] sm:$0xff]  ;;  %3136 = vmatprep.subr.bf16.mxu1 %v4815_v11 }
  0xb4   : > { %v3262_v52 = vpack.i.bf16 %v2280_v46, %v2273_v14  ;;  %v4804_v42 = vrot.slane %v5739_v15, %v3504_v9  ;;  %v4808_v56 = vrot.slane %v5740_v53, %v3504_v9  ;;  %v2324_v54 = vrot.slane %v5741_v4, %v3504_v9  ;;  %v5742_v2 = vld [vmem:[#allocation58_spill] sm:$0xff] }
  0xb5   : > { %v2328_v45 = vrot.slane %v5742_v2, %v3504_v9  ;;  %v2365_v40 = vsel %vm1172_vm1, %v4750_v41, %v4746_v58  ;;  %v2372_v30 = vsel %vm1172_vm1, %v4786_v47, %v4780_v60  ;;  %v4827_v14 = vrot.slane %v4436_v22, %v3504_v9 }
  0xb6   : > { %3263 = vrot.lane.b32.xlu0 %v3262_v52, %s3402_s8  ;;  %v2366_v46 = vsel %vm845_vm0, %v4756_v19, %v2365_v40  ;;  %v2373_v7 = vsel %vm845_vm0, %v4790_v5, %v2372_v30  ;;  %v4836_v61 = vrot.slane %v4456_v57, %v3504_v9  ;;  %v4840_v15 = vrot.slane %v4444_v33, %v3504_v9 }
  0xb7   : > { %v2367_v22 = vsel %vm847_vm2, %v4760_v23, %v2366_v46  ;;  %v2374_v52 = vsel %vm847_vm2, %v4796_v49, %v2373_v7  ;;  %v4848_v53 = vrot.slane %v4467_v48, %v3504_v9  ;;  %v4852_v4 = vrot.slane %v4447_v59, %v3504_v9 }
  0xb8   : > { %v2368_v33 = vsel %vm849_vm3, %v4766_v12, %v2367_v22  ;;  %v2375_v57 = vsel %vm849_vm3, %v4800_v6, %v2374_v52  ;;  %v4861_v2 = vrot.slane %v4471_v17, %v3504_v9  ;;  %v4865_v48 = vrot.slane %v4459_v39, %v3504_v9 }
  0xb9   : > { %v2369_v59 = vsel %vm851_vm4, %v4770_v8, %v2368_v33  ;;  %v2376_v40 = vsel %vm851_vm4, %v4804_v42, %v2375_v57  ;;  %v4874_v30 = vrot.slane %v4484_v3, %v3504_v9  ;;  %v4878_v17 = vrot.slane %v4496_v38, %v3504_v9 }
  0xba   : > { %v2370_v39 = vsel %vm853_vm5, %v4776_v43, %v2369_v59  ;;  %v2377_v46 = vsel %vm853_vm5, %v4808_v56, %v2376_v40  ;;  %v4886_v7 = vrot.slane %v4487_v1, %v3504_v9  ;;  %v4890_v22 = vrot.slane %v4508_v36, %v3504_v9 }
  0xbb   : > { %5743 = vst [vmem:[#allocation8_spill] sm:$0xff] %v4874_v30  ;;  %5744 = vst [vmem:[#allocation6_spill] sm:$0xff] %v4878_v17  ;;  %v2371_v3 = vsel %vm855_vm6, %v2324_v54, %v2370_v39  ;;  %v2378_v52 = vsel %vm855_vm6, %v2328_v45, %v2377_v46  ;;  %v4896_v38 = vrot.slane %v4490_v13, %v3504_v9 }
  0xbc   : > { %5745 = vst [vmem:[#allocation5_spill] sm:$0xff] %v4886_v7  ;;  %5746 = vst [vmem:[#allocation51_spill] sm:$0xff] %v4890_v22  ;;  %v4900_v33 = vrot.slane %v4512_v27, %v3504_v9  ;;  %v3267_v57 = vpack.i.bf16 %v2378_v52, %v2371_v3  ;;  %v4904_v1 = vrot.slane %v4499_v35, %v3504_v9 }
  0xbd   : > { %5747 = vst [vmem:[#allocation54_spill] sm:$0xff] %v4896_v38  ;;  %v1280_v36 = vrot.slane %v4479_v25, %v3504_v9  ;;  %v1284_v54 = vrot.slane %v4520_v21, %v3504_v9  ;;  %v1327_v13 = vsel %vm1172_vm1, %v4836_v61, %v4827_v14  ;;  %v1334_v27 = vsel %vm1172_vm1, %v4878_v17, %v4874_v30  ;;  %v5772_v17 = vld [vmem:[#allocation17_spill] sm:$0xff] }
  0xbe   : > { %5748 = vst [vmem:[#allocation52_spill] sm:$0xff] %v4900_v33  ;;  %5749 = vst [vmem:[#allocation55_spill] sm:$0xff] %v4904_v1  ;;  %v4918_v45 = vrot.slane %v4629_v50, %v3504_v9  ;;  %v4922_v35 = vrot.slane %v4649_v31, %v3504_v9  ;;  %3268 = vrot.lane.b32.xlu1 %v3267_v57, %s3403_s9  ;;  %v1328_v25 = vsel %vm845_vm0, %v4840_v15, %v1327_v13 }
  0xbf   : > { %v1335_v21 = vsel %vm845_vm0, %v4886_v7, %v1334_v27  ;;  %v4931_v59 = vrot.slane %v4645_v29, %v3504_v9  ;;  %v4935_v50 = vrot.slane %v4669_v32, %v3504_v9  ;;  %v1329_v31 = vsel %vm847_vm2, %v4848_v53, %v1328_v25 }
  0xc0   : > { %v1336_v40 = vsel %vm847_vm2, %v4890_v22, %v1335_v21  ;;  %v4943_v39 = vrot.slane %v4638_v37, %v3504_v9  ;;  %v4947_v46 = vrot.slane %v4661_v62, %v3504_v9  ;;  %v1330_v29 = vsel %vm849_vm3, %v4852_v4, %v1329_v31 }
  0xc1   : > { %v1337_v32 = vsel %vm849_vm3, %v4896_v38, %v1336_v40  ;;  %v4955_v3 = vrot.slane %v4657_v34, %v3504_v9  ;;  %v4959_v52 = vrot.slane %v4679_v16, %v3504_v9  ;;  %v1331_v37 = vsel %vm851_vm4, %v4861_v2, %v1330_v29  ;;  %v324_v29 = vld [vmem:[%s3497_s7 + $0xf8] sm:$0xff] }
  0xc2   : > { %v1338_v62 = vsel %vm851_vm4, %v4900_v33, %v1337_v32  ;;  %v4967_v57 = vrot.slane %v4690_v28, %v3504_v9  ;;  %v4971_v13 = vrot.slane %v4683_v55, %v3504_v9  ;;  %v1332_v34 = vsel %vm853_vm5, %v4865_v48, %v1331_v37  ;;  %v323_v28 = vld [vmem:[%s3497_s7 + $0xf0] sm:$0xff]  ;;  %s3327_s7 = sshll.u32 %s3404_s13, 4  ;;  %s3328_s7 = int_to_ptr.vmem [resolvable:$false] %s3327_s7 }
  0xc3   : > { %v1339_v16 = vsel %vm853_vm5, %v4904_v1, %v1338_v62  ;;  %v4979_v27 = vrot.slane %v4698_v24, %v3504_v9  ;;  %v4983_v25 = vrot.slane %v4686_v44, %v3504_v9  ;;  %v1333_v21 = vsel %vm855_vm6, %v1280_v36, %v1332_v34  ;;  %p3330_p1 = scmp.lt.s32.totalorder %s5461_s29, %s3328_s7 }
  0xc4   : > { %v1340_v55 = vsel %vm855_vm6, %v1284_v54, %v1339_v16  ;;  %v4990_v31 = vrot.slane %v4705_v63, %v3504_v9  ;;  %v4994_v40 = vrot.slane %v4701_v26, %v3504_v9  ;;  %v2332_v32 = vrot.slane %v4676_v10, %v3504_v9 }
  0xc5   : > { %v3272_v24 = vpack.i.bf16 %v1340_v55, %v1333_v21  ;;  %v2336_v44 = vrot.slane %v4720_v0, %v3504_v9  ;;  %v2379_v36 = vsel %vm1172_vm1, %v4922_v35, %v4918_v45  ;;  %v2386_v26 = vsel %vm1172_vm1, %v4967_v57, %v4959_v52 }
  0xc6   : > { %5750 = vst [vmem:[#allocation53_spill] sm:$0xff] %v4990_v31  ;;  %5751 = vst [vmem:[#allocation57_spill] sm:$0xff] %v4994_v40  ;;  %v2380_v63 = vsel %vm845_vm0, %v4931_v59, %v2379_v36  ;;  %v2637_v54 = vcombine.high %v323_v28, %v323_v28  ;;  %v2644_v37 = vrot.slane %v323_v28, %v5690_v51 }
  0xc7   : > { %3273 = vrot.lane.b32.xlu0 %v3272_v24, %s3403_s9  ;;  %v2381_v10 = vsel %vm847_vm2, %v4935_v50, %v2380_v63  ;;  %v2387_v0 = vsel %vm845_vm0, %v4971_v13, %v2386_v26  ;;  %v2654_v62 = vcombine.high %v324_v29, %v324_v29  ;;  %v2661_v34 = vrot.slane %v324_v29, %v5690_v51 }
  0xc8   : > { %v2382_v16 = vsel %vm849_vm3, %v4943_v39, %v2381_v10  ;;  %v2388_v21 = vsel %vm847_vm2, %v4979_v27, %v2387_v0  ;;  %v2651_v55 = vrot.slane %v2637_v54, %v5690_v51  ;;  %v2652_v28 = vcombine.high %v2644_v37, %v2644_v37 }
  0xc9   : > { %v2383_v24 = vsel %vm851_vm4, %v4947_v46, %v2382_v16  ;;  %v2389_v36 = vsel %vm849_vm3, %v4983_v25, %v2388_v21  ;;  %v2668_v63 = vrot.slane %v2654_v62, %v5690_v51  ;;  %v2669_v26 = vcombine.high %v2661_v34, %v2661_v34 }
  0xca   : > { %v2384_v29 = vsel %vm853_vm5, %v4955_v3, %v2383_v24  ;;  %v2390_v10 = vsel %vm851_vm4, %v4990_v31, %v2389_v36  ;;  %v2653_v1 = vcombine.high %v2651_v55, %v2651_v55  ;;  %v2710_v0 = vrot.slane %v2644_v37, %v5691_v20  ;;  %v5780_v31 = vld [vmem:[#allocation27_spill] sm:$0xff] }
  0xcb   : > { %v2385_v54 = vsel %vm855_vm6, %v2332_v32, %v2384_v29  ;;  %v2391_v16 = vsel %vm853_vm5, %v4994_v40, %v2390_v10  ;;  %v2714_v33 = vrot.slane %v2652_v28, %v5691_v20  ;;  %v2670_v51 = vcombine.high %v2668_v63, %v2668_v63  ;;  %v5771_v40 = vld [vmem:[#allocation16_spill] sm:$0xff] }
  0xcc   : > { %v2392_v21 = vsel %vm855_vm6, %v2336_v44, %v2391_v16  ;;  %v2718_v62 = vrot.slane %v2651_v55, %v5691_v20  ;;  %v2722_v24 = vrot.slane %v2653_v1, %v5691_v20  ;;  %v2726_v36 = vrot.slane %v2661_v34, %v5691_v20 }
  0xcd   : > { %v3277_v38 = vpack.i.bf16 %v2392_v21, %v2385_v54  ;;  %v2730_v22 = vrot.slane %v2669_v26, %v5691_v20  ;;  %v2739_v7 = vsel %vm1172_vm1, %v2714_v33, %v2710_v0  ;;  %v5042_v32 = vrot.slane %v2644_v37, %v3504_v9  ;;  %v5059_v37 = vpop.permute.xlu1 %3208 }
  0xce   : > { %v5045_v29 = vrot.slane %v2652_v28, %v3504_v9  ;;  %v5048_v44 = vrot.slane %v2651_v55, %v3504_v9  ;;  %v2734_v10 = vrot.slane %v2668_v63, %v5691_v20  ;;  %v2740_v54 = vsel %vm845_vm0, %v2718_v62, %v2739_v7  ;;  %5754 = vst [vmem:[#allocation58_spill] sm:$0xff] %v5059_v37 }
  0xcf   : > { %3278 = vrot.lane.b32.xlu1 %v3277_v38, %s3403_s9  ;;  %v5054_v16 = vrot.slane %v2653_v1, %v3504_v9  ;;  %v5057_v33 = vrot.slane %v2661_v34, %v3504_v9  ;;  %v2738_v28 = vrot.slane %v2670_v51, %v5691_v20  ;;  %v2741_v0 = vsel %vm847_vm2, %v2722_v24, %v2740_v54  ;;  %v3204_v54 = vpop.permute.xlu0 %3203 }
  0xd0   : > { %v5064_v55 = vrot.slane %v2669_v26, %v3504_v9  ;;  %v2753_v38 = vsel %vm1172_vm1, %v5045_v29, %v5042_v32  ;;  %v2742_v7 = vsel %vm849_vm3, %v2726_v36, %v2741_v0  ;;  %v5071_v1 = vrot.slane %v2668_v63, %v3504_v9  ;;  %v5758_v0 = vld [vmem:[#allocation45_spill] sm:$0xff] }
  0xd1   : > { %5752 = vst [vmem:[#allocation56_spill] sm:$0xff] %v5054_v16  ;;  %5753 = vst [vmem:[#allocation50_spill] sm:$0xff] %v5057_v33  ;;  %v2754_v34 = vsel %vm845_vm0, %v5048_v44, %v2753_v38  ;;  %v2743_v21 = vsel %vm851_vm4, %v2730_v22, %v2742_v7  ;;  %v2752_v20 = vrot.slane %v2670_v51, %v3504_v9  ;;  %v3219_v9 = vpop.permute.xlu1 %3218  ;;  %v5759_v7 = vld [vmem:[#allocation46_spill] sm:$0xff] }
  0xd2   : > { %5755 = vst [vmem:[#allocation86_spill] sm:$0xff] %v5064_v55  ;;  %5756 = vst [vmem:[#allocation87_spill] sm:$0xff] %v5071_v1  ;;  %v2755_v26 = vsel %vm847_vm2, %v5054_v16, %v2754_v34  ;;  %v2744_v62 = vsel %vm853_vm5, %v2734_v10, %v2743_v21  ;;  %v5757_v10 = vld [vmem:[#allocation44_spill] sm:$0xff]  ;;  %v5760_v34 = vld [vmem:[#allocation9_spill] sm:$0xff]  ;;  %v3220_v30 = vunpack.i.l.bf16 %v3219_v9 }
  0xd3   : > { %v2756_v24 = vsel %vm849_vm3, %v5057_v33, %v2755_v26  ;;  %v2745_v36 = vsel %vm855_vm6, %v2738_v28, %v2744_v62  ;;  %v1917_v38 = vsel %vm845_vm0, %v5758_v0, %v5757_v10  ;;  %v5761_v21 = vld [vmem:[#allocation12_spill] sm:$0xff]  ;;  %v5762_v62 = vld [vmem:[#allocation47_spill] sm:$0xff]  ;;  %v3214_v10 = vpop.permute.xlu0 %3213  ;;  %v5766_v0 = vld [vmem:[#allocation49_spill] sm:$0xff] }
  0xd4   : > { %v2757_v63 = vsel %vm851_vm4, %v5064_v55, %v2756_v24  ;;  %2746 = vrot.lane.b32.xlu0 %v2745_v36, %s3402_s8  ;;  %v1918_v28 = vsel %vm847_vm2, %v5759_v7, %v1917_v38  ;;  %v1923_v26 = vsel %vm845_vm0, %v5761_v21, %v5760_v34  ;;  %v5763_v36 = vld [vmem:[#allocation10_spill] sm:$0xff]  ;;  %v5767_v7 = vld [vmem:[#allocation11_spill] sm:$0xff]  ;;  %v3205_v55 = vunpack.i.l.bf16 %v3204_v54  ;;  %s3329_s8 = scalar_lea.vmem %s3328_s7, 2048 }
  0xd5   : > { %v2758_v22 = vsel %vm853_vm5, %v5071_v1, %v2757_v63  ;;  %v1919_v24 = vsel %vm849_vm3, %v5762_v62, %v1918_v28  ;;  %v1924_v63 = vsel %vm847_vm2, %v5763_v36, %v1923_v26  ;;  %v3229_v34 = vpop.permute.xlu1 %3228  ;;  %v5768_v28 = vld [vmem:[#allocation7_spill] sm:$0xff]  ;;  %v5770_v36 = vld [vmem:[#allocation14_spill] sm:$0xff]  ;;  %p3331_p2 = scmp.lt.s32.totalorder %s3329_s8, %s3323_s12 }
  0xd6   : > { %v2759_v51 = vsel %vm855_vm6, %v2752_v20, %v2758_v22  ;;  %v5764_v20 = vld [vmem:[#allocation48_spill] sm:$0xff]  ;;  %v5769_v26 = vld [vmem:[#allocation15_spill] sm:$0xff]  ;;  %v3230_v33 = vunpack.i.l.bf16 %v3229_v34 }
  0xd7   : > { %2760 = vrot.lane.b32.xlu1 %v2759_v51, %s3403_s9  ;;  %v1920_v22 = vsel %vm851_vm4, %v5764_v20, %v1919_v24  ;;  %v5765_v51 = vld [vmem:[#allocation13_spill] sm:$0xff]  ;;  %v3206_v24 = vunpack.i.h.bf16 %v3204_v54  ;;  %v3216_v20 = vunpack.i.h.bf16 %v3214_v10  ;;  %p3332_p3 = por %p3331_p2, %p3330_p1 }
  0xd8   : > { %v1925_v37 = vsel %vm849_vm3, %v5765_v51, %v1924_v63  ;;  %v1921_v38 = vsel %vm853_vm5, %v5766_v0, %v1920_v22  ;;  %v3215_v51 = vunpack.i.l.bf16 %v3214_v10  ;;  %v3231_v0 = vunpack.i.h.bf16 %v3229_v34  ;;  %v5776_v10 = vld [vmem:[#allocation25_spill] sm:$0xff] }
  0xd9   : > { %v1926_v1 = vsel %vm851_vm4, %v5767_v7, %v1925_v37  ;;  %v1922_v21 = vsel %vm855_vm6, %v5768_v28, %v1921_v38  ;;  %v3221_v7 = vunpack.i.h.bf16 %v3219_v9  ;;  %v1905_v38 = vsel %vm845_vm0, %v5772_v17, %v5771_v40  ;;  %v5773_v28 = vld [vmem:[#allocation23_spill] sm:$0xff]  ;;  %v5778_v17 = vld [vmem:[#allocation26_spill] sm:$0xff]  ;;  %v5779_v9 = vld [vmem:[#allocation20_spill] sm:$0xff]  ;;  %p3333_p5 = pnand %p3332_p3, %p3326_p0 }
  0xda   : > { %v1927_v62 = vsel %vm853_vm5, %v5769_v26, %v1926_v1  ;;  %v1963_v22 = vsel %vm907_vm7, 0.0, %v1922_v21  ;;  %v5774_v1 = vld [vmem:[#allocation24_spill] sm:$0xff] }
  0xdb   : > { %v1928_v63 = vsel %vm855_vm6, %v5770_v36, %v1927_v62  ;;  %v1911_v26 = vsel %vm845_vm0, %v5774_v1, %v5773_v28  ;;  %v5775_v62 = vld [vmem:[#allocation18_spill] sm:$0xff]  ;;  %v2419_v34 = vsel %vm1365_vm8, %v1963_v22, %v3215_v51  ;;  %v5782_v22 = vld [vmem:[#allocation21_spill] sm:$0xff] }
  0xdc   : > { %v1964_v37 = vsel %vm907_vm7, 0.0, %v1928_v63  ;;  %v1906_v54 = vsel %vm847_vm2, %v5775_v62, %v1905_v38  ;;  %v1912_v21 = vsel %vm847_vm2, %v5776_v10, %v1911_v26  ;;  %v5777_v63 = vld [vmem:[#allocation19_spill] sm:$0xff]  ;;  %v5781_v26 = vld [vmem:[#allocation80_spill] sm:$0xff]  ;;  %v2427_v51 = vsel %vm1374_vm9, %v2419_v34, %v3230_v33  ;;  %v5784_v10 = vld [vmem:[#allocation81_spill] sm:$0xff] }
  0xdd   : > { %v2420_v36 = vsel %vm1365_vm8, %v1964_v37, %v3216_v20  ;;  %v1907_v16 = vsel %vm849_vm3, %v5777_v63, %v1906_v54  ;;  %v1913_v40 = vsel %vm849_vm3, %v5778_v17, %v1912_v21  ;;  %v881_v20 = vsel %vm845_vm0, %v5781_v26, %v4582_v18  ;;  %v5783_v62 = vld [vmem:[#allocation28_spill] sm:$0xff]  ;;  %v5785_v21 = vld [vmem:[#allocation22_spill] sm:$0xff]  ;;  %v5788_v17 = vld [vmem:[#allocation83_spill] sm:$0xff] }
  0xde   : > { %v2428_v28 = vsel %vm1374_vm9, %v2420_v36, %v3231_v0  ;;  %v1908_v1 = vsel %vm851_vm4, %v5779_v9, %v1907_v16  ;;  %v1914_v38 = vsel %vm851_vm4, %v5780_v31, %v1913_v40  ;;  %v882_v0 = vsel %vm847_vm2, %v5784_v10, %v881_v20  ;;  %v5786_v36 = vld [vmem:[#allocation29_spill] sm:$0xff]  ;;  %v5787_v63 = vld [vmem:[#allocation82_spill] sm:$0xff]  ;;  %v5789_v26 = vld [vmem:[#allocation84_spill] sm:$0xff] }
  0xdf   : > { %v1909_v37 = vsel %vm853_vm5, %v5782_v22, %v1908_v1  ;;  %v1915_v54 = vsel %vm853_vm5, %v5783_v62, %v1914_v38  ;;  %v883_v18 = vsel %vm849_vm3, %v5787_v63, %v882_v0  ;;  %v2434_v9 = vpack.c.bf16 %v2428_v28, %v2427_v51  ;;  %v5790_v62 = vld [vmem:[#allocation85_spill] sm:$0xff]  ;;  %v5796_v63 = vld [vmem:[#allocation60_spill] sm:$0xff] }
  0xe0   : > { %v1910_v16 = vsel %vm855_vm6, %v5785_v21, %v1909_v37  ;;  %v1916_v31 = vsel %vm855_vm6, %v5786_v36, %v1915_v54  ;;  %v884_v40 = vsel %vm851_vm4, %v5788_v17, %v883_v18  ;;  %v1929_v28 = vsel %vm845_vm0, %v4750_v41, %v4746_v58  ;;  %v5793_v21 = vld [vmem:[#allocation37_spill] sm:$0xff] }
  0xe1   : > { %v1961_v33 = vsel %vm907_vm7, 0.0, %v1910_v16  ;;  %v1962_v34 = vsel %vm907_vm7, 0.0, %v1916_v31  ;;  %v885_v20 = vsel %vm853_vm5, %v5789_v26, %v884_v40  ;;  %v1941_v51 = vsel %vm845_vm0, %v4922_v35, %v4918_v45  ;;  %v5794_v16 = vld [vmem:[#allocation38_spill] sm:$0xff]  ;;  %v5795_v31 = vld [vmem:[#allocation59_spill] sm:$0xff] }
  0xe2   : > { %v2417_v1 = vsel %vm1365_vm8, %v1961_v33, %v3205_v55  ;;  %v2418_v38 = vsel %vm1365_vm8, %v1962_v34, %v3206_v24  ;;  %v5167_v54 = vsel %vm855_vm6, %v5790_v62, %v885_v20  ;;  %v1935_v55 = vsel %vm845_vm0, %v4786_v47, %v4780_v60  ;;  %v5181_v24 = vld [vmem:[%s5515_s2 + $0x38] sm:$0xff]   ;;  %v5797_v33 = vld [vmem:[#allocation66_spill] sm:$0xff]  ;;  %v5798_v34 = vld [vmem:[#allocation67_spill] sm:$0xff] }
  0xe3   : > { %v2425_v22 = vsel %vm1374_vm9, %v2417_v1, %v3220_v30  ;;  %v2426_v37 = vsel %vm1374_vm9, %v2418_v38, %v3221_v7  ;;  %v887_v30 = vsel %vm845_vm0, %v4836_v61, %v4827_v14  ;;  %v1930_v7 = vsel %vm847_vm2, %v4756_v19, %v1929_v28  ;;  %v5802_v20 = vld [vmem:[#allocation68_spill] sm:$0xff]  ;;  %v5803_v62 = vld [vmem:[#allocation53_spill] sm:$0xff] }
  0xe4   : > { %v2433_v10 = vpack.c.bf16 %v2426_v37, %v2425_v22  ;;  %v1936_v41 = vsel %vm847_vm2, %v4790_v5, %v1935_v55  ;;  %v888_v58 = vsel %vm847_vm2, %v4840_v15, %v887_v30  ;;  %v1931_v60 = vsel %vm849_vm3, %v4760_v23, %v1930_v7  ;;  %v5805_v28 = vld [vmem:[#allocation8_spill] sm:$0xff]  ;;  %v5806_v55 = vld [vmem:[#allocation6_spill] sm:$0xff] }
  0xe5   : > { %v1937_v47 = vsel %vm849_vm3, %v4796_v49, %v1936_v41  ;;  %v889_v14 = vsel %vm849_vm3, %v4848_v53, %v888_v58  ;;  %v1932_v19 = vsel %vm851_vm4, %v4766_v12, %v1931_v60  ;;  %v5214_v12 = vld [vmem:[%s5515_s2 + $0x30] sm:$0xff]   ;;  %v869_v36 = vsel %vm845_vm0, %v5794_v16, %v5793_v21  ;;  %v5807_v7 = vld [vmem:[#allocation62_spill] sm:$0xff]  ;;  %v5808_v58 = vld [vmem:[#allocation57_spill] sm:$0xff] }
  0xe6   : > { %3100 = vmatprep.mubr.msk.bf16.mxu0 %vm2462_vm10, %v2433_v10  ;;  %v1938_v5 = vsel %vm851_vm4, %v4800_v6, %v1937_v47  ;;  %v890_v61 = vsel %vm851_vm4, %v4852_v4, %v889_v14  ;;  %v1933_v23 = vsel %vm853_vm5, %v4770_v8, %v1932_v19  ;;  %v846_v18 = vsel %vm845_vm0, %v5796_v63, %v5795_v31  ;;  %v5804_v10 = vld [vmem:[#allocation56_spill] sm:$0xff]  ;;  %v5810_v14 = vld [vmem:[#allocation5_spill] sm:$0xff]  ;;  %v5817_v21 = vld [vmem:[#allocation54_spill] sm:$0xff] }
  0xe7   : > { %3101 = vmatmul.mubr.msk.bf16.vlgmr.msra.gmra.mxu0 %vm2462_vm10, %v2434_v9  ;;  %v1939_v49 = vsel %vm853_vm5, %v4804_v42, %v1938_v5  ;;  %v891_v15 = vsel %vm853_vm5, %v4861_v2, %v890_v61  ;;  %v1934_v6 = vsel %vm855_vm6, %v4776_v43, %v1933_v23  ;;  %v5791_v43 = vld [vmem:[#allocation30_spill] sm:$0xff]  ;;  %v1947_v35 = vsel %vm845_vm0, %v4967_v57, %v4959_v52  ;;  %v5265_v52 = vpop.permute.xlu0 %3223  ;;  %v5799_v57 = vld [vmem:[#allocation61_spill] sm:$0xff]  ;;  %v5818_v63 = vld [vmem:[#allocation52_spill] sm:$0xff] }
  0xe8   : > { %3123 = vmatpush3.bf16.msra.mxu0 %v4815_v11  ;;  %v1940_v53 = vsel %vm855_vm6, %v4808_v56, %v1939_v49  ;;  %v892_v8 = vsel %vm855_vm6, %v4865_v48, %v891_v15  ;;  %v5223_v42 = vsel %vm907_vm7, 0.0, %v1934_v6  ;;  %v5792_v56 = vld [vmem:[#allocation31_spill] sm:$0xff]  ;;  %v1942_v48 = vsel %vm847_vm2, %v4931_v59, %v1941_v51  ;;  %v5811_v5 = vld [vmem:[#allocation69_spill] sm:$0xff]  ;;  %v5812_v49 = vld [vmem:[#allocation86_spill] sm:$0xff] }
  0xe9   : > { %3124 = vmatprep.subr.bf16.mxu0 %v5181_v24  ;;  %v5226_v4 = vsel %vm907_vm7, 0.0, %v1940_v53  ;;  %v5229_v2 = vsel %vm907_vm7, 0.0, %v892_v8  ;;  %v863_v0 = vsel %vm845_vm0, %v5792_v56, %v5791_v43  ;;  %v1943_v45 = vsel %vm849_vm3, %v4935_v50, %v1942_v48  ;;  %v5813_v6 = vld [vmem:[#allocation51_spill] sm:$0xff]  ;;  %v5814_v8 = vld [vmem:[#allocation40_spill] sm:$0xff]  ;;  %v5815_v43 = vld [vmem:[#allocation33_spill] sm:$0xff] }
  0xea   : > { %v857_v59 = vsel %vm845_vm0, %v5798_v34, %v5797_v33  ;;  %v1944_v17 = vsel %vm851_vm4, %v4943_v39, %v1943_v45  ;;  %v1948_v40 = vsel %vm847_vm2, %v4971_v13, %v1947_v35  ;;  %v2699_v9 = vsel %vm845_vm0, %v5045_v29, %v5042_v32  ;;  %v5800_v32 = vld [vmem:[#allocation32_spill] sm:$0xff]  ;;  %v5819_v45 = vld [vmem:[#allocation63_spill] sm:$0xff]  ;;  %v5820_v33 = vld [vmem:[#allocation70_spill] sm:$0xff] }
  0xeb   : > { %v1945_v50 = vsel %vm853_vm5, %v4947_v46, %v1944_v17  ;;  %v848_v1 = vsel %vm847_vm2, %v5799_v57, %v846_v18  ;;  %v1949_v13 = vsel %vm849_vm3, %v4979_v27, %v1948_v40  ;;  %v2700_v38 = vsel %vm847_vm2, %v5048_v44, %v2699_v9  ;;  %v5801_v46 = vld [vmem:[#allocation39_spill] sm:$0xff]  ;;  %v5822_v40 = vld [vmem:[#allocation41_spill] sm:$0xff] }
  0xec   : > { %3125 = vmatpush3.bf16.msra.mxu0 %v5181_v24  ;;  %v1946_v39 = vsel %vm855_vm6, %v4955_v3, %v1945_v50  ;;  %v864_v29 = vsel %vm847_vm2, %v5800_v32, %v863_v0  ;;  %v870_v26 = vsel %vm847_vm2, %v5801_v46, %v869_v36  ;;  %v858_v22 = vsel %vm847_vm2, %v5802_v20, %v857_v59  ;;  %v5816_v0 = vld [vmem:[#allocation87_spill] sm:$0xff]  ;;  %v5318_v36 = vpop.permute.xlu0 %3233  ;;  %v5823_v50 = vld [vmem:[#allocation34_spill] sm:$0xff] }
  0xed   : > { %3126 = vmatprep.subr.bf16.mxu0 %v5214_v12  ;;  %v1950_v37 = vsel %vm851_vm4, %v4983_v25, %v1949_v13  ;;  %v5286_v27 = vsel %vm907_vm7, 0.0, %v1946_v39  ;;  %v2701_v44 = vsel %vm849_vm3, %v5804_v10, %v2700_v38  ;;  %v893_v30 = vsel %vm845_vm0, %v5806_v55, %v5805_v28  ;;  %v5809_v25 = vld [vmem:[#allocation50_spill] sm:$0xff]  ;;  %v5821_v59 = vld [vmem:[#allocation55_spill] sm:$0xff]  ;;  %v5824_v39 = vld [vmem:[#allocation64_spill] sm:$0xff] }
  0xee   : > { %v1951_v3 = vsel %vm853_vm5, %v5803_v62, %v1950_v37  ;;  %v850_v41 = vsel %vm849_vm3, %v5807_v7, %v848_v1  ;;  %v2702_v47 = vsel %vm851_vm4, %v5809_v25, %v2701_v44  ;;  %v894_v19 = vsel %vm847_vm2, %v5810_v14, %v893_v30  ;;  %v5825_v38 = vld [vmem:[#allocation71_spill] sm:$0xff]  ;;  %v5828_v62 = vld [vmem:[#allocation65_spill] sm:$0xff]  ;;  %v5829_v10 = vld [vmem:[#allocation72_spill] sm:$0xff] }
  0xef   : > { %v1952_v60 = vsel %vm855_vm6, %v5808_v58, %v1951_v3  ;;  %v859_v61 = vsel %vm849_vm3, %v5811_v5, %v858_v22  ;;  %v2703_v15 = vsel %vm853_vm5, %v5812_v49, %v2702_v47  ;;  %v895_v53 = vsel %vm849_vm3, %v5813_v6, %v894_v19  ;;  %v5830_v28 = vld [vmem:[#allocation43_spill] sm:$0xff]  ;;  %v5831_v30 = vld [vmem:[#allocation36_spill] sm:$0xff] }
  0xf0   : > { %3127 = vmatpush3.bf16.msra.mxu0 %v5214_v12  ;;  %v5304_v23 = vsel %vm907_vm7, 0.0, %v1952_v60  ;;  %v871_v51 = vsel %vm849_vm3, %v5814_v8, %v870_v26  ;;  %v865_v56 = vsel %vm849_vm3, %v5815_v43, %v864_v29  ;;  %v2704_v48 = vsel %vm855_vm6, %v5816_v0, %v2703_v15  ;;  %v5826_v29 = vld [vmem:[#allocation42_spill] sm:$0xff]  ;;  %v5827_v26 = vld [vmem:[#allocation35_spill] sm:$0xff]  ;;  %v5346_v37 = vpop.permute.xlu1 %3238 }
  0xf1   : > { %v896_v16 = vsel %vm851_vm4, %v5817_v21, %v895_v53  ;;  %v5321_v31 = vsel %vm907_vm7, 0.0, %v2704_v48  ;;  %v852_v35 = vsel %vm851_vm4, %v5819_v45, %v850_v41  ;;  %v860_v34 = vsel %vm851_vm4, %v5820_v33, %v859_v61  ;;  %v5832_v60 = vld [vmem:[#allocation58_spill] sm:$0xff]  ;;  %v5833_v21 = vld [vmem:[#allocation73_spill] sm:$0xff]  ;;  %v5835_v33 = vld [vmem:[#allocation75_spill] sm:$0xff] }
  0xf2   : > { %v897_v18 = vsel %vm853_vm5, %v5818_v63, %v896_v16  ;;  %v872_v9 = vsel %vm851_vm4, %v5822_v40, %v871_v51  ;;  %v866_v57 = vsel %vm851_vm4, %v5823_v50, %v865_v56  ;;  %v854_v13 = vsel %vm853_vm5, %v5824_v39, %v852_v35  ;;  %v5834_v16 = vld [vmem:[#allocation74_spill] sm:$0xff] }
  0xf3   : > { %v898_v17 = vsel %vm855_vm6, %v5821_v59, %v897_v18  ;;  %v861_v32 = vsel %vm853_vm5, %v5825_v38, %v860_v34  ;;  %v873_v46 = vsel %vm853_vm5, %v5826_v29, %v872_v9  ;;  %v867_v20 = vsel %vm853_vm5, %v5827_v26, %v866_v57  ;;  %v5837_v9 = vld [vmem:[#allocation77_spill] sm:$0xff]  ;;  %v5838_v57 = vld [vmem:[#allocation78_spill] sm:$0xff] }
  0xf4   : > { %v5336_v1 = vsel %vm907_vm7, 0.0, %v898_v17  ;;  %v856_v3 = vsel %vm855_vm6, %v5828_v62, %v854_v13  ;;  %v862_v44 = vsel %vm855_vm6, %v5829_v10, %v861_v32  ;;  %v874_v55 = vsel %vm855_vm6, %v5830_v28, %v873_v46  ;;  %v5836_v17 = vld [vmem:[#allocation76_spill] sm:$0xff]  ;;  %v5839_v13 = vld [vmem:[#allocation79_spill] sm:$0xff] }
  0xf5   : > { %v868_v7 = vsel %vm855_vm6, %v5831_v30, %v867_v20  ;;  %v3211_v25 = vunpack.i.h.bf16 %v5832_v60  ;;  %v3210_v47 = vunpack.i.l.bf16 %v5832_v60  ;;  %v908_v14 = vsel %vm907_vm7, 0.0, %v856_v3 }
  0xf6   : > { %v909_v19 = vsel %vm907_vm7, 0.0, %v862_v44  ;;  %v911_v5 = vsel %vm907_vm7, 0.0, %v874_v55  ;;  %v910_v61 = vsel %vm907_vm7, 0.0, %v868_v7  ;;  %v3226_v49 = vunpack.i.h.bf16 %v5265_v52 }
  0xf7   : > { %v3225_v15 = vunpack.i.l.bf16 %v5265_v52  ;;  %v1369_v51 = vsel %vm1365_vm8, %v911_v5, %v3211_v25  ;;  %v1368_v43 = vsel %vm1365_vm8, %v910_v61, %v3210_v47  ;;  %v875_v63 = vsel %vm845_vm0, %v5834_v16, %v5833_v21 }
  0xf8   : > { %v5369_v48 = vsel %vm1374_vm9, %v1369_v51, %v3226_v49  ;;  %v876_v34 = vsel %vm847_vm2, %v5835_v33, %v875_v63  ;;  %v3236_v32 = vunpack.i.h.bf16 %v5318_v36  ;;  %v913_v46 = vsel %vm907_vm7, 0.0, %v5167_v54 }
  0xf9   : > { %v5375_v52 = vsel %vm1374_vm9, %v1368_v43, %v3225_v15  ;;  %v877_v40 = vsel %vm849_vm3, %v5836_v17, %v876_v34  ;;  %v3241_v44 = vunpack.i.h.bf16 %v5346_v37  ;;  %v3240_v28 = vunpack.i.l.bf16 %v5346_v37 }
  0xfa   : > { %v1384_v59 = vpack.c.bf16 %v5369_v48, %v5375_v52  ;;  %v878_v50 = vsel %vm851_vm4, %v5837_v9, %v877_v40 }
  0xfb   : > { %v879_v39 = vsel %vm853_vm5, %v5838_v57, %v878_v50  ;;  %v2422_v7 = vsel %vm1365_vm8, %v5226_v4, %v3241_v44 }
  0xfc   : > { %v3244_v22 = vpop.permute.xlu0 %3243  ;;  %v880_v38 = vsel %vm855_vm6, %v5839_v13, %v879_v39 }
  0xfd   : > { %v3246_v41 = vunpack.i.h.bf16 %v3244_v22  ;;  %v3245_v58 = vunpack.i.l.bf16 %v3244_v22  ;;  %v912_v29 = vsel %vm907_vm7, 0.0, %v880_v38  ;;  %v1371_v22 = vsel %vm1365_vm8, %v913_v46, %v3236_v32 }
  0xff   : > { %v1366_v53 = vsel %vm1365_vm8, %v908_v14, %v3245_v58  ;;  %v1367_v8 = vsel %vm1365_vm8, %v909_v19, %v3246_v41  ;;  %v2421_v41 = vsel %vm1365_vm8, %v5223_v42, %v3240_v28 }
 0x105   : > { %v3254_v6 = vpop.permute.xlu1 %3253 }
 0x106   : > { %v3256_v56 = vunpack.i.h.bf16 %v3254_v6  ;;  %v3255_v0 = vunpack.i.l.bf16 %v3254_v6 }
 0x108   : > { %v1375_v18 = vsel %vm1374_vm9, %v1366_v53, %v3255_v0  ;;  %v5379_v45 = vsel %vm1374_vm9, %v1367_v8, %v3256_v56 }
 0x109   : > { %v1383_v35 = vpack.c.bf16 %v5379_v45, %v1375_v18  ;;  %v2765_v18 = vpack.c.bf16 %v5375_v52, %v5379_v45 }
 0x10b   : > { %3114 = vmatprep.mubr.msk.bf16.mxu1 %vm2462_vm10, %v1383_v35 }
 0x10c   : > { %3115 = vmatmul.mubr.msk.bf16.vlgmr.msra.gmra.mxu1 %vm2462_vm10, %v1384_v59 }
 0x10d   : > { %3139 = vmatpush3.bf16.msra.mxu1 %v4815_v11  ;;  %v3235_v11 = vunpack.i.l.bf16 %v5318_v36 }
 0x10e   : > { %3137 = vmatprep.subr.bf16.mxu1 %v5181_v24 }
 0x10f   : > { %v1370_v62 = vsel %vm1365_vm8, %v912_v29, %v3235_v11 }
 0x111   : > { %3140 = vmatpush3.bf16.msra.mxu1 %v5181_v24 }
 0x112   : > { %3138 = vmatprep.subr.bf16.mxu1 %v5214_v12 }
 0x113   : > { %v3249_v36 = vpop.permute.xlu0 %3248 }
 0x114   : > { %v3251_v14 = vunpack.i.h.bf16 %v3249_v36  ;;  %v3250_v19 = vunpack.i.l.bf16 %v3249_v36 }
 0x115   : > { %3141 = vmatpush3.bf16.msra.mxu1 %v5214_v12 }
 0x116   : > { %v1372_v49 = vsel %vm1365_vm8, %v5229_v2, %v3250_v19  ;;  %v1373_v4 = vsel %vm1365_vm8, %v5336_v1, %v3251_v14 }
 0x11c   : > { %v3259_v24 = vpop.permute.xlu1 %3258 }
 0x11d   : > { %v3261_v26 = vunpack.i.h.bf16 %v3259_v24  ;;  %v3260_v20 = vunpack.i.l.bf16 %v3259_v24 }
 0x11f   : > { %v1380_v12 = vsel %vm1374_vm9, %v1371_v22, %v3261_v26  ;;  %v1379_v3 = vsel %vm1374_vm9, %v1370_v62, %v3260_v20  ;;  %v3064_v26 = vld [vmem:[%s5516_s3] ss:$0 sm:$0xff] }
 0x120   : > { %v1385_v10 = vpack.c.bf16 %v1380_v12, %v1379_v3  ;;  %v2766_v59 = vpack.c.bf16 %v1379_v3, %v5369_v48 }
 0x122   : > { %3118 = vmatprep.mubr.msk.bf16.mxu1 %vm2462_vm10, %v1385_v10 }
 0x128   : > { %v3264_v58 = vpop.permute.xlu0 %3263 }
 0x129   : > { %v3266_v8 = vunpack.i.h.bf16 %v3264_v58  ;;  %v3265_v51 = vunpack.i.l.bf16 %v3264_v58 }
 0x12b   : > { %v2424_v2 = vsel %vm1365_vm8, %v5304_v23, %v3266_v8  ;;  %v2423_v1 = vsel %vm1365_vm8, %v5286_v27, %v3265_v51 }
 0x130   : > { %v3269_v54 = vpop.permute.xlu1 %3268 }
 0x131   : > { %v3271_v55 = vunpack.i.h.bf16 %v3269_v54  ;;  %v3270_v30 = vunpack.i.l.bf16 %v3269_v54 }
 0x133   : > { %v2430_v60 = vsel %vm1374_vm9, %v2422_v7, %v3271_v55  ;;  %v2429_v25 = vsel %vm1374_vm9, %v2421_v41, %v3270_v30 }
 0x134   : > { %v2435_v47 = vpack.c.bf16 %v2430_v60, %v2429_v25 }
 0x136   : > { %3104 = vmatprep.mubr.msk.bf16.mxu0 %vm2462_vm10, %v2435_v47 }
 0x139   : > { %v3274_v37 = vpop.permute.xlu0 %3273 }
 0x13a   : > { %v3276_v5 = vunpack.i.h.bf16 %v3274_v37  ;;  %v3275_v61 = vunpack.i.l.bf16 %v3274_v37 }
 0x13c   : > { %v1381_v42 = vsel %vm1374_vm9, %v1372_v49, %v3275_v61  ;;  %v1382_v15 = vsel %vm1374_vm9, %v1373_v4, %v3276_v5 }
 0x13d   : > { %v1386_v6 = vpack.c.bf16 %v1382_v15, %v1381_v42  ;;  %v2767_v53 = vpack.c.bf16 %v1381_v42, %v1380_v12 }
 0x13f   : > { %3119 = vmatmul.mubr.msk.bf16.gmra.mxu1 %vm2462_vm10, %v1386_v6 }
 0x140   : > { %3132 = vmatprep.mubr.msk.bf16.mxu1 %vm2462_vm10, %v2767_v53 }
 0x141   : > { %v3279_v43 = vpop.permute.xlu1 %3278 }
 0x142   : > { %v3281_v56 = vunpack.i.h.bf16 %v3279_v43  ;;  %v3280_v0 = vunpack.i.l.bf16 %v3279_v43 }
 0x144   : > { %v2432_v21 = vsel %vm1374_vm9, %v2424_v2, %v3281_v56  ;;  %v2431_v16 = vsel %vm1374_vm9, %v2423_v1, %v3280_v0 }
 0x145   : > { %v2436_v63 = vpack.c.bf16 %v2432_v21, %v2431_v16 }
 0x146   : > { %v2747_v35 = vpop.permute.xlu0 %2746 }
 0x147   : > { %3105 = vmatmul.mubr.msk.bf16.gmra.mxu0 %vm2462_vm10, %v2436_v63  ;;  %v2763_v33 = vsel %vm1365_vm8, %v5321_v31, %v2747_v35 }
 0x148   : > { %3128 = vmatprep.mubr.msk.bf16.mxu0 %vm2462_vm10, %v2765_v18 }
 0x149   : > { %v2761_v23 = vpop.permute.xlu1 %2760 }
 0x14a   : > { %v2764_v34 = vsel %vm1374_vm9, %v2763_v33, %v2761_v23 }
 0x14b   : > { %v2768_v27 = vpack.c.bf16 %v2764_v34, %v1382_v15 }
 0x14d   : > { %3133 = vmatmul.mubr.msk.bf16.vlgmr.msra.gmra.mxu1 %vm2462_vm10, %v2768_v27 }
 0x14f   : > { %3129 = vmatmul.mubr.msk.bf16.vlgmr.msra.gmra.mxu0 %vm2462_vm10, %v2766_v59 }
 0x1a7   : > { %v3102_v17 = vpop.f32.mrf.mxu0 }
 0x1a9   : > { %v2509_v9 = vpop.f32.mrf.mxu0 }
 0x1ab   : > { %v3103_v57 = vpop.f32.mrf.mxu0 }
 0x1ad   : > { %v2512_v13 = vpop.f32.mrf.mxu0 }
 0x1cc   : > { %v3116_v52 = vpop.f32.mrf.mxu1 }
 0x1cd   : > { %v2613_v22 = vadd.f32 %v3116_v52, %v3102_v17 }
 0x1ce   : > { %v2604_v45 = vpop.f32.mrf.mxu1 }
 0x1cf   : > { %v2605_v3 = vadd.f32 %v2604_v45, %v2509_v9 }
 0x1d0   : > { %v3117_v40 = vpop.f32.mrf.mxu1 }
 0x1d1   : > { %v2616_v30 = vadd.f32 %v3117_v40, %v3103_v57 }
 0x1d2   : > { %v2607_v31 = vpop.f32.mrf.mxu1 }
 0x1d3   : > { %v2608_v19 = vadd.f32 %v2607_v31, %v2512_v13 }
 0x1ff   : > { %v3120_v50 = vpop.f32.mrf.mxu1 }
 0x201   : > { %v2620_v39 = vpop.f32.mrf.mxu1 }
 0x203   : > { %v3121_v38 = vpop.f32.mrf.mxu1 }
 0x205   : > { %v2623_v48 = vpop.f32.mrf.mxu1 }
 0x207   : > { %v3106_v32 = vpop.f32.mrf.mxu0 }
 0x208   : > { %v2629_v46 = vadd.f32 %v3120_v50, %v3106_v32 }
 0x209   : > { %v2525_v11 = vpop.f32.mrf.mxu0 }
 0x20a   : > { %v2621_v62 = vadd.f32 %v2620_v39, %v2525_v11 }
 0x20b   : > { %v3107_v29 = vpop.f32.mrf.mxu0 }
 0x20c   : > { %v2632_v44 = vadd.f32 %v3121_v38, %v3107_v29 }
 0x20d   : > { %v2528_v24 = vpop.f32.mrf.mxu0  ;;  %v3134_v20 = vpop.f32.mrf.mxu1 }
 0x20e   : > { %v2877_v12 = vadd.f32 %v3134_v20, %v2629_v46  ;;  %v2624_v7 = vadd.f32 %v2623_v48, %v2528_v24 }
 0x20f   : > { %v3130_v10 = vpop.f32.mrf.mxu0  ;;  %v2856_v36 = vpop.f32.mrf.mxu1 }
 0x210   : > { %v2873_v28 = vadd.f32 %v3130_v10, %v2613_v22  ;;  %v2892_v54 = vadd.f32 %v3064_v26, %v2877_v12  ;;  %v2875_v55 = vadd.f32 %v2856_v36, %v2621_v62 }
 0x211   : > { %v2840_v41 = vpop.f32.mrf.mxu0  ;;  %v3135_v58 = vpop.f32.mrf.mxu1 }
 0x212   : > { %v2888_v60 = vadd.f32 %v3064_v26, %v2873_v28  ;;  %2900 = vst.msk [vmem:[%s262_s5 + $0x30] sm:$0xff] %vm1365_vm8, %v2892_v54  ;;  %v2871_v25 = vadd.f32 %v2840_v41, %v2605_v3  ;;  %v2890_v47 = vadd.f32 %v3064_v26, %v2875_v55  ;;  %v2878_v14 = vadd.f32 %v3135_v58, %v2632_v44 }
 0x213   : > { %v3131_v37 = vpop.f32.mrf.mxu0  ;;  %v2859_v5 = vpop.f32.mrf.mxu1 }
 0x214   : > { %2896 = vst.msk [vmem:[%s262_s5 + $0x10] sm:$0xff] %vm1365_vm8, %v2888_v60  ;;  %v2886_v61 = vadd.f32 %v3064_v26, %v2871_v25  ;;  %2898 = vst.msk [vmem:[%s262_s5 + $0x20] sm:$0xff] %vm1365_vm8, %v2890_v47  ;;  %v2874_v49 = vadd.f32 %v3131_v37, %v2616_v30  ;;  %v2893_v4 = vadd.f32 %v3064_v26, %v2878_v14 }
 0x215   : > { %v2876_v42 = vadd.f32 %v2859_v5, %v2624_v7  ;;  %v2843_v15 = vpop.f32.mrf.mxu0 }
 0x216   : > { %2894 = vst.msk [vmem:[%s262_s5] sm:$0xff] %vm1365_vm8, %v2886_v61  ;;  %v2889_v6 = vadd.f32 %v3064_v26, %v2874_v49  ;;  %2901 = vst.msk [vmem:[%s262_s5 + $0x38] sm:$0xff] %vm1365_vm8, %v2893_v4  ;;  %v2872_v53 = vadd.f32 %v2843_v15, %v2608_v19 }
 0x217   : > { %v2891_v8 = vadd.f32 %v3064_v26, %v2876_v42 }
 0x218   : > { %2897 = vst.msk [vmem:[%s262_s5 + $0x18] sm:$0xff] %vm1365_vm8, %v2889_v6  ;;  %v2887_v51 = vadd.f32 %v3064_v26, %v2872_v53 }
 0x219   : > { %2899 = vst.msk [vmem:[%s262_s5 + $0x28] sm:$0xff] %vm1365_vm8, %v2891_v8 }
 0x21a   : > { %2895 = vst.msk [vmem:[%s262_s5 + $0x8] sm:$0xff] %vm1365_vm8, %v2887_v51 }
 0x21b   : > { %3336 = shalt.err (!%p3333_p5)
}
 0x21c   : > { %s3337_s9 = scalar_lea.hbm %s5459_s11, 1024  ;;  %s3341_s22 = scalar_lea.hbm %s5517_s4, 2048 }
 0x21d   : > { %p3338_p6 = scmp.ne.s32.totalorder %s5459_s11, %s3337_s9  ;;  %p3342_p10 = scmp.lt.s32.totalorder %s5459_s11, %s5517_s4 }
 0x21e   : > { %p3343_p11 = scmp.lt.s32.totalorder %s3341_s22, %s3337_s9 }
 0x21f   : > { %p3339_p7 = pnand %p3338_p6, %p3472_p4 }
 0x220   : > { %p3344_p12 = por %p3343_p11, %p3342_p10 }
 0x221   : > { %p3340_p9 = pneg %p3339_p7 }
 0x223   : > { %p3345_p13 = pnand %p3344_p12, %p3340_p9 }
 0x225   : > { %3348 = shalt.err (!%p3345_p13)
}
 0x226   : > { %s3405_s5 = smov 128   ;;  %s3406_s6 = smov 8  }
 0x227   : > { %3142 = dma.vmem_to_hbm [thread:$0]  (%p3472_p4), %s5461_s29, 1024, %s5459_s11, %s5468_s18, %s3405_s5, %s3405_s5, %s3406_s6  }
 0x228 PF: > { %p3148_p0 = scmp.ge.s32.totalorder %s3399_s20, 2  ;;  %s2933_s30 = sand.u32 1, %s3379_s15  }
 0x229   : > { %s2934_s10 = scalar_lea.sflag [#allocation3], %s2933_s30 }
 0x22a   : > { %p3145_p1 = pnand %p3148_p0, %p3479_p8 }
 0x22c   : > { %p3146_p2 = pneg %p3145_p1 }
 0x22e   : > { %3374 = dma.done.wait (%p3146_p2), %s2934_s10, 1024  }
 0x22f   : > { %3376 = vsyncadd (%p3146_p2), %s2934_s10, 4294966272  ;;  %s17_s20 = sadd.s32 1, %s3399_s20   ;;  %s5840_s15 = smov %s3383_s16 }
 0x230   : > { %p14_p3 = scmp.ge.s32.totalorder %s17_s20, 4   ;;  %s5841_s16 = smov %s3387_s17 }
 0x231   : > { %s5842_s17 = smov %s3485_s28  ;;  %s5843_s18 = smov %s3395_s19 }
 0x232   : > { %s5844_s19 = smov %s5846_s23  ;;  %16 = sbr.rel (!%p14_p3) target bundleno = 4 (0x4), region = 76 }
 0x237   :  { %2939 = vsyncpa [#allocation3], 1 }
 0x238   :  { %2941 = vsyncpa [#allocation3 + $0x1], 1 }

</bundles_post_ra>
